<compile_context>
chip_gen: v5e
topology: v5e:2x2
jax: 0.10.0
libtpu: 0.0.40
codegen_flags: <defaults>
</compile_context>

<pallas_src>
import functools

import jax
import jax.numpy as jnp
from jax import lax
from jax.experimental import pallas as pl
from jax.experimental.pallas import tpu as pltpu

# ----------------------------- configuration --------------------------------
B = 1
N_CAM = 2
C_IN = 4
H_IMG, W_IMG = 16, 32
H_F, W_F = H_IMG // 2, W_IMG // 2           # camera feature map 8 x 16
P_PIX = N_CAM * H_F * W_F                   # 256 camera feature pixels
C_FEAT = 32                                 # camera feature channels
D_BINS = 8                                  # depth bins
BEV_X = BEV_Y = 32                          # raw BEV grid (before downsample)
OUT_X = OUT_Y = 16                          # fused BEV grid (256 cells)
C_IMG_BEV = 32
C_PTS = 64
C_FUSED = 64
N_CLASSES = 10
HEAD_CH = 2 + 1 + 3 + 2 + 2 + N_CLASSES     # reg, height, dim, rot, vel, heatmap
HM_OFF = 10                                 # heatmap starts at head channel 10
HEAD_PAD = 128                              # lane-dense head output width
N_PTS = 1024
PC_MIN, PC_MAX = -54.0, 54.0

# ---- packed-slab layout: every block starts at a 128-lane boundary ----------
COL_BB, COL_DN, COL_DS, COL_L, COL_FI, COL_FP, COL_H = (
    0, 128, 256, 384, 512, 640, 768)
W_SLAB_K, W_SLAB_N = 64, 896                # bf16 weight slab
BCOL_BB, BCOL_DN, BCOL_DS, BCOL_L, BCOL_F, BCOL_H = (
    0, 128, 256, 384, 512, 640)
B_SLAB_N = 768                              # f32 bias slab


# ----------------------------- fused Pallas kernel ---------------------------
def _bevfusion_kernel(scatter_idx_ref,       # SMEM (2,) int32
                      x_ref,                 # (P_PIX, 16)  bf16  pooled pixels
                      geom_ref,              # (D_BINS, P_PIX) int32
                      vox_idx_ref,           # (1, N_PTS)   int32
                      pts_ref,               # (N_PTS, 8)   bf16
                      w_ref,                 # (64, 896)    bf16  weight slab
                      b_ref,                 # (1, 768)     f32   bias slab
                      o_ref):                # (256, 128)   bf16  lane-dense head
    cells = OUT_X * OUT_Y

    # ---- camera backbone 1x1 conv (2x2 image avg-pool folded into weights) --
    feat = jnp.maximum(
        jnp.dot(x_ref[...], w_ref[0:16, COL_BB:COL_BB + C_FEAT],
                preferred_element_type=jnp.float32)
        + b_ref[0:1, BCOL_BB:BCOL_BB + C_FEAT],
        0.0).astype(jnp.bfloat16)                               # (P, 32)

    # ---- depthnet (padded to 128 lanes) + softmax ---------------------------
    # padded lanes carry a -1e30 bias -> exp underflows to 0, softmax exact.
    logits = jnp.dot(feat, w_ref[0:C_FEAT, COL_DN:COL_DN + 128],
                     preferred_element_type=jnp.float32) \
        + b_ref[0:1, BCOL_DN:BCOL_DN + 128]                     # (P, 128) f32
    z = logits - jnp.max(logits, axis=-1, keepdims=True)
    e = jnp.exp(z)
    depth = e * pl.reciprocal(jnp.sum(e, axis=-1, keepdims=True),
                              approx=True)                      # (P, 128) f32

    # ---- lift-splat + camera bev_pool fused into ONE depth-weighted one-hot
    #      matmul:  M[cell, p] = sum_d 1[geom[d,p]==cell] * depth[p,d]
    #               img_csum   = M @ feat   (single K=256 bf16 MXU matmul)
    depth_t = jnp.transpose(depth)                              # (128, P), aligned xpose
    geom = geom_ref[...]                                        # (D, P) int32
    cell_rows = lax.broadcasted_iota(jnp.int32, (cells, P_PIX), 0)
    m = jnp.zeros((cells, P_PIX), jnp.float32)
    for d in range(D_BINS):                                     # VPU-only unroll
        m = m + jnp.where(cell_rows == geom[d:d + 1, :],
                          depth_t[d:d + 1, :], 0.0)
    img_csum = jnp.dot(m.astype(jnp.bfloat16), feat,
                       preferred_element_type=jnp.float32)      # (cells, 32)
    # 2x2 BEV avg-pool (x0.25) is folded into w_ds in the wrapper (exact).
    img_pooled = img_csum.astype(jnp.bfloat16)

    # ---- vtransform downsample 1x1 conv + ReLU ------------------------------
    img_bev = jnp.maximum(
        jnp.dot(img_pooled, w_ref[0:C_FEAT, COL_DS:COL_DS + C_IMG_BEV],
                preferred_element_type=jnp.float32)
        + b_ref[0:1, BCOL_DS:BCOL_DS + C_IMG_BEV],
        0.0).astype(jnp.bfloat16)                               # (cells, 32)

    # ---- lidar voxelization: scatter-mean as one bf16 one-hot matmul --------
    # TODO(synk): real lidar path is an spconv sparse-3D-conv ONNX engine; here
    # it is a voxel scatter-mean + 1x1 conv projection.
    cell_rows_p = lax.broadcasted_iota(jnp.int32, (cells, N_PTS), 0)
    onehot_p = (cell_rows_p == vox_idx_ref[...]).astype(jnp.bfloat16)  # (cells, N_PTS)
    vox = jnp.dot(onehot_p, pts_ref[...],
                  preferred_element_type=jnp.float32)           # (cells, 8)
    cnt = jnp.maximum(vox[:, 4:5], 1.0)
    vox_mean = (vox[:, 0:4] * pl.reciprocal(cnt, approx=True)).astype(jnp.bfloat16)
    pts_bev = jnp.maximum(
        jnp.dot(vox_mean, w_ref[0:4, COL_L:COL_L + C_PTS],
                preferred_element_type=jnp.float32)
        + b_ref[0:1, BCOL_L:BCOL_L + C_PTS],
        0.0).astype(jnp.bfloat16)                               # (cells, 64)

    # ---- fusion: concat + 1x1 conv expressed as two matmuls -----------------
    # TODO(synk): real fuser uses a 3x3 conv; a 1x1 conv keeps the matmul path.
    fused = jnp.maximum(
        jnp.dot(img_bev, w_ref[0:C_IMG_BEV, COL_FI:COL_FI + C_FUSED],
                preferred_element_type=jnp.float32)
        + jnp.dot(pts_bev, w_ref[0:C_PTS, COL_FP:COL_FP + C_FUSED],
                  preferred_element_type=jnp.float32)
        + b_ref[0:1, BCOL_F:BCOL_F + C_FUSED],
        0.0).astype(jnp.bfloat16)                               # (cells, 64)

    # ---- head: shared 1x1 conv, padded to 128 lanes for a dense store -------
    head = jnp.dot(fused, w_ref[0:C_FUSED, COL_H:COL_H + HEAD_PAD],
                   preferred_element_type=jnp.float32) \
        + b_ref[0:1, BCOL_H:BCOL_H + HEAD_PAD]                  # (cells, 128) f32

    # ---- scatter_nd1: overwrite one heatmap class channel (dynamic index) ---
    hm = head[:, HM_OFF:HM_OFF + N_CLASSES]
    src = jnp.max(hm, axis=-1, keepdims=True)                   # per-cell class max
    target = HM_OFF + scatter_idx_ref[1]                        # scatter_idx[0] = batch 0
    lane = lax.broadcasted_iota(jnp.int32, head.shape, 1)
    o_ref[...] = jnp.where(lane == target, src, head).astype(o_ref.dtype)


def bevfusion_fused(scatter_idx, x16, geom_dp, vox_idx, pts_aug, w_slab, b_slab):
    vmem = pl.BlockSpec(memory_space=pltpu.MemorySpace.VMEM)
    smem = pl.BlockSpec(memory_space=pltpu.MemorySpace.SMEM)
    return pl.pallas_call(
        _bevfusion_kernel,
        out_shape=jax.ShapeDtypeStruct((OUT_X * OUT_Y, HEAD_PAD), jnp.bfloat16),
        in_specs=[smem] + [vmem] * 6,
        out_specs=vmem,
    )(scatter_idx, x16, geom_dp, vox_idx, pts_aug, w_slab, b_slab)


# ----------------------------- parameters ------------------------------------
def init_params(key):
    ks = jax.random.split(key, 12)

    def dense(kw, kb, fan_in, fan_out):
        w = (jax.random.normal(kw, (fan_in, fan_out), jnp.float32)
             / jnp.sqrt(float(fan_in))).astype(jnp.bfloat16)
        # biases kept in f32: added straight onto the f32 MXU accumulator.
        b = 0.01 * jax.random.normal(kb, (1, fan_out), jnp.float32)
        return w, b

    return {
        'backbone':   dense(ks[0],  ks[1],  C_IN, C_FEAT),
        'depthnet':   dense(ks[2],  ks[3],  C_FEAT, D_BINS),
        'downsample': dense(ks[4],  ks[5],  C_FEAT, C_IMG_BEV),
        'lidar':      dense(ks[6],  ks[7],  4, C_PTS),
        'fusion':     dense(ks[8],  ks[9],  C_IMG_BEV + C_PTS, C_FUSED),
        'head':       dense(ks[10], ks[11], C_FUSED, HEAD_CH),
    }


# ----------------------------- forward ---------------------------------------
def bevfusion_forward(params, imgs, points, geom_idx):
    w_bb, b_bb = params['backbone']
    w_dn, b_dn = params['depthnet']
    w_ds, b_ds = params['downsample']
    w_l, b_l = params['lidar']
    w_f, b_f = params['fusion']
    w_h, b_h = params['head']

    # 2x2 image avg-pool folded into the backbone conv (exact): the 4 pooled
    # taps are fed as 16 input channels against replicated weights / 4.
    w_bb_eff = (jnp.tile(w_bb.astype(jnp.float32), (4, 1)) * 0.25).astype(jnp.bfloat16)
    # 2x2 BEV avg-pool folded into the downsample conv weight (exact pow2 scale).
    w_ds_eff = (w_ds.astype(jnp.float32) * 0.25).astype(jnp.bfloat16)
    w_fi, w_fp = w_f[:C_IMG_BEV], w_f[C_IMG_BEV:]
    w_h_pad = jnp.pad(w_h, ((0, 0), (0, HEAD_PAD - HEAD_CH)))

    # ---- pack all 1x1-conv weights into one zero-padded bf16 slab ----------
    w_slab = jnp.zeros((W_SLAB_K, W_SLAB_N), jnp.bfloat16)
    w_slab = w_slab.at[:16, COL_BB:COL_BB + C_FEAT].set(w_bb_eff)
    w_slab = w_slab.at[:C_FEAT, COL_DN:COL_DN + D_BINS].set(w_dn)
    w_slab = w_slab.at[:C_FEAT, COL_DS:COL_DS + C_IMG_BEV].set(w_ds_eff)
    w_slab = w_slab.at[:4, COL_L:COL_L + C_PTS].set(w_l)
    w_slab = w_slab.at[:C_IMG_BEV, COL_FI:COL_FI + C_FUSED].set(w_fi)
    w_slab = w_slab.at[:C_PTS, COL_FP:COL_FP + C_FUSED].set(w_fp)
    w_slab = w_slab.at[:C_FUSED, COL_H:COL_H + HEAD_PAD].set(w_h_pad)

    # ---- pack all biases into one f32 slab (1 lane-tile per bias) ----------
    b_slab = jnp.zeros((1, B_SLAB_N), jnp.float32)
    b_slab = b_slab.at[:, BCOL_BB:BCOL_BB + C_FEAT].set(b_bb)
    b_slab = b_slab.at[:, BCOL_DN:BCOL_DN + D_BINS].set(b_dn)
    # padded depth lanes get -1e30 so the in-kernel softmax ignores them
    b_slab = b_slab.at[:, BCOL_DN + D_BINS:BCOL_DN + 128].set(-1e30)
    b_slab = b_slab.at[:, BCOL_DS:BCOL_DS + C_IMG_BEV].set(b_ds)
    b_slab = b_slab.at[:, BCOL_L:BCOL_L + C_PTS].set(b_l)
    b_slab = b_slab.at[:, BCOL_F:BCOL_F + C_FUSED].set(b_f)
    b_slab = b_slab.at[:, BCOL_H:BCOL_H + HEAD_CH].set(b_h)

    # ---- image pixels, channels-last, 2x2 pool taps as extra channels -------
    x = imgs[0].astype(jnp.float32).reshape(N_CAM, C_IN, H_F, 2, W_F, 2)
    x = jnp.transpose(x, (0, 2, 4, 3, 5, 1)).reshape(P_PIX, 4 * C_IN)
    x16 = x.astype(jnp.bfloat16)

    # ---- geometry glue (stands in for metas / utils.get_geometry) -----------
    fx, fy = geom_idx // BEV_Y, geom_idx % BEV_Y
    coarse = (fx // 2) * OUT_Y + (fy // 2)                       # fine->coarse cell
    geom_dp = coarse.reshape(P_PIX, D_BINS).T.astype(jnp.int32)  # (D, P)

    # ---- voxelization glue ---------------------------------------------------
    cell = jnp.floor((points[:, :2] - PC_MIN) / (PC_MAX - PC_MIN) * OUT_X)
    cell = jnp.clip(cell, 0, OUT_X - 1).astype(jnp.int32)
    vox_idx = (cell[:, 0] * OUT_Y + cell[:, 1]).reshape(1, N_PTS)
    pts_aug = jnp.concatenate(
        [points, jnp.ones((N_PTS, 1), jnp.float32),
         jnp.zeros((N_PTS, 3), jnp.float32)], axis=1).astype(jnp.bfloat16)

    # scatter_nd1 index buffer: (batch, class) slab to overwrite.
    scatter_idx = jnp.array([0, 3], jnp.int32)

    # ---- single fused Pallas launch -----------------------------------------
    head_pad = bevfusion_fused(scatter_idx, x16, geom_dp, vox_idx, pts_aug,
                               w_slab, b_slab)

    head = jnp.transpose(head_pad[:, :HEAD_CH].reshape(OUT_X, OUT_Y, HEAD_CH),
                         (2, 0, 1))[None]                        # NCHW (1, 20, X, Y)
    reg, height, dim, rot, vel = (head[:, 0:2], head[:, 2:3], head[:, 3:6],
                                  head[:, 6:8], head[:, 8:10])
    heatmap = head[:, HM_OFF:HM_OFF + N_CLASSES]                 # (1, 10, X, Y)

    score = jnp.max(jax.nn.sigmoid(heatmap.astype(jnp.float32)), axis=1)
    query_label = jnp.argmax(heatmap.astype(jnp.float32), axis=1).astype(jnp.int32)

    # TODO(synk): utils.decode (3D box decoding / NMS) has no clean Pallas equivalent.
    return reg, height, dim, rot, vel, heatmap, score, query_label


# ----------------------------- main -------------------------------------------
if __name__ == "__main__":
    key = jax.random.PRNGKey(0)
    k_img, k_pts, k_geom, k_par = jax.random.split(key, 4)

    imgs = jax.random.normal(
        k_img, (B, N_CAM, C_IN, H_IMG, W_IMG), jnp.float32).astype(jnp.bfloat16)
    points = jax.random.uniform(
        k_pts, (N_PTS, 4), jnp.float32, PC_MIN, PC_MAX)
    # stands in for metas / get_geometry: flat fine-BEV cell index per frustum row
    geom_idx = jax.random.randint(
        k_geom, (P_PIX * D_BINS,), 0, BEV_X * BEV_Y, jnp.int32)

    params = init_params(k_par)
    fwd = jax.jit(functools.partial(bevfusion_forward, params))

    outs = fwd(imgs, points, geom_idx)
    jax.block_until_ready(outs)
    print("KERNEL_OK")
</pallas_src>

<mosaic_0001>
module attributes {stable_mosaic.version = 11 : i64} {
  func.func @_bevfusion_kernel(%arg0: memref<2xi32, #tpu.memory_space<smem>>, %arg1: memref<256x16xbf16, #tpu.memory_space<vmem>>, %arg2: memref<8x256xi32, #tpu.memory_space<vmem>>, %arg3: memref<1x1024xi32, #tpu.memory_space<vmem>>, %arg4: memref<1024x8xbf16, #tpu.memory_space<vmem>>, %arg5: memref<64x896xbf16, #tpu.memory_space<vmem>>, %arg6: memref<1x768xf32, #tpu.memory_space<vmem>>, %arg7: memref<256x128xbf16, #tpu.memory_space<vmem>>) attributes {dimension_semantics = [], scalar_prefetch = 0 : i64, scratch_operands = 0 : i64, tpu.core_type = #tpu.core_type<tc>} {
    %c0 = arith.constant 0 : index
    %c0_0 = arith.constant 0 : index
    %0 = vector.load %arg1[%c0, %c0_0] : memref<256x16xbf16, #tpu.memory_space<vmem>>, vector<256x16xbf16>
    %c0_1 = arith.constant 0 : index
    %c0_2 = arith.constant 0 : index
    %1 = vector.load %arg5[%c0_1, %c0_2] : memref<64x896xbf16, #tpu.memory_space<vmem>>, vector<16x32xbf16>
    %cst = arith.constant dense<0.000000e+00> : vector<256x32xf32>
    %2 = tpu.matmul %0, %1, %cst {dimension_numbers = #tpu.dot_dimension_numbers<[1], [0], [0], [1], [0, 0, 1, 1], [], []>} : vector<256x16xbf16>, vector<16x32xbf16>, vector<256x32xf32> -> vector<256x32xf32>
    %c0_3 = arith.constant 0 : index
    %c0_4 = arith.constant 0 : index
    %3 = vector.load %arg6[%c0_3, %c0_4] : memref<1x768xf32, #tpu.memory_space<vmem>>, vector<1x32xf32>
    %4 = vector.broadcast %3 : vector<1x32xf32> to vector<256x32xf32>
    %5 = arith.addf %2, %4 : vector<256x32xf32>
    %cst_5 = arith.constant 0.000000e+00 : f32
    %6 = vector.broadcast %cst_5 : f32 to vector<256x32xf32>
    %7 = arith.maximumf %5, %6 : vector<256x32xf32>
    %8 = arith.truncf %7 : vector<256x32xf32> to vector<256x32xbf16>
    %c0_6 = arith.constant 0 : index
    %c128 = arith.constant 128 : index
    %9 = vector.load %arg5[%c0_6, %c128] : memref<64x896xbf16, #tpu.memory_space<vmem>>, vector<32x128xbf16>
    %cst_7 = arith.constant dense<0.000000e+00> : vector<256x128xf32>
    %10 = tpu.matmul %8, %9, %cst_7 {dimension_numbers = #tpu.dot_dimension_numbers<[1], [0], [0], [1], [0, 0, 1, 1], [], []>} : vector<256x32xbf16>, vector<32x128xbf16>, vector<256x128xf32> -> vector<256x128xf32>
    %c0_8 = arith.constant 0 : index
    %c128_9 = arith.constant 128 : index
    %11 = vector.load %arg6[%c0_8, %c128_9] : memref<1x768xf32, #tpu.memory_space<vmem>>, vector<1x128xf32>
    %12 = vector.broadcast %11 : vector<1x128xf32> to vector<256x128xf32>
    %13 = arith.addf %10, %12 : vector<256x128xf32>
    %cst_10 = arith.constant dense<0xFF800000> : vector<256xf32>
    %14 = vector.multi_reduction <maximumf>, %13, %cst_10 [1] : vector<256x128xf32> to vector<256xf32>
    %15 = vector.shape_cast %14 : vector<256xf32> to vector<256x1xf32>
    %16 = vector.broadcast %15 : vector<256x1xf32> to vector<256x128xf32>
    %17 = arith.subf %13, %16 : vector<256x128xf32>
    %18 = math.exp %17 : vector<256x128xf32>
    %cst_11 = arith.constant dense<0.000000e+00> : vector<256xf32>
    %19 = vector.multi_reduction <add>, %18, %cst_11 [1] : vector<256x128xf32> to vector<256xf32>
    %20 = vector.shape_cast %19 : vector<256xf32> to vector<256x1xf32>
    %21 = tpu.reciprocal %20 {approx = true} : vector<256x1xf32> -> vector<256x1xf32>
    %22 = vector.broadcast %21 : vector<256x1xf32> to vector<256x128xf32>
    %23 = arith.mulf %18, %22 : vector<256x128xf32>
    %24 = tpu.transpose %23, [1, 0] : vector<256x128xf32> -> vector<128x256xf32>
    %c0_12 = arith.constant 0 : index
    %c0_13 = arith.constant 0 : index
    %25 = vector.load %arg2[%c0_12, %c0_13] : memref<8x256xi32, #tpu.memory_space<vmem>>, vector<8x256xi32>
    %26 = tpu.iota {dimensions = array<i32: 0>} : vector<256x256xi32>
    %cst_14 = arith.constant 0.000000e+00 : f32
    %27 = vector.broadcast %cst_14 : f32 to vector<256x256xf32>
    %28 = vector.extract_strided_slice %25 {offsets = [0, 0], sizes = [1, 256], strides = [1, 1]} : vector<8x256xi32> to vector<1x256xi32>
    %29 = vector.broadcast %28 : vector<1x256xi32> to vector<256x256xi32>
    %30 = arith.cmpi eq, %26, %29 : vector<256x256xi32>
    %31 = vector.extract_strided_slice %24 {offsets = [0, 0], sizes = [1, 256], strides = [1, 1]} : vector<128x256xf32> to vector<1x256xf32>
    %cst_15 = arith.constant 0.000000e+00 : f32
    %32 = vector.shape_cast %31 : vector<1x256xf32> to vector<1x256xf32>
    %33 = vector.broadcast %32 : vector<1x256xf32> to vector<256x256xf32>
    %34 = vector.broadcast %cst_15 : f32 to vector<256x256xf32>
    %35 = arith.select %30, %33, %34 : vector<256x256xi1>, vector<256x256xf32>
    %36 = arith.addf %27, %35 : vector<256x256xf32>
    %37 = vector.extract_strided_slice %25 {offsets = [1, 0], sizes = [1, 256], strides = [1, 1]} : vector<8x256xi32> to vector<1x256xi32>
    %38 = vector.broadcast %37 : vector<1x256xi32> to vector<256x256xi32>
    %39 = arith.cmpi eq, %26, %38 : vector<256x256xi32>
    %40 = vector.extract_strided_slice %24 {offsets = [1, 0], sizes = [1, 256], strides = [1, 1]} : vector<128x256xf32> to vector<1x256xf32>
    %cst_16 = arith.constant 0.000000e+00 : f32
    %41 = vector.shape_cast %40 : vector<1x256xf32> to vector<1x256xf32>
    %42 = vector.broadcast %41 : vector<1x256xf32> to vector<256x256xf32>
    %43 = vector.broadcast %cst_16 : f32 to vector<256x256xf32>
    %44 = arith.select %39, %42, %43 : vector<256x256xi1>, vector<256x256xf32>
    %45 = arith.addf %36, %44 : vector<256x256xf32>
    %46 = vector.extract_strided_slice %25 {offsets = [2, 0], sizes = [1, 256], strides = [1, 1]} : vector<8x256xi32> to vector<1x256xi32>
    %47 = vector.broadcast %46 : vector<1x256xi32> to vector<256x256xi32>
    %48 = arith.cmpi eq, %26, %47 : vector<256x256xi32>
    %49 = vector.extract_strided_slice %24 {offsets = [2, 0], sizes = [1, 256], strides = [1, 1]} : vector<128x256xf32> to vector<1x256xf32>
    %cst_17 = arith.constant 0.000000e+00 : f32
    %50 = vector.shape_cast %49 : vector<1x256xf32> to vector<1x256xf32>
    %51 = vector.broadcast %50 : vector<1x256xf32> to vector<256x256xf32>
    %52 = vector.broadcast %cst_17 : f32 to vector<256x256xf32>
    %53 = arith.select %48, %51, %52 : vector<256x256xi1>, vector<256x256xf32>
    %54 = arith.addf %45, %53 : vector<256x256xf32>
    %55 = vector.extract_strided_slice %25 {offsets = [3, 0], sizes = [1, 256], strides = [1, 1]} : vector<8x256xi32> to vector<1x256xi32>
    %56 = vector.broadcast %55 : vector<1x256xi32> to vector<256x256xi32>
    %57 = arith.cmpi eq, %26, %56 : vector<256x256xi32>
    %58 = vector.extract_strided_slice %24 {offsets = [3, 0], sizes = [1, 256], strides = [1, 1]} : vector<128x256xf32> to vector<1x256xf32>
    %cst_18 = arith.constant 0.000000e+00 : f32
    %59 = vector.shape_cast %58 : vector<1x256xf32> to vector<1x256xf32>
    %60 = vector.broadcast %59 : vector<1x256xf32> to vector<256x256xf32>
    %61 = vector.broadcast %cst_18 : f32 to vector<256x256xf32>
    %62 = arith.select %57, %60, %61 : vector<256x256xi1>, vector<256x256xf32>
    %63 = arith.addf %54, %62 : vector<256x256xf32>
    %64 = vector.extract_strided_slice %25 {offsets = [4, 0], sizes = [1, 256], strides = [1, 1]} : vector<8x256xi32> to vector<1x256xi32>
    %65 = vector.broadcast %64 : vector<1x256xi32> to vector<256x256xi32>
    %66 = arith.cmpi eq, %26, %65 : vector<256x256xi32>
    %67 = vector.extract_strided_slice %24 {offsets = [4, 0], sizes = [1, 256], strides = [1, 1]} : vector<128x256xf32> to vector<1x256xf32>
    %cst_19 = arith.constant 0.000000e+00 : f32
    %68 = vector.shape_cast %67 : vector<1x256xf32> to vector<1x256xf32>
    %69 = vector.broadcast %68 : vector<1x256xf32> to vector<256x256xf32>
    %70 = vector.broadcast %cst_19 : f32 to vector<256x256xf32>
    %71 = arith.select %66, %69, %70 : vector<256x256xi1>, vector<256x256xf32>
    %72 = arith.addf %63, %71 : vector<256x256xf32>
    %73 = vector.extract_strided_slice %25 {offsets = [5, 0], sizes = [1, 256], strides = [1, 1]} : vector<8x256xi32> to vector<1x256xi32>
    %74 = vector.broadcast %73 : vector<1x256xi32> to vector<256x256xi32>
    %75 = arith.cmpi eq, %26, %74 : vector<256x256xi32>
    %76 = vector.extract_strided_slice %24 {offsets = [5, 0], sizes = [1, 256], strides = [1, 1]} : vector<128x256xf32> to vector<1x256xf32>
    %cst_20 = arith.constant 0.000000e+00 : f32
    %77 = vector.shape_cast %76 : vector<1x256xf32> to vector<1x256xf32>
    %78 = vector.broadcast %77 : vector<1x256xf32> to vector<256x256xf32>
    %79 = vector.broadcast %cst_20 : f32 to vector<256x256xf32>
    %80 = arith.select %75, %78, %79 : vector<256x256xi1>, vector<256x256xf32>
    %81 = arith.addf %72, %80 : vector<256x256xf32>
    %82 = vector.extract_strided_slice %25 {offsets = [6, 0], sizes = [1, 256], strides = [1, 1]} : vector<8x256xi32> to vector<1x256xi32>
    %83 = vector.broadcast %82 : vector<1x256xi32> to vector<256x256xi32>
    %84 = arith.cmpi eq, %26, %83 : vector<256x256xi32>
    %85 = vector.extract_strided_slice %24 {offsets = [6, 0], sizes = [1, 256], strides = [1, 1]} : vector<128x256xf32> to vector<1x256xf32>
    %cst_21 = arith.constant 0.000000e+00 : f32
    %86 = vector.shape_cast %85 : vector<1x256xf32> to vector<1x256xf32>
    %87 = vector.broadcast %86 : vector<1x256xf32> to vector<256x256xf32>
    %88 = vector.broadcast %cst_21 : f32 to vector<256x256xf32>
    %89 = arith.select %84, %87, %88 : vector<256x256xi1>, vector<256x256xf32>
    %90 = arith.addf %81, %89 : vector<256x256xf32>
    %91 = vector.extract_strided_slice %25 {offsets = [7, 0], sizes = [1, 256], strides = [1, 1]} : vector<8x256xi32> to vector<1x256xi32>
    %92 = vector.broadcast %91 : vector<1x256xi32> to vector<256x256xi32>
    %93 = arith.cmpi eq, %26, %92 : vector<256x256xi32>
    %94 = vector.extract_strided_slice %24 {offsets = [7, 0], sizes = [1, 256], strides = [1, 1]} : vector<128x256xf32> to vector<1x256xf32>
    %cst_22 = arith.constant 0.000000e+00 : f32
    %95 = vector.shape_cast %94 : vector<1x256xf32> to vector<1x256xf32>
    %96 = vector.broadcast %95 : vector<1x256xf32> to vector<256x256xf32>
    %97 = vector.broadcast %cst_22 : f32 to vector<256x256xf32>
    %98 = arith.select %93, %96, %97 : vector<256x256xi1>, vector<256x256xf32>
    %99 = arith.addf %90, %98 : vector<256x256xf32>
    %100 = arith.truncf %99 : vector<256x256xf32> to vector<256x256xbf16>
    %cst_23 = arith.constant dense<0.000000e+00> : vector<256x32xf32>
    %101 = tpu.matmul %100, %8, %cst_23 {dimension_numbers = #tpu.dot_dimension_numbers<[1], [0], [0], [1], [0, 0, 1, 1], [], []>} : vector<256x256xbf16>, vector<256x32xbf16>, vector<256x32xf32> -> vector<256x32xf32>
    %102 = arith.truncf %101 : vector<256x32xf32> to vector<256x32xbf16>
    %c0_24 = arith.constant 0 : index
    %c256 = arith.constant 256 : index
    %103 = vector.load %arg5[%c0_24, %c256] : memref<64x896xbf16, #tpu.memory_space<vmem>>, vector<32x32xbf16>
    %cst_25 = arith.constant dense<0.000000e+00> : vector<256x32xf32>
    %104 = tpu.matmul %102, %103, %cst_25 {dimension_numbers = #tpu.dot_dimension_numbers<[1], [0], [0], [1], [0, 0, 1, 1], [], []>} : vector<256x32xbf16>, vector<32x32xbf16>, vector<256x32xf32> -> vector<256x32xf32>
    %c0_26 = arith.constant 0 : index
    %c256_27 = arith.constant 256 : index
    %105 = vector.load %arg6[%c0_26, %c256_27] : memref<1x768xf32, #tpu.memory_space<vmem>>, vector<1x32xf32>
    %106 = vector.broadcast %105 : vector<1x32xf32> to vector<256x32xf32>
    %107 = arith.addf %104, %106 : vector<256x32xf32>
    %cst_28 = arith.constant 0.000000e+00 : f32
    %108 = vector.broadcast %cst_28 : f32 to vector<256x32xf32>
    %109 = arith.maximumf %107, %108 : vector<256x32xf32>
    %110 = arith.truncf %109 : vector<256x32xf32> to vector<256x32xbf16>
    %111 = tpu.iota {dimensions = array<i32: 0>} : vector<256x1024xi32>
    %c0_29 = arith.constant 0 : index
    %c0_30 = arith.constant 0 : index
    %112 = vector.load %arg3[%c0_29, %c0_30] : memref<1x1024xi32, #tpu.memory_space<vmem>>, vector<1x1024xi32>
    %113 = vector.broadcast %112 : vector<1x1024xi32> to vector<256x1024xi32>
    %114 = arith.cmpi eq, %111, %113 : vector<256x1024xi32>
    %115 = arith.extui %114 : vector<256x1024xi1> to vector<256x1024xi32>
    %116 = arith.sitofp %115 : vector<256x1024xi32> to vector<256x1024xf32>
    %117 = arith.truncf %116 : vector<256x1024xf32> to vector<256x1024xbf16>
    %c0_31 = arith.constant 0 : index
    %c0_32 = arith.constant 0 : index
    %118 = vector.load %arg4[%c0_31, %c0_32] : memref<1024x8xbf16, #tpu.memory_space<vmem>>, vector<1024x8xbf16>
    %cst_33 = arith.constant dense<0.000000e+00> : vector<256x8xf32>
    %119 = tpu.matmul %117, %118, %cst_33 {dimension_numbers = #tpu.dot_dimension_numbers<[1], [0], [0], [1], [0, 0, 1, 1], [], []>} : vector<256x1024xbf16>, vector<1024x8xbf16>, vector<256x8xf32> -> vector<256x8xf32>
    %120 = vector.extract_strided_slice %119 {offsets = [0, 4], sizes = [256, 1], strides = [1, 1]} : vector<256x8xf32> to vector<256x1xf32>
    %cst_34 = arith.constant 1.000000e+00 : f32
    %121 = vector.broadcast %cst_34 : f32 to vector<256x1xf32>
    %122 = arith.maximumf %120, %121 : vector<256x1xf32>
    %123 = vector.extract_strided_slice %119 {offsets = [0, 0], sizes = [256, 4], strides = [1, 1]} : vector<256x8xf32> to vector<256x4xf32>
    %124 = tpu.reciprocal %122 {approx = true} : vector<256x1xf32> -> vector<256x1xf32>
    %125 = vector.broadcast %124 : vector<256x1xf32> to vector<256x4xf32>
    %126 = arith.mulf %123, %125 : vector<256x4xf32>
    %127 = arith.truncf %126 : vector<256x4xf32> to vector<256x4xbf16>
    %c0_35 = arith.constant 0 : index
    %c384 = arith.constant 384 : index
    %128 = vector.load %arg5[%c0_35, %c384] : memref<64x896xbf16, #tpu.memory_space<vmem>>, vector<4x64xbf16>
    %cst_36 = arith.constant dense<0.000000e+00> : vector<256x64xf32>
    %129 = tpu.matmul %127, %128, %cst_36 {dimension_numbers = #tpu.dot_dimension_numbers<[1], [0], [0], [1], [0, 0, 1, 1], [], []>} : vector<256x4xbf16>, vector<4x64xbf16>, vector<256x64xf32> -> vector<256x64xf32>
    %c0_37 = arith.constant 0 : index
    %c384_38 = arith.constant 384 : index
    %130 = vector.load %arg6[%c0_37, %c384_38] : memref<1x768xf32, #tpu.memory_space<vmem>>, vector<1x64xf32>
    %131 = vector.broadcast %130 : vector<1x64xf32> to vector<256x64xf32>
    %132 = arith.addf %129, %131 : vector<256x64xf32>
    %cst_39 = arith.constant 0.000000e+00 : f32
    %133 = vector.broadcast %cst_39 : f32 to vector<256x64xf32>
    %134 = arith.maximumf %132, %133 : vector<256x64xf32>
    %135 = arith.truncf %134 : vector<256x64xf32> to vector<256x64xbf16>
    %c0_40 = arith.constant 0 : index
    %c512 = arith.constant 512 : index
    %136 = vector.load %arg5[%c0_40, %c512] : memref<64x896xbf16, #tpu.memory_space<vmem>>, vector<32x64xbf16>
    %cst_41 = arith.constant dense<0.000000e+00> : vector<256x64xf32>
    %137 = tpu.matmul %110, %136, %cst_41 {dimension_numbers = #tpu.dot_dimension_numbers<[1], [0], [0], [1], [0, 0, 1, 1], [], []>} : vector<256x32xbf16>, vector<32x64xbf16>, vector<256x64xf32> -> vector<256x64xf32>
    %c0_42 = arith.constant 0 : index
    %c640 = arith.constant 640 : index
    %138 = vector.load %arg5[%c0_42, %c640] : memref<64x896xbf16, #tpu.memory_space<vmem>>, vector<64x64xbf16>
    %cst_43 = arith.constant dense<0.000000e+00> : vector<256x64xf32>
    %139 = tpu.matmul %135, %138, %cst_43 {dimension_numbers = #tpu.dot_dimension_numbers<[1], [0], [0], [1], [0, 0, 1, 1], [], []>} : vector<256x64xbf16>, vector<64x64xbf16>, vector<256x64xf32> -> vector<256x64xf32>
    %140 = arith.addf %137, %139 : vector<256x64xf32>
    %c0_44 = arith.constant 0 : index
    %c512_45 = arith.constant 512 : index
    %141 = vector.load %arg6[%c0_44, %c512_45] : memref<1x768xf32, #tpu.memory_space<vmem>>, vector<1x64xf32>
    %142 = vector.broadcast %141 : vector<1x64xf32> to vector<256x64xf32>
    %143 = arith.addf %140, %142 : vector<256x64xf32>
    %cst_46 = arith.constant 0.000000e+00 : f32
    %144 = vector.broadcast %cst_46 : f32 to vector<256x64xf32>
    %145 = arith.maximumf %143, %144 : vector<256x64xf32>
    %146 = arith.truncf %145 : vector<256x64xf32> to vector<256x64xbf16>
    %c0_47 = arith.constant 0 : index
    %c768 = arith.constant 768 : index
    %147 = vector.load %arg5[%c0_47, %c768] : memref<64x896xbf16, #tpu.memory_space<vmem>>, vector<64x128xbf16>
    %cst_48 = arith.constant dense<0.000000e+00> : vector<256x128xf32>
    %148 = tpu.matmul %146, %147, %cst_48 {dimension_numbers = #tpu.dot_dimension_numbers<[1], [0], [0], [1], [0, 0, 1, 1], [], []>} : vector<256x64xbf16>, vector<64x128xbf16>, vector<256x128xf32> -> vector<256x128xf32>
    %c0_49 = arith.constant 0 : index
    %c640_50 = arith.constant 640 : index
    %149 = vector.load %arg6[%c0_49, %c640_50] : memref<1x768xf32, #tpu.memory_space<vmem>>, vector<1x128xf32>
    %150 = vector.broadcast %149 : vector<1x128xf32> to vector<256x128xf32>
    %151 = arith.addf %148, %150 : vector<256x128xf32>
    %152 = vector.extract_strided_slice %151 {offsets = [0, 10], sizes = [256, 10], strides = [1, 1]} : vector<256x128xf32> to vector<256x10xf32>
    %cst_51 = arith.constant dense<0xFF800000> : vector<256xf32>
    %153 = vector.multi_reduction <maximumf>, %152, %cst_51 [1] : vector<256x10xf32> to vector<256xf32>
    %154 = vector.shape_cast %153 : vector<256xf32> to vector<256x1xf32>
    %c1 = arith.constant 1 : index
    %155 = memref.load %arg0[%c1] : memref<2xi32, #tpu.memory_space<smem>>
    %c10_i32 = arith.constant 10 : i32
    %156 = arith.addi %c10_i32, %155 : i32
    %157 = tpu.iota {dimensions = array<i32: 1>} : vector<256x128xi32>
    %158 = vector.broadcast %156 : i32 to vector<256x128xi32>
    %159 = arith.cmpi eq, %157, %158 : vector<256x128xi32>
    %160 = vector.shape_cast %154 : vector<256x1xf32> to vector<256x1xf32>
    %161 = vector.broadcast %160 : vector<256x1xf32> to vector<256x128xf32>
    %162 = arith.select %159, %161, %151 : vector<256x128xi1>, vector<256x128xf32>
    %163 = arith.truncf %162 : vector<256x128xf32> to vector<256x128xbf16>
    %c0_52 = arith.constant 0 : index
    %c0_53 = arith.constant 0 : index
    %164 = vector.load %arg7[%c0_52, %c0_53] : memref<256x128xbf16, #tpu.memory_space<vmem>>, vector<256x128xbf16>
    tpu.vector_store %arg7[%c0_52, %c0_53], %163 {strides = array<i32>} : memref<256x128xbf16, #tpu.memory_space<vmem>>, vector<256x128xbf16>,
    return
  }
}

</mosaic_0001>

<bundles_post_ra>
// kernel: bevfusion_forward.1
= control target key start
LH: loop header
LB: loop body
LE: loop exit
PB: predicated region body
PF: predicated region fallthrough
CT: control target
= control target key end

     0   :  { %12 = vsyncpa [#allocation3], 0  ;;  %s7702_s27 = smov [#allocation2]   ;;  %s12644_s0 = inlined_call_operand.vmem [shape: s32[2], index: 0, kind: input, shape index: {}]   ;;  %s12645_s1 = inlined_call_operand.vmem [shape: bf16[256,16], index: 1, kind: input, shape index: {}]   ;;  %s12646_s2 = inlined_call_operand.vmem [shape: s32[8,256], index: 2, kind: input, shape index: {}]   ;;  %s12647_s3 = inlined_call_operand.vmem [shape: s32[1,1024], index: 3, kind: input, shape index: {}]   ;;  %s12648_s4 = inlined_call_operand.vmem [shape: bf16[1024,8], index: 4, kind: input, shape index: {}]   ;;  %s12649_s5 = inlined_call_operand.vmem [shape: bf16[64,896], index: 5, kind: input, shape index: {}]   ;;  %s12650_s6 = inlined_call_operand.vmem [shape: f32[1,768], index: 6, kind: input, shape index: {}]   ;;  %s12651_s7 = inlined_call_operand.vmem [shape: bf16[256,128], index: 7, kind: output, shape index: {}]  }
   0x1   :  { %s18_s26 = sshll.u32 %s12644_s0, 4  ;;  %s19_s26 = int_to_ptr.vmem [resolvable:$true] %s18_s26 }
   0x2   :  { %21 = dma.vmem_to_smem %s19_s26, 16, %s7702_s27, [#allocation3]  }
   0x3   :  { %7700 = dma.done.wait [#allocation3], 16  }
   0x4   :  { %7701 = vsyncadd [#allocation3], 4294967280 }
   0x5   :  { %38 = sfence }
   0x6   :  { %v6340_v0 = vld [vmem:[%s12649_s5] sm:$0xf]  ;;  %v7295_v1 = vld [vmem:[%s12649_s5 + $0x18] sm:$0xf0]  ;;  %vm164_vm0 = vcmask 130048   ;;  %v7284_v4 = vld [vmem:[%s12645_s1 + $0x28] sm:$0xff] }
   0x7   :  { %v6341_v2 = vor.u32 %v7295_v1, %v6340_v0  ;;  %v7279_v3 = vld [vmem:[%s12645_s1] sm:$0xff]  ;;  %v7280_v6 = vld [vmem:[%s12645_s1 + $0x8] sm:$0xff]  ;;  %v7285_v7 = vld [vmem:[%s12645_s1 + $0x30] sm:$0xff]  ;;  %vm12652_vm1 = vcmask 261120  }
   0x8   :  { %v7291_v5 = vld [vmem:[%s12645_s1 + $0x60] sm:$0xff]  ;;  %v7292_v8 = vld [vmem:[%s12645_s1 + $0x68] sm:$0xff]  ;;  %v6364_v9 = vld [vmem:[%s12649_s5 + $0x3c] sm:$0xf] }
   0x9   :  { %220 = vmatpush.bf16.msra.mxu0 %v6341_v2  ;;  %7469 = vmatpush.bf16.msra.mxu1 %v6341_v2  ;;  %v7297_v10 = vld [vmem:[%s12649_s5 + $0x54] sm:$0xf0]  ;;  %v7281_v12 = vld [vmem:[%s12645_s1 + $0x10] sm:$0xff]  ;;  %v6360_v16 = vld [vmem:[%s12649_s5 + $0x4] sm:$0xf] }
   0xa   :  { %7471 = vmatpush.bf16.msra.mxu3 %v6341_v2  ;;  %7470 = vmatpush.bf16.msra.mxu2 %v6341_v2  ;;  %v6365_v11 = vor.u32 %v7297_v10, %v6364_v9  ;;  %v7286_v13 = vld [vmem:[%s12645_s1 + $0x38] sm:$0xff]  ;;  %v7293_v14 = vld [vmem:[%s12645_s1 + $0x70] sm:$0xff]  ;;  %v7296_v17 = vld [vmem:[%s12649_s5 + $0x1c] sm:$0xf0] }
   0xb   :  { %v7289_v15 = vld [vmem:[%s12645_s1 + $0x50] sm:$0xff]  ;;  %v6361_v18 = vor.u32 %v7296_v17, %v6360_v16  ;;  %v7282_v19 = vld [vmem:[%s12645_s1 + $0x18] sm:$0xff]  ;;  %v7287_v20 = vld [vmem:[%s12645_s1 + $0x40] sm:$0xff] }
   0xc   :  { %6342 = vmatmul.msk.bf16.vlgmr.msra.gmra.mxu0 %vm164_vm0, %v7279_v3  ;;  %6347 = vmatmul.msk.bf16.vlgmr.msra.gmra.mxu1 %vm164_vm0, %v7284_v4  ;;  %v7294_v21 = vld [vmem:[%s12645_s1 + $0x78] sm:$0xff]  ;;  %v7283_v23 = vld [vmem:[%s12645_s1 + $0x20] sm:$0xff]  ;;  %v7288_v24 = vld [vmem:[%s12645_s1 + $0x48] sm:$0xff] }
   0xd   :  { %6354 = vmatmul.msk.bf16.vlgmr.msra.gmra.mxu3 %vm164_vm0, %v7291_v5  ;;  %425 = vmatpush.bf16.msrb.mxu1 %v6365_v11  ;;  %v7290_v22 = vld [vmem:[%s12645_s1 + $0x58] sm:$0xff]  ;;  %v7833_v27 = vld [vmem:[%s12650_s6] ss:$0 sm:$0xff] }
   0xe   :  { %6352 = vmatmul.msk.bf16.vlgmr.msra.gmra.mxu2 %vm164_vm0, %v7289_v15 }
  0x11   :  { %426 = vmatpush.bf16.msrb.mxu1 %v6361_v18 }
  0x1c   :  { %6343 = vmatmul.msk.bf16.gmra.mxu0 %vm164_vm0, %v7280_v6  ;;  %6348 = vmatmul.msk.bf16.gmra.mxu1 %vm164_vm0, %v7285_v7 }
  0x1d   :  { %6355 = vmatmul.msk.bf16.gmra.mxu3 %vm164_vm0, %v7292_v8 }
  0x1e   :  { %6353 = vmatmul.msk.bf16.gmra.mxu2 %vm164_vm0, %v7290_v22 }
  0x2c   :  { %6344 = vmatmul.msk.bf16.gmra.mxu0 %vm164_vm0, %v7281_v12  ;;  %6349 = vmatmul.msk.bf16.gmra.mxu1 %vm164_vm0, %v7286_v13 }
  0x2d   :  { %6356 = vmatmul.msk.bf16.gmra.mxu3 %vm164_vm0, %v7293_v14 }
  0x3c   :  { %6345 = vmatmul.msk.bf16.gmra.mxu0 %vm164_vm0, %v7282_v19  ;;  %6350 = vmatmul.msk.bf16.gmra.mxu1 %vm164_vm0, %v7287_v20 }
  0x3d   :  { %6357 = vmatmul.msk.bf16.gmra.mxu3 %vm164_vm0, %v7294_v21 }
  0x4c   :  { %6346 = vmatmul.msk.bf16.gmra.mxu0 %vm164_vm0, %v7283_v23  ;;  %6351 = vmatmul.msk.bf16.gmra.mxu1 %vm164_vm0, %v7288_v24 }
  0x89   :  { %v222_v25 = vpop.f32.mrf.mxu0  ;;  %v247_v26 = vpop.f32.mrf.mxu1 }
  0x8a   :  { %v223_v28 = vadd.f32 %v7833_v27, %v222_v25  ;;  %v248_v61 = vadd.f32 %v7833_v27, %v247_v26 }
  0x8c   :  { %v302_v33 = vmax.f32 %v223_v28, 0.0  ;;  %v312_v6 = vmax.f32 %v248_v61, 0.0 }
  0x90   :  { %v7836_v29 = vpop.f32.mrf.mxu3 }
  0x91   :  { %v224_v30 = vpop.f32.mrf.mxu0  ;;  %v249_v31 = vpop.f32.mrf.mxu1 }
  0x92   :  { %v225_v32 = vadd.f32 %v7833_v27, %v224_v30  ;;  %v7857_v60 = vpop.f32.mrf.mxu2  ;;  %v250_v62 = vadd.f32 %v7833_v27, %v249_v31 }
  0x94   :  { %v303_v34 = vmax.f32 %v225_v32, 0.0  ;;  %v313_v7 = vmax.f32 %v250_v62, 0.0 }
  0x96   :  { %v7839_v35 = vpack.c.bf16 %v303_v34, %v302_v33  ;;  %v7873_v12 = vpack.c.bf16 %v313_v7, %v312_v6 }
  0x98   :  { %6366 = vmatmul.msk.bf16.vlgmr.msrb.gmra.mxu1 %vm12652_vm1, %v7839_v35  ;;  %v7843_v36 = vpop.f32.mrf.mxu3 }
  0x99   :  { %v227_v37 = vpop.f32.mrf.mxu0  ;;  %v252_v38 = vpop.f32.mrf.mxu1 }
  0x9a   :  { %v228_v39 = vadd.f32 %v7833_v27, %v227_v37  ;;  %v253_v51 = vadd.f32 %v7833_v27, %v252_v38  ;;  %v274_v13 = vpop.f32.mrf.mxu2 }
  0x9c   :  { %v304_v44 = vmax.f32 %v228_v39, 0.0  ;;  %v314_v63 = vmax.f32 %v253_v51, 0.0 }
  0xa0   :  { %v287_v40 = vpop.f32.mrf.mxu3 }
  0xa1   :  { %v229_v41 = vpop.f32.mrf.mxu0  ;;  %v254_v42 = vpop.f32.mrf.mxu1  ;;  %v288_v32 = vadd.f32 %v7833_v27, %v287_v40 }
  0xa2   :  { %v230_v43 = vadd.f32 %v7833_v27, %v229_v41  ;;  %v255_v53 = vadd.f32 %v7833_v27, %v254_v42  ;;  %v277_v23 = vpop.f32.mrf.mxu2  ;;  %v283_v41 = vadd.f32 %v7833_v27, %v7836_v29 }
  0xa3   :  { %v278_v29 = vadd.f32 %v7833_v27, %v277_v23 }
  0xa4   :  { %v305_v45 = vmax.f32 %v230_v43, 0.0  ;;  %v315_v1 = vmax.f32 %v255_v53, 0.0  ;;  %v285_v43 = vadd.f32 %v7833_v27, %v7843_v36 }
  0xa6   :  { %v7847_v46 = vpack.c.bf16 %v305_v45, %v304_v44  ;;  %v7868_v8 = vpack.c.bf16 %v315_v1, %v314_v63  ;;  %v328_v44 = vmax.f32 %v288_v32, 0.0 }
  0xa8   :  { %6367 = vmatmul.msk.bf16.gmra.mxu1 %vm12652_vm1, %v7847_v46  ;;  %v289_v47 = vpop.f32.mrf.mxu3 }
  0xa9   :  { %v232_v48 = vpop.f32.mrf.mxu0  ;;  %v257_v49 = vpop.f32.mrf.mxu1  ;;  %v290_v33 = vadd.f32 %v7833_v27, %v289_v47 }
  0xaa   :  { %v258_v50 = vadd.f32 %v7833_v27, %v257_v49  ;;  %v233_v52 = vadd.f32 %v7833_v27, %v232_v48  ;;  %v279_v47 = vpop.f32.mrf.mxu2 }
  0xab   :  { %v329_v45 = vmax.f32 %v290_v33, 0.0  ;;  %v280_v36 = vadd.f32 %v7833_v27, %v279_v47 }
  0xac   :  { %v316_v58 = vmax.f32 %v258_v50, 0.0  ;;  %v306_v0 = vmax.f32 %v233_v52, 0.0  ;;  %v326_v50 = vmax.f32 %v283_v41, 0.0  ;;  %v327_v52 = vmax.f32 %v285_v43, 0.0 }
  0xad   :  { %v7898_v53 = vpack.c.bf16 %v329_v45, %v328_v44  ;;  %v325_v61 = vmax.f32 %v280_v36, 0.0 }
  0xae   :  { %v346_v62 = vpack.c.bf16 %v327_v52, %v326_v50 }
  0xb0   :  { %v292_v54 = vpop.f32.mrf.mxu3 }
  0xb1   :  { %v234_v55 = vpop.f32.mrf.mxu0  ;;  %v259_v56 = vpop.f32.mrf.mxu1  ;;  %v293_v24 = vadd.f32 %v7833_v27, %v292_v54 }
  0xb2   :  { %v235_v57 = vadd.f32 %v7833_v27, %v234_v55  ;;  %v260_v59 = vadd.f32 %v7833_v27, %v259_v56  ;;  %v273_v56 = vadd.f32 %v7833_v27, %v7857_v60 }
  0xb3   :  { %v330_v34 = vmax.f32 %v293_v24, 0.0 }
  0xb4   :  { %v307_v2 = vmax.f32 %v235_v57, 0.0  ;;  %v317_v3 = vmax.f32 %v260_v59, 0.0  ;;  %v324_v59 = vmax.f32 %v278_v29, 0.0 }
  0xb6   :  { %v7861_v4 = vpack.c.bf16 %v307_v2, %v306_v0  ;;  %v7863_v5 = vpack.c.bf16 %v317_v3, %v316_v58  ;;  %v275_v58 = vadd.f32 %v7833_v27, %v274_v13  ;;  %v322_v0 = vmax.f32 %v273_v56, 0.0 }
  0xb7   :  { %v345_v3 = vpack.c.bf16 %v325_v61, %v324_v59 }
  0xb8   :  { %6368 = vmatmul.msk.bf16.gmra.mxu1 %vm12652_vm1, %v7861_v4  ;;  %2495 = vmatpush.bf16.msrb.mxu2 %v7863_v5  ;;  %v294_v9 = vpop.f32.mrf.mxu3  ;;  %v323_v1 = vmax.f32 %v275_v58, 0.0 }
  0xb9   :  { %v237_v10 = vpop.f32.mrf.mxu0  ;;  %v7870_v11 = vpop.f32.mrf.mxu1  ;;  %v295_v25 = vadd.f32 %v7833_v27, %v294_v9 }
  0xba   :  { %v238_v14 = vadd.f32 %v7833_v27, %v237_v10  ;;  %v263_v6 = vadd.f32 %v7833_v27, %v7870_v11  ;;  %v344_v13 = vpack.c.bf16 %v323_v1, %v322_v0 }
  0xbb   :  { %v331_v37 = vmax.f32 %v295_v25, 0.0 }
  0xbc   :  { %2496 = vmatpush.bf16.msrb.mxu2 %v7868_v8  ;;  %v308_v18 = vmax.f32 %v238_v14, 0.0  ;;  %v318_v14 = vmax.f32 %v263_v6, 0.0 }
  0xbd   :  { %v7892_v48 = vpack.c.bf16 %v331_v37, %v330_v34 }
  0xc0   :  { %2497 = vmatpush.bf16.msrb.mxu2 %v7873_v12  ;;  %v297_v15 = vpop.f32.mrf.mxu3 }
  0xc1   :  { %v239_v16 = vpop.f32.mrf.mxu0  ;;  %v264_v20 = vpop.f32.mrf.mxu1  ;;  %v298_v21 = vadd.f32 %v7833_v27, %v297_v15 }
  0xc2   :  { %v240_v17 = vadd.f32 %v7833_v27, %v239_v16  ;;  %v265_v7 = vadd.f32 %v7833_v27, %v264_v20 }
  0xc3   :  { %v332_v30 = vmax.f32 %v298_v21, 0.0 }
  0xc4   :  { %v309_v19 = vmax.f32 %v240_v17, 0.0  ;;  %v319_v15 = vmax.f32 %v265_v7, 0.0 }
  0xc6   :  { %v337_v22 = vpack.c.bf16 %v309_v19, %v308_v18  ;;  %v342_v17 = vpack.c.bf16 %v319_v15, %v318_v14 }
  0xc8   :  { %6369 = vmatmul.msk.bf16.gmra.mxu1 %vm12652_vm1, %v337_v22  ;;  %v299_v26 = vpop.f32.mrf.mxu3 }
  0xc9   :  { %v242_v28 = vpop.f32.mrf.mxu0  ;;  %v300_v31 = vadd.f32 %v7833_v27, %v299_v26  ;;  %v267_v42 = vpop.f32.mrf.mxu1 }
  0xca   :  { %v243_v40 = vadd.f32 %v7833_v27, %v242_v28  ;;  %v268_v2 = vadd.f32 %v7833_v27, %v267_v42 }
  0xcb   :  { %v333_v38 = vmax.f32 %v300_v31, 0.0 }
  0xcc   :  { %v310_v54 = vmax.f32 %v243_v40, 0.0  ;;  %v320_v9 = vmax.f32 %v268_v2, 0.0 }
  0xcd   :  { %v7885_v39 = vpack.c.bf16 %v333_v38, %v332_v30 }
  0xcf   :  { %2584 = vmatpush.bf16.msrb.mxu3 %v7885_v39 }
  0xd1   :  { %v244_v49 = vpop.f32.mrf.mxu0  ;;  %v269_v63 = vpop.f32.mrf.mxu1 }
  0xd2   :  { %v245_v51 = vadd.f32 %v7833_v27, %v244_v49  ;;  %v270_v60 = vadd.f32 %v7833_v27, %v269_v63  ;;  %v7923_v27 = vld [vmem:[%s12650_s6 + $0x1] ss:$0 sm:$0xff] }
  0xd3   :  { %2585 = vmatpush.bf16.msrb.mxu3 %v7892_v48 }
  0xd4   :  { %v311_v55 = vmax.f32 %v245_v51, 0.0  ;;  %v321_v10 = vmax.f32 %v270_v60, 0.0 }
  0xd6   :  { %v338_v57 = vpack.c.bf16 %v311_v55, %v310_v54  ;;  %v343_v16 = vpack.c.bf16 %v321_v10, %v320_v9 }
  0xd7   :  { %2586 = vmatpush.bf16.msrb.mxu3 %v7898_v53 }
  0xd8   :  { %6370 = vmatmul.msk.bf16.gmra.mxu1 %vm12652_vm1, %v338_v57  ;;  %2498 = vmatpush.bf16.msrb.mxu2 %v338_v57 }
  0xdb   :  { %2587 = vmatpush.bf16.msrb.mxu3 %v346_v62 }
  0xdc   :  { %2499 = vmatpush.bf16.msrb.mxu2 %v337_v22 }
  0xdf   :  { %2588 = vmatpush.bf16.msrb.mxu3 %v345_v3 }
  0xe0   :  { %2500 = vmatpush.bf16.msrb.mxu2 %v7861_v4 }
  0xe3   :  { %2589 = vmatpush.bf16.msrb.mxu3 %v344_v13 }
  0xe4   :  { %2501 = vmatpush.bf16.msrb.mxu2 %v7847_v46 }
  0xe7   :  { %2590 = vmatpush.bf16.msrb.mxu3 %v343_v16 }
  0xe8   :  { %6371 = vmatmul.msk.bf16.gmra.mxu1 %vm12652_vm1, %v7873_v12  ;;  %2502 = vmatpush.bf16.msrb.mxu2 %v7839_v35 }
  0xeb   :  { %2591 = vmatpush.bf16.msrb.mxu3 %v342_v17 }
  0xf8   :  { %6372 = vmatmul.msk.bf16.gmra.mxu1 %vm12652_vm1, %v7868_v8 }
 0x108   :  { %6373 = vmatmul.msk.bf16.gmra.mxu1 %vm12652_vm1, %v7863_v5 }
 0x115   :  { %v428_v46 = vpop.f32.mrf.mxu1 }
 0x116   :  { %v429_v4 = vadd.f32 %v7923_v27, %v428_v46 }
 0x118   :  { %6374 = vmatmul.msk.bf16.gmra.mxu1 %vm12652_vm1, %v342_v17  ;;  %508 = vmax.xlane.f32.xlu0 %v429_v4 }
 0x11d   :  { %v430_v11 = vpop.f32.mrf.mxu1 }
 0x11e   :  { %v431_v35 = vadd.f32 %v7923_v27, %v430_v11 }
 0x120   :  { %510 = vmax.xlane.f32.xlu1 %v431_v35 }
 0x125   :  { %v433_v12 = vpop.f32.mrf.mxu1 }
 0x126   :  { %v7929_v8 = vadd.f32 %v7923_v27, %v433_v12 }
 0x128   :  { %6375 = vmatmul.msk.bf16.gmra.mxu1 %vm12652_vm1, %v343_v16  ;;  %512 = vmax.xlane.f32.xlu2 %v7929_v8 }
 0x12d   :  { %v435_v5 = vpop.f32.mrf.mxu1 }
 0x12e   :  { %v7934_v18 = vadd.f32 %v7923_v27, %v435_v5 }
 0x130   :  { %514 = vmax.xlane.f32.xlu0 %v7934_v18 }
 0x135   :  { %v438_v19 = vpop.f32.mrf.mxu1 }
 0x136   :  { %v7938_v20 = vadd.f32 %v7923_v27, %v438_v19 }
 0x138   :  { %6376 = vmatmul.msk.bf16.gmra.mxu1 %vm12652_vm1, %v344_v13  ;;  %516 = vmax.xlane.f32.xlu2 %v7938_v20 }
 0x13d   :  { %v440_v21 = vpop.f32.mrf.mxu1 }
 0x13e   :  { %v7943_v22 = vadd.f32 %v7923_v27, %v440_v21 }
 0x140   :  { %518 = vmax.xlane.f32.xlu1 %v7943_v22 }
 0x145   :  { %v443_v23 = vpop.f32.mrf.mxu1 }
 0x146   :  { %v7947_v24 = vadd.f32 %v7923_v27, %v443_v23 }
 0x148   :  { %6377 = vmatmul.msk.bf16.gmra.mxu1 %vm12652_vm1, %v345_v3  ;;  %520 = vmax.xlane.f32.xlu0 %v7947_v24 }
 0x14d   :  { %v445_v25 = vpop.f32.mrf.mxu1 }
 0x14e   :  { %v7952_v26 = vadd.f32 %v7923_v27, %v445_v25 }
 0x150   :  { %522 = vmax.xlane.f32.xlu2 %v7952_v26 }
 0x155   :  { %v448_v28 = vpop.f32.mrf.mxu1 }
 0x156   :  { %v7956_v30 = vadd.f32 %v7923_v27, %v448_v28 }
 0x158   :  { %6378 = vmatmul.msk.bf16.gmra.mxu1 %vm12652_vm1, %v346_v62  ;;  %524 = vmax.xlane.f32.xlu1 %v7956_v30 }
 0x15d   :  { %v450_v31 = vpop.f32.mrf.mxu1 }
 0x15e   :  { %v7961_v32 = vadd.f32 %v7923_v27, %v450_v31 }
 0x160   :  { %526 = vmax.xlane.f32.xlu0 %v7961_v32 }
 0x165   :  { %v453_v33 = vpop.f32.mrf.mxu1 }
 0x166   :  { %v7965_v34 = vadd.f32 %v7923_v27, %v453_v33 }
 0x168   :  { %6379 = vmatmul.msk.bf16.gmra.mxu1 %vm12652_vm1, %v7898_v53  ;;  %528 = vmax.xlane.f32.xlu2 %v7965_v34 }
 0x16d   :  { %v455_v37 = vpop.f32.mrf.mxu1 }
 0x16e   :  { %v7971_v38 = vadd.f32 %v7923_v27, %v455_v37 }
 0x170   :  { %530 = vmax.xlane.f32.xlu1 %v7971_v38 }
 0x175   :  { %v458_v41 = vpop.f32.mrf.mxu1 }
 0x176   :  { %v7975_v42 = vadd.f32 %v7923_v27, %v458_v41 }
 0x178   :  { %6380 = vmatmul.msk.bf16.gmra.mxu1 %vm12652_vm1, %v7892_v48  ;;  %532 = vmax.xlane.f32.xlu0 %v7975_v42 }
 0x17d   :  { %v460_v43 = vpop.f32.mrf.mxu1 }
 0x17e   :  { %v7981_v44 = vadd.f32 %v7923_v27, %v460_v43 }
 0x180   :  { %534 = vmax.xlane.f32.xlu2 %v7981_v44 }
 0x185   :  { %v463_v45 = vpop.f32.mrf.mxu1 }
 0x186   :  { %v7985_v40 = vadd.f32 %v7923_v27, %v463_v45 }
 0x188   :  { %6381 = vmatmul.msk.bf16.gmra.mxu1 %vm12652_vm1, %v7885_v39  ;;  %536 = vmax.xlane.f32.xlu1 %v7985_v40 }
 0x18b   :  { %v509_v47 = vpop.xlane.xlu0 %508 }
 0x18c   :  { %v572_v49 = vsub.f32 %v429_v4, %v509_v47 }
 0x18d   :  { %v465_v48 = vpop.f32.mrf.mxu1 }
 0x18e   :  { %v604_v50 = vmul.f32 1.442695, %v572_v49  ;;  %v7991_v51 = vadd.f32 %v7923_v27, %v465_v48 }
 0x190   :  { %7493 = vpow2.f32 %v604_v50  ;;  %538 = vmax.xlane.f32.xlu0 %v7991_v51 }
 0x193   :  { %v511_v52 = vpop.xlane.xlu1 %510 }
 0x194   :  { %v573_v29 = vsub.f32 %v431_v35, %v511_v52 }
 0x195   :  { %v468_v53 = vpop.f32.mrf.mxu1 }
 0x196   :  { %v7994_v36 = vpop.eup %7493  ;;  %v606_v54 = vmul.f32 1.442695, %v573_v29  ;;  %v7997_v39 = vadd.f32 %v7923_v27, %v468_v53 }
 0x197   :  { %668 = vadd.xlane.f32.xlu2 %v7994_v36 }
 0x198   :  { %7495 = vpow2.f32 %v606_v54  ;;  %540 = vmax.xlane.f32.xlu0 %v7997_v39 }
 0x19b   :  { %v513_v55 = vpop.xlane.xlu2 %512 }
 0x19c   :  { %v574_v56 = vsub.f32 %v7929_v8, %v513_v55 }
 0x19d   :  { %v470_v57 = vpop.f32.mrf.mxu1 }
 0x19e   :  { %v8002_v58 = vpop.eup %7495  ;;  %v608_v59 = vmul.f32 1.442695, %v574_v56  ;;  %v8007_v0 = vadd.f32 %v7923_v27, %v470_v57 }
 0x19f   :  { %670 = vadd.xlane.f32.xlu1 %v8002_v58 }
 0x1a0   :  { %7497 = vpow2.f32 %v608_v59 }
 0x1a3   :  { %v515_v61 = vpop.xlane.xlu0 %514 }
 0x1a4   :  { %v575_v62 = vsub.f32 %v7934_v18, %v515_v61 }
 0x1a5   :  { %v473_v63 = vpop.f32.mrf.mxu1 }
 0x1a6   :  { %v8009_v1 = vpop.eup %7497  ;;  %v610_v2 = vmul.f32 1.442695, %v575_v62  ;;  %v8012_v3 = vadd.f32 %v7923_v27, %v473_v63 }
 0x1a7   :  { %542 = vmax.xlane.f32.xlu1 %v8007_v0  ;;  %672 = vadd.xlane.f32.xlu0 %v8009_v1 }
 0x1a8   :  { %7499 = vpow2.f32 %v610_v2  ;;  %544 = vmax.xlane.f32.xlu2 %v8012_v3 }
 0x1ab   :  { %v517_v60 = vpop.xlane.xlu2 %516 }
 0x1ac   :  { %v576_v6 = vsub.f32 %v7938_v20, %v517_v60 }
 0x1ad   :  { %v475_v7 = vpop.f32.mrf.mxu1 }
 0x1ae   :  { %v8018_v9 = vpop.eup %7499  ;;  %v612_v10 = vmul.f32 1.442695, %v576_v6  ;;  %v8021_v13 = vadd.f32 %v7923_v27, %v475_v7 }
 0x1b0   :  { %7501 = vpow2.f32 %v612_v10  ;;  %546 = vmax.xlane.f32.xlu1 %v8021_v13  ;;  %674 = vadd.xlane.f32.xlu2 %v8018_v9 }
 0x1b3   :  { %v519_v14 = vpop.xlane.xlu1 %518 }
 0x1b4   :  { %v577_v15 = vsub.f32 %v7943_v22, %v519_v14 }
 0x1b5   :  { %v478_v16 = vpop.f32.mrf.mxu1 }
 0x1b6   :  { %v8026_v17 = vpop.eup %7501  ;;  %v614_v46 = vmul.f32 1.442695, %v577_v15  ;;  %v8029_v4 = vadd.f32 %v7923_v27, %v478_v16 }
 0x1b8   :  { %7503 = vpow2.f32 %v614_v46  ;;  %676 = vadd.xlane.f32.xlu1 %v8026_v17  ;;  %548 = vmax.xlane.f32.xlu0 %v8029_v4 }
 0x1bb   :  { %v521_v11 = vpop.xlane.xlu0 %520 }
 0x1bc   :  { %v578_v35 = vsub.f32 %v7947_v24, %v521_v11 }
 0x1bd   :  { %v480_v12 = vpop.f32.mrf.mxu1 }
 0x1be   :  { %v8034_v8 = vpop.eup %7503  ;;  %v616_v5 = vmul.f32 1.442695, %v578_v35  ;;  %v8037_v18 = vadd.f32 %v7923_v27, %v480_v12 }
 0x1c0   :  { %7505 = vpow2.f32 %v616_v5  ;;  %678 = vadd.xlane.f32.xlu0 %v8034_v8  ;;  %550 = vmax.xlane.f32.xlu2 %v8037_v18 }
 0x1c3   :  { %v523_v19 = vpop.xlane.xlu2 %522 }
 0x1c4   :  { %v579_v20 = vsub.f32 %v7952_v26, %v523_v19 }
 0x1c5   :  { %v483_v21 = vpop.f32.mrf.mxu1 }
 0x1c6   :  { %v8042_v22 = vpop.eup %7505  ;;  %v618_v23 = vmul.f32 1.442695, %v579_v20  ;;  %v8045_v24 = vadd.f32 %v7923_v27, %v483_v21 }
 0x1c8   :  { %7507 = vpow2.f32 %v618_v23  ;;  %552 = vmax.xlane.f32.xlu1 %v8045_v24  ;;  %680 = vadd.xlane.f32.xlu2 %v8042_v22 }
 0x1cb   :  { %v525_v25 = vpop.xlane.xlu1 %524 }
 0x1cc   :  { %v580_v28 = vsub.f32 %v7956_v30, %v525_v25 }
 0x1cd   :  { %v485_v31 = vpop.f32.mrf.mxu1 }
 0x1ce   :  { %v8050_v33 = vpop.eup %7507  ;;  %v620_v37 = vmul.f32 1.442695, %v580_v28  ;;  %v8053_v26 = vadd.f32 %v7923_v27, %v485_v31 }
 0x1d0   :  { %7509 = vpow2.f32 %v620_v37  ;;  %682 = vadd.xlane.f32.xlu1 %v8050_v33  ;;  %554 = vmax.xlane.f32.xlu0 %v8053_v26 }
 0x1d3   :  { %v527_v41 = vpop.xlane.xlu0 %526 }
 0x1d4   :  { %v581_v43 = vsub.f32 %v7961_v32, %v527_v41 }
 0x1d5   :  { %v488_v45 = vpop.f32.mrf.mxu1 }
 0x1d6   :  { %v8058_v47 = vpop.eup %7509  ;;  %v622_v49 = vmul.f32 1.442695, %v581_v43  ;;  %v8061_v30 = vadd.f32 %v7923_v27, %v488_v45 }
 0x1d8   :  { %7511 = vpow2.f32 %v622_v49  ;;  %684 = vadd.xlane.f32.xlu0 %v8058_v47  ;;  %556 = vmax.xlane.f32.xlu2 %v8061_v30 }
 0x1db   :  { %v529_v48 = vpop.xlane.xlu2 %528 }
 0x1dc   :  { %v582_v50 = vsub.f32 %v7965_v34, %v529_v48 }
 0x1dd   :  { %v490_v52 = vpop.f32.mrf.mxu1 }
 0x1de   :  { %v8066_v29 = vpop.eup %7511  ;;  %v624_v53 = vmul.f32 1.442695, %v582_v50  ;;  %v8069_v32 = vadd.f32 %v7923_v27, %v490_v52 }
 0x1e0   :  { %7513 = vpow2.f32 %v624_v53  ;;  %558 = vmax.xlane.f32.xlu1 %v8069_v32  ;;  %686 = vadd.xlane.f32.xlu2 %v8066_v29 }
 0x1e3   :  { %v531_v7 = vpop.xlane.xlu1 %530 }
 0x1e5   :  { %v493_v54 = vpop.f32.mrf.mxu1 }
 0x1e6   :  { %v8073_v55 = vpop.eup %7513  ;;  %v8076_v56 = vadd.f32 %v7923_v27, %v493_v54 }
 0x1e8   :  { %688 = vadd.xlane.f32.xlu1 %v8073_v55  ;;  %560 = vmax.xlane.f32.xlu0 %v8076_v56 }
 0x1eb   :  { %v533_v34 = vpop.xlane.xlu0 %532 }
 0x1ec   :  { %v584_v57 = vsub.f32 %v7975_v42, %v533_v34  ;;  %v583_v42 = vsub.f32 %v7971_v38, %v531_v7 }
 0x1ed   :  { %v495_v59 = vpop.f32.mrf.mxu1 }
 0x1ee   :  { %v628_v61 = vmul.f32 1.442695, %v584_v57  ;;  %v8082_v62 = vadd.f32 %v7923_v27, %v495_v59  ;;  %v626_v15 = vmul.f32 1.442695, %v583_v42 }
 0x1f0   :  { %7515 = vpow2.f32 %v628_v61  ;;  %562 = vmax.xlane.f32.xlu2 %v8082_v62 }
 0x1f3   :  { %v535_v63 = vpop.xlane.xlu2 %534 }
 0x1f4   :  { %v585_v2 = vsub.f32 %v7981_v44, %v535_v63 }
 0x1f5   :  { %v498_v60 = vpop.f32.mrf.mxu1 }
 0x1f6   :  { %v8086_v6 = vpop.eup %7515  ;;  %v630_v10 = vmul.f32 1.442695, %v585_v2  ;;  %v8089_v14 = vadd.f32 %v7923_v27, %v498_v60 }
 0x1f8   :  { %7517 = vpow2.f32 %v630_v10  ;;  %564 = vmax.xlane.f32.xlu1 %v8089_v14  ;;  %692 = vadd.xlane.f32.xlu2 %v8086_v6 }
 0x1f9   :  { %7519 = vpow2.f32 %v626_v15 }
 0x1fb   :  { %v8110_v38 = vpop.xlane.xlu1 %536 }
 0x1fd   :  { %v500_v16 = vpop.f32.mrf.mxu1 }
 0x1fe   :  { %v8094_v46 = vpop.eup %7517  ;;  %v8097_v44 = vadd.f32 %v7923_v27, %v500_v16 }
 0x1ff   :  { %v8106_v5 = vpop.eup %7519 }
 0x200   :  { %694 = vadd.xlane.f32.xlu1 %v8094_v46  ;;  %566 = vmax.xlane.f32.xlu0 %v8097_v44 }
 0x203   :  { %v8101_v11 = vpop.xlane.xlu0 %538 }
 0x205   :  { %v503_v35 = vpop.f32.mrf.mxu1 }
 0x206   :  { %v8104_v12 = vadd.f32 %v7923_v27, %v503_v35 }
 0x208   :  { %690 = vadd.xlane.f32.xlu0 %v8106_v5  ;;  %568 = vmax.xlane.f32.xlu2 %v8104_v12 }
 0x20a   :  { %v8119_v31 = vpop.xlane.xlu2 %668 }
 0x20b   :  { %v541_v19 = vpop.xlane.xlu0 %540 }
 0x20c   :  { %v588_v20 = vsub.f32 %v7997_v39, %v541_v19 }
 0x20d   :  { %v505_v21 = vpop.f32.mrf.mxu1 }
 0x20e   :  { %v636_v23 = vmul.f32 1.442695, %v588_v20  ;;  %v8114_v25 = vadd.f32 %v7923_v27, %v505_v21 }
 0x210   :  { %7521 = vpow2.f32 %v636_v23  ;;  %570 = vmax.xlane.f32.xlu1 %v8114_v25 }
 0x212   :  { %v8117_v28 = vpop.xlane.xlu1 %670 }
 0x216   :  { %v8121_v37 = vpop.eup %7521 }
 0x217   :  { %700 = vadd.xlane.f32.xlu0 %v8121_v37 }
 0x21a   :  { %v543_v41 = vpop.xlane.xlu1 %542  ;;  %v8126_v48 = vpop.xlane.xlu0 %672 }
 0x21b   :  { %v589_v43 = vsub.f32 %v8007_v0, %v543_v41  ;;  %v545_v39 = vpop.xlane.xlu2 %544 }
 0x21c   :  { %v590_v45 = vsub.f32 %v8012_v3, %v545_v39 }
 0x21d   :  { %v638_v49 = vmul.f32 1.442695, %v589_v43 }
 0x21e   :  { %v640_v27 = vmul.f32 1.442695, %v590_v45 }
 0x21f   :  { %7523 = vpow2.f32 %v638_v49 }
 0x220   :  { %7525 = vpow2.f32 %v640_v27 }
 0x223   :  { %v547_v50 = vpop.xlane.xlu1 %546  ;;  %v8135_v0 = vpop.xlane.xlu2 %674 }
 0x224   :  { %v591_v52 = vsub.f32 %v8021_v13, %v547_v50 }
 0x225   :  { %v8129_v53 = vpop.eup %7523 }
 0x226   :  { %v8131_v54 = vpop.eup %7525  ;;  %v642_v34 = vmul.f32 1.442695, %v591_v52  ;;  %702 = vadd.xlane.f32.xlu2 %v8129_v53 }
 0x227   :  { %704 = vadd.xlane.f32.xlu1 %v8131_v54 }
 0x228   :  { %7527 = vpow2.f32 %v642_v34 }
 0x22b   :  { %v549_v3 = vpop.xlane.xlu0 %548  ;;  %v8141_v13 = vpop.xlane.xlu1 %676 }
 0x22c   :  { %v592_v57 = vsub.f32 %v8029_v4, %v549_v3 }
 0x22e   :  { %v8138_v59 = vpop.eup %7527  ;;  %v644_v61 = vmul.f32 1.442695, %v592_v57 }
 0x22f   :  { %706 = vadd.xlane.f32.xlu0 %v8138_v59 }
 0x230   :  { %7529 = vpow2.f32 %v644_v61  ;;  %v587_v61 = vsub.f32 %v7991_v51, %v8101_v11 }
 0x233   :  { %v551_v63 = vpop.xlane.xlu2 %550  ;;  %v8147_v10 = vpop.xlane.xlu0 %678 }
 0x234   :  { %v593_v2 = vsub.f32 %v8037_v18, %v551_v63 }
 0x236   :  { %v8144_v60 = vpop.eup %7529  ;;  %v646_v7 = vmul.f32 1.442695, %v593_v2 }
 0x237   :  { %708 = vadd.xlane.f32.xlu2 %v8144_v60 }
 0x238   :  { %7531 = vpow2.f32 %v646_v7 }
 0x23b   :  { %v553_v4 = vpop.xlane.xlu1 %552  ;;  %v8153_v35 = vpop.xlane.xlu2 %680 }
 0x23c   :  { %v594_v42 = vsub.f32 %v8045_v24, %v553_v4 }
 0x23e   :  { %v8150_v15 = vpop.eup %7531  ;;  %v648_v16 = vmul.f32 1.442695, %v594_v42 }
 0x23f   :  { %710 = vadd.xlane.f32.xlu1 %v8150_v15 }
 0x240   :  { %7533 = vpow2.f32 %v648_v16 }
 0x243   :  { %v555_v18 = vpop.xlane.xlu0 %554  ;;  %v8159_v23 = vpop.xlane.xlu1 %682 }
 0x244   :  { %v595_v19 = vsub.f32 %v8053_v26, %v555_v18 }
 0x246   :  { %v8156_v20 = vpop.eup %7533  ;;  %v650_v21 = vmul.f32 1.442695, %v595_v19  ;;  %v586_v19 = vsub.f32 %v7985_v40, %v8110_v38 }
 0x247   :  { %712 = vadd.xlane.f32.xlu0 %v8156_v20 }
 0x248   :  { %7535 = vpow2.f32 %v650_v21 }
 0x24b   :  { %v557_v24 = vpop.xlane.xlu2 %556  ;;  %v8165_v45 = vpop.xlane.xlu0 %684 }
 0x24c   :  { %v596_v41 = vsub.f32 %v8061_v30, %v557_v24 }
 0x24e   :  { %v8162_v43 = vpop.eup %7535  ;;  %v652_v39 = vmul.f32 1.442695, %v596_v41 }
 0x24f   :  { %714 = vadd.xlane.f32.xlu2 %v8162_v43 }
 0x250   :  { %7537 = vpow2.f32 %v652_v39 }
 0x253   :  { %v559_v26 = vpop.xlane.xlu1 %558  ;;  %v8171_v52 = vpop.xlane.xlu2 %686 }
 0x254   :  { %v597_v49 = vsub.f32 %v8069_v32, %v559_v26  ;;  %v634_v32 = vmul.f32 1.442695, %v587_v61 }
 0x256   :  { %v8168_v27 = vpop.eup %7537  ;;  %v654_v50 = vmul.f32 1.442695, %v597_v49 }
 0x257   :  { %716 = vadd.xlane.f32.xlu1 %v8168_v27 }
 0x258   :  { %7539 = vpow2.f32 %v654_v50 }
 0x25b   :  { %v561_v30 = vpop.xlane.xlu0 %560  ;;  %v8179_v63 = vpop.xlane.xlu1 %688 }
 0x25c   :  { %v598_v34 = vsub.f32 %v8076_v56, %v561_v30 }
 0x25e   :  { %v8174_v3 = vpop.eup %7539  ;;  %v656_v57 = vmul.f32 1.442695, %v598_v34 }
 0x25f   :  { %718 = vadd.xlane.f32.xlu0 %v8174_v3 }
 0x260   :  { %7541 = vpow2.f32 %v656_v57 }
 0x261   :  { %7543 = vpow2.f32 %v634_v32 }
 0x263   :  { %v563_v2 = vpop.xlane.xlu2 %562 }
 0x264   :  { %v599_v7 = vsub.f32 %v8082_v62, %v563_v2  ;;  %v632_v62 = vmul.f32 1.442695, %v586_v19 }
 0x266   :  { %v8182_v4 = vpop.eup %7541  ;;  %v658_v42 = vmul.f32 1.442695, %v599_v7 }
 0x267   :  { %720 = vadd.xlane.f32.xlu2 %v8182_v4  ;;  %v8186_v51 = vpop.eup %7543 }
 0x268   :  { %7545 = vpow2.f32 %v658_v42 }
 0x26b   :  { %v565_v56 = vpop.xlane.xlu1 %564  ;;  %v8194_v21 = vpop.xlane.xlu2 %692 }
 0x26c   :  { %v600_v16 = vsub.f32 %v8089_v14, %v565_v56 }
 0x26e   :  { %v8188_v11 = vpop.eup %7545  ;;  %v660_v18 = vmul.f32 1.442695, %v600_v16 }
 0x26f   :  { %722 = vadd.xlane.f32.xlu1 %v8188_v11  ;;  %698 = vadd.xlane.f32.xlu2 %v8186_v51 }
 0x270   :  { %7547 = vpow2.f32 %v660_v18 }
 0x271   :  { %7549 = vpow2.f32 %v632_v62 }
 0x273   :  { %v567_v24 = vpop.xlane.xlu0 %566  ;;  %v8200_v26 = vpop.xlane.xlu1 %694 }
 0x274   :  { %v601_v41 = vsub.f32 %v8097_v44, %v567_v24 }
 0x276   :  { %v8197_v14 = vpop.eup %7547  ;;  %v662_v39 = vmul.f32 1.442695, %v601_v41 }
 0x277   :  { %724 = vadd.xlane.f32.xlu0 %v8197_v14  ;;  %v8203_v49 = vpop.eup %7549 }
 0x278   :  { %7551 = vpow2.f32 %v662_v39 }
 0x27b   :  { %v569_v40 = vpop.xlane.xlu2 %568  ;;  %v8216_v32 = vpop.xlane.xlu0 %690 }
 0x27c   :  { %v602_v38 = vsub.f32 %v8104_v12, %v569_v40 }
 0x27e   :  { %v8205_v50 = vpop.eup %7551  ;;  %v664_v30 = vmul.f32 1.442695, %v602_v38 }
 0x27f   :  { %696 = vadd.xlane.f32.xlu0 %v8203_v49  ;;  %726 = vadd.xlane.f32.xlu2 %v8205_v50 }
 0x280   :  { %7553 = vpow2.f32 %v664_v30 }
 0x283   :  { %v571_v44 = vpop.xlane.xlu1 %570 }
 0x284   :  { %v603_v34 = vsub.f32 %v8114_v25, %v571_v44 }
 0x286   :  { %v8210_v57 = vpop.eup %7553  ;;  %v666_v61 = vmul.f32 1.442695, %v603_v34 }
 0x287   :  { %728 = vadd.xlane.f32.xlu1 %v8210_v57 }
 0x288   :  { %7555 = vpow2.f32 %v666_v61 }
 0x28a   :  { %v701_v2 = vpop.xlane.xlu0 %700 }
 0x28b   :  { %7557 = vrcp.f32 %v701_v2 }
 0x28e   :  { %v8213_v12 = vpop.eup %7555 }
 0x28f   :  { %730 = vadd.xlane.f32.xlu0 %v8213_v12 }
 0x291   :  { %v7558_v42 = vpop.eup %7557 }
 0x292   :  { %v780_v56 = vmul.f32 %v7558_v42, %v8121_v37 }
 0x299   :  { %v703_v7 = vpop.xlane.xlu2 %702 }
 0x29a   :  { %7559 = vrcp.f32 %v703_v7  ;;  %v705_v25 = vpop.xlane.xlu1 %704 }
 0x29b   :  { %7561 = vrcp.f32 %v705_v25 }
 0x2a0   :  { %v7560_v16 = vpop.eup %7559 }
 0x2a1   :  { %v781_v18 = vmul.f32 %v7560_v16, %v8129_v53  ;;  %v7562_v62 = vpop.eup %7561 }
 0x2a2   :  { %v707_v19 = vpop.xlane.xlu0 %706  ;;  %v782_v24 = vmul.f32 %v7562_v62, %v8131_v54 }
 0x2a3   :  { %7563 = vrcp.f32 %v707_v19 }
 0x2a4   :  { %7565 = vrcp.f32 %v8119_v31 }
 0x2a8   :  { %828 = vxpose.xlu2.b32.start [1/16] (narrow) %v780_v56, 8 }
 0x2a9   :  { %v7564_v39 = vpop.eup %7563 }
 0x2aa   :  { %v709_v41 = vpop.xlane.xlu2 %708  ;;  %v7566_v40 = vpop.eup %7565  ;;  %v783_v37 = vmul.f32 %v7564_v39, %v8138_v59 }
 0x2ab   :  { %7567 = vrcp.f32 %v709_v41  ;;  %v764_v38 = vmul.f32 %v7566_v40, %v7994_v36 }
 0x2ac   :  { %7569 = vrcp.f32 %v8117_v28 }
 0x2b0   :  { %829 = vxpose.xlu2.b32.cont [2/16] (narrow) %v781_v18, 8 }
 0x2b1   :  { %v7568_v30 = vpop.eup %7567 }
 0x2b2   :  { %v711_v53 = vpop.xlane.xlu1 %710  ;;  %v7570_v44 = vpop.eup %7569  ;;  %v784_v31 = vmul.f32 %v7568_v30, %v8144_v60 }
 0x2b3   :  { %7571 = vrcp.f32 %v711_v53  ;;  %v765_v54 = vmul.f32 %v7570_v44, %v8002_v58 }
 0x2b4   :  { %7573 = vrcp.f32 %v8126_v48 }
 0x2b8   :  { %830 = vxpose.xlu2.b32.cont [3/16] (narrow) %v782_v24, 8 }
 0x2b9   :  { %v7572_v28 = vpop.eup %7571 }
 0x2ba   :  { %v713_v34 = vpop.xlane.xlu0 %712  ;;  %v7574_v61 = vpop.eup %7573  ;;  %v785_v36 = vmul.f32 %v7572_v28, %v8150_v15 }
 0x2bb   :  { %7575 = vrcp.f32 %v713_v34  ;;  %v766_v59 = vmul.f32 %v7574_v61, %v8009_v1  ;;  %v12653_v61 = vlaneseq }
 0x2bc   :  { %7577 = vrcp.f32 %v8135_v0 }
 0x2c0   :  { %831 = vxpose.xlu2.b32.cont [4/16] (narrow) %v783_v37, 8 }
 0x2c1   :  { %796 = vxpose.xlu1.b32.start [1/16] (narrow) %v764_v38, 8  ;;  %v7576_v48 = vpop.eup %7575 }
 0x2c2   :  { %v715_v2 = vpop.xlane.xlu2 %714  ;;  %v7578_v7 = vpop.eup %7577  ;;  %v786_v58 = vmul.f32 %v7576_v48, %v8156_v20 }
 0x2c3   :  { %7579 = vrcp.f32 %v715_v2  ;;  %v767_v60 = vmul.f32 %v7578_v7, %v8018_v9 }
 0x2c4   :  { %7581 = vrcp.f32 %v8141_v13 }
 0x2c8   :  { %832 = vxpose.xlu2.b32.cont [5/16] (narrow) %v784_v31, 8 }
 0x2c9   :  { %797 = vxpose.xlu1.b32.cont [2/16] (narrow) %v765_v54, 8  ;;  %v7580_v0 = vpop.eup %7579 }
 0x2ca   :  { %v717_v42 = vpop.xlane.xlu1 %716  ;;  %v7582_v56 = vpop.eup %7581  ;;  %v787_v1 = vmul.f32 %v7580_v0, %v8162_v43 }
 0x2cb   :  { %7583 = vrcp.f32 %v717_v42  ;;  %v768_v15 = vmul.f32 %v7582_v56, %v8026_v17 }
 0x2cc   :  { %7585 = vrcp.f32 %v8147_v10 }
 0x2d0   :  { %833 = vxpose.xlu2.b32.cont [6/16] (narrow) %v785_v36, 8 }
 0x2d1   :  { %798 = vxpose.xlu1.b32.cont [3/16] (narrow) %v766_v59, 8  ;;  %v7584_v13 = vpop.eup %7583 }
 0x2d2   :  { %v719_v25 = vpop.xlane.xlu0 %718  ;;  %v7586_v16 = vpop.eup %7585  ;;  %v788_v9 = vmul.f32 %v7584_v13, %v8168_v27 }
 0x2d3   :  { %7587 = vrcp.f32 %v719_v25  ;;  %v769_v20 = vmul.f32 %v7586_v16, %v8034_v8 }
 0x2d4   :  { %7589 = vrcp.f32 %v8153_v35 }
 0x2d8   :  { %834 = vxpose.xlu2.b32.cont [7/16] (narrow) %v786_v58, 8 }
 0x2d9   :  { %799 = vxpose.xlu1.b32.cont [4/16] (narrow) %v767_v60, 8  ;;  %v7588_v10 = vpop.eup %7587 }
 0x2da   :  { %v721_v18 = vpop.xlane.xlu2 %720  ;;  %v7590_v19 = vpop.eup %7589  ;;  %v789_v17 = vmul.f32 %v7588_v10, %v8174_v3 }
 0x2db   :  { %7591 = vrcp.f32 %v721_v18  ;;  %v770_v43 = vmul.f32 %v7590_v19, %v8042_v22 }
 0x2dc   :  { %7593 = vrcp.f32 %v8159_v23 }
 0x2e0   :  { %835 = vxpose.xlu2.b32.cont [8/16] (narrow) %v787_v1, 8 }
 0x2e1   :  { %800 = vxpose.xlu1.b32.cont [5/16] (narrow) %v768_v15, 8  ;;  %v7592_v35 = vpop.eup %7591 }
 0x2e2   :  { %v723_v62 = vpop.xlane.xlu1 %722  ;;  %v7594_v24 = vpop.eup %7593  ;;  %v790_v8 = vmul.f32 %v7592_v35, %v8182_v4 }
 0x2e3   :  { %7595 = vrcp.f32 %v723_v62  ;;  %v771_v27 = vmul.f32 %v7594_v24, %v8050_v33  ;;  %v699_v41 = vpop.xlane.xlu2 %698 }
 0x2e4   :  { %7597 = vrcp.f32 %v8165_v45 }
 0x2e8   :  { %836 = vxpose.xlu2.b32.cont [9/16] (narrow) %v788_v9, 8 }
 0x2e9   :  { %801 = vxpose.xlu1.b32.cont [6/16] (narrow) %v769_v20, 8  ;;  %v7596_v39 = vpop.eup %7595 }
 0x2ea   :  { %v725_v23 = vpop.xlane.xlu0 %724  ;;  %v7598_v3 = vpop.eup %7597  ;;  %v791_v22 = vmul.f32 %v7596_v39, %v8188_v11 }
 0x2eb   :  { %7599 = vrcp.f32 %v725_v23  ;;  %v772_v40 = vmul.f32 %v7598_v3, %v8058_v47 }
 0x2ec   :  { %7601 = vrcp.f32 %v8171_v52 }
 0x2f0   :  { %837 = vxpose.xlu2.b32.cont [10/16] (narrow) %v789_v17, 8 }
 0x2f1   :  { %802 = vxpose.xlu1.b32.cont [7/16] (narrow) %v770_v43, 8  ;;  %v7600_v37 = vpop.eup %7599 }
 0x2f2   :  { %v727_v45 = vpop.xlane.xlu2 %726  ;;  %v7602_v4 = vpop.eup %7601  ;;  %v792_v33 = vmul.f32 %v7600_v37, %v8197_v14 }
 0x2f3   :  { %7603 = vrcp.f32 %v727_v45  ;;  %v773_v38 = vmul.f32 %v7602_v4, %v8066_v29  ;;  %v697_v53 = vpop.xlane.xlu0 %696 }
 0x2f4   :  { %7605 = vrcp.f32 %v8179_v63 }
 0x2f8   :  { %838 = vxpose.xlu2.b32.cont [11/16] (narrow) %v790_v8, 8 }
 0x2f9   :  { %803 = vxpose.xlu1.b32.cont [8/16] (narrow) %v771_v27, 8  ;;  %v7604_v30 = vpop.eup %7603 }
 0x2fa   :  { %v729_v52 = vpop.xlane.xlu1 %728  ;;  %v7606_v11 = vpop.eup %7605  ;;  %v793_v47 = vmul.f32 %v7604_v30, %v8205_v50 }
 0x2fb   :  { %7607 = vrcp.f32 %v729_v52  ;;  %v774_v44 = vmul.f32 %v7606_v11, %v8073_v55 }
 0x2fc   :  { %7609 = vrcp.f32 %v8216_v32 }
 0x300   :  { %839 = vxpose.xlu2.b32.cont [12/16] (narrow) %v791_v22, 8 }
 0x301   :  { %804 = vxpose.xlu1.b32.cont [9/16] (narrow) %v772_v40, 8  ;;  %v7608_v31 = vpop.eup %7607 }
 0x302   :  { %v731_v63 = vpop.xlane.xlu0 %730  ;;  %v7610_v14 = vpop.eup %7609  ;;  %v794_v29 = vmul.f32 %v7608_v31, %v8210_v57 }
 0x303   :  { %7611 = vrcp.f32 %v731_v63  ;;  %v775_v54 = vmul.f32 %v7610_v14, %v8106_v5 }
 0x304   :  { %7613 = vrcp.f32 %v8194_v21 }
 0x305   :  { %7615 = vrcp.f32 %v8200_v26  ;;  %v861_v26 = vld [vmem:[%s12646_s2 + $0x8] sm:$0xff] }
 0x306   :  { %7617 = vrcp.f32 %v697_v53  ;;  %v8269_v36 = vperm.slane %v861_v26, 0  ;;  %v8275_v2 = vperm.slane %v861_v26, 1  ;;  %v8279_v48 = vperm.slane %v861_v26, 3 }
 0x307   :  { %7619 = vrcp.f32 %v699_v41  ;;  %v8281_v7 = vperm.slane %v861_v26, 4  ;;  %v8285_v58 = vperm.slane %v861_v26, 5  ;;  %v8287_v60 = vperm.slane %v861_v26, 6 }
 0x308   :  { %840 = vxpose.xlu2.b32.cont [13/16] (narrow) %v792_v33, 8 }
 0x309   :  { %805 = vxpose.xlu1.b32.cont [10/16] (narrow) %v773_v38, 8  ;;  %v7612_v34 = vpop.eup %7611 }
 0x30a   :  { %v7614_v32 = vpop.eup %7613  ;;  %v795_v55 = vmul.f32 %v7612_v34, %v8213_v12  ;;  %v8267_v12 = vshrl.u32 %v12653_v61, 7 }
 0x30b   :  { %v776_v50 = vmul.f32 %v7614_v32, %v8086_v6  ;;  %v7616_v28 = vpop.eup %7615 }
 0x30c   :  { %v777_v21 = vmul.f32 %v7616_v28, %v8094_v46  ;;  %v7618_v57 = vpop.eup %7617  ;;  %12731 = vst [vmem:[#allocation5_spill] sm:$0xff] %v8267_v12  ;;  %v8273_v46 = vadd.s32 8, %v8267_v12  ;;  %vm898_vm2 = vcmp.eq.s32.totalorder %v8267_v12, %v8269_v36  ;;  %v8294_v42 = vadd.s32 16, %v8267_v12 }
 0x30d   :  { %v778_v5 = vmul.f32 %v7618_v57, %v8203_v49  ;;  %v7620_v6 = vpop.eup %7619  ;;  %v8277_v49 = vperm.slane %v861_v26, 2  ;;  %v8297_v0 = vadd.s32 24, %v8267_v12  ;;  %vm1094_vm4 = vcmp.eq.s32.totalorder %v8267_v12, %v8275_v2 }
 0x30e   :  { %v779_v59 = vmul.f32 %v7620_v6, %v8186_v51  ;;  %12732 = vst [vmem:[#allocation6_spill] sm:$0xff] %v8273_v46  ;;  %vm900_vm3 = vcmp.eq.s32.totalorder %v8273_v46, %v8269_v36  ;;  %v8291_v51 = vperm.slane %v861_v26, 7  ;;  %vm1096_vm5 = vcmp.eq.s32.totalorder %v8273_v46, %v8275_v2 }
 0x30f   :  { %12733 = vst [vmem:[#allocation7_spill] sm:$0xff] %v8294_v42  ;;  %vm1290_vm6 = vcmp.eq.s32.totalorder %v8267_v12, %v8277_v49  ;;  %vm1292_vm7 = vcmp.eq.s32.totalorder %v8273_v46, %v8277_v49  ;;  %vm1486_vm8 = vcmp.eq.s32.totalorder %v8267_v12, %v8279_v48  ;;  %vm1488_vm9 = vcmp.eq.s32.totalorder %v8273_v46, %v8279_v48 }
 0x310   :  { %841 = vxpose.xlu2.b32.cont [14/16] (narrow) %v793_v47, 8  ;;  %12734 = vst [vmem:[#allocation8_spill] sm:$0xff] %v8297_v0  ;;  %vm1682_vm10 = vcmp.eq.s32.totalorder %v8267_v12, %v8281_v7  ;;  %vm1100_vm14 = vcmp.eq.s32.totalorder %v8297_v0, %v8275_v2  ;;  %vm1294_vm15 = vcmp.eq.s32.totalorder %v8294_v42, %v8277_v49  ;;  %v8348_v1 = vadd.s32 32, %v8267_v12 }
 0x311   :  { %806 = vxpose.xlu1.b32.cont [11/16] (narrow) %v774_v44, 8  ;;  %vm1296_vm0 = vcmp.eq.s32.totalorder %v8297_v0, %v8277_v49  ;;  %v8351_v15 = vadd.s32 40, %v8267_v12  ;;  %v8354_v25 = vadd.s32 48, %v8267_v12  ;;  %v8357_v13 = vadd.s32 56, %v8267_v12 }
 0x312   :  { %12735 = vst [vmem:[#allocation9_spill] sm:$0xff] %v8348_v1  ;;  %vm1882_vm13 = vcmp.eq.s32.totalorder %v8294_v42, %v8285_v58  ;;  %vm1884_vm12 = vcmp.eq.s32.totalorder %v8297_v0, %v8285_v58  ;;  %vm2078_vm11 = vcmp.eq.s32.totalorder %v8294_v42, %v8287_v60  ;;  %vm2080_vm1 = vcmp.eq.s32.totalorder %v8297_v0, %v8287_v60 }
 0x313   :  { %12736 = vst [vmem:[#allocation10_spill] sm:$0xff] %v8351_v15 }
 0x314   :  { %12737 = vst [vmem:[#allocation11_spill] sm:$0xff] %v8354_v25 }
 0x315   :  { %12738 = vst [vmem:[#allocation12_spill] sm:$0xff] %v8357_v13 }
 0x318   :  { %842 = vxpose.xlu2.b32.cont [15/16] (narrow) %v794_v29, 8 }
 0x319   :  { %807 = vxpose.xlu1.b32.cont [12/16] (narrow) %v775_v54, 8 }
 0x320   :  { %843 = vxpose.xlu2.b32.end [16/16] (narrow) %v795_v55, 8 }
 0x321   :  { %808 = vxpose.xlu1.b32.cont [13/16] (narrow) %v776_v50, 8 }
 0x329   :  { %809 = vxpose.xlu1.b32.cont [14/16] (narrow) %v777_v21, 8 }
 0x331   :  { %810 = vxpose.xlu1.b32.cont [15/16] (narrow) %v778_v5, 8 }
 0x339   :  { %811 = vxpose.xlu1.b32.end [16/16] (narrow) %v779_v59, 8 }
 0x341   :  { %v844_v56 = vpop.trf.xlu2 }
 0x342   :  { %v8359_v16 = vperm.slane %v844_v56, 0  ;;  %v8361_v9 = vperm.slane %v844_v56, 1  ;;  %v8363_v20 = vperm.slane %v844_v56, 2  ;;  %v8365_v18 = vperm.slane %v844_v56, 3 }
 0x343   :  { %v8367_v10 = vperm.slane %v844_v56, 4  ;;  %v8369_v19 = vperm.slane %v844_v56, 5  ;;  %v8371_v17 = vperm.slane %v844_v56, 6  ;;  %v8373_v43 = vperm.slane %v844_v56, 7 }
 0x344   :  { %v964_v62 = vsel %vm898_vm2, %v8359_v16, 0.0  ;;  %v966_v35 = vsel %vm900_vm3, %v8359_v16, 0.0  ;;  %v1160_v24 = vsel %vm1094_vm4, %v8361_v9, 0.0  ;;  %v1162_v8 = vsel %vm1096_vm5, %v8361_v9, 0.0 }
 0x345   :  { %v1224_v27 = vadd.f32 %v1160_v24, %v964_v62  ;;  %v1226_v41 = vadd.f32 %v1162_v8, %v966_v35  ;;  %v1356_v23 = vsel %vm1290_vm6, %v8363_v20, 0.0  ;;  %v1358_v39 = vsel %vm1292_vm7, %v8363_v20, 0.0 }
 0x346   :  { %vm2274_vm2 = vcmp.eq.s32.totalorder %v8294_v42, %v8291_v51  ;;  %vm2276_vm3 = vcmp.eq.s32.totalorder %v8297_v0, %v8291_v51  ;;  %vm906_vm4 = vcmp.eq.s32.totalorder %v8348_v1, %v8269_v36  ;;  %v1552_v3 = vsel %vm1486_vm8, %v8365_v18, 0.0 }
 0x347   :  { %v1554_v22 = vsel %vm1488_vm9, %v8365_v18, 0.0  ;;  %v1748_v40 = vsel %vm1682_vm10, %v8367_v10, 0.0  ;;  %vm12739_vm6 = vcmp.eq.s32.totalorder %v8273_v46, %v8281_v7  ;;  %v1420_v37 = vadd.f32 %v1356_v23, %v1224_v27 }
 0x348   :  { %v1750_v45 = vsel %vm12739_vm6, %v8367_v10, 0.0  ;;  %v1422_v4 = vadd.f32 %v1358_v39, %v1226_v41  ;;  %vm12740_vm7 = vcmp.eq.s32.totalorder %v8267_v12, %v8285_v58  ;;  %vm12741_vm8 = vcmp.eq.s32.totalorder %v8273_v46, %v8285_v58 }
 0x349   :  { %v1944_v33 = vsel %vm12740_vm7, %v8369_v19, 0.0  ;;  %v1946_v38 = vsel %vm12741_vm8, %v8369_v19, 0.0  ;;  %vm1102_vm9 = vcmp.eq.s32.totalorder %v8348_v1, %v8275_v2  ;;  %vm12742_vm7 = vcmp.eq.s32.totalorder %v8267_v12, %v8287_v60 }
 0x34a   :  { %v2140_v53 = vsel %vm12742_vm7, %v8371_v17, 0.0  ;;  %vm12743_vm8 = vcmp.eq.s32.totalorder %v8273_v46, %v8287_v60  ;;  %vm12744_vm10 = vcmp.eq.s32.totalorder %v8267_v12, %v8291_v51  ;;  %vm12745_vm6 = vcmp.eq.s32.totalorder %v8273_v46, %v8291_v51 }
 0x34b   :  { %v2142_v52 = vsel %vm12743_vm8, %v8371_v17, 0.0  ;;  %v2336_v30 = vsel %vm12744_vm10, %v8373_v43, 0.0  ;;  %v2338_v11 = vsel %vm12745_vm6, %v8373_v43, 0.0  ;;  %v1616_v47 = vadd.f32 %v1552_v3, %v1420_v37 }
 0x34c   :  { %v1618_v44 = vadd.f32 %v1554_v22, %v1422_v4  ;;  %vm12746_vm7 = vcmp.eq.s32.totalorder %v8294_v42, %v8269_v36  ;;  %vm12747_vm8 = vcmp.eq.s32.totalorder %v8297_v0, %v8269_v36  ;;  %vm1494_vm10 = vcmp.eq.s32.totalorder %v8348_v1, %v8279_v48 }
 0x34d   :  { %v968_v63 = vsel %vm12746_vm7, %v8359_v16, 0.0  ;;  %v970_v31 = vsel %vm12747_vm8, %v8359_v16, 0.0  ;;  %vm1496_vm5 = vcmp.eq.s32.totalorder %v8351_v15, %v8279_v48  ;;  %vm12748_vm6 = vcmp.eq.s32.totalorder %v8294_v42, %v8275_v2 }
 0x34e   :  { %v1164_v14 = vsel %vm12748_vm6, %v8361_v9, 0.0  ;;  %v1166_v29 = vsel %vm1100_vm14, %v8361_v9, 0.0  ;;  %v1360_v54 = vsel %vm1294_vm15, %v8363_v20, 0.0  ;;  %v1362_v34 = vsel %vm1296_vm0, %v8363_v20, 0.0 }
 0x34f   :  { %v1812_v32 = vadd.f32 %v1748_v40, %v1616_v47  ;;  %v1814_v55 = vadd.f32 %v1750_v45, %v1618_v44  ;;  %v1228_v50 = vadd.f32 %v1164_v14, %v968_v63  ;;  %v1230_v28 = vadd.f32 %v1166_v29, %v970_v31 }
 0x350   :  { %vm12749_vm7 = vcmp.eq.s32.totalorder %v8294_v42, %v8279_v48  ;;  %vm12750_vm14 = vcmp.eq.s32.totalorder %v8297_v0, %v8279_v48  ;;  %vm12751_vm15 = vcmp.eq.s32.totalorder %v8294_v42, %v8281_v7  ;;  %vm12752_vm0 = vcmp.eq.s32.totalorder %v8297_v0, %v8281_v7 }
 0x351   :  { %v1556_v21 = vsel %vm12749_vm7, %v8365_v18, 0.0  ;;  %v1558_v57 = vsel %vm12750_vm14, %v8365_v18, 0.0  ;;  %v1752_v5 = vsel %vm12751_vm15, %v8367_v10, 0.0  ;;  %v1754_v26 = vsel %vm12752_vm0, %v8367_v10, 0.0 }
 0x352   :  { %v2008_v6 = vadd.f32 %v1944_v33, %v1812_v32  ;;  %v2010_v59 = vadd.f32 %v1946_v38, %v1814_v55  ;;  %v1424_v56 = vadd.f32 %v1360_v54, %v1228_v50  ;;  %v1426_v62 = vadd.f32 %v1362_v34, %v1230_v28 }
 0x353   :  { %v1948_v35 = vsel %vm1882_vm13, %v8369_v19, 0.0  ;;  %v1950_v24 = vsel %vm1884_vm12, %v8369_v19, 0.0  ;;  %v2144_v8 = vsel %vm2078_vm11, %v8371_v17, 0.0  ;;  %v2146_v27 = vsel %vm2080_vm1, %v8371_v17, 0.0 }
 0x354   :  { %v2204_v41 = vadd.f32 %v2140_v53, %v2008_v6  ;;  %v2206_v23 = vadd.f32 %v2142_v52, %v2010_v59  ;;  %v1620_v39 = vadd.f32 %v1556_v21, %v1424_v56  ;;  %v1622_v3 = vadd.f32 %v1558_v57, %v1426_v62 }
 0x355   :  { %v2340_v22 = vsel %vm2274_vm2, %v8373_v43, 0.0  ;;  %v2342_v40 = vsel %vm2276_vm3, %v8373_v43, 0.0  ;;  %v972_v45 = vsel %vm906_vm4, %v8359_v16, 0.0  ;;  %vm12753_vm1 = vcmp.eq.s32.totalorder %v8351_v15, %v8269_v36 }
 0x356   :  { %v974_v37 = vsel %vm12753_vm1, %v8359_v16, 0.0  ;;  %v2400_v4 = vadd.f32 %v2336_v30, %v2204_v41  ;;  %v2402_v33 = vadd.f32 %v2338_v11, %v2206_v23  ;;  %v1816_v38 = vadd.f32 %v1752_v5, %v1620_v39  ;;  %v7315_v41 = vld [vmem:[%s12648_s4 + $0x78] sm:$0xff] }
 0x357   :  { %v1818_v53 = vadd.f32 %v1754_v26, %v1622_v3  ;;  %v1168_v52 = vsel %vm1102_vm9, %v8361_v9, 0.0  ;;  %vm12754_vm11 = vcmp.eq.s32.totalorder %v8351_v15, %v8275_v2  ;;  %vm12755_vm12 = vcmp.eq.s32.totalorder %v8348_v1, %v8277_v49  ;;  %4400 = vmatpush.bf16.msra.mxu2 %v7315_v41 }
 0x358   :  { %v1170_v47 = vsel %vm12754_vm11, %v8361_v9, 0.0  ;;  %v1364_v44 = vsel %vm12755_vm12, %v8363_v20, 0.0  ;;  %vm12756_vm13 = vcmp.eq.s32.totalorder %v8351_v15, %v8277_v49  ;;  %v2464_v11 = vpack.c.bf16 %v2402_v33, %v2400_v4 }
 0x359   :  { %v1366_v30 = vsel %vm12756_vm13, %v8363_v20, 0.0  ;;  %v2012_v63 = vadd.f32 %v1948_v35, %v1816_v38  ;;  %v2014_v31 = vadd.f32 %v1950_v24, %v1818_v53  ;;  %v1232_v14 = vadd.f32 %v1168_v52, %v972_v45  ;;  %v860_v35 = vld [vmem:[%s12646_s2] sm:$0xff] }
 0x35a   :  { %v1234_v29 = vadd.f32 %v1170_v47, %v974_v37  ;;  %v1560_v54 = vsel %vm1494_vm10, %v8365_v18, 0.0  ;;  %v1562_v34 = vsel %vm1496_vm5, %v8365_v18, 0.0  ;;  %vm1690_vm2 = vcmp.eq.s32.totalorder %v8348_v1, %v8281_v7  ;;  %2592 = vmatmul.bf16.vlgmr.msrb.gmra.mxu3 %v2464_v11 }
 0x35b   :  { %v2208_v32 = vadd.f32 %v2144_v8, %v2012_v63  ;;  %v2210_v55 = vadd.f32 %v2146_v27, %v2014_v31  ;;  %v1428_v50 = vadd.f32 %v1364_v44, %v1232_v14  ;;  %vm1692_vm3 = vcmp.eq.s32.totalorder %v8351_v15, %v8281_v7 }
 0x35c   :  { %v1430_v28 = vadd.f32 %v1366_v30, %v1234_v29  ;;  %v1756_v21 = vsel %vm1690_vm2, %v8367_v10, 0.0  ;;  %v1758_v57 = vsel %vm1692_vm3, %v8367_v10, 0.0  ;;  %vm1886_vm4 = vcmp.eq.s32.totalorder %v8348_v1, %v8285_v58 }
 0x35d   :  { %vm910_vm5 = vcmp.eq.s32.totalorder %v8354_v25, %v8269_v36  ;;  %vm912_vm9 = vcmp.eq.s32.totalorder %v8357_v13, %v8269_v36  ;;  %v2404_v5 = vadd.f32 %v2340_v22, %v2208_v32  ;;  %v2406_v26 = vadd.f32 %v2342_v40, %v2210_v55 }
 0x35e   :  { %v1624_v6 = vadd.f32 %v1560_v54, %v1428_v50  ;;  %vm1888_vm8 = vcmp.eq.s32.totalorder %v8351_v15, %v8285_v58  ;;  %vm1106_vm10 = vcmp.eq.s32.totalorder %v8354_v25, %v8275_v2  ;;  %v1626_v59 = vadd.f32 %v1562_v34, %v1430_v28 }
 0x35f   :  { %v1952_v56 = vsel %vm1886_vm4, %v8369_v19, 0.0  ;;  %v1954_v62 = vsel %vm1888_vm8, %v8369_v19, 0.0  ;;  %vm2082_vm6 = vcmp.eq.s32.totalorder %v8348_v1, %v8287_v60  ;;  %v2466_v24 = vpack.c.bf16 %v2406_v26, %v2404_v5 }
 0x360   :  { %v1820_v8 = vadd.f32 %v1756_v21, %v1624_v6  ;;  %vm2084_vm7 = vcmp.eq.s32.totalorder %v8351_v15, %v8287_v60  ;;  %v2148_v27 = vsel %vm2082_vm6, %v8371_v17, 0.0  ;;  %vm1108_vm14 = vcmp.eq.s32.totalorder %v8357_v13, %v8275_v2 }
 0x361   :  { %v1822_v23 = vadd.f32 %v1758_v57, %v1626_v59  ;;  %v2150_v39 = vsel %vm2084_vm7, %v8371_v17, 0.0  ;;  %vm2278_vm15 = vcmp.eq.s32.totalorder %v8348_v1, %v8291_v51  ;;  %vm2280_vm0 = vcmp.eq.s32.totalorder %v8351_v15, %v8291_v51 }
 0x362   :  { %v2016_v3 = vadd.f32 %v1952_v56, %v1820_v8  ;;  %v2344_v22 = vsel %vm2278_vm15, %v8373_v43, 0.0  ;;  %v2346_v40 = vsel %vm2280_vm0, %v8373_v43, 0.0  ;;  %v8601_v45 = vperm.slane %v860_v35, 0 }
 0x363   :  { %v2018_v37 = vadd.f32 %v1954_v62, %v1822_v23  ;;  %v8603_v4 = vperm.slane %v860_v35, 1  ;;  %v8605_v33 = vperm.slane %v860_v35, 2  ;;  %v8607_v38 = vperm.slane %v860_v35, 3 }
 0x364   :  { %v2212_v53 = vadd.f32 %v2148_v27, %v2016_v3  ;;  %vm897_vm1 = vcmp.eq.s32.totalorder %v8267_v12, %v8601_v45  ;;  %vm899_vm11 = vcmp.eq.s32.totalorder %v8273_v46, %v8601_v45  ;;  %v8613_v52 = vperm.slane %v860_v35, 4 }
 0x365   :  { %v2214_v47 = vadd.f32 %v2150_v39, %v2018_v37  ;;  %vm1093_vm12 = vcmp.eq.s32.totalorder %v8267_v12, %v8603_v4  ;;  %vm1095_vm13 = vcmp.eq.s32.totalorder %v8273_v46, %v8603_v4  ;;  %vm1289_vm2 = vcmp.eq.s32.totalorder %v8267_v12, %v8605_v33  ;;  %v812_v50 = vpop.trf.xlu1 }
 0x366   :  { %v8621_v44 = vadd.f32 %v2344_v22, %v2212_v53  ;;  %vm1291_vm3 = vcmp.eq.s32.totalorder %v8273_v46, %v8605_v33  ;;  %vm1485_vm4 = vcmp.eq.s32.totalorder %v8267_v12, %v8607_v38  ;;  %vm1487_vm8 = vcmp.eq.s32.totalorder %v8273_v46, %v8607_v38 }
 0x367   :  { %v8629_v30 = vadd.f32 %v2346_v40, %v2214_v47  ;;  %vm1681_vm6 = vcmp.eq.s32.totalorder %v8267_v12, %v8613_v52  ;;  %v8635_v11 = vperm.slane %v860_v35, 5  ;;  %v8637_v63 = vperm.slane %v860_v35, 6 }
 0x368   :  { %v8639_v31 = vperm.slane %v860_v35, 7  ;;  %v976_v14 = vsel %vm910_vm5, %v8359_v16, 0.0  ;;  %v978_v29 = vsel %vm912_vm9, %v8359_v16, 0.0  ;;  %v1172_v34 = vsel %vm1106_vm10, %v8361_v9, 0.0 }
 0x369   :  { %vm1879_vm0 = vcmp.eq.s32.totalorder %v8273_v46, %v8635_v11  ;;  %vm2075_vm9 = vcmp.eq.s32.totalorder %v8273_v46, %v8637_v63  ;;  %v1174_v32 = vsel %vm1108_vm14, %v8361_v9, 0.0  ;;  %v1236_v55 = vadd.f32 %v1172_v34, %v976_v14  ;;  %v7307_v34 = vld [vmem:[%s12648_s4 + $0x38] sm:$0xff] }
 0x36a   :  { %vm2269_vm7 = vcmp.eq.s32.totalorder %v8267_v12, %v8639_v31  ;;  %vm1302_vm10 = vcmp.eq.s32.totalorder %v8354_v25, %v8277_v49  ;;  %vm1304_vm5 = vcmp.eq.s32.totalorder %v8357_v13, %v8277_v49  ;;  %2597 = vmatmul.bf16.gmra.mxu3 %v2466_v24  ;;  %v1238_v28 = vadd.f32 %v1174_v32, %v978_v29  ;;  %v7323_v29 = vld [vmem:[%s12648_s4 + $0xb8] sm:$0xff] }
 0x36b   :  { %v1368_v21 = vsel %vm1302_vm10, %v8363_v20, 0.0  ;;  %v1370_v57 = vsel %vm1304_vm5, %v8363_v20, 0.0  ;;  %vm1498_vm15 = vcmp.eq.s32.totalorder %v8354_v25, %v8279_v48  ;;  %v8679_v5 = vperm.slane %v812_v50, 0  ;;  %4489 = vmatpush.bf16.msra.mxu3 %v7323_v29  ;;  %4311 = vmatpush.bf16.msra.mxu1 %v7307_v34 }
 0x36c   :  { %v8681_v26 = vperm.slane %v812_v50, 1  ;;  %v8683_v6 = vperm.slane %v812_v50, 2  ;;  %v8685_v59 = vperm.slane %v812_v50, 3  ;;  %v8687_v56 = vperm.slane %v812_v50, 4 }
 0x36d   :  { %v8689_v62 = vperm.slane %v812_v50, 5  ;;  %v8691_v35 = vperm.slane %v812_v50, 6  ;;  %v8693_v24 = vperm.slane %v812_v50, 7  ;;  %v963_v8 = vsel %vm897_vm1, %v8679_v5, 0.0 }
 0x36e   :  { %v965_v27 = vsel %vm899_vm11, %v8679_v5, 0.0  ;;  %v1159_v41 = vsel %vm1093_vm12, %v8681_v26, 0.0  ;;  %v1161_v23 = vsel %vm1095_vm13, %v8681_v26, 0.0  ;;  %v1355_v22 = vsel %vm1289_vm2, %v8683_v6, 0.0 }
 0x36f   :  { %v1223_v39 = vadd.f32 %v1159_v41, %v963_v8  ;;  %v1225_v3 = vadd.f32 %v1161_v23, %v965_v27  ;;  %v1357_v40 = vsel %vm1291_vm3, %v8683_v6, 0.0  ;;  %v1551_v37 = vsel %vm1485_vm4, %v8685_v59, 0.0 }
 0x370   :  { %v1553_v53 = vsel %vm1487_vm8, %v8685_v59, 0.0  ;;  %v1747_v47 = vsel %vm1681_vm6, %v8687_v56, 0.0  ;;  %vm12757_vm14 = vcmp.eq.s32.totalorder %v8273_v46, %v8613_v52  ;;  %vm12758_vm1 = vcmp.eq.s32.totalorder %v8267_v12, %v8635_v11 }
 0x371   :  { %v1749_v14 = vsel %vm12757_vm14, %v8687_v56, 0.0  ;;  %v1419_v32 = vadd.f32 %v1355_v22, %v1223_v39  ;;  %v1421_v50 = vadd.f32 %v1357_v40, %v1225_v3  ;;  %v1943_v8 = vsel %vm12758_vm1, %v8689_v62, 0.0 }
 0x372   :  { %v1945_v27 = vsel %vm1879_vm0, %v8689_v62, 0.0  ;;  %vm12759_vm11 = vcmp.eq.s32.totalorder %v8267_v12, %v8637_v63  ;;  %v2141_v23 = vsel %vm2075_vm9, %v8691_v35, 0.0  ;;  %v2335_v39 = vsel %vm2269_vm7, %v8693_v24, 0.0 }
 0x373   :  { %v2139_v41 = vsel %vm12759_vm11, %v8691_v35, 0.0  ;;  %vm12760_vm12 = vcmp.eq.s32.totalorder %v8273_v46, %v8639_v31  ;;  %v1615_v22 = vadd.f32 %v1551_v37, %v1419_v32  ;;  %v1617_v40 = vadd.f32 %v1553_v53, %v1421_v50 }
 0x374   :  { %v2337_v3 = vsel %vm12760_vm12, %v8693_v24, 0.0  ;;  %v1432_v61 = vadd.f32 %v1368_v21, %v1236_v55  ;;  %v1434_v54 = vadd.f32 %v1370_v57, %v1238_v28  ;;  %vm1500_vm13 = vcmp.eq.s32.totalorder %v8357_v13, %v8279_v48 }
 0x375   :  { %v1564_v15 = vsel %vm1498_vm15, %v8365_v18, 0.0  ;;  %vm1694_vm2 = vcmp.eq.s32.totalorder %v8354_v25, %v8281_v7  ;;  %vm1696_vm3 = vcmp.eq.s32.totalorder %v8357_v13, %v8281_v7  ;;  %v1811_v29 = vadd.f32 %v1747_v47, %v1615_v22 }
 0x376   :  { %v1813_v34 = vadd.f32 %v1749_v14, %v1617_v40  ;;  %v1566_v37 = vsel %vm1500_vm13, %v8365_v18, 0.0  ;;  %v1628_v55 = vadd.f32 %v1564_v15, %v1432_v61  ;;  %v1760_v21 = vsel %vm1694_vm2, %v8367_v10, 0.0 }
 0x377   :  { %v1630_v28 = vadd.f32 %v1566_v37, %v1434_v54  ;;  %v1762_v57 = vsel %vm1696_vm3, %v8367_v10, 0.0  ;;  %vm1890_vm4 = vcmp.eq.s32.totalorder %v8354_v25, %v8285_v58  ;;  %v2007_v53 = vadd.f32 %v1943_v8, %v1811_v29 }
 0x378   :  { %v2009_v32 = vadd.f32 %v1945_v27, %v1813_v34  ;;  %v1824_v50 = vadd.f32 %v1760_v21, %v1628_v55  ;;  %vm1892_vm8 = vcmp.eq.s32.totalorder %v8357_v13, %v8285_v58  ;;  %v1956_v47 = vsel %vm1890_vm4, %v8369_v19, 0.0 }
 0x379   :  { %v1826_v46 = vadd.f32 %v1762_v57, %v1630_v28  ;;  %v1958_v14 = vsel %vm1892_vm8, %v8369_v19, 0.0  ;;  %vm2086_vm6 = vcmp.eq.s32.totalorder %v8354_v25, %v8287_v60  ;;  %v2203_v61 = vadd.f32 %v2139_v41, %v2007_v53 }
 0x37a   :  { %v2205_v15 = vadd.f32 %v2141_v23, %v2009_v32  ;;  %v2020_v54 = vadd.f32 %v1956_v47, %v1824_v50  ;;  %vm2088_vm7 = vcmp.eq.s32.totalorder %v8357_v13, %v8287_v60  ;;  %v2152_v27 = vsel %vm2086_vm6, %v8371_v17, 0.0 }
 0x37b   :  { %v2022_v8 = vadd.f32 %v1958_v14, %v1826_v46  ;;  %v2154_v22 = vsel %vm2088_vm7, %v8371_v17, 0.0  ;;  %vm2282_vm15 = vcmp.eq.s32.totalorder %v8354_v25, %v8291_v51  ;;  %v12761_v40 = vpack.c.bf16 %v8629_v30, %v8621_v44 }
 0x37c   :  { %v2399_v29 = vadd.f32 %v2335_v39, %v2203_v61  ;;  %v2401_v34 = vadd.f32 %v2337_v3, %v2205_v15  ;;  %v2216_v41 = vadd.f32 %v2152_v27, %v2020_v54  ;;  %vm2284_vm0 = vcmp.eq.s32.totalorder %v8357_v13, %v8291_v51 }
 0x37d   :  { %2602 = vmatmul.bf16.gmra.mxu3 %v12761_v40  ;;  %v2218_v23 = vadd.f32 %v2154_v22, %v2022_v8  ;;  %v2348_v46 = vsel %vm2282_vm15, %v8373_v43, 0.0  ;;  %v2350_v37 = vsel %vm2284_vm0, %v8373_v43, 0.0  ;;  %vm901_vm5 = vcmp.eq.s32.totalorder %v8294_v42, %v8601_v45 }
 0x37e   :  { %v2463_v55 = vpack.c.bf16 %v2401_v34, %v2399_v29  ;;  %v2412_v28 = vadd.f32 %v2348_v46, %v2216_v41  ;;  %vm903_vm9 = vcmp.eq.s32.totalorder %v8297_v0, %v8601_v45  ;;  %v967_v44 = vsel %vm901_vm5, %v8679_v5, 0.0 }
 0x37f   :  { %v2414_v30 = vadd.f32 %v2350_v37, %v2218_v23  ;;  %v969_v39 = vsel %vm903_vm9, %v8679_v5, 0.0  ;;  %vm1097_vm10 = vcmp.eq.s32.totalorder %v8294_v42, %v8603_v4  ;;  %vm1099_vm14 = vcmp.eq.s32.totalorder %v8297_v0, %v8603_v4 }
 0x380   :  { %2503 = vmatmul.bf16.vlgmr.msrb.gmra.mxu2 %v2463_v55  ;;  %v1163_v3 = vsel %vm1097_vm10, %v8681_v26, 0.0  ;;  %v1165_v21 = vsel %vm1099_vm14, %v8681_v26, 0.0  ;;  %vm1293_vm1 = vcmp.eq.s32.totalorder %v8294_v42, %v8605_v33  ;;  %vm1295_vm11 = vcmp.eq.s32.totalorder %v8297_v0, %v8605_v33 }
 0x381   :  { %v1227_v57 = vadd.f32 %v1163_v3, %v967_v44  ;;  %v1229_v53 = vadd.f32 %v1165_v21, %v969_v39  ;;  %v1359_v32 = vsel %vm1293_vm1, %v8683_v6, 0.0  ;;  %v1361_v50 = vsel %vm1295_vm11, %v8683_v6, 0.0  ;;  %v7314_v44 = vld [vmem:[%s12648_s4 + $0x70] sm:$0xff] }
 0x382   :  { %vm1489_vm12 = vcmp.eq.s32.totalorder %v8294_v42, %v8607_v38  ;;  %vm1491_vm13 = vcmp.eq.s32.totalorder %v8297_v0, %v8607_v38  ;;  %vm1685_vm2 = vcmp.eq.s32.totalorder %v8294_v42, %v8613_v52  ;;  %v2470_v47 = vpack.c.bf16 %v2414_v30, %v2412_v28  ;;  %4401 = vmatpush.bf16.msra.mxu2 %v7314_v44 }
 0x383   :  { %v1423_v14 = vadd.f32 %v1359_v32, %v1227_v57  ;;  %v1425_v61 = vadd.f32 %v1361_v50, %v1229_v53  ;;  %v1555_v15 = vsel %vm1489_vm12, %v8685_v59, 0.0  ;;  %v1557_v54 = vsel %vm1491_vm13, %v8685_v59, 0.0 }
 0x384   :  { %vm1687_vm3 = vcmp.eq.s32.totalorder %v8297_v0, %v8613_v52  ;;  %vm1881_vm4 = vcmp.eq.s32.totalorder %v8294_v42, %v8635_v11  ;;  %vm1883_vm8 = vcmp.eq.s32.totalorder %v8297_v0, %v8635_v11  ;;  %v1751_v22 = vsel %vm1685_vm2, %v8687_v56, 0.0 }
 0x385   :  { %v1619_v8 = vadd.f32 %v1555_v15, %v1423_v14  ;;  %v1621_v27 = vadd.f32 %v1557_v54, %v1425_v61  ;;  %v1753_v40 = vsel %vm1687_vm3, %v8687_v56, 0.0  ;;  %v1947_v29 = vsel %vm1881_vm4, %v8689_v62, 0.0 }
 0x386   :  { %vm2077_vm6 = vcmp.eq.s32.totalorder %v8294_v42, %v8637_v63  ;;  %vm2079_vm7 = vcmp.eq.s32.totalorder %v8297_v0, %v8637_v63  ;;  %vm2273_vm15 = vcmp.eq.s32.totalorder %v8294_v42, %v8639_v31  ;;  %v1949_v23 = vsel %vm1883_vm8, %v8689_v62, 0.0 }
 0x387   :  { %v1815_v34 = vadd.f32 %v1751_v22, %v1619_v8  ;;  %v1817_v41 = vadd.f32 %v1753_v40, %v1621_v27  ;;  %v2143_v46 = vsel %vm2077_vm6, %v8691_v35, 0.0  ;;  %v2145_v37 = vsel %vm2079_vm7, %v8691_v35, 0.0 }
 0x388   :  { %vm2275_vm0 = vcmp.eq.s32.totalorder %v8297_v0, %v8639_v31  ;;  %v8846_v55 = vadd.s32 64, %v8267_v12  ;;  %v8849_v28 = vadd.s32 72, %v8267_v12  ;;  %v2339_v3 = vsel %vm2273_vm15, %v8693_v24, 0.0 }
 0x389   :  { %v2011_v30 = vadd.f32 %v1947_v29, %v1815_v34  ;;  %v2013_v39 = vadd.f32 %v1949_v23, %v1817_v41  ;;  %v2341_v21 = vsel %vm2275_vm0, %v8693_v24, 0.0  ;;  %vm905_vm1 = vcmp.eq.s32.totalorder %v8348_v1, %v8601_v45 }
 0x38a   :  { %12762 = vst [vmem:[#allocation13_spill] sm:$0xff] %v8846_v55  ;;  %vm914_vm5 = vcmp.eq.s32.totalorder %v8846_v55, %v8269_v36  ;;  %vm916_vm9 = vcmp.eq.s32.totalorder %v8849_v28, %v8269_v36  ;;  %vm1110_vm10 = vcmp.eq.s32.totalorder %v8846_v55, %v8275_v2  ;;  %vm1112_vm14 = vcmp.eq.s32.totalorder %v8849_v28, %v8275_v2 }
 0x38b   :  { %12763 = vst [vmem:[#allocation14_spill] sm:$0xff] %v8849_v28  ;;  %v2207_v57 = vadd.f32 %v2143_v46, %v2011_v30  ;;  %v2209_v53 = vadd.f32 %v2145_v37, %v2013_v39  ;;  %v980_v32 = vsel %vm914_vm5, %v8359_v16, 0.0  ;;  %v982_v50 = vsel %vm916_vm9, %v8359_v16, 0.0 }
 0x38c   :  { %v1176_v14 = vsel %vm1110_vm10, %v8361_v9, 0.0  ;;  %v1178_v61 = vsel %vm1112_vm14, %v8361_v9, 0.0  ;;  %vm1306_vm11 = vcmp.eq.s32.totalorder %v8846_v55, %v8277_v49  ;;  %vm1308_vm12 = vcmp.eq.s32.totalorder %v8849_v28, %v8277_v49 }
 0x38d   :  { %2607 = vmatmul.bf16.gmra.mxu3 %v2470_v47  ;;  %v2403_v15 = vadd.f32 %v2339_v3, %v2207_v57  ;;  %v2405_v54 = vadd.f32 %v2341_v21, %v2209_v53  ;;  %v1240_v8 = vadd.f32 %v1176_v14, %v980_v32  ;;  %v1242_v27 = vadd.f32 %v1178_v61, %v982_v50  ;;  %v12764_v50 = vld [vmem:[#allocation10_spill] sm:$0xff] }
 0x38e   :  { %v1372_v22 = vsel %vm1306_vm11, %v8363_v20, 0.0  ;;  %v1374_v40 = vsel %vm1308_vm12, %v8363_v20, 0.0  ;;  %vm1502_vm13 = vcmp.eq.s32.totalorder %v8846_v55, %v8279_v48  ;;  %vm1504_vm2 = vcmp.eq.s32.totalorder %v8849_v28, %v8279_v48 }
 0x38f   :  { %v2465_v47 = vpack.c.bf16 %v2405_v54, %v2403_v15  ;;  %v1436_v29 = vadd.f32 %v1372_v22, %v1240_v8  ;;  %v1438_v34 = vadd.f32 %v1374_v40, %v1242_v27  ;;  %v1568_v41 = vsel %vm1502_vm13, %v8365_v18, 0.0 }
 0x390   :  { %v1570_v23 = vsel %vm1504_vm2, %v8365_v18, 0.0  ;;  %vm1698_vm3 = vcmp.eq.s32.totalorder %v8846_v55, %v8281_v7  ;;  %vm1700_vm4 = vcmp.eq.s32.totalorder %v8849_v28, %v8281_v7  ;;  %vm1894_vm8 = vcmp.eq.s32.totalorder %v8846_v55, %v8285_v58 }
 0x391   :  { %2508 = vmatmul.bf16.gmra.mxu2 %v2465_v47  ;;  %v1632_v46 = vadd.f32 %v1568_v41, %v1436_v29  ;;  %v1634_v37 = vadd.f32 %v1570_v23, %v1438_v34  ;;  %v1764_v44 = vsel %vm1698_vm3, %v8367_v10, 0.0  ;;  %v1766_v30 = vsel %vm1700_vm4, %v8367_v10, 0.0 }
 0x392   :  { %vm1896_vm6 = vcmp.eq.s32.totalorder %v8849_v28, %v8285_v58  ;;  %v1960_v39 = vsel %vm1894_vm8, %v8369_v19, 0.0  ;;  %vm2090_vm7 = vcmp.eq.s32.totalorder %v8846_v55, %v8287_v60  ;;  %vm2092_vm15 = vcmp.eq.s32.totalorder %v8849_v28, %v8287_v60 }
 0x393   :  { %v1828_v3 = vadd.f32 %v1764_v44, %v1632_v46  ;;  %v1830_v21 = vadd.f32 %v1766_v30, %v1634_v37  ;;  %v1962_v57 = vsel %vm1896_vm6, %v8369_v19, 0.0  ;;  %v2156_v53 = vsel %vm2090_vm7, %v8371_v17, 0.0 }
 0x394   :  { %v2158_v32 = vsel %vm2092_vm15, %v8371_v17, 0.0  ;;  %vm2286_vm0 = vcmp.eq.s32.totalorder %v8846_v55, %v8291_v51  ;;  %vm2288_vm5 = vcmp.eq.s32.totalorder %v8849_v28, %v8291_v51  ;;  %vm907_vm9 = vcmp.eq.s32.totalorder %v12764_v50, %v8601_v45 }
 0x395   :  { %v2024_v14 = vadd.f32 %v1960_v39, %v1828_v3  ;;  %v2026_v61 = vadd.f32 %v1962_v57, %v1830_v21  ;;  %v2352_v15 = vsel %vm2286_vm0, %v8373_v43, 0.0  ;;  %v2354_v54 = vsel %vm2288_vm5, %v8373_v43, 0.0 }
 0x396   :  { %v971_v8 = vsel %vm905_vm1, %v8679_v5, 0.0  ;;  %v973_v27 = vsel %vm907_vm9, %v8679_v5, 0.0  ;;  %vm1101_vm10 = vcmp.eq.s32.totalorder %v8348_v1, %v8603_v4  ;;  %vm1103_vm14 = vcmp.eq.s32.totalorder %v12764_v50, %v8603_v4 }
 0x397   :  { %v2220_v22 = vadd.f32 %v2156_v53, %v2024_v14  ;;  %v2222_v40 = vadd.f32 %v2158_v32, %v2026_v61  ;;  %v1167_v47 = vsel %vm1101_vm10, %v8681_v26, 0.0  ;;  %v1169_v29 = vsel %vm1103_vm14, %v8681_v26, 0.0 }
 0x398   :  { %v1231_v34 = vadd.f32 %v1167_v47, %v971_v8  ;;  %v1233_v41 = vadd.f32 %v1169_v29, %v973_v27  ;;  %vm1297_vm11 = vcmp.eq.s32.totalorder %v8348_v1, %v8605_v33  ;;  %vm1299_vm1 = vcmp.eq.s32.totalorder %v12764_v50, %v8605_v33 }
 0x399   :  { %v2416_v23 = vadd.f32 %v2352_v15, %v2220_v22  ;;  %v2418_v46 = vadd.f32 %v2354_v54, %v2222_v40  ;;  %v1363_v37 = vsel %vm1297_vm11, %v8683_v6, 0.0  ;;  %v1365_v44 = vsel %vm1299_vm1, %v8683_v6, 0.0 }
 0x39a   :  { %v1427_v30 = vadd.f32 %v1363_v37, %v1231_v34  ;;  %v1429_v39 = vadd.f32 %v1365_v44, %v1233_v41  ;;  %vm1493_vm12 = vcmp.eq.s32.totalorder %v8348_v1, %v8607_v38  ;;  %vm1495_vm13 = vcmp.eq.s32.totalorder %v12764_v50, %v8607_v38  ;;  %v7322_v41 = vld [vmem:[%s12648_s4 + $0xb0] sm:$0xff] }
 0x39b   :  { %v2472_v3 = vpack.c.bf16 %v2418_v46, %v2416_v23  ;;  %v1559_v21 = vsel %vm1493_vm12, %v8685_v59, 0.0  ;;  %v1561_v57 = vsel %vm1495_vm13, %v8685_v59, 0.0  ;;  %vm1689_vm2 = vcmp.eq.s32.totalorder %v8348_v1, %v8613_v52  ;;  %v7306_v23 = vld [vmem:[%s12648_s4 + $0x30] sm:$0xff]  ;;  %4490 = vmatpush.bf16.msra.mxu3 %v7322_v41 }
 0x39c   :  { %v1623_v53 = vadd.f32 %v1559_v21, %v1427_v30  ;;  %v1625_v32 = vadd.f32 %v1561_v57, %v1429_v39  ;;  %vm1691_vm3 = vcmp.eq.s32.totalorder %v12764_v50, %v8613_v52  ;;  %v1755_v14 = vsel %vm1689_vm2, %v8687_v56, 0.0  ;;  %4312 = vmatpush.bf16.msra.mxu1 %v7306_v23 }
 0x39d   :  { %2612 = vmatmul.bf16.gmra.mxu3 %v2472_v3  ;;  %v1757_v61 = vsel %vm1691_vm3, %v8687_v56, 0.0  ;;  %vm1885_vm4 = vcmp.eq.s32.totalorder %v8348_v1, %v8635_v11  ;;  %vm1887_vm8 = vcmp.eq.s32.totalorder %v12764_v50, %v8635_v11  ;;  %vm2081_vm6 = vcmp.eq.s32.totalorder %v8348_v1, %v8637_v63 }
 0x39e   :  { %v1819_v15 = vadd.f32 %v1755_v14, %v1623_v53  ;;  %v1821_v54 = vadd.f32 %v1757_v61, %v1625_v32  ;;  %v1951_v8 = vsel %vm1885_vm4, %v8689_v62, 0.0  ;;  %v1953_v27 = vsel %vm1887_vm8, %v8689_v62, 0.0 }
 0x39f   :  { %vm2083_vm7 = vcmp.eq.s32.totalorder %v12764_v50, %v8637_v63  ;;  %v2147_v22 = vsel %vm2081_vm6, %v8691_v35, 0.0  ;;  %vm2277_vm15 = vcmp.eq.s32.totalorder %v8348_v1, %v8639_v31  ;;  %vm2279_vm0 = vcmp.eq.s32.totalorder %v12764_v50, %v8639_v31 }
 0x3a0   :  { %v2015_v40 = vadd.f32 %v1951_v8, %v1819_v15  ;;  %v2017_v47 = vadd.f32 %v1953_v27, %v1821_v54  ;;  %v2149_v29 = vsel %vm2083_vm7, %v8691_v35, 0.0  ;;  %v2343_v34 = vsel %vm2277_vm15, %v8693_v24, 0.0 }
 0x3a1   :  { %v2345_v46 = vsel %vm2279_vm0, %v8693_v24, 0.0  ;;  %v8962_v37 = vadd.s32 80, %v8267_v12  ;;  %v8965_v44 = vadd.s32 88, %v8267_v12  ;;  %vm909_vm5 = vcmp.eq.s32.totalorder %v8354_v25, %v8601_v45 }
 0x3a2   :  { %v2211_v30 = vadd.f32 %v2147_v22, %v2015_v40  ;;  %v2213_v39 = vadd.f32 %v2149_v29, %v2017_v47  ;;  %vm911_vm9 = vcmp.eq.s32.totalorder %v8357_v13, %v8601_v45  ;;  %v975_v3 = vsel %vm909_vm5, %v8679_v5, 0.0 }
 0x3a3   :  { %12765 = vst [vmem:[#allocation15_spill] sm:$0xff] %v8962_v37  ;;  %vm918_vm10 = vcmp.eq.s32.totalorder %v8962_v37, %v8269_v36  ;;  %vm920_vm14 = vcmp.eq.s32.totalorder %v8965_v44, %v8269_v36  ;;  %vm1114_vm11 = vcmp.eq.s32.totalorder %v8962_v37, %v8275_v2  ;;  %vm1116_vm1 = vcmp.eq.s32.totalorder %v8965_v44, %v8275_v2 }
 0x3a4   :  { %12766 = vst [vmem:[#allocation16_spill] sm:$0xff] %v8965_v44  ;;  %v2407_v21 = vadd.f32 %v2343_v34, %v2211_v30  ;;  %v2409_v57 = vadd.f32 %v2345_v46, %v2213_v39  ;;  %v984_v53 = vsel %vm918_vm10, %v8359_v16, 0.0  ;;  %v986_v32 = vsel %vm920_vm14, %v8359_v16, 0.0 }
 0x3a5   :  { %v1180_v14 = vsel %vm1114_vm11, %v8361_v9, 0.0  ;;  %v1182_v61 = vsel %vm1116_vm1, %v8361_v9, 0.0  ;;  %vm1310_vm12 = vcmp.eq.s32.totalorder %v8962_v37, %v8277_v49  ;;  %vm1312_vm13 = vcmp.eq.s32.totalorder %v8965_v44, %v8277_v49 }
 0x3a6   :  { %v2467_v15 = vpack.c.bf16 %v2409_v57, %v2407_v21  ;;  %v1244_v54 = vadd.f32 %v1180_v14, %v984_v53  ;;  %v1246_v8 = vadd.f32 %v1182_v61, %v986_v32  ;;  %v1376_v27 = vsel %vm1310_vm12, %v8363_v20, 0.0 }
 0x3a7   :  { %v1378_v22 = vsel %vm1312_vm13, %v8363_v20, 0.0  ;;  %vm1506_vm2 = vcmp.eq.s32.totalorder %v8962_v37, %v8279_v48  ;;  %vm1508_vm3 = vcmp.eq.s32.totalorder %v8965_v44, %v8279_v48  ;;  %vm1702_vm4 = vcmp.eq.s32.totalorder %v8962_v37, %v8281_v7 }
 0x3a8   :  { %2513 = vmatmul.bf16.gmra.mxu2 %v2467_v15  ;;  %v1440_v40 = vadd.f32 %v1376_v27, %v1244_v54  ;;  %v1442_v47 = vadd.f32 %v1378_v22, %v1246_v8  ;;  %v1572_v29 = vsel %vm1506_vm2, %v8365_v18, 0.0  ;;  %v1574_v34 = vsel %vm1508_vm3, %v8365_v18, 0.0 }
 0x3a9   :  { %vm1704_vm8 = vcmp.eq.s32.totalorder %v8965_v44, %v8281_v7  ;;  %v1768_v41 = vsel %vm1702_vm4, %v8367_v10, 0.0  ;;  %vm1898_vm6 = vcmp.eq.s32.totalorder %v8962_v37, %v8285_v58  ;;  %vm1900_vm7 = vcmp.eq.s32.totalorder %v8965_v44, %v8285_v58 }
 0x3aa   :  { %v1636_v23 = vadd.f32 %v1572_v29, %v1440_v40  ;;  %v1638_v46 = vadd.f32 %v1574_v34, %v1442_v47  ;;  %v1770_v30 = vsel %vm1704_vm8, %v8367_v10, 0.0  ;;  %v1964_v39 = vsel %vm1898_vm6, %v8369_v19, 0.0 }
 0x3ab   :  { %v1966_v21 = vsel %vm1900_vm7, %v8369_v19, 0.0  ;;  %vm2094_vm15 = vcmp.eq.s32.totalorder %v8962_v37, %v8287_v60  ;;  %vm2096_vm0 = vcmp.eq.s32.totalorder %v8965_v44, %v8287_v60  ;;  %vm2290_vm5 = vcmp.eq.s32.totalorder %v8962_v37, %v8291_v51 }
 0x3ac   :  { %v1832_v57 = vadd.f32 %v1768_v41, %v1636_v23  ;;  %v1834_v53 = vadd.f32 %v1770_v30, %v1638_v46  ;;  %v2160_v32 = vsel %vm2094_vm15, %v8371_v17, 0.0  ;;  %v2162_v14 = vsel %vm2096_vm0, %v8371_v17, 0.0 }
 0x3ad   :  { %vm2292_vm10 = vcmp.eq.s32.totalorder %v8965_v44, %v8291_v51  ;;  %v2356_v61 = vsel %vm2290_vm5, %v8373_v43, 0.0  ;;  %v977_v15 = vsel %vm911_vm9, %v8679_v5, 0.0  ;;  %vm1105_vm14 = vcmp.eq.s32.totalorder %v8354_v25, %v8603_v4 }
 0x3ae   :  { %v2028_v54 = vadd.f32 %v1964_v39, %v1832_v57  ;;  %v2030_v8 = vadd.f32 %v1966_v21, %v1834_v53  ;;  %v2358_v27 = vsel %vm2292_vm10, %v8373_v43, 0.0  ;;  %vm1107_vm11 = vcmp.eq.s32.totalorder %v8357_v13, %v8603_v4 }
 0x3af   :  { %v1171_v22 = vsel %vm1105_vm14, %v8681_v26, 0.0  ;;  %v1173_v40 = vsel %vm1107_vm11, %v8681_v26, 0.0  ;;  %vm1301_vm1 = vcmp.eq.s32.totalorder %v8354_v25, %v8605_v33  ;;  %vm1303_vm9 = vcmp.eq.s32.totalorder %v8357_v13, %v8605_v33 }
 0x3b0   :  { %v2224_v47 = vadd.f32 %v2160_v32, %v2028_v54  ;;  %v2226_v29 = vadd.f32 %v2162_v14, %v2030_v8  ;;  %v1235_v34 = vadd.f32 %v1171_v22, %v975_v3  ;;  %v1237_v41 = vadd.f32 %v1173_v40, %v977_v15 }
 0x3b1   :  { %v1367_v23 = vsel %vm1301_vm1, %v8683_v6, 0.0  ;;  %v1369_v46 = vsel %vm1303_vm9, %v8683_v6, 0.0  ;;  %vm1497_vm12 = vcmp.eq.s32.totalorder %v8354_v25, %v8607_v38  ;;  %vm1499_vm13 = vcmp.eq.s32.totalorder %v8357_v13, %v8607_v38 }
 0x3b2   :  { %v2420_v30 = vadd.f32 %v2356_v61, %v2224_v47  ;;  %v2422_v39 = vadd.f32 %v2358_v27, %v2226_v29  ;;  %v1431_v21 = vadd.f32 %v1367_v23, %v1235_v34  ;;  %v1433_v57 = vadd.f32 %v1369_v46, %v1237_v41 }
 0x3b3   :  { %v1563_v53 = vsel %vm1497_vm12, %v8685_v59, 0.0  ;;  %v1565_v32 = vsel %vm1499_vm13, %v8685_v59, 0.0  ;;  %vm1693_vm2 = vcmp.eq.s32.totalorder %v8354_v25, %v8613_v52  ;;  %vm1695_vm3 = vcmp.eq.s32.totalorder %v8357_v13, %v8613_v52 }
 0x3b4   :  { %v2474_v3 = vpack.c.bf16 %v2422_v39, %v2420_v30  ;;  %v1627_v14 = vadd.f32 %v1563_v53, %v1431_v21  ;;  %v1629_v15 = vadd.f32 %v1565_v32, %v1433_v57  ;;  %v1759_v54 = vsel %vm1693_vm2, %v8687_v56, 0.0  ;;  %v7313_v21 = vld [vmem:[%s12648_s4 + $0x68] sm:$0xff] }
 0x3b5   :  { %v1761_v61 = vsel %vm1695_vm3, %v8687_v56, 0.0  ;;  %vm1889_vm4 = vcmp.eq.s32.totalorder %v8354_v25, %v8635_v11  ;;  %vm1891_vm8 = vcmp.eq.s32.totalorder %v8357_v13, %v8635_v11  ;;  %vm2085_vm6 = vcmp.eq.s32.totalorder %v8354_v25, %v8637_v63  ;;  %4402 = vmatpush.bf16.msra.mxu2 %v7313_v21 }
 0x3b6   :  { %2617 = vmatmul.bf16.gmra.mxu3 %v2474_v3  ;;  %v1823_v8 = vadd.f32 %v1759_v54, %v1627_v14  ;;  %v1825_v27 = vadd.f32 %v1761_v61, %v1629_v15  ;;  %v1955_v22 = vsel %vm1889_vm4, %v8689_v62, 0.0  ;;  %v1957_v40 = vsel %vm1891_vm8, %v8689_v62, 0.0 }
 0x3b7   :  { %vm2087_vm7 = vcmp.eq.s32.totalorder %v8357_v13, %v8637_v63  ;;  %v2151_v47 = vsel %vm2085_vm6, %v8691_v35, 0.0  ;;  %vm2281_vm15 = vcmp.eq.s32.totalorder %v8354_v25, %v8639_v31  ;;  %vm2283_vm0 = vcmp.eq.s32.totalorder %v8357_v13, %v8639_v31 }
 0x3b8   :  { %v2019_v29 = vadd.f32 %v1955_v22, %v1823_v8  ;;  %v2021_v34 = vadd.f32 %v1957_v40, %v1825_v27  ;;  %v2153_v41 = vsel %vm2087_vm7, %v8691_v35, 0.0  ;;  %v2347_v23 = vsel %vm2281_vm15, %v8693_v24, 0.0 }
 0x3b9   :  { %v2349_v46 = vsel %vm2283_vm0, %v8693_v24, 0.0  ;;  %v9067_v30 = vadd.s32 96, %v8267_v12  ;;  %v9070_v39 = vadd.s32 104, %v8267_v12  ;;  %vm913_vm5 = vcmp.eq.s32.totalorder %v8846_v55, %v8601_v45 }
 0x3ba   :  { %v2215_v57 = vadd.f32 %v2151_v47, %v2019_v29  ;;  %v2217_v53 = vadd.f32 %v2153_v41, %v2021_v34  ;;  %vm915_vm10 = vcmp.eq.s32.totalorder %v8849_v28, %v8601_v45  ;;  %v979_v32 = vsel %vm913_vm5, %v8679_v5, 0.0 }
 0x3bb   :  { %12767 = vst [vmem:[#allocation17_spill] sm:$0xff] %v9067_v30  ;;  %vm922_vm14 = vcmp.eq.s32.totalorder %v9067_v30, %v8269_v36  ;;  %vm924_vm11 = vcmp.eq.s32.totalorder %v9070_v39, %v8269_v36  ;;  %vm1118_vm1 = vcmp.eq.s32.totalorder %v9067_v30, %v8275_v2  ;;  %vm1120_vm9 = vcmp.eq.s32.totalorder %v9070_v39, %v8275_v2 }
 0x3bc   :  { %12768 = vst [vmem:[#allocation18_spill] sm:$0xff] %v9070_v39  ;;  %v2411_v3 = vadd.f32 %v2347_v23, %v2215_v57  ;;  %v2413_v14 = vadd.f32 %v2349_v46, %v2217_v53  ;;  %v988_v15 = vsel %vm922_vm14, %v8359_v16, 0.0  ;;  %v990_v54 = vsel %vm924_vm11, %v8359_v16, 0.0 }
 0x3bd   :  { %v1184_v61 = vsel %vm1118_vm1, %v8361_v9, 0.0  ;;  %v1186_v8 = vsel %vm1120_vm9, %v8361_v9, 0.0  ;;  %vm1314_vm12 = vcmp.eq.s32.totalorder %v9067_v30, %v8277_v49  ;;  %vm1316_vm13 = vcmp.eq.s32.totalorder %v9070_v39, %v8277_v49 }
 0x3be   :  { %v2469_v27 = vpack.c.bf16 %v2413_v14, %v2411_v3  ;;  %v1248_v22 = vadd.f32 %v1184_v61, %v988_v15  ;;  %v1250_v40 = vadd.f32 %v1186_v8, %v990_v54  ;;  %v1380_v47 = vsel %vm1314_vm12, %v8363_v20, 0.0 }
 0x3bf   :  { %v1382_v29 = vsel %vm1316_vm13, %v8363_v20, 0.0  ;;  %vm1510_vm2 = vcmp.eq.s32.totalorder %v9067_v30, %v8279_v48  ;;  %vm1512_vm3 = vcmp.eq.s32.totalorder %v9070_v39, %v8279_v48  ;;  %vm1706_vm4 = vcmp.eq.s32.totalorder %v9067_v30, %v8281_v7 }
 0x3c0   :  { %2518 = vmatmul.bf16.gmra.mxu2 %v2469_v27  ;;  %v1444_v34 = vadd.f32 %v1380_v47, %v1248_v22  ;;  %v1446_v41 = vadd.f32 %v1382_v29, %v1250_v40  ;;  %v1576_v23 = vsel %vm1510_vm2, %v8365_v18, 0.0  ;;  %v1578_v46 = vsel %vm1512_vm3, %v8365_v18, 0.0 }
 0x3c1   :  { %vm1708_vm8 = vcmp.eq.s32.totalorder %v9070_v39, %v8281_v7  ;;  %v1772_v21 = vsel %vm1706_vm4, %v8367_v10, 0.0  ;;  %vm1902_vm6 = vcmp.eq.s32.totalorder %v9067_v30, %v8285_v58  ;;  %vm1904_vm7 = vcmp.eq.s32.totalorder %v9070_v39, %v8285_v58 }
 0x3c2   :  { %v1640_v57 = vadd.f32 %v1576_v23, %v1444_v34  ;;  %v1642_v53 = vadd.f32 %v1578_v46, %v1446_v41  ;;  %v1774_v3 = vsel %vm1708_vm8, %v8367_v10, 0.0  ;;  %v1968_v14 = vsel %vm1902_vm6, %v8369_v19, 0.0 }
 0x3c3   :  { %v1970_v15 = vsel %vm1904_vm7, %v8369_v19, 0.0  ;;  %vm2098_vm15 = vcmp.eq.s32.totalorder %v9067_v30, %v8287_v60  ;;  %vm2100_vm0 = vcmp.eq.s32.totalorder %v9070_v39, %v8287_v60  ;;  %vm2294_vm5 = vcmp.eq.s32.totalorder %v9067_v30, %v8291_v51 }
 0x3c4   :  { %v1836_v54 = vadd.f32 %v1772_v21, %v1640_v57  ;;  %v1838_v61 = vadd.f32 %v1774_v3, %v1642_v53  ;;  %v2164_v8 = vsel %vm2098_vm15, %v8371_v17, 0.0  ;;  %v2166_v27 = vsel %vm2100_vm0, %v8371_v17, 0.0 }
 0x3c5   :  { %vm2296_vm14 = vcmp.eq.s32.totalorder %v9070_v39, %v8291_v51  ;;  %v2360_v22 = vsel %vm2294_vm5, %v8373_v43, 0.0  ;;  %v981_v40 = vsel %vm915_vm10, %v8679_v5, 0.0  ;;  %vm1109_vm11 = vcmp.eq.s32.totalorder %v8846_v55, %v8603_v4 }
 0x3c6   :  { %v2032_v47 = vadd.f32 %v1968_v14, %v1836_v54  ;;  %v2034_v29 = vadd.f32 %v1970_v15, %v1838_v61  ;;  %v2362_v34 = vsel %vm2296_vm14, %v8373_v43, 0.0  ;;  %vm1111_vm1 = vcmp.eq.s32.totalorder %v8849_v28, %v8603_v4 }
 0x3c7   :  { %v1175_v41 = vsel %vm1109_vm11, %v8681_v26, 0.0  ;;  %v1177_v23 = vsel %vm1111_vm1, %v8681_v26, 0.0  ;;  %vm1305_vm9 = vcmp.eq.s32.totalorder %v8846_v55, %v8605_v33  ;;  %vm1307_vm10 = vcmp.eq.s32.totalorder %v8849_v28, %v8605_v33 }
 0x3c8   :  { %v2228_v46 = vadd.f32 %v2164_v8, %v2032_v47  ;;  %v2230_v21 = vadd.f32 %v2166_v27, %v2034_v29  ;;  %v1239_v57 = vadd.f32 %v1175_v41, %v979_v32  ;;  %v1241_v53 = vadd.f32 %v1177_v23, %v981_v40  ;;  %v7299_v23 = vld [vmem:[%s12649_s5 + $0x58] sm:$0xf0] }
 0x3c9   :  { %v1371_v3 = vsel %vm1305_vm9, %v8683_v6, 0.0  ;;  %v1373_v14 = vsel %vm1307_vm10, %v8683_v6, 0.0  ;;  %vm1501_vm12 = vcmp.eq.s32.totalorder %v8846_v55, %v8607_v38  ;;  %vm1503_vm13 = vcmp.eq.s32.totalorder %v8849_v28, %v8607_v38 }
 0x3ca   :  { %v2424_v15 = vadd.f32 %v2360_v22, %v2228_v46  ;;  %v2426_v54 = vadd.f32 %v2362_v34, %v2230_v21  ;;  %v1435_v61 = vadd.f32 %v1371_v3, %v1239_v57  ;;  %v1437_v13 = vadd.f32 %v1373_v14, %v1241_v53 }
 0x3cb   :  { %v1567_v25 = vsel %vm1501_vm12, %v8685_v59, 0.0  ;;  %v1569_v8 = vsel %vm1503_vm13, %v8685_v59, 0.0  ;;  %vm1697_vm2 = vcmp.eq.s32.totalorder %v8846_v55, %v8613_v52  ;;  %vm1699_vm3 = vcmp.eq.s32.totalorder %v8849_v28, %v8613_v52 }
 0x3cc   :  { %v2476_v32 = vpack.c.bf16 %v2426_v54, %v2424_v15  ;;  %v1631_v27 = vadd.f32 %v1567_v25, %v1435_v61  ;;  %v1633_v40 = vadd.f32 %v1569_v8, %v1437_v13  ;;  %v1763_v47 = vsel %vm1697_vm2, %v8687_v56, 0.0  ;;  %v6388_v13 = vld [vmem:[%s12649_s5 + $0x40] sm:$0xf]  ;;  %v7321_v8 = vld [vmem:[%s12648_s4 + $0xa8] sm:$0xff] }
 0x3cd   :  { %v1765_v22 = vsel %vm1699_vm3, %v8687_v56, 0.0  ;;  %vm1893_vm4 = vcmp.eq.s32.totalorder %v8846_v55, %v8635_v11  ;;  %vm1895_vm8 = vcmp.eq.s32.totalorder %v8849_v28, %v8635_v11  ;;  %vm2089_vm6 = vcmp.eq.s32.totalorder %v8846_v55, %v8637_v63  ;;  %4491 = vmatpush.bf16.msra.mxu3 %v7321_v8 }
 0x3ce   :  { %2622 = vmatmul.bf16.gmra.mxu3 %v2476_v32  ;;  %v1827_v29 = vadd.f32 %v1763_v47, %v1631_v27  ;;  %v1829_v34 = vadd.f32 %v1765_v22, %v1633_v40  ;;  %v1959_v41 = vsel %vm1893_vm4, %v8689_v62, 0.0  ;;  %v1961_v25 = vsel %vm1895_vm8, %v8689_v62, 0.0  ;;  %v7305_v32 = vld [vmem:[%s12648_s4 + $0x28] sm:$0xff] }
 0x3cf   :  { %vm2091_vm7 = vcmp.eq.s32.totalorder %v8849_v28, %v8637_v63  ;;  %v2155_v46 = vsel %vm2089_vm6, %v8691_v35, 0.0  ;;  %vm2285_vm15 = vcmp.eq.s32.totalorder %v8846_v55, %v8639_v31  ;;  %vm2287_vm0 = vcmp.eq.s32.totalorder %v8849_v28, %v8639_v31  ;;  %4313 = vmatpush.bf16.msra.mxu1 %v7305_v32 }
 0x3d0   :  { %v2023_v21 = vadd.f32 %v1959_v41, %v1827_v29  ;;  %v2025_v57 = vadd.f32 %v1961_v25, %v1829_v34  ;;  %v2157_v53 = vsel %vm2091_vm7, %v8691_v35, 0.0  ;;  %v2351_v3 = vsel %vm2285_vm15, %v8693_v24, 0.0 }
 0x3d1   :  { %v2353_v14 = vsel %vm2287_vm0, %v8693_v24, 0.0  ;;  %v6389_v15 = vor.u32 %v7299_v23, %v6388_v13  ;;  %v9181_v54 = vadd.s32 112, %v8267_v12  ;;  %v9184_v61 = vadd.s32 120, %v8267_v12 }
 0x3d2   :  { %v2219_v27 = vadd.f32 %v2155_v46, %v2023_v21  ;;  %v2221_v40 = vadd.f32 %v2157_v53, %v2025_v57  ;;  %vm917_vm5 = vcmp.eq.s32.totalorder %v8962_v37, %v8601_v45  ;;  %vm919_vm14 = vcmp.eq.s32.totalorder %v8965_v44, %v8601_v45 }
 0x3d3   :  { %12769 = vst [vmem:[#allocation19_spill] sm:$0xff] %v9181_v54  ;;  %2763 = vmatpush.bf16.msrb.mxu0 %v6389_v15  ;;  %vm926_vm11 = vcmp.eq.s32.totalorder %v9181_v54, %v8269_v36  ;;  %vm928_vm1 = vcmp.eq.s32.totalorder %v9184_v61, %v8269_v36  ;;  %vm1122_vm9 = vcmp.eq.s32.totalorder %v9181_v54, %v8275_v2 }
 0x3d4   :  { %12770 = vst [vmem:[#allocation20_spill] sm:$0xff] %v9184_v61  ;;  %vm1124_vm10 = vcmp.eq.s32.totalorder %v9184_v61, %v8275_v2  ;;  %v2415_v47 = vadd.f32 %v2351_v3, %v2219_v27  ;;  %v2417_v22 = vadd.f32 %v2353_v14, %v2221_v40  ;;  %v992_v29 = vsel %vm926_vm11, %v8359_v16, 0.0 }
 0x3d5   :  { %v994_v34 = vsel %vm928_vm1, %v8359_v16, 0.0  ;;  %v1188_v41 = vsel %vm1122_vm9, %v8361_v9, 0.0  ;;  %v1190_v25 = vsel %vm1124_vm10, %v8361_v9, 0.0  ;;  %vm1318_vm12 = vcmp.eq.s32.totalorder %v9181_v54, %v8277_v49 }
 0x3d6   :  { %vm1320_vm13 = vcmp.eq.s32.totalorder %v9184_v61, %v8277_v49  ;;  %v2471_v13 = vpack.c.bf16 %v2417_v22, %v2415_v47  ;;  %v1252_v23 = vadd.f32 %v1188_v41, %v992_v29  ;;  %v1254_v46 = vadd.f32 %v1190_v25, %v994_v34 }
 0x3d7   :  { %v1384_v21 = vsel %vm1318_vm12, %v8363_v20, 0.0  ;;  %v1386_v57 = vsel %vm1320_vm13, %v8363_v20, 0.0  ;;  %vm1514_vm2 = vcmp.eq.s32.totalorder %v9181_v54, %v8279_v48  ;;  %vm1516_vm3 = vcmp.eq.s32.totalorder %v9184_v61, %v8279_v48 }
 0x3d8   :  { %vm1710_vm4 = vcmp.eq.s32.totalorder %v9181_v54, %v8281_v7  ;;  %2523 = vmatmul.bf16.gmra.mxu2 %v2471_v13  ;;  %v1448_v53 = vadd.f32 %v1384_v21, %v1252_v23  ;;  %v1450_v3 = vadd.f32 %v1386_v57, %v1254_v46  ;;  %v1580_v14 = vsel %vm1514_vm2, %v8365_v18, 0.0 }
 0x3d9   :  { %v1582_v15 = vsel %vm1516_vm3, %v8365_v18, 0.0  ;;  %vm1712_vm8 = vcmp.eq.s32.totalorder %v9184_v61, %v8281_v7  ;;  %v1776_v8 = vsel %vm1710_vm4, %v8367_v10, 0.0  ;;  %vm1906_vm6 = vcmp.eq.s32.totalorder %v9181_v54, %v8285_v58 }
 0x3da   :  { %vm1908_vm7 = vcmp.eq.s32.totalorder %v9184_v61, %v8285_v58  ;;  %v1644_v32 = vadd.f32 %v1580_v14, %v1448_v53  ;;  %v1646_v27 = vadd.f32 %v1582_v15, %v1450_v3  ;;  %v1778_v40 = vsel %vm1712_vm8, %v8367_v10, 0.0 }
 0x3db   :  { %v1972_v47 = vsel %vm1906_vm6, %v8369_v19, 0.0  ;;  %v1974_v22 = vsel %vm1908_vm7, %v8369_v19, 0.0  ;;  %vm2102_vm15 = vcmp.eq.s32.totalorder %v9181_v54, %v8287_v60  ;;  %vm2104_vm0 = vcmp.eq.s32.totalorder %v9184_v61, %v8287_v60 }
 0x3dc   :  { %vm2298_vm11 = vcmp.eq.s32.totalorder %v9181_v54, %v8291_v51  ;;  %v1840_v29 = vadd.f32 %v1776_v8, %v1644_v32  ;;  %v1842_v34 = vadd.f32 %v1778_v40, %v1646_v27  ;;  %v2168_v41 = vsel %vm2102_vm15, %v8371_v17, 0.0 }
 0x3dd   :  { %v2170_v25 = vsel %vm2104_vm0, %v8371_v17, 0.0  ;;  %vm2300_vm1 = vcmp.eq.s32.totalorder %v9184_v61, %v8291_v51  ;;  %v2364_v13 = vsel %vm2298_vm11, %v8373_v43, 0.0  ;;  %v983_v23 = vsel %vm917_vm5, %v8679_v5, 0.0 }
 0x3de   :  { %v985_v46 = vsel %vm919_vm14, %v8679_v5, 0.0  ;;  %v2036_v21 = vadd.f32 %v1972_v47, %v1840_v29  ;;  %v2038_v57 = vadd.f32 %v1974_v22, %v1842_v34  ;;  %v2366_v53 = vsel %vm2300_vm1, %v8373_v43, 0.0 }
 0x3df   :  { %vm1113_vm9 = vcmp.eq.s32.totalorder %v8962_v37, %v8603_v4  ;;  %vm1115_vm10 = vcmp.eq.s32.totalorder %v8965_v44, %v8603_v4  ;;  %vm1309_vm5 = vcmp.eq.s32.totalorder %v8962_v37, %v8605_v33  ;;  %vm1311_vm12 = vcmp.eq.s32.totalorder %v8965_v44, %v8605_v33 }
 0x3e0   :  { %v1179_v3 = vsel %vm1113_vm9, %v8681_v26, 0.0  ;;  %v2232_v14 = vadd.f32 %v2168_v41, %v2036_v21  ;;  %v2234_v15 = vadd.f32 %v2170_v25, %v2038_v57  ;;  %v1181_v8 = vsel %vm1115_vm10, %v8681_v26, 0.0 }
 0x3e1   :  { %v1243_v32 = vadd.f32 %v1179_v3, %v983_v23  ;;  %v1245_v27 = vadd.f32 %v1181_v8, %v985_v46  ;;  %v1375_v40 = vsel %vm1309_vm5, %v8683_v6, 0.0  ;;  %v1377_v47 = vsel %vm1311_vm12, %v8683_v6, 0.0 }
 0x3e2   :  { %vm1505_vm14 = vcmp.eq.s32.totalorder %v8962_v37, %v8607_v38  ;;  %v2428_v22 = vadd.f32 %v2364_v13, %v2232_v14  ;;  %v2430_v29 = vadd.f32 %v2366_v53, %v2234_v15  ;;  %vm1507_vm13 = vcmp.eq.s32.totalorder %v8965_v44, %v8607_v38 }
 0x3e3   :  { %v1439_v34 = vadd.f32 %v1375_v40, %v1243_v32  ;;  %v1441_v28 = vadd.f32 %v1377_v47, %v1245_v27  ;;  %v1571_v41 = vsel %vm1505_vm14, %v8685_v59, 0.0  ;;  %vm1701_vm2 = vcmp.eq.s32.totalorder %v8962_v37, %v8613_v52 }
 0x3e4   :  { %v2478_v25 = vpack.c.bf16 %v2430_v29, %v2428_v22  ;;  %v1573_v23 = vsel %vm1507_vm13, %v8685_v59, 0.0  ;;  %vm1703_vm3 = vcmp.eq.s32.totalorder %v8965_v44, %v8613_v52  ;;  %v1767_v13 = vsel %vm1701_vm2, %v8687_v56, 0.0  ;;  %v7312_v29 = vld [vmem:[%s12648_s4 + $0x60] sm:$0xff] }
 0x3e5   :  { %v1635_v46 = vadd.f32 %v1571_v41, %v1439_v34  ;;  %v1637_v21 = vadd.f32 %v1573_v23, %v1441_v28  ;;  %vm1897_vm4 = vcmp.eq.s32.totalorder %v8962_v37, %v8635_v11  ;;  %vm1899_vm8 = vcmp.eq.s32.totalorder %v8965_v44, %v8635_v11  ;;  %4403 = vmatpush.bf16.msra.mxu2 %v7312_v29 }
 0x3e6   :  { %2627 = vmatmul.bf16.gmra.mxu3 %v2478_v25  ;;  %v1769_v57 = vsel %vm1703_vm3, %v8687_v56, 0.0  ;;  %v1963_v3 = vsel %vm1897_vm4, %v8689_v62, 0.0  ;;  %vm2093_vm6 = vcmp.eq.s32.totalorder %v8962_v37, %v8637_v63  ;;  %v1965_v28 = vsel %vm1899_vm8, %v8689_v62, 0.0 }
 0x3e7   :  { %v1831_v53 = vadd.f32 %v1767_v13, %v1635_v46  ;;  %v1833_v14 = vadd.f32 %v1769_v57, %v1637_v21  ;;  %vm2095_vm7 = vcmp.eq.s32.totalorder %v8965_v44, %v8637_v63  ;;  %vm2289_vm15 = vcmp.eq.s32.totalorder %v8962_v37, %v8639_v31 }
 0x3e8   :  { %v2159_v8 = vsel %vm2093_vm6, %v8691_v35, 0.0  ;;  %v2161_v32 = vsel %vm2095_vm7, %v8691_v35, 0.0  ;;  %vm2291_vm0 = vcmp.eq.s32.totalorder %v8965_v44, %v8639_v31  ;;  %v2355_v40 = vsel %vm2289_vm15, %v8693_v24, 0.0 }
 0x3e9   :  { %v2027_v15 = vadd.f32 %v1963_v3, %v1831_v53  ;;  %v2029_v27 = vadd.f32 %v1965_v28, %v1833_v14  ;;  %v9294_v47 = vadd.s32 128, %v8267_v12  ;;  %v9297_v22 = vadd.s32 136, %v8267_v12 }
 0x3ea   :  { %v2357_v41 = vsel %vm2291_vm0, %v8693_v24, 0.0  ;;  %vm921_vm11 = vcmp.eq.s32.totalorder %v9067_v30, %v8601_v45  ;;  %vm923_vm1 = vcmp.eq.s32.totalorder %v9070_v39, %v8601_v45  ;;  %vm1117_vm14 = vcmp.eq.s32.totalorder %v9067_v30, %v8603_v4 }
 0x3eb   :  { %12771 = vst [vmem:[#allocation21_spill] sm:$0xff] %v9294_v47  ;;  %v2223_v34 = vadd.f32 %v2159_v8, %v2027_v15  ;;  %v2225_v25 = vadd.f32 %v2161_v32, %v2029_v27  ;;  %vm930_vm9 = vcmp.eq.s32.totalorder %v9294_v47, %v8269_v36  ;;  %vm932_vm10 = vcmp.eq.s32.totalorder %v9297_v22, %v8269_v36 }
 0x3ec   :  { %12772 = vst [vmem:[#allocation22_spill] sm:$0xff] %v9297_v22  ;;  %vm1126_vm5 = vcmp.eq.s32.totalorder %v9294_v47, %v8275_v2  ;;  %v996_v46 = vsel %vm930_vm9, %v8359_v16, 0.0  ;;  %v998_v21 = vsel %vm932_vm10, %v8359_v16, 0.0  ;;  %vm1128_vm12 = vcmp.eq.s32.totalorder %v9297_v22, %v8275_v2 }
 0x3ed   :  { %v2419_v23 = vadd.f32 %v2355_v40, %v2223_v34  ;;  %v2421_v13 = vadd.f32 %v2357_v41, %v2225_v25  ;;  %v1192_v57 = vsel %vm1126_vm5, %v8361_v9, 0.0  ;;  %v1194_v53 = vsel %vm1128_vm12, %v8361_v9, 0.0 }
 0x3ee   :  { %vm1322_vm13 = vcmp.eq.s32.totalorder %v9294_v47, %v8277_v49  ;;  %v1256_v3 = vadd.f32 %v1192_v57, %v996_v46  ;;  %v1258_v14 = vadd.f32 %v1194_v53, %v998_v21  ;;  %vm1324_vm2 = vcmp.eq.s32.totalorder %v9297_v22, %v8277_v49 }
 0x3ef   :  { %v1388_v28 = vsel %vm1322_vm13, %v8363_v20, 0.0  ;;  %v2473_v15 = vpack.c.bf16 %v2421_v13, %v2419_v23  ;;  %v1390_v8 = vsel %vm1324_vm2, %v8363_v20, 0.0  ;;  %vm1518_vm3 = vcmp.eq.s32.totalorder %v9294_v47, %v8279_v48 }
 0x3f0   :  { %vm1520_vm4 = vcmp.eq.s32.totalorder %v9297_v22, %v8279_v48  ;;  %v1452_v32 = vadd.f32 %v1388_v28, %v1256_v3  ;;  %v1454_v27 = vadd.f32 %v1390_v8, %v1258_v14  ;;  %v1584_v40 = vsel %vm1518_vm3, %v8365_v18, 0.0 }
 0x3f1   :  { %v1586_v29 = vsel %vm1520_vm4, %v8365_v18, 0.0  ;;  %2528 = vmatmul.bf16.gmra.mxu2 %v2473_v15  ;;  %vm1714_vm8 = vcmp.eq.s32.totalorder %v9294_v47, %v8281_v7  ;;  %vm1716_vm6 = vcmp.eq.s32.totalorder %v9297_v22, %v8281_v7  ;;  %vm1910_vm7 = vcmp.eq.s32.totalorder %v9294_v47, %v8285_v58 }
 0x3f2   :  { %vm1912_vm15 = vcmp.eq.s32.totalorder %v9297_v22, %v8285_v58  ;;  %v1648_v34 = vadd.f32 %v1584_v40, %v1452_v32  ;;  %v1650_v41 = vadd.f32 %v1586_v29, %v1454_v27  ;;  %v1780_v25 = vsel %vm1714_vm8, %v8367_v10, 0.0 }
 0x3f3   :  { %v1782_v23 = vsel %vm1716_vm6, %v8367_v10, 0.0  ;;  %v1976_v46 = vsel %vm1910_vm7, %v8369_v19, 0.0  ;;  %v1978_v21 = vsel %vm1912_vm15, %v8369_v19, 0.0  ;;  %vm2106_vm0 = vcmp.eq.s32.totalorder %v9294_v47, %v8287_v60 }
 0x3f4   :  { %vm2108_vm9 = vcmp.eq.s32.totalorder %v9297_v22, %v8287_v60  ;;  %v1844_v13 = vadd.f32 %v1780_v25, %v1648_v34  ;;  %v1846_v57 = vadd.f32 %v1782_v23, %v1650_v41  ;;  %v2172_v53 = vsel %vm2106_vm0, %v8371_v17, 0.0 }
 0x3f5   :  { %v2174_v3 = vsel %vm2108_vm9, %v8371_v17, 0.0  ;;  %vm2302_vm10 = vcmp.eq.s32.totalorder %v9294_v47, %v8291_v51  ;;  %vm2304_vm5 = vcmp.eq.s32.totalorder %v9297_v22, %v8291_v51  ;;  %v987_v14 = vsel %vm921_vm11, %v8679_v5, 0.0 }
 0x3f6   :  { %v989_v28 = vsel %vm923_vm1, %v8679_v5, 0.0  ;;  %v2040_v15 = vadd.f32 %v1976_v46, %v1844_v13  ;;  %v2042_v8 = vadd.f32 %v1978_v21, %v1846_v57  ;;  %v2368_v32 = vsel %vm2302_vm10, %v8373_v43, 0.0 }
 0x3f7   :  { %v2370_v27 = vsel %vm2304_vm5, %v8373_v43, 0.0  ;;  %vm1119_vm12 = vcmp.eq.s32.totalorder %v9070_v39, %v8603_v4  ;;  %v1183_v40 = vsel %vm1117_vm14, %v8681_v26, 0.0  ;;  %vm1313_vm11 = vcmp.eq.s32.totalorder %v9067_v30, %v8605_v33 }
 0x3f8   :  { %vm1315_vm1 = vcmp.eq.s32.totalorder %v9070_v39, %v8605_v33  ;;  %v2236_v29 = vadd.f32 %v2172_v53, %v2040_v15  ;;  %v2238_v34 = vadd.f32 %v2174_v3, %v2042_v8  ;;  %v1185_v41 = vsel %vm1119_vm12, %v8681_v26, 0.0 }
 0x3f9   :  { %v1247_v25 = vadd.f32 %v1183_v40, %v987_v14  ;;  %v1249_v23 = vadd.f32 %v1185_v41, %v989_v28  ;;  %v1379_v46 = vsel %vm1313_vm11, %v8683_v6, 0.0  ;;  %v1381_v21 = vsel %vm1315_vm1, %v8683_v6, 0.0 }
 0x3fa   :  { %vm1509_vm13 = vcmp.eq.s32.totalorder %v9067_v30, %v8607_v38  ;;  %v2432_v13 = vadd.f32 %v2368_v32, %v2236_v29  ;;  %v2434_v57 = vadd.f32 %v2370_v27, %v2238_v34  ;;  %vm1511_vm14 = vcmp.eq.s32.totalorder %v9070_v39, %v8607_v38  ;;  %v7298_v29 = vld [vmem:[%s12649_s5 + $0x20] sm:$0xf0] }
 0x3fb   :  { %v1443_v44 = vadd.f32 %v1379_v46, %v1247_v25  ;;  %v1445_v37 = vadd.f32 %v1381_v21, %v1249_v23  ;;  %v1575_v53 = vsel %vm1509_vm13, %v8685_v59, 0.0  ;;  %v1577_v3 = vsel %vm1511_vm14, %v8685_v59, 0.0 }
 0x3fc   :  { %vm1705_vm2 = vcmp.eq.s32.totalorder %v9067_v30, %v8613_v52  ;;  %v2480_v14 = vpack.c.bf16 %v2434_v57, %v2432_v13  ;;  %vm1707_vm3 = vcmp.eq.s32.totalorder %v9070_v39, %v8613_v52  ;;  %vm1901_vm4 = vcmp.eq.s32.totalorder %v9067_v30, %v8635_v11 }
 0x3fd   :  { %v1639_v28 = vadd.f32 %v1575_v53, %v1443_v44  ;;  %v1771_v15 = vsel %vm1705_vm2, %v8687_v56, 0.0  ;;  %v1641_v8 = vadd.f32 %v1577_v3, %v1445_v37  ;;  %v1773_v32 = vsel %vm1707_vm3, %v8687_v56, 0.0  ;;  %v6384_v37 = vld [vmem:[%s12649_s5 + $0x8] sm:$0xf]  ;;  %v7320_v3 = vld [vmem:[%s12648_s4 + $0xa0] sm:$0xff] }
 0x3fe   :  { %vm1903_vm8 = vcmp.eq.s32.totalorder %v9070_v39, %v8635_v11  ;;  %2632 = vmatmul.bf16.gmra.mxu3 %v2480_v14  ;;  %v1967_v40 = vsel %vm1901_vm4, %v8689_v62, 0.0  ;;  %vm2097_vm6 = vcmp.eq.s32.totalorder %v9067_v30, %v8637_v63  ;;  %vm2099_vm7 = vcmp.eq.s32.totalorder %v9070_v39, %v8637_v63  ;;  %v7304_v14 = vld [vmem:[%s12648_s4 + $0x20] sm:$0xff] }
 0x3ff   :  { %v1835_v27 = vadd.f32 %v1771_v15, %v1639_v28  ;;  %v1969_v44 = vsel %vm1903_vm8, %v8689_v62, 0.0  ;;  %v1837_v34 = vadd.f32 %v1773_v32, %v1641_v8  ;;  %v2163_v41 = vsel %vm2097_vm6, %v8691_v35, 0.0  ;;  %v9436_v32 = vpop.f32.mrf.mxu3  ;;  %4492 = vmatpush.bf16.msra.mxu3 %v7320_v3  ;;  %4314 = vmatpush.bf16.msra.mxu1 %v7304_v14 }
 0x400   :  { %vm2293_vm15 = vcmp.eq.s32.totalorder %v9067_v30, %v8639_v31  ;;  %v2165_v23 = vsel %vm2099_vm7, %v8691_v35, 0.0  ;;  %vm2295_vm0 = vcmp.eq.s32.totalorder %v9070_v39, %v8639_v31  ;;  %v6385_v57 = vor.u32 %v7298_v29, %v6384_v37 }
 0x401   :  { %v2031_v25 = vadd.f32 %v1967_v40, %v1835_v27  ;;  %v2359_v46 = vsel %vm2293_vm15, %v8693_v24, 0.0  ;;  %v2033_v21 = vadd.f32 %v1969_v44, %v1837_v34  ;;  %v2361_v13 = vsel %vm2295_vm0, %v8693_v24, 0.0 }
 0x402   :  { %v9415_v53 = vadd.s32 144, %v8267_v12  ;;  %v9424_v15 = vadd.s32 152, %v8267_v12  ;;  %vm925_vm9 = vcmp.eq.s32.totalorder %v9181_v54, %v8601_v45  ;;  %vm927_vm10 = vcmp.eq.s32.totalorder %v9184_v61, %v8601_v45  ;;  %2764 = vmatpush.bf16.msrb.mxu0 %v6385_v57 }
 0x403   :  { %v2227_v28 = vadd.f32 %v2163_v41, %v2031_v25  ;;  %v2229_v8 = vadd.f32 %v2165_v23, %v2033_v21 }
 0x404   :  { %12773 = vst [vmem:[#allocation23_spill] sm:$0xff] %v9415_v53  ;;  %vm934_vm5 = vcmp.eq.s32.totalorder %v9415_v53, %v8269_v36  ;;  %vm1130_vm12 = vcmp.eq.s32.totalorder %v9415_v53, %v8275_v2  ;;  %vm1326_vm11 = vcmp.eq.s32.totalorder %v9415_v53, %v8277_v49  ;;  %vm936_vm1 = vcmp.eq.s32.totalorder %v9424_v15, %v8269_v36 }
 0x405   :  { %12774 = vst [vmem:[#allocation24_spill] sm:$0xff] %v9424_v15  ;;  %v2423_v27 = vadd.f32 %v2359_v46, %v2227_v28  ;;  %v1000_v40 = vsel %vm934_vm5, %v8359_v16, 0.0  ;;  %vm1132_vm13 = vcmp.eq.s32.totalorder %v9424_v15, %v8275_v2  ;;  %v2425_v44 = vadd.f32 %v2361_v13, %v2229_v8 }
 0x406   :  { %v1002_v37 = vsel %vm936_vm1, %v8359_v16, 0.0  ;;  %v1196_v29 = vsel %vm1130_vm12, %v8361_v9, 0.0  ;;  %v1198_v34 = vsel %vm1132_vm13, %v8361_v9, 0.0  ;;  %vm1328_vm14 = vcmp.eq.s32.totalorder %v9424_v15, %v8277_v49 }
 0x407   :  { %v1260_v41 = vadd.f32 %v1196_v29, %v1000_v40  ;;  %v1262_v25 = vadd.f32 %v1198_v34, %v1002_v37  ;;  %v1392_v23 = vsel %vm1326_vm11, %v8363_v20, 0.0  ;;  %v2475_v46 = vpack.c.bf16 %v2425_v44, %v2423_v27 }
 0x408   :  { %v1394_v21 = vsel %vm1328_vm14, %v8363_v20, 0.0  ;;  %vm1522_vm2 = vcmp.eq.s32.totalorder %v9415_v53, %v8279_v48  ;;  %vm1524_vm3 = vcmp.eq.s32.totalorder %v9424_v15, %v8279_v48  ;;  %vm1718_vm4 = vcmp.eq.s32.totalorder %v9415_v53, %v8281_v7 }
 0x409   :  { %v1456_v13 = vadd.f32 %v1392_v23, %v1260_v41  ;;  %v1458_v57 = vadd.f32 %v1394_v21, %v1262_v25  ;;  %v1588_v3 = vsel %vm1522_vm2, %v8365_v18, 0.0  ;;  %v1590_v14 = vsel %vm1524_vm3, %v8365_v18, 0.0  ;;  %2533 = vmatmul.bf16.gmra.mxu2 %v2475_v46  ;;  %v9486_v21 = vpop.f32.mrf.mxu3 }
 0x40a   :  { %vm1720_vm8 = vcmp.eq.s32.totalorder %v9424_v15, %v8281_v7  ;;  %vm1914_vm6 = vcmp.eq.s32.totalorder %v9415_v53, %v8285_v58  ;;  %vm1916_vm7 = vcmp.eq.s32.totalorder %v9424_v15, %v8285_v58  ;;  %v1784_v27 = vsel %vm1718_vm4, %v8367_v10, 0.0 }
 0x40b   :  { %v1652_v28 = vadd.f32 %v1588_v3, %v1456_v13  ;;  %v1654_v8 = vadd.f32 %v1590_v14, %v1458_v57  ;;  %v1786_v40 = vsel %vm1720_vm8, %v8367_v10, 0.0  ;;  %v1980_v44 = vsel %vm1914_vm6, %v8369_v19, 0.0 }
 0x40c   :  { %v1982_v37 = vsel %vm1916_vm7, %v8369_v19, 0.0  ;;  %vm2110_vm15 = vcmp.eq.s32.totalorder %v9415_v53, %v8287_v60  ;;  %vm2112_vm0 = vcmp.eq.s32.totalorder %v9424_v15, %v8287_v60  ;;  %vm2306_vm5 = vcmp.eq.s32.totalorder %v9415_v53, %v8291_v51 }
 0x40d   :  { %v1848_v29 = vadd.f32 %v1784_v27, %v1652_v28  ;;  %v1850_v34 = vadd.f32 %v1786_v40, %v1654_v8  ;;  %v2176_v41 = vsel %vm2110_vm15, %v8371_v17, 0.0  ;;  %v2178_v25 = vsel %vm2112_vm0, %v8371_v17, 0.0 }
 0x40e   :  { %vm2308_vm12 = vcmp.eq.s32.totalorder %v9424_v15, %v8291_v51  ;;  %v991_v23 = vsel %vm925_vm9, %v8679_v5, 0.0  ;;  %v993_v46 = vsel %vm927_vm10, %v8679_v5, 0.0  ;;  %v2372_v3 = vsel %vm2306_vm5, %v8373_v43, 0.0 }
 0x40f   :  { %v2044_v13 = vadd.f32 %v1980_v44, %v1848_v29  ;;  %v2046_v57 = vadd.f32 %v1982_v37, %v1850_v34  ;;  %v2374_v14 = vsel %vm2308_vm12, %v8373_v43, 0.0  ;;  %vm1121_vm11 = vcmp.eq.s32.totalorder %v9181_v54, %v8603_v4 }
 0x410   :  { %vm1123_vm1 = vcmp.eq.s32.totalorder %v9184_v61, %v8603_v4  ;;  %vm1317_vm9 = vcmp.eq.s32.totalorder %v9181_v54, %v8605_v33  ;;  %vm1319_vm10 = vcmp.eq.s32.totalorder %v9184_v61, %v8605_v33  ;;  %v1187_v27 = vsel %vm1121_vm11, %v8681_v26, 0.0 }
 0x411   :  { %v2240_v28 = vadd.f32 %v2176_v41, %v2044_v13  ;;  %v2242_v8 = vadd.f32 %v2178_v25, %v2046_v57  ;;  %v1189_v40 = vsel %vm1123_vm1, %v8681_v26, 0.0  ;;  %v1251_v44 = vadd.f32 %v1187_v27, %v991_v23 }
 0x412   :  { %v1253_v37 = vadd.f32 %v1189_v40, %v993_v46  ;;  %v1383_v29 = vsel %vm1317_vm9, %v8683_v6, 0.0  ;;  %v1385_v34 = vsel %vm1319_vm10, %v8683_v6, 0.0  ;;  %vm1513_vm13 = vcmp.eq.s32.totalorder %v9181_v54, %v8607_v38 }
 0x413   :  { %v2436_v39 = vadd.f32 %v2372_v3, %v2240_v28  ;;  %v2438_v30 = vadd.f32 %v2374_v14, %v2242_v8  ;;  %vm1515_vm14 = vcmp.eq.s32.totalorder %v9184_v61, %v8607_v38  ;;  %v1447_v41 = vadd.f32 %v1383_v29, %v1251_v44  ;;  %v9525_v44 = vpop.f32.mrf.mxu3 }
 0x414   :  { %v1449_v25 = vadd.f32 %v1385_v34, %v1253_v37  ;;  %v1579_v13 = vsel %vm1513_vm13, %v8685_v59, 0.0  ;;  %v1581_v57 = vsel %vm1515_vm14, %v8685_v59, 0.0  ;;  %vm1709_vm2 = vcmp.eq.s32.totalorder %v9181_v54, %v8613_v52 }
 0x415   :  { %v2482_v23 = vpack.c.bf16 %v2438_v30, %v2436_v39  ;;  %vm1711_vm3 = vcmp.eq.s32.totalorder %v9184_v61, %v8613_v52  ;;  %vm1905_vm4 = vcmp.eq.s32.totalorder %v9181_v54, %v8635_v11  ;;  %v1643_v46 = vadd.f32 %v1579_v13, %v1447_v41 }
 0x416   :  { %v1645_v3 = vadd.f32 %v1581_v57, %v1449_v25  ;;  %v1775_v14 = vsel %vm1709_vm2, %v8687_v56, 0.0  ;;  %v1777_v28 = vsel %vm1711_vm3, %v8687_v56, 0.0  ;;  %vm1907_vm8 = vcmp.eq.s32.totalorder %v9184_v61, %v8635_v11  ;;  %v7311_v57 = vld [vmem:[%s12648_s4 + $0x58] sm:$0xff] }
 0x417   :  { %2637 = vmatmul.bf16.gmra.mxu3 %v2482_v23  ;;  %v1971_v30 = vsel %vm1905_vm4, %v8689_v62, 0.0  ;;  %vm2101_vm6 = vcmp.eq.s32.totalorder %v9181_v54, %v8637_v63  ;;  %vm2103_vm7 = vcmp.eq.s32.totalorder %v9184_v61, %v8637_v63  ;;  %v1839_v39 = vadd.f32 %v1775_v14, %v1643_v46  ;;  %v7303_v23 = vld [vmem:[%s12648_s4 + $0x18] sm:$0xff]  ;;  %4404 = vmatpush.bf16.msra.mxu2 %v7311_v57 }
 0x418   :  { %v1841_v8 = vadd.f32 %v1777_v28, %v1645_v3  ;;  %v1973_v27 = vsel %vm1907_vm8, %v8689_v62, 0.0  ;;  %v2167_v40 = vsel %vm2101_vm6, %v8691_v35, 0.0  ;;  %v2169_v37 = vsel %vm2103_vm7, %v8691_v35, 0.0  ;;  %4315 = vmatpush.bf16.msra.mxu1 %v7303_v23 }
 0x419   :  { %vm2297_vm15 = vcmp.eq.s32.totalorder %v9181_v54, %v8639_v31  ;;  %vm2299_vm0 = vcmp.eq.s32.totalorder %v9184_v61, %v8639_v31  ;;  %v9533_v29 = vadd.s32 160, %v8267_v12  ;;  %v2035_v34 = vadd.f32 %v1971_v30, %v1839_v39  ;;  %v7302_v39 = vld [vmem:[%s12648_s4 + $0x10] sm:$0xff] }
 0x41a   :  { %v2037_v41 = vadd.f32 %v1973_v27, %v1841_v8  ;;  %v2363_v25 = vsel %vm2297_vm15, %v8693_v24, 0.0  ;;  %v2365_v13 = vsel %vm2299_vm0, %v8693_v24, 0.0  ;;  %v9544_v46 = vadd.s32 168, %v8267_v12 }
 0x41b   :  { %12775 = vst [vmem:[#allocation25_spill] sm:$0xff] %v9533_v29  ;;  %vm938_vm5 = vcmp.eq.s32.totalorder %v9533_v29, %v8269_v36  ;;  %vm1134_vm12 = vcmp.eq.s32.totalorder %v9533_v29, %v8275_v2  ;;  %vm1330_vm11 = vcmp.eq.s32.totalorder %v9533_v29, %v8277_v49  ;;  %v2231_v3 = vadd.f32 %v2167_v40, %v2035_v34 }
 0x41c   :  { %12776 = vst [vmem:[#allocation26_spill] sm:$0xff] %v9544_v46  ;;  %v2233_v14 = vadd.f32 %v2169_v37, %v2037_v41  ;;  %v1004_v28 = vsel %vm938_vm5, %v8359_v16, 0.0  ;;  %v1200_v30 = vsel %vm1134_vm12, %v8361_v9, 0.0  ;;  %vm940_vm1 = vcmp.eq.s32.totalorder %v9544_v46, %v8269_v36  ;;  %4316 = vmatpush.bf16.msra.mxu1 %v7302_v39  ;;  %v9587_v39 = vpop.f32.mrf.mxu3 }
 0x41d   :  { %vm1136_vm9 = vcmp.eq.s32.totalorder %v9544_v46, %v8275_v2  ;;  %v1264_v8 = vadd.f32 %v1200_v30, %v1004_v28  ;;  %vm1332_vm10 = vcmp.eq.s32.totalorder %v9544_v46, %v8277_v49  ;;  %v2427_v27 = vadd.f32 %v2363_v25, %v2231_v3 }
 0x41e   :  { %v2429_v40 = vadd.f32 %v2365_v13, %v2233_v14  ;;  %v1006_v37 = vsel %vm940_vm1, %v8359_v16, 0.0  ;;  %v1202_v34 = vsel %vm1136_vm9, %v8361_v9, 0.0  ;;  %v1396_v57 = vsel %vm1330_vm11, %v8363_v20, 0.0  ;;  %v7301_v13 = vld [vmem:[%s12648_s4 + $0x8] sm:$0xff] }
 0x41f   :  { %v1266_v41 = vadd.f32 %v1202_v34, %v1006_v37  ;;  %v1398_v23 = vsel %vm1332_vm10, %v8363_v20, 0.0  ;;  %vm1526_vm13 = vcmp.eq.s32.totalorder %v9533_v29, %v8279_v48  ;;  %v1460_v30 = vadd.f32 %v1396_v57, %v1264_v8 }
 0x420   :  { %v2477_v28 = vpack.c.bf16 %v2429_v40, %v2427_v27  ;;  %vm1528_vm14 = vcmp.eq.s32.totalorder %v9544_v46, %v8279_v48  ;;  %v1592_v25 = vsel %vm1526_vm13, %v8365_v18, 0.0  ;;  %vm1722_vm2 = vcmp.eq.s32.totalorder %v9533_v29, %v8281_v7  ;;  %4317 = vmatpush.bf16.msra.mxu1 %v7301_v13 }
 0x421   :  { %v1462_v3 = vadd.f32 %v1398_v23, %v1266_v41  ;;  %v1594_v14 = vsel %vm1528_vm14, %v8365_v18, 0.0  ;;  %vm1724_vm3 = vcmp.eq.s32.totalorder %v9544_v46, %v8281_v7  ;;  %v1656_v8 = vadd.f32 %v1592_v25, %v1460_v30 }
 0x422   :  { %2538 = vmatmul.bf16.gmra.mxu2 %v2477_v28  ;;  %v1788_v27 = vsel %vm1722_vm2, %v8367_v10, 0.0  ;;  %v1790_v40 = vsel %vm1724_vm3, %v8367_v10, 0.0  ;;  %vm1918_vm4 = vcmp.eq.s32.totalorder %v9533_v29, %v8285_v58  ;;  %vm1920_vm8 = vcmp.eq.s32.totalorder %v9544_v46, %v8285_v58 }
 0x423   :  { %v1658_v37 = vadd.f32 %v1594_v14, %v1462_v3  ;;  %v1984_v34 = vsel %vm1918_vm4, %v8369_v19, 0.0  ;;  %vm2114_vm6 = vcmp.eq.s32.totalorder %v9533_v29, %v8287_v60  ;;  %v1852_v41 = vadd.f32 %v1788_v27, %v1656_v8  ;;  %v2504_v8 = vpop.f32.mrf.mxu2 }
 0x424   :  { %v1986_v57 = vsel %vm1920_vm8, %v8369_v19, 0.0  ;;  %vm2116_vm7 = vcmp.eq.s32.totalorder %v9544_v46, %v8287_v60  ;;  %v2180_v23 = vsel %vm2114_vm6, %v8371_v17, 0.0  ;;  %vm2310_vm15 = vcmp.eq.s32.totalorder %v9533_v29, %v8291_v51 }
 0x425   :  { %v1854_v28 = vadd.f32 %v1790_v40, %v1658_v37  ;;  %v2182_v30 = vsel %vm2116_vm7, %v8371_v17, 0.0  ;;  %vm2312_vm0 = vcmp.eq.s32.totalorder %v9544_v46, %v8291_v51  ;;  %v2048_v25 = vadd.f32 %v1984_v34, %v1852_v41 }
 0x426   :  { %v2376_v3 = vsel %vm2310_vm15, %v8373_v43, 0.0  ;;  %v2378_v14 = vsel %vm2312_vm0, %v8373_v43, 0.0  ;;  %vm929_vm5 = vcmp.eq.s32.totalorder %v9294_v47, %v8601_v45  ;;  %vm931_vm12 = vcmp.eq.s32.totalorder %v9297_v22, %v8601_v45 }
 0x427   :  { %v2050_v27 = vadd.f32 %v1986_v57, %v1854_v28  ;;  %v995_v13 = vsel %vm929_vm5, %v8679_v5, 0.0  ;;  %vm1125_vm11 = vcmp.eq.s32.totalorder %v9294_v47, %v8603_v4  ;;  %v2244_v40 = vadd.f32 %v2180_v23, %v2048_v25  ;;  %v7300_v28 = vld [vmem:[%s12648_s4] sm:$0xff] }
 0x428   :  { %v997_v37 = vsel %vm931_vm12, %v8679_v5, 0.0  ;;  %vm1127_vm1 = vcmp.eq.s32.totalorder %v9297_v22, %v8603_v4  ;;  %v1191_v34 = vsel %vm1125_vm11, %v8681_v26, 0.0  ;;  %vm1321_vm9 = vcmp.eq.s32.totalorder %v9294_v47, %v8605_v33  ;;  %4318 = vmatpush.bf16.msra.mxu1 %v7300_v28 }
 0x429   :  { %v2246_v41 = vadd.f32 %v2182_v30, %v2050_v27  ;;  %v1193_v61 = vsel %vm1127_vm1, %v8681_v26, 0.0  ;;  %v1255_v57 = vadd.f32 %v1191_v34, %v995_v13  ;;  %v2440_v54 = vadd.f32 %v2376_v3, %v2244_v40  ;;  %v9633_v40 = vpop.f32.mrf.mxu3 }
 0x42a   :  { %v1257_v23 = vadd.f32 %v1193_v61, %v997_v37  ;;  %vm1323_vm10 = vcmp.eq.s32.totalorder %v9297_v22, %v8605_v33  ;;  %v1387_v25 = vsel %vm1321_vm9, %v8683_v6, 0.0  ;;  %vm1517_vm13 = vcmp.eq.s32.totalorder %v9294_v47, %v8607_v38 }
 0x42b   :  { %v2442_v55 = vadd.f32 %v2378_v14, %v2246_v41  ;;  %v1389_v30 = vsel %vm1323_vm10, %v8683_v6, 0.0  ;;  %v1451_v27 = vadd.f32 %v1387_v25, %v1255_v57  ;;  %vm1519_vm14 = vcmp.eq.s32.totalorder %v9297_v22, %v8607_v38 }
 0x42c   :  { %v1453_v13 = vadd.f32 %v1389_v30, %v1257_v23  ;;  %v1583_v3 = vsel %vm1517_vm13, %v8685_v59, 0.0  ;;  %vm1713_vm2 = vcmp.eq.s32.totalorder %v9294_v47, %v8613_v52  ;;  %v1585_v14 = vsel %vm1519_vm14, %v8685_v59, 0.0  ;;  %v2506_v23 = vpop.f32.mrf.mxu2 }
 0x42d   :  { %v2484_v61 = vpack.c.bf16 %v2442_v55, %v2440_v54  ;;  %v1647_v37 = vadd.f32 %v1583_v3, %v1451_v27  ;;  %vm1715_vm3 = vcmp.eq.s32.totalorder %v9297_v22, %v8613_v52  ;;  %v1779_v41 = vsel %vm1713_vm2, %v8687_v56, 0.0 }
 0x42e   :  { %v1649_v34 = vadd.f32 %v1585_v14, %v1453_v13  ;;  %vm1909_vm4 = vcmp.eq.s32.totalorder %v9294_v47, %v8635_v11  ;;  %v1781_v57 = vsel %vm1715_vm3, %v8687_v56, 0.0  ;;  %vm1911_vm8 = vcmp.eq.s32.totalorder %v9297_v22, %v8635_v11  ;;  %v7319_v14 = vld [vmem:[%s12648_s4 + $0x98] sm:$0xff] }
 0x42f   :  { %2642 = vmatmul.bf16.gmra.mxu3 %v2484_v61  ;;  %v1843_v28 = vadd.f32 %v1779_v41, %v1647_v37  ;;  %vm2105_vm6 = vcmp.eq.s32.totalorder %v9294_v47, %v8637_v63  ;;  %v1975_v54 = vsel %vm1909_vm4, %v8689_v62, 0.0  ;;  %vm2107_vm7 = vcmp.eq.s32.totalorder %v9297_v22, %v8637_v63  ;;  %v7331_v37 = vld [vmem:[%s12648_s4 + $0xf8] sm:$0xff] }
 0x430   :  { %v1845_v55 = vadd.f32 %v1781_v57, %v1649_v34  ;;  %v1977_v25 = vsel %vm1911_vm8, %v8689_v62, 0.0  ;;  %vm2301_vm15 = vcmp.eq.s32.totalorder %v9294_v47, %v8639_v31  ;;  %vm2303_vm0 = vcmp.eq.s32.totalorder %v9297_v22, %v8639_v31  ;;  %4493 = vmatpush.bf16.msra.mxu3 %v7319_v14  ;;  %4578 = vmatpush.bf16.msra.mxu0 %v7331_v37 }
 0x431   :  { %v2039_v30 = vadd.f32 %v1975_v54, %v1843_v28  ;;  %v2171_v13 = vsel %vm2105_vm6, %v8691_v35, 0.0  ;;  %v2173_v3 = vsel %vm2107_vm7, %v8691_v35, 0.0  ;;  %v2594_v61 = vadd.f32 %v9436_v32, %v2504_v8 }
 0x432   :  { %v2041_v27 = vadd.f32 %v1977_v25, %v1845_v55  ;;  %v2596_v41 = vadd.f32 %v9486_v21, %v2506_v23  ;;  %v9665_v57 = vadd.s32 176, %v8267_v12  ;;  %v9668_v28 = vadd.s32 184, %v8267_v12 }
 0x433   :  { %v2235_v34 = vadd.f32 %v2171_v13, %v2039_v30  ;;  %v2367_v32 = vsel %vm2301_vm15, %v8693_v24, 0.0  ;;  %v2369_v8 = vsel %vm2303_vm0, %v8693_v24, 0.0  ;;  %vm933_vm5 = vcmp.eq.s32.totalorder %v9415_v53, %v8601_v45 }
 0x434   :  { %12777 = vst [vmem:[#allocation27_spill] sm:$0xff] %v9665_v57  ;;  %v2237_v55 = vadd.f32 %v2173_v3, %v2041_v27  ;;  %v2673_v25 = vpack.c.bf16 %v2596_v41, %v2594_v61  ;;  %vm942_vm12 = vcmp.eq.s32.totalorder %v9665_v57, %v8269_v36  ;;  %vm944_vm11 = vcmp.eq.s32.totalorder %v9668_v28, %v8269_v36  ;;  %v9686_v27 = vpop.f32.mrf.mxu3 }
 0x435   :  { %12778 = vst [vmem:[#allocation28_spill] sm:$0xff] %v9668_v28  ;;  %v2431_v54 = vadd.f32 %v2367_v32, %v2235_v34  ;;  %vm935_vm1 = vcmp.eq.s32.totalorder %v9424_v15, %v8601_v45  ;;  %v1008_v23 = vsel %vm942_vm12, %v8359_v16, 0.0  ;;  %v1010_v30 = vsel %vm944_vm11, %v8359_v16, 0.0 }
 0x436   :  { %v2433_v21 = vadd.f32 %v2369_v8, %v2237_v55  ;;  %vm1138_vm9 = vcmp.eq.s32.totalorder %v9665_v57, %v8275_v2  ;;  %vm1129_vm10 = vcmp.eq.s32.totalorder %v9415_v53, %v8603_v4  ;;  %vm1140_vm13 = vcmp.eq.s32.totalorder %v9668_v28, %v8275_v2 }
 0x437   :  { %v1204_v13 = vsel %vm1138_vm9, %v8361_v9, 0.0  ;;  %vm1334_vm14 = vcmp.eq.s32.totalorder %v9665_v57, %v8277_v49  ;;  %vm1336_vm2 = vcmp.eq.s32.totalorder %v9668_v28, %v8277_v49  ;;  %vm12779_vm3 = vcmask 261120  }
 0x438   :  { %6390 = vmatmul.msk.bf16.vlgmr.msrb.gmra.mxu0 %vm12779_vm3, %v2673_v25  ;;  %v2479_v3 = vpack.c.bf16 %v2433_v21, %v2431_v54  ;;  %v1206_v61 = vsel %vm1140_vm13, %v8361_v9, 0.0  ;;  %v1268_v14 = vadd.f32 %v1204_v13, %v1008_v23  ;;  %v1400_v37 = vsel %vm1334_vm14, %v8363_v20, 0.0 }
 0x439   :  { %v1270_v34 = vadd.f32 %v1206_v61, %v1010_v30  ;;  %v1402_v41 = vsel %vm1336_vm2, %v8363_v20, 0.0  ;;  %vm1530_vm4 = vcmp.eq.s32.totalorder %v9665_v57, %v8279_v48  ;;  %vm1532_vm8 = vcmp.eq.s32.totalorder %v9668_v28, %v8279_v48 }
 0x43a   :  { %2543 = vmatmul.bf16.gmra.mxu2 %v2479_v3  ;;  %v1464_v55 = vadd.f32 %v1400_v37, %v1268_v14  ;;  %v1596_v32 = vsel %vm1530_vm4, %v8365_v18, 0.0  ;;  %v1598_v8 = vsel %vm1532_vm8, %v8365_v18, 0.0  ;;  %vm1726_vm6 = vcmp.eq.s32.totalorder %v9665_v57, %v8281_v7 }
 0x43b   :  { %v1466_v54 = vadd.f32 %v1402_v41, %v1270_v34  ;;  %vm1728_vm7 = vcmp.eq.s32.totalorder %v9668_v28, %v8281_v7  ;;  %v1792_v25 = vsel %vm1726_vm6, %v8367_v10, 0.0  ;;  %vm1922_vm15 = vcmp.eq.s32.totalorder %v9665_v57, %v8285_v58 }
 0x43c   :  { %v1660_v21 = vadd.f32 %v1596_v32, %v1464_v55  ;;  %v1794_v23 = vsel %vm1728_vm7, %v8367_v10, 0.0  ;;  %vm1924_vm0 = vcmp.eq.s32.totalorder %v9668_v28, %v8285_v58  ;;  %v1988_v30 = vsel %vm1922_vm15, %v8369_v19, 0.0  ;;  %v2509_v32 = vpop.f32.mrf.mxu2 }
 0x43d   :  { %v1662_v13 = vadd.f32 %v1598_v8, %v1466_v54  ;;  %v1990_v3 = vsel %vm1924_vm0, %v8369_v19, 0.0  ;;  %vm2118_vm12 = vcmp.eq.s32.totalorder %v9665_v57, %v8287_v60  ;;  %vm2120_vm11 = vcmp.eq.s32.totalorder %v9668_v28, %v8287_v60 }
 0x43e   :  { %v1856_v61 = vadd.f32 %v1792_v25, %v1660_v21  ;;  %v2184_v14 = vsel %vm2118_vm12, %v8371_v17, 0.0  ;;  %v2186_v37 = vsel %vm2120_vm11, %v8371_v17, 0.0  ;;  %vm2314_vm9 = vcmp.eq.s32.totalorder %v9665_v57, %v8291_v51 }
 0x43f   :  { %v1858_v34 = vadd.f32 %v1794_v23, %v1662_v13  ;;  %vm2316_vm13 = vcmp.eq.s32.totalorder %v9668_v28, %v8291_v51  ;;  %v2380_v41 = vsel %vm2314_vm9, %v8373_v43, 0.0  ;;  %v999_v55 = vsel %vm933_vm5, %v8679_v5, 0.0  ;;  %v9739_v23 = vpop.f32.mrf.mxu3 }
 0x440   :  { %v2052_v8 = vadd.f32 %v1988_v30, %v1856_v61  ;;  %v2382_v54 = vsel %vm2316_vm13, %v8373_v43, 0.0  ;;  %v1001_v25 = vsel %vm935_vm1, %v8679_v5, 0.0  ;;  %vm1131_vm14 = vcmp.eq.s32.totalorder %v9424_v15, %v8603_v4  ;;  %12780 = vst [vmem:[#allocation29_spill] sm:$0xff] %v9739_v23 }
 0x441   :  { %v2054_v21 = vadd.f32 %v1990_v3, %v1858_v34  ;;  %v1195_v13 = vsel %vm1129_vm10, %v8681_v26, 0.0  ;;  %v1197_v30 = vsel %vm1131_vm14, %v8681_v26, 0.0  ;;  %vm1325_vm5 = vcmp.eq.s32.totalorder %v9415_v53, %v8605_v33 }
 0x442   :  { %v2248_v61 = vadd.f32 %v2184_v14, %v2052_v8  ;;  %v1259_v22 = vadd.f32 %v1195_v13, %v999_v55  ;;  %v1261_v47 = vadd.f32 %v1197_v30, %v1001_v25  ;;  %vm1327_vm1 = vcmp.eq.s32.totalorder %v9424_v15, %v8605_v33 }
 0x443   :  { %v2250_v50 = vadd.f32 %v2186_v37, %v2054_v21  ;;  %v1391_v3 = vsel %vm1325_vm5, %v8683_v6, 0.0  ;;  %v1393_v34 = vsel %vm1327_vm1, %v8683_v6, 0.0  ;;  %vm1521_vm2 = vcmp.eq.s32.totalorder %v9415_v53, %v8607_v38 }
 0x444   :  { %v2444_v23 = vadd.f32 %v2380_v41, %v2248_v61  ;;  %v1455_v1 = vadd.f32 %v1391_v3, %v1259_v22  ;;  %v1457_v28 = vadd.f32 %v1393_v34, %v1261_v47  ;;  %vm1523_vm10 = vcmp.eq.s32.totalorder %v9424_v15, %v8607_v38 }
 0x445   :  { %v2446_v14 = vadd.f32 %v2382_v54, %v2250_v50  ;;  %v1587_v55 = vsel %vm1521_vm2, %v8685_v59, 0.0  ;;  %v1589_v8 = vsel %vm1523_vm10, %v8685_v59, 0.0  ;;  %vm1717_vm3 = vcmp.eq.s32.totalorder %v9415_v53, %v8613_v52 }
 0x446   :  { %v1651_v37 = vadd.f32 %v1587_v55, %v1455_v1  ;;  %v1653_v25 = vadd.f32 %v1589_v8, %v1457_v28  ;;  %vm1719_vm4 = vcmp.eq.s32.totalorder %v9424_v15, %v8613_v52  ;;  %v1783_v41 = vsel %vm1717_vm3, %v8687_v56, 0.0  ;;  %v9773_v28 = vld [vmem:[%s12647_s3] sm:$0xff] }
 0x447   :  { %v2486_v22 = vpack.c.bf16 %v2446_v14, %v2444_v23  ;;  %v1785_v47 = vsel %vm1719_vm4, %v8687_v56, 0.0  ;;  %vm1913_vm8 = vcmp.eq.s32.totalorder %v9415_v53, %v8635_v11  ;;  %vm1915_vm6 = vcmp.eq.s32.totalorder %v9424_v15, %v8635_v11  ;;  %12781 = vst [vmem:[#allocation30_spill] sm:$0xff] %v9773_v28  ;;  %v2511_v23 = vpop.f32.mrf.mxu2  ;;  %v9790_v8 = vpop.f32.mrf.mxu3 }
 0x448   :  { %v1847_v50 = vadd.f32 %v1783_v41, %v1651_v37  ;;  %v1849_v54 = vadd.f32 %v1785_v47, %v1653_v25  ;;  %v1979_v21 = vsel %vm1913_vm8, %v8689_v62, 0.0  ;;  %v1981_v1 = vsel %vm1915_vm6, %v8689_v62, 0.0  ;;  %v7310_v47 = vld [vmem:[%s12648_s4 + $0x50] sm:$0xff] }
 0x449   :  { %2647 = vmatmul.bf16.gmra.mxu3 %v2486_v22  ;;  %vm2109_vm7 = vcmp.eq.s32.totalorder %v9415_v53, %v8637_v63  ;;  %vm2111_vm15 = vcmp.eq.s32.totalorder %v9424_v15, %v8637_v63  ;;  %vm2305_vm0 = vcmp.eq.s32.totalorder %v9415_v53, %v8639_v31  ;;  %vm2307_vm12 = vcmp.eq.s32.totalorder %v9424_v15, %v8639_v31 }
 0x44a   :  { %v2043_v13 = vadd.f32 %v1979_v21, %v1847_v50  ;;  %v2045_v30 = vadd.f32 %v1981_v1, %v1849_v54  ;;  %v2175_v61 = vsel %vm2109_vm7, %v8691_v35, 0.0  ;;  %v2177_v3 = vsel %vm2111_vm15, %v8691_v35, 0.0  ;;  %v12782_v50 = vld [vmem:[#allocation6_spill] sm:$0xff]  ;;  %4405 = vmatpush.bf16.msra.mxu2 %v7310_v47 }
 0x44b   :  { %v2371_v34 = vsel %vm2305_vm0, %v8693_v24, 0.0  ;;  %v2373_v14 = vsel %vm2307_vm12, %v8693_v24, 0.0  ;;  %v9788_v55 = vperm.slane %v9773_v28, 0  ;;  %v2599_v41 = vadd.f32 %v9525_v44, %v2509_v32 }
 0x44c   :  { %v2239_v37 = vadd.f32 %v2175_v61, %v2043_v13  ;;  %v2241_v25 = vadd.f32 %v2177_v3, %v2045_v30  ;;  %v2601_v22 = vadd.f32 %v9587_v39, %v2511_v23  ;;  %v9802_v54 = vadd.s32 192, %v8267_v12 }
 0x44d   :  { %vm2903_vm11 = vcmp.eq.s32.totalorder %v8267_v12, %v9788_v55  ;;  %vm2911_vm9 = vcmp.eq.s32.totalorder %v12782_v50, %v9788_v55  ;;  %v9805_v21 = vadd.s32 200, %v8267_v12  ;;  %vm937_vm14 = vcmp.eq.s32.totalorder %v9533_v29, %v8601_v45 }
 0x44e   :  { %v2435_v1 = vadd.f32 %v2371_v34, %v2239_v37  ;;  %v2437_v44 = vadd.f32 %v2373_v14, %v2241_v25  ;;  %vm6918_vm13 = vmpackc.low %vm2911_vm9, %vm2903_vm11  ;;  %v2674_v39 = vpack.c.bf16 %v2601_v22, %v2599_v41  ;;  %v12687_v32 = vmov 1.0|1.0  }
 0x44f   :  { %12783 = vst [vmem:[#allocation31_spill] sm:$0xff] %v9805_v21  ;;  %6919 = vmatmul.msk.bf16.vlgmr.msra.gmra.mxu1 %vm6918_vm13, %v12687_v32  ;;  %vm946_vm5 = vcmp.eq.s32.totalorder %v9802_v54, %v8269_v36  ;;  %vm948_vm1 = vcmp.eq.s32.totalorder %v9805_v21, %v8269_v36  ;;  %vm1142_vm2 = vcmp.eq.s32.totalorder %v9802_v54, %v8275_v2  ;;  %vm12784_vm3 = vcmask 261120  }
 0x450   :  { %vm1144_vm10 = vcmp.eq.s32.totalorder %v9805_v21, %v8275_v2  ;;  %v2481_v23 = vpack.c.bf16 %v2437_v44, %v2435_v1  ;;  %v1012_v13 = vsel %vm946_vm5, %v8359_v16, 0.0  ;;  %v1014_v30 = vsel %vm948_vm1, %v8359_v16, 0.0  ;;  %6391 = vmatmul.msk.bf16.gmra.mxu0 %vm12784_vm3, %v2674_v39 }
 0x451   :  { %v1208_v61 = vsel %vm1142_vm2, %v8361_v9, 0.0  ;;  %v1210_v3 = vsel %vm1144_vm10, %v8361_v9, 0.0  ;;  %vm1338_vm4 = vcmp.eq.s32.totalorder %v9802_v54, %v8277_v49  ;;  %vm1340_vm8 = vcmp.eq.s32.totalorder %v9805_v21, %v8277_v49 }
 0x452   :  { %v1272_v34 = vadd.f32 %v1208_v61, %v1012_v13  ;;  %2548 = vmatmul.bf16.gmra.mxu2 %v2481_v23  ;;  %v1274_v14 = vadd.f32 %v1210_v3, %v1014_v30  ;;  %v1404_v37 = vsel %vm1338_vm4, %v8363_v20, 0.0  ;;  %v1406_v25 = vsel %vm1340_vm8, %v8363_v20, 0.0  ;;  %v9845_v13 = vpop.f32.mrf.mxu3 }
 0x453   :  { %vm1534_vm6 = vcmp.eq.s32.totalorder %v9802_v54, %v8279_v48  ;;  %vm1536_vm7 = vcmp.eq.s32.totalorder %v9805_v21, %v8279_v48  ;;  %vm1730_vm15 = vcmp.eq.s32.totalorder %v9802_v54, %v8281_v7  ;;  %vm1732_vm0 = vcmp.eq.s32.totalorder %v9805_v21, %v8281_v7 }
 0x454   :  { %v1468_v41 = vadd.f32 %v1404_v37, %v1272_v34  ;;  %v1600_v22 = vsel %vm1534_vm6, %v8365_v18, 0.0  ;;  %v1470_v47 = vadd.f32 %v1406_v25, %v1274_v14  ;;  %v1602_v1 = vsel %vm1536_vm7, %v8365_v18, 0.0 }
 0x455   :  { %v1796_v44 = vsel %vm1730_vm15, %v8367_v10, 0.0  ;;  %v1798_v23 = vsel %vm1732_vm0, %v8367_v10, 0.0  ;;  %vm1926_vm12 = vcmp.eq.s32.totalorder %v9802_v54, %v8285_v58  ;;  %vm1928_vm11 = vcmp.eq.s32.totalorder %v9805_v21, %v8285_v58 }
 0x456   :  { %v1664_v39 = vadd.f32 %v1600_v22, %v1468_v41  ;;  %v1666_v30 = vadd.f32 %v1602_v1, %v1470_v47  ;;  %v1992_v61 = vsel %vm1926_vm12, %v8369_v19, 0.0  ;;  %v1994_v3 = vsel %vm1928_vm11, %v8369_v19, 0.0 }
 0x457   :  { %vm2122_vm9 = vcmp.eq.s32.totalorder %v9802_v54, %v8287_v60  ;;  %vm2124_vm13 = vcmp.eq.s32.totalorder %v9805_v21, %v8287_v60  ;;  %vm2318_vm5 = vcmp.eq.s32.totalorder %v9802_v54, %v8291_v51  ;;  %vm2320_vm1 = vcmp.eq.s32.totalorder %v9805_v21, %v8291_v51 }
 0x458   :  { %v1860_v34 = vadd.f32 %v1796_v44, %v1664_v39  ;;  %v2188_v14 = vsel %vm2122_vm9, %v8371_v17, 0.0  ;;  %v1862_v37 = vadd.f32 %v1798_v23, %v1666_v30  ;;  %v2190_v25 = vsel %vm2124_vm13, %v8371_v17, 0.0  ;;  %v2514_v44 = vpop.f32.mrf.mxu2 }
 0x459   :  { %v2384_v41 = vsel %vm2318_vm5, %v8373_v43, 0.0  ;;  %v2386_v47 = vsel %vm2320_vm1, %v8373_v43, 0.0  ;;  %vm939_vm2 = vcmp.eq.s32.totalorder %v9544_v46, %v8601_v45  ;;  %v1003_v1 = vsel %vm937_vm14, %v8679_v5, 0.0 }
 0x45a   :  { %v2056_v22 = vadd.f32 %v1992_v61, %v1860_v34  ;;  %v2058_v39 = vadd.f32 %v1994_v3, %v1862_v37  ;;  %v1005_v23 = vsel %vm939_vm2, %v8679_v5, 0.0  ;;  %vm1133_vm10 = vcmp.eq.s32.totalorder %v9533_v29, %v8603_v4 }
 0x45b   :  { %vm1135_vm3 = vcmp.eq.s32.totalorder %v9544_v46, %v8603_v4  ;;  %v1199_v61 = vsel %vm1133_vm10, %v8681_v26, 0.0  ;;  %vm1329_vm4 = vcmp.eq.s32.totalorder %v9533_v29, %v8605_v33  ;;  %vm1331_vm14 = vcmp.eq.s32.totalorder %v9544_v46, %v8605_v33 }
 0x45c   :  { %v2252_v30 = vadd.f32 %v2188_v14, %v2056_v22  ;;  %v1201_v34 = vsel %vm1135_vm3, %v8681_v26, 0.0  ;;  %v2254_v32 = vadd.f32 %v2190_v25, %v2058_v39  ;;  %v1263_v15 = vadd.f32 %v1199_v61, %v1003_v1 }
 0x45d   :  { %v1265_v53 = vadd.f32 %v1201_v34, %v1005_v23  ;;  %v1395_v37 = vsel %vm1329_vm4, %v8683_v6, 0.0  ;;  %v1397_v50 = vsel %vm1331_vm14, %v8683_v6, 0.0  ;;  %vm1525_vm8 = vcmp.eq.s32.totalorder %v9533_v29, %v8607_v38 }
 0x45e   :  { %v2448_v3 = vadd.f32 %v2384_v41, %v2252_v30  ;;  %v2450_v14 = vadd.f32 %v2386_v47, %v2254_v32  ;;  %v1459_v22 = vadd.f32 %v1395_v37, %v1263_v15  ;;  %vm1527_vm6 = vcmp.eq.s32.totalorder %v9544_v46, %v8607_v38  ;;  %v9890_v41 = vpop.f32.mrf.mxu3 }
 0x45f   :  { %v1461_v28 = vadd.f32 %v1397_v50, %v1265_v53  ;;  %v1591_v25 = vsel %vm1525_vm8, %v8685_v59, 0.0  ;;  %v1593_v1 = vsel %vm1527_vm6, %v8685_v59, 0.0  ;;  %vm1721_vm7 = vcmp.eq.s32.totalorder %v9533_v29, %v8613_v52 }
 0x460   :  { %vm1723_vm15 = vcmp.eq.s32.totalorder %v9544_v46, %v8613_v52  ;;  %v2488_v39 = vpack.c.bf16 %v2450_v14, %v2448_v3  ;;  %v1655_v23 = vadd.f32 %v1591_v25, %v1459_v22  ;;  %v1787_v53 = vsel %vm1721_vm7, %v8687_v56, 0.0  ;;  %v2516_v34 = vpop.f32.mrf.mxu2 }
 0x461   :  { %v1657_v32 = vadd.f32 %v1593_v1, %v1461_v28  ;;  %v1789_v15 = vsel %vm1723_vm15, %v8687_v56, 0.0  ;;  %vm1917_vm0 = vcmp.eq.s32.totalorder %v9533_v29, %v8635_v11  ;;  %vm1919_vm12 = vcmp.eq.s32.totalorder %v9544_v46, %v8635_v11 }
 0x462   :  { %vm2113_vm11 = vcmp.eq.s32.totalorder %v9533_v29, %v8637_v63  ;;  %2652 = vmatmul.bf16.gmra.mxu3 %v2488_v39  ;;  %v1851_v50 = vadd.f32 %v1787_v53, %v1655_v23  ;;  %v1983_v30 = vsel %vm1917_vm0, %v8689_v62, 0.0  ;;  %v1985_v28 = vsel %vm1919_vm12, %v8689_v62, 0.0  ;;  %v7318_v53 = vld [vmem:[%s12648_s4 + $0x90] sm:$0xff] }
 0x463   :  { %v1853_v47 = vadd.f32 %v1789_v15, %v1657_v32  ;;  %vm2115_vm9 = vcmp.eq.s32.totalorder %v9544_v46, %v8637_v63  ;;  %v2179_v61 = vsel %vm2113_vm11, %v8691_v35, 0.0  ;;  %vm2309_vm13 = vcmp.eq.s32.totalorder %v9533_v29, %v8639_v31  ;;  %v7330_v15 = vld [vmem:[%s12648_s4 + $0xf0] sm:$0xff]  ;;  %4494 = vmatpush.bf16.msra.mxu3 %v7318_v53 }
 0x464   :  { %v2047_v3 = vadd.f32 %v1983_v30, %v1851_v50  ;;  %v2181_v14 = vsel %vm2115_vm9, %v8691_v35, 0.0  ;;  %vm2311_vm5 = vcmp.eq.s32.totalorder %v9544_v46, %v8639_v31  ;;  %v2375_v22 = vsel %vm2309_vm13, %v8693_v24, 0.0  ;;  %4579 = vmatpush.bf16.msra.mxu0 %v7330_v15 }
 0x465   :  { %v2049_v37 = vadd.f32 %v1985_v28, %v1853_v47  ;;  %vm2919_vm1 = vcmp.eq.s32.totalorder %v8294_v42, %v9788_v55  ;;  %vm2927_vm2 = vcmp.eq.s32.totalorder %v8297_v0, %v9788_v55  ;;  %v2604_v25 = vadd.f32 %v9633_v40, %v2514_v44 }
 0x466   :  { %v2243_v1 = vadd.f32 %v2179_v61, %v2047_v3  ;;  %vm6920_vm10 = vmpackc.low %vm2927_vm2, %vm2919_vm1  ;;  %v2606_v23 = vadd.f32 %v9686_v27, %v2516_v34  ;;  %v9918_v32 = vadd.s32 208, %v8267_v12  ;;  %v2377_v50 = vsel %vm2311_vm5, %v8693_v24, 0.0  ;;  %v12788_v27 = vld [vmem:[#allocation28_spill] sm:$0xff]  ;;  %v9944_v34 = vpop.f32.mrf.mxu3 }
 0x467   :  { %v2245_v39 = vadd.f32 %v2181_v14, %v2049_v37  ;;  %v12786_v47 = vmov 1.0|1.0   ;;  %v9929_v40 = vadd.s32 216, %v8267_v12  ;;  %vm941_vm3 = vcmp.eq.s32.totalorder %v9665_v57, %v8601_v45  ;;  %12789 = vst [vmem:[#allocation34_spill] sm:$0xff] %v9944_v34 }
 0x468   :  { %12785 = vst [vmem:[#allocation32_spill] sm:$0xff] %v9918_v32  ;;  %6921 = vmatmul.msk.bf16.gmra.mxu1 %vm6920_vm10, %v12786_v47  ;;  %vm943_vm4 = vcmp.eq.s32.totalorder %v12788_v27, %v8601_v45  ;;  %v2439_v44 = vadd.f32 %v2375_v22, %v2243_v1  ;;  %v2675_v28 = vpack.c.bf16 %v2606_v23, %v2604_v25  ;;  %vm12790_vm0 = vcmask 261120  }
 0x469   :  { %12787 = vst [vmem:[#allocation33_spill] sm:$0xff] %v9929_v40  ;;  %v2441_v30 = vadd.f32 %v2377_v50, %v2245_v39  ;;  %vm950_vm14 = vcmp.eq.s32.totalorder %v9918_v32, %v8269_v36  ;;  %vm952_vm8 = vcmp.eq.s32.totalorder %v9929_v40, %v8269_v36  ;;  %vm1146_vm6 = vcmp.eq.s32.totalorder %v9918_v32, %v8275_v2 }
 0x46a   :  { %v1016_v61 = vsel %vm950_vm14, %v8359_v16, 0.0  ;;  %vm1148_vm7 = vcmp.eq.s32.totalorder %v9929_v40, %v8275_v2  ;;  %vm1137_vm15 = vcmp.eq.s32.totalorder %v9665_v57, %v8603_v4  ;;  %v1018_v37 = vsel %vm952_vm8, %v8359_v16, 0.0  ;;  %6392 = vmatmul.msk.bf16.gmra.mxu0 %vm12790_vm0, %v2675_v28 }
 0x46b   :  { %v2483_v3 = vpack.c.bf16 %v2441_v30, %v2439_v44  ;;  %v1212_v14 = vsel %vm1146_vm6, %v8361_v9, 0.0  ;;  %v1214_v22 = vsel %vm1148_vm7, %v8361_v9, 0.0  ;;  %vm1342_vm12 = vcmp.eq.s32.totalorder %v9918_v32, %v8277_v49 }
 0x46c   :  { %v1276_v25 = vadd.f32 %v1212_v14, %v1016_v61  ;;  %v1278_v1 = vadd.f32 %v1214_v22, %v1018_v37  ;;  %vm1344_vm11 = vcmp.eq.s32.totalorder %v9929_v40, %v8277_v49  ;;  %v1408_v39 = vsel %vm1342_vm12, %v8363_v20, 0.0  ;;  %v9980_v22 = vpop.f32.mrf.mxu2 }
 0x46d   :  { %2553 = vmatmul.bf16.gmra.mxu2 %v2483_v3  ;;  %v1410_v23 = vsel %vm1344_vm11, %v8363_v20, 0.0  ;;  %vm1538_vm9 = vcmp.eq.s32.totalorder %v9918_v32, %v8279_v48  ;;  %vm1540_vm13 = vcmp.eq.s32.totalorder %v9929_v40, %v8279_v48  ;;  %vm1734_vm5 = vcmp.eq.s32.totalorder %v9918_v32, %v8281_v7 }
 0x46e   :  { %v1472_v53 = vadd.f32 %v1408_v39, %v1276_v25  ;;  %v1474_v15 = vadd.f32 %v1410_v23, %v1278_v1  ;;  %v1604_v50 = vsel %vm1538_vm9, %v8365_v18, 0.0  ;;  %v1606_v44 = vsel %vm1540_vm13, %v8365_v18, 0.0 }
 0x46f   :  { %vm1736_vm1 = vcmp.eq.s32.totalorder %v9929_v40, %v8281_v7  ;;  %vm1930_vm2 = vcmp.eq.s32.totalorder %v9918_v32, %v8285_v58  ;;  %vm1932_vm10 = vcmp.eq.s32.totalorder %v9929_v40, %v8285_v58  ;;  %v1800_v61 = vsel %vm1734_vm5, %v8367_v10, 0.0 }
 0x470   :  { %v1668_v30 = vadd.f32 %v1604_v50, %v1472_v53  ;;  %v1670_v28 = vadd.f32 %v1606_v44, %v1474_v15  ;;  %v1802_v3 = vsel %vm1736_vm1, %v8367_v10, 0.0  ;;  %v1996_v37 = vsel %vm1930_vm2, %v8369_v19, 0.0 }
 0x471   :  { %v1998_v14 = vsel %vm1932_vm10, %v8369_v19, 0.0  ;;  %vm2126_vm14 = vcmp.eq.s32.totalorder %v9918_v32, %v8287_v60  ;;  %vm2128_vm8 = vcmp.eq.s32.totalorder %v9929_v40, %v8287_v60  ;;  %vm2322_vm6 = vcmp.eq.s32.totalorder %v9918_v32, %v8291_v51 }
 0x472   :  { %v1864_v25 = vadd.f32 %v1800_v61, %v1668_v30  ;;  %v1866_v1 = vadd.f32 %v1802_v3, %v1670_v28  ;;  %v2192_v39 = vsel %vm2126_vm14, %v8371_v17, 0.0  ;;  %v2194_v23 = vsel %vm2128_vm8, %v8371_v17, 0.0  ;;  %v9998_v61 = vpop.f32.mrf.mxu3 }
 0x473   :  { %vm2324_vm7 = vcmp.eq.s32.totalorder %v9929_v40, %v8291_v51  ;;  %v1007_v53 = vsel %vm941_vm3, %v8679_v5, 0.0  ;;  %v1009_v15 = vsel %vm943_vm4, %v8679_v5, 0.0  ;;  %v2388_v30 = vsel %vm2322_vm6, %v8373_v43, 0.0  ;;  %12791 = vst [vmem:[#allocation35_spill] sm:$0xff] %v9998_v61 }
 0x474   :  { %v2060_v50 = vadd.f32 %v1996_v37, %v1864_v25  ;;  %v2062_v44 = vadd.f32 %v1998_v14, %v1866_v1  ;;  %v2390_v28 = vsel %vm2324_vm7, %v8373_v43, 0.0  ;;  %vm1139_vm0 = vcmp.eq.s32.totalorder %v12788_v27, %v8603_v4 }
 0x475   :  { %v1203_v3 = vsel %vm1137_vm15, %v8681_v26, 0.0  ;;  %vm1333_vm3 = vcmp.eq.s32.totalorder %v9665_v57, %v8605_v33  ;;  %vm1335_vm4 = vcmp.eq.s32.totalorder %v12788_v27, %v8605_v33  ;;  %v1205_v25 = vsel %vm1139_vm0, %v8681_v26, 0.0 }
 0x476   :  { %v2256_v37 = vadd.f32 %v2192_v39, %v2060_v50  ;;  %v2258_v14 = vadd.f32 %v2194_v23, %v2062_v44  ;;  %v1267_v1 = vadd.f32 %v1203_v3, %v1007_v53  ;;  %v1269_v46 = vadd.f32 %v1205_v25, %v1009_v15 }
 0x477   :  { %v1399_v29 = vsel %vm1333_vm3, %v8683_v6, 0.0  ;;  %v1401_v0 = vsel %vm1335_vm4, %v8683_v6, 0.0  ;;  %vm1529_vm12 = vcmp.eq.s32.totalorder %v9665_v57, %v8607_v38  ;;  %vm1531_vm15 = vcmp.eq.s32.totalorder %v12788_v27, %v8607_v38 }
 0x478   :  { %v2452_v42 = vadd.f32 %v2388_v30, %v2256_v37  ;;  %v2454_v61 = vadd.f32 %v2390_v28, %v2258_v14  ;;  %v1463_v34 = vadd.f32 %v1399_v29, %v1267_v1  ;;  %v1465_v40 = vadd.f32 %v1401_v0, %v1269_v46  ;;  %v2521_v0 = vpop.f32.mrf.mxu2  ;;  %v12792_v1 = vld [vmem:[#allocation9_spill] sm:$0xff] }
 0x479   :  { %v1595_v39 = vsel %vm1529_vm12, %v8685_v59, 0.0  ;;  %v1597_v23 = vsel %vm1531_vm15, %v8685_v59, 0.0  ;;  %vm1725_vm11 = vcmp.eq.s32.totalorder %v9665_v57, %v8613_v52  ;;  %vm1727_vm9 = vcmp.eq.s32.totalorder %v12788_v27, %v8613_v52 }
 0x47a   :  { %v2490_v53 = vpack.c.bf16 %v2454_v61, %v2452_v42  ;;  %v1659_v15 = vadd.f32 %v1595_v39, %v1463_v34  ;;  %v1791_v50 = vsel %vm1725_vm11, %v8687_v56, 0.0  ;;  %v1661_v44 = vadd.f32 %v1597_v23, %v1465_v40  ;;  %v10042_v37 = vpop.f32.mrf.mxu3  ;;  %v12793_v39 = vld [vmem:[#allocation10_spill] sm:$0xff] }
 0x47b   :  { %v1793_v29 = vsel %vm1727_vm9, %v8687_v56, 0.0  ;;  %vm1921_vm13 = vcmp.eq.s32.totalorder %v9665_v57, %v8635_v11  ;;  %vm1923_vm5 = vcmp.eq.s32.totalorder %v12788_v27, %v8635_v11  ;;  %vm2117_vm1 = vcmp.eq.s32.totalorder %v9665_v57, %v8637_v63 }
 0x47c   :  { %2657 = vmatmul.bf16.gmra.mxu3 %v2490_v53  ;;  %v1855_v46 = vadd.f32 %v1791_v50, %v1659_v15  ;;  %v1987_v42 = vsel %vm1921_vm13, %v8689_v62, 0.0  ;;  %v1989_v34 = vsel %vm1923_vm5, %v8689_v62, 0.0  ;;  %v1857_v30 = vadd.f32 %v1793_v29, %v1661_v44  ;;  %v12794_v53 = vld [vmem:[#allocation29_spill] sm:$0xff]  ;;  %v7309_v29 = vld [vmem:[%s12648_s4 + $0x48] sm:$0xff] }
 0x47d   :  { %vm2119_vm2 = vcmp.eq.s32.totalorder %v12788_v27, %v8637_v63  ;;  %v2183_v40 = vsel %vm2117_vm1, %v8691_v35, 0.0  ;;  %vm2313_vm10 = vcmp.eq.s32.totalorder %v9665_v57, %v8639_v31  ;;  %vm2315_vm14 = vcmp.eq.s32.totalorder %v12788_v27, %v8639_v31  ;;  %4406 = vmatpush.bf16.msra.mxu2 %v7309_v29 }
 0x47e   :  { %v2051_v28 = vadd.f32 %v1987_v42, %v1855_v46  ;;  %v2185_v61 = vsel %vm2119_vm2, %v8691_v35, 0.0  ;;  %v2379_v3 = vsel %vm2313_vm10, %v8693_v24, 0.0  ;;  %v2053_v14 = vadd.f32 %v1989_v34, %v1857_v30 }
 0x47f   :  { %v2381_v25 = vsel %vm2315_vm14, %v8693_v24, 0.0  ;;  %vm2935_vm8 = vcmp.eq.s32.totalorder %v12792_v1, %v9788_v55  ;;  %vm2943_vm6 = vcmp.eq.s32.totalorder %v12793_v39, %v9788_v55  ;;  %v2609_v15 = vadd.f32 %v12794_v53, %v9980_v22 }
 0x480   :  { %v2247_v23 = vadd.f32 %v2183_v40, %v2051_v28  ;;  %vm6922_vm7 = vmpackc.low %vm2943_vm6, %vm2935_vm8  ;;  %v2611_v50 = vadd.f32 %v9790_v8, %v2521_v0  ;;  %v10053_v44 = vadd.s32 224, %v8267_v12  ;;  %v2249_v46 = vadd.f32 %v2185_v61, %v2053_v14 }
 0x481   :  { %6923 = vmatmul.msk.bf16.gmra.mxu1 %vm6922_vm7, %v12786_v47  ;;  %v10060_v42 = vadd.s32 232, %v8267_v12  ;;  %vm945_vm0 = vcmp.eq.s32.totalorder %v9802_v54, %v8601_v45  ;;  %vm947_vm3 = vcmp.eq.s32.totalorder %v9805_v21, %v8601_v45  ;;  %vm12797_vm13 = vcmask 261120  }
 0x482   :  { %12795 = vst [vmem:[#allocation29_spill] sm:$0xff] %v10053_v44  ;;  %v2443_v8 = vadd.f32 %v2379_v3, %v2247_v23  ;;  %v2676_v22 = vpack.c.bf16 %v2611_v50, %v2609_v15  ;;  %vm954_vm4 = vcmp.eq.s32.totalorder %v10053_v44, %v8269_v36  ;;  %vm1150_vm12 = vcmp.eq.s32.totalorder %v10053_v44, %v8275_v2 }
 0x483   :  { %12796 = vst [vmem:[#allocation36_spill] sm:$0xff] %v10060_v42  ;;  %v2445_v0 = vadd.f32 %v2381_v25, %v2249_v46  ;;  %vm956_vm15 = vcmp.eq.s32.totalorder %v10060_v42, %v8269_v36  ;;  %v1020_v34 = vsel %vm954_vm4, %v8359_v16, 0.0  ;;  %vm1152_vm11 = vcmp.eq.s32.totalorder %v10060_v42, %v8275_v2  ;;  %v10083_v25 = vpop.f32.mrf.mxu2 }
 0x484   :  { %v1022_v30 = vsel %vm956_vm15, %v8359_v16, 0.0  ;;  %v1216_v40 = vsel %vm1150_vm12, %v8361_v9, 0.0  ;;  %v1218_v28 = vsel %vm1152_vm11, %v8361_v9, 0.0  ;;  %vm1346_vm9 = vcmp.eq.s32.totalorder %v10053_v44, %v8277_v49  ;;  %6393 = vmatmul.msk.bf16.gmra.mxu0 %vm12797_vm13, %v2676_v22 }
 0x485   :  { %v2485_v61 = vpack.c.bf16 %v2445_v0, %v2443_v8  ;;  %v1280_v3 = vadd.f32 %v1216_v40, %v1020_v34  ;;  %v1282_v14 = vadd.f32 %v1218_v28, %v1022_v30  ;;  %vm1348_vm5 = vcmp.eq.s32.totalorder %v10060_v42, %v8277_v49  ;;  %v10101_v8 = vpop.f32.mrf.mxu3 }
 0x486   :  { %v1412_v23 = vsel %vm1346_vm9, %v8363_v20, 0.0  ;;  %v1414_v53 = vsel %vm1348_vm5, %v8363_v20, 0.0  ;;  %vm1542_vm1 = vcmp.eq.s32.totalorder %v10053_v44, %v8279_v48  ;;  %vm1544_vm2 = vcmp.eq.s32.totalorder %v10060_v42, %v8279_v48 }
 0x487   :  { %2558 = vmatmul.bf16.gmra.mxu2 %v2485_v61  ;;  %v1476_v15 = vadd.f32 %v1412_v23, %v1280_v3  ;;  %v1478_v50 = vadd.f32 %v1414_v53, %v1282_v14  ;;  %v1608_v29 = vsel %vm1542_vm1, %v8365_v18, 0.0  ;;  %v1610_v46 = vsel %vm1544_vm2, %v8365_v18, 0.0 }
 0x488   :  { %vm1738_vm10 = vcmp.eq.s32.totalorder %v10053_v44, %v8281_v7  ;;  %vm1740_vm14 = vcmp.eq.s32.totalorder %v10060_v42, %v8281_v7  ;;  %vm1934_vm8 = vcmp.eq.s32.totalorder %v10053_v44, %v8285_v58  ;;  %vm1936_vm6 = vcmp.eq.s32.totalorder %v10060_v42, %v8285_v58 }
 0x489   :  { %v1672_v22 = vadd.f32 %v1608_v29, %v1476_v15  ;;  %v1674_v0 = vadd.f32 %v1610_v46, %v1478_v50  ;;  %v1804_v34 = vsel %vm1738_vm10, %v8367_v10, 0.0  ;;  %v1806_v30 = vsel %vm1740_vm14, %v8367_v10, 0.0 }
 0x48a   :  { %v2000_v40 = vsel %vm1934_vm8, %v8369_v19, 0.0  ;;  %v2002_v28 = vsel %vm1936_vm6, %v8369_v19, 0.0  ;;  %vm2130_vm7 = vcmp.eq.s32.totalorder %v10053_v44, %v8287_v60  ;;  %vm2132_vm4 = vcmp.eq.s32.totalorder %v10060_v42, %v8287_v60 }
 0x48b   :  { %v1868_v61 = vadd.f32 %v1804_v34, %v1672_v22  ;;  %v1870_v3 = vadd.f32 %v1806_v30, %v1674_v0  ;;  %v2196_v14 = vsel %vm2130_vm7, %v8371_v17, 0.0  ;;  %v2198_v23 = vsel %vm2132_vm4, %v8371_v17, 0.0 }
 0x48c   :  { %vm2326_vm12 = vcmp.eq.s32.totalorder %v10053_v44, %v8291_v51  ;;  %vm2328_vm15 = vcmp.eq.s32.totalorder %v10060_v42, %v8291_v51  ;;  %v1011_v53 = vsel %vm945_vm0, %v8679_v5, 0.0  ;;  %v1013_v15 = vsel %vm947_vm3, %v8679_v5, 0.0 }
 0x48d   :  { %v2064_v50 = vadd.f32 %v2000_v40, %v1868_v61  ;;  %v2066_v29 = vadd.f32 %v2002_v28, %v1870_v3  ;;  %v2392_v46 = vsel %vm2326_vm12, %v8373_v43, 0.0  ;;  %v2394_v22 = vsel %vm2328_vm15, %v8373_v43, 0.0  ;;  %v2526_v28 = vpop.f32.mrf.mxu2 }
 0x48e   :  { %vm1141_vm11 = vcmp.eq.s32.totalorder %v9802_v54, %v8603_v4  ;;  %vm1143_vm9 = vcmp.eq.s32.totalorder %v9805_v21, %v8603_v4  ;;  %vm1337_vm0 = vcmp.eq.s32.totalorder %v9802_v54, %v8605_v33  ;;  %vm1339_vm13 = vcmp.eq.s32.totalorder %v9805_v21, %v8605_v33 }
 0x48f   :  { %v2260_v0 = vadd.f32 %v2196_v14, %v2064_v50  ;;  %v2262_v34 = vadd.f32 %v2198_v23, %v2066_v29  ;;  %v1207_v30 = vsel %vm1141_vm11, %v8681_v26, 0.0  ;;  %v1209_v40 = vsel %vm1143_vm9, %v8681_v26, 0.0 }
 0x490   :  { %v1271_v61 = vadd.f32 %v1207_v30, %v1011_v53  ;;  %v1273_v3 = vadd.f32 %v1209_v40, %v1013_v15  ;;  %v1403_v27 = vsel %vm1337_vm0, %v8683_v6, 0.0  ;;  %v1405_v57 = vsel %vm1339_vm13, %v8683_v6, 0.0  ;;  %v10145_v53 = vpop.f32.mrf.mxu3  ;;  %v12798_v40 = vld [vmem:[#allocation11_spill] sm:$0xff] }
 0x491   :  { %v2456_v39 = vadd.f32 %v2392_v46, %v2260_v0  ;;  %v2458_v1 = vadd.f32 %v2394_v22, %v2262_v34  ;;  %vm1533_vm3 = vcmp.eq.s32.totalorder %v9802_v54, %v8607_v38  ;;  %vm1535_vm5 = vcmp.eq.s32.totalorder %v9805_v21, %v8607_v38 }
 0x492   :  { %v1467_v14 = vadd.f32 %v1403_v27, %v1271_v61  ;;  %v1469_v23 = vadd.f32 %v1405_v57, %v1273_v3  ;;  %v1599_v50 = vsel %vm1533_vm3, %v8685_v59, 0.0  ;;  %v1601_v29 = vsel %vm1535_vm5, %v8685_v59, 0.0 }
 0x493   :  { %v2492_v15 = vpack.c.bf16 %v2458_v1, %v2456_v39  ;;  %vm1729_vm1 = vcmp.eq.s32.totalorder %v9802_v54, %v8613_v52  ;;  %vm1731_vm2 = vcmp.eq.s32.totalorder %v9805_v21, %v8613_v52  ;;  %vm1925_vm10 = vcmp.eq.s32.totalorder %v9802_v54, %v8635_v11 }
 0x494   :  { %v1663_v46 = vadd.f32 %v1599_v50, %v1467_v14  ;;  %v1665_v22 = vadd.f32 %v1601_v29, %v1469_v23  ;;  %v1795_v57 = vsel %vm1729_vm1, %v8687_v56, 0.0  ;;  %v1797_v27 = vsel %vm1731_vm2, %v8687_v56, 0.0  ;;  %v12799_v50 = vld [vmem:[#allocation12_spill] sm:$0xff] }
 0x495   :  { %2662 = vmatmul.bf16.gmra.mxu3 %v2492_v15  ;;  %vm1927_vm14 = vcmp.eq.s32.totalorder %v9805_v21, %v8635_v11  ;;  %vm2121_vm8 = vcmp.eq.s32.totalorder %v9802_v54, %v8637_v63  ;;  %vm2123_vm6 = vcmp.eq.s32.totalorder %v9805_v21, %v8637_v63  ;;  %v1991_v0 = vsel %vm1925_vm10, %v8689_v62, 0.0 }
 0x496   :  { %v1859_v1 = vadd.f32 %v1795_v57, %v1663_v46  ;;  %v1861_v39 = vadd.f32 %v1797_v27, %v1665_v22  ;;  %v1993_v34 = vsel %vm1927_vm14, %v8689_v62, 0.0  ;;  %v2187_v30 = vsel %vm2121_vm8, %v8691_v35, 0.0  ;;  %v7317_v22 = vld [vmem:[%s12648_s4 + $0x88] sm:$0xff]  ;;  %v10186_v27 = vpop.f32.mrf.mxu2 }
 0x497   :  { %vm2317_vm7 = vcmp.eq.s32.totalorder %v9802_v54, %v8639_v31  ;;  %vm2319_vm4 = vcmp.eq.s32.totalorder %v9805_v21, %v8639_v31  ;;  %vm2951_vm12 = vcmp.eq.s32.totalorder %v12798_v40, %v9788_v55  ;;  %v2189_v14 = vsel %vm2123_vm6, %v8691_v35, 0.0  ;;  %v7329_v57 = vld [vmem:[%s12648_s4 + $0xe8] sm:$0xff]  ;;  %4495 = vmatpush.bf16.msra.mxu3 %v7317_v22 }
 0x498   :  { %v2055_v61 = vadd.f32 %v1991_v0, %v1859_v1  ;;  %v2057_v3 = vadd.f32 %v1993_v34, %v1861_v39  ;;  %v2383_v23 = vsel %vm2317_vm7, %v8693_v24, 0.0  ;;  %vm2959_vm15 = vcmp.eq.s32.totalorder %v12799_v50, %v9788_v55  ;;  %4580 = vmatpush.bf16.msra.mxu0 %v7329_v57 }
 0x499   :  { %v2614_v29 = vadd.f32 %v9845_v13, %v10083_v25  ;;  %v2616_v15 = vadd.f32 %v9890_v41, %v2526_v28  ;;  %v10178_v46 = vadd.s32 240, %v8267_v12  ;;  %v2385_v0 = vsel %vm2319_vm4, %v8693_v24, 0.0  ;;  %vm6924_vm11 = vmpackc.low %vm2959_vm15, %vm2951_vm12 }
 0x49a   :  { %v2251_v1 = vadd.f32 %v2187_v30, %v2055_v61  ;;  %v2253_v39 = vadd.f32 %v2189_v14, %v2057_v3  ;;  %v10193_v13 = vadd.s32 248, %v8267_v12  ;;  %6925 = vmatmul.msk.bf16.gmra.mxu1 %vm6924_vm11, %v12786_v47  ;;  %vm949_vm3 = vcmp.eq.s32.totalorder %v9918_v32, %v8601_v45  ;;  %v10207_v30 = vpop.f32.mrf.mxu3  ;;  %v7316_v61 = vld [vmem:[%s12648_s4 + $0x80] sm:$0xff] }
 0x49b   :  { %v2677_v41 = vpack.c.bf16 %v2616_v15, %v2614_v29  ;;  %vm958_vm9 = vcmp.eq.s32.totalorder %v10178_v46, %v8269_v36  ;;  %vm1154_vm0 = vcmp.eq.s32.totalorder %v10178_v46, %v8275_v2  ;;  %vm1350_vm13 = vcmp.eq.s32.totalorder %v10178_v46, %v8277_v49  ;;  %4496 = vmatpush.bf16.msra.mxu3 %v7316_v61 }
 0x49c   :  { %12800 = vst [vmem:[#allocation11_spill] sm:$0xff] %v10193_v13  ;;  %v2447_v25 = vadd.f32 %v2383_v23, %v2251_v1  ;;  %v2449_v28 = vadd.f32 %v2385_v0, %v2253_v39  ;;  %vm960_vm5 = vcmp.eq.s32.totalorder %v10193_v13, %v8269_v36  ;;  %v1024_v34 = vsel %vm958_vm9, %v8359_v16, 0.0 }
 0x49d   :  { %v1026_v3 = vsel %vm960_vm5, %v8359_v16, 0.0  ;;  %vm1156_vm1 = vcmp.eq.s32.totalorder %v10193_v13, %v8275_v2  ;;  %v1220_v14 = vsel %vm1154_vm0, %v8361_v9, 0.0  ;;  %vm1352_vm2 = vcmp.eq.s32.totalorder %v10193_v13, %v8277_v49 }
 0x49e   :  { %vm12801_vm10 = vcmask 261120   ;;  %v2487_v36 = vpack.c.bf16 %v2449_v28, %v2447_v25  ;;  %v1222_v23 = vsel %vm1156_vm1, %v8361_v9, 0.0  ;;  %v1284_v29 = vadd.f32 %v1220_v14, %v1024_v34 }
 0x49f   :  { %6394 = vmatmul.msk.bf16.gmra.mxu0 %vm12801_vm10, %v2677_v41  ;;  %v1416_v15 = vsel %vm1350_vm13, %v8363_v20, 0.0  ;;  %v1286_v16 = vadd.f32 %v1222_v23, %v1026_v3  ;;  %v1418_v22 = vsel %vm1352_vm2, %v8363_v20, 0.0  ;;  %vm1546_vm14 = vcmp.eq.s32.totalorder %v10178_v46, %v8279_v48 }
 0x4a0   :  { %vm1548_vm8 = vcmp.eq.s32.totalorder %v10193_v13, %v8279_v48  ;;  %2563 = vmatmul.bf16.gmra.mxu2 %v2487_v36  ;;  %v1480_v2 = vadd.f32 %v1416_v15, %v1284_v29  ;;  %v1612_v57 = vsel %vm1546_vm14, %v8365_v18, 0.0  ;;  %vm1742_vm6 = vcmp.eq.s32.totalorder %v10178_v46, %v8281_v7  ;;  %v10238_v48 = vpop.f32.mrf.mxu2 }
 0x4a1   :  { %v1614_v9 = vsel %vm1548_vm8, %v8365_v18, 0.0  ;;  %v1482_v49 = vadd.f32 %v1418_v22, %v1286_v16  ;;  %vm1744_vm7 = vcmp.eq.s32.totalorder %v10193_v13, %v8281_v7  ;;  %v1808_v20 = vsel %vm1742_vm6, %v8367_v10, 0.0  ;;  %v7308_v22 = vld [vmem:[%s12648_s4 + $0x40] sm:$0xff] }
 0x4a2   :  { %vm1938_vm4 = vcmp.eq.s32.totalorder %v10178_v46, %v8285_v58  ;;  %v1676_v1 = vadd.f32 %v1612_v57, %v1480_v2  ;;  %v1810_v39 = vsel %vm1744_vm7, %v8367_v10, 0.0  ;;  %vm1940_vm12 = vcmp.eq.s32.totalorder %v10193_v13, %v8285_v58  ;;  %v10264_v3 = vpop.f32.mrf.mxu3  ;;  %4407 = vmatpush.bf16.msra.mxu2 %v7308_v22  ;;  %v12805_v22 = vld [vmem:[#allocation34_spill] sm:$0xff] }
 0x4a3   :  { %v2004_v18 = vsel %vm1938_vm4, %v8369_v19, 0.0  ;;  %v1678_v0 = vadd.f32 %v1614_v9, %v1482_v49  ;;  %v2006_v41 = vsel %vm1940_vm12, %v8369_v19, 0.0  ;;  %vm2134_vm15 = vcmp.eq.s32.totalorder %v10178_v46, %v8287_v60  ;;  %v12802_v19 = vld [vmem:[#allocation33_spill] sm:$0xff] }
 0x4a4   :  { %vm2136_vm11 = vcmp.eq.s32.totalorder %v10193_v13, %v8287_v60  ;;  %v1872_v7 = vadd.f32 %v1808_v20, %v1676_v1  ;;  %v2200_v25 = vsel %vm2134_vm15, %v8371_v17, 0.0  ;;  %vm2330_vm9 = vcmp.eq.s32.totalorder %v10178_v46, %v8291_v51 }
 0x4a5   :  { %v2202_v28 = vsel %vm2136_vm11, %v8371_v17, 0.0  ;;  %v1874_v58 = vadd.f32 %v1810_v39, %v1678_v0  ;;  %vm2332_vm0 = vcmp.eq.s32.totalorder %v10193_v13, %v8291_v51  ;;  %v2396_v10 = vsel %vm2330_vm9, %v8373_v43, 0.0 }
 0x4a6   :  { %vm951_vm13 = vcmp.eq.s32.totalorder %v12802_v19, %v8601_v45  ;;  %v2068_v34 = vadd.f32 %v2004_v18, %v1872_v7  ;;  %v2398_v60 = vsel %vm2332_vm0, %v8373_v43, 0.0  ;;  %v1015_v17 = vsel %vm949_vm3, %v8679_v5, 0.0 }
 0x4a7   :  { %v1017_v61 = vsel %vm951_vm13, %v8679_v5, 0.0  ;;  %v2070_v14 = vadd.f32 %v2006_v41, %v1874_v58  ;;  %vm1145_vm5 = vcmp.eq.s32.totalorder %v9918_v32, %v8603_v4  ;;  %vm1147_vm1 = vcmp.eq.s32.totalorder %v12802_v19, %v8603_v4 }
 0x4a8   :  { %vm1341_vm2 = vcmp.eq.s32.totalorder %v9918_v32, %v8605_v33  ;;  %v2264_v51 = vadd.f32 %v2200_v25, %v2068_v34  ;;  %v1211_v43 = vsel %vm1145_vm5, %v8681_v26, 0.0  ;;  %v1213_v36 = vsel %vm1147_vm1, %v8681_v26, 0.0  ;;  %v10280_v2 = vpop.f32.mrf.mxu2 }
 0x4a9   :  { %vm1343_vm3 = vcmp.eq.s32.totalorder %v12802_v19, %v8605_v33  ;;  %v2266_v23 = vadd.f32 %v2202_v28, %v2070_v14  ;;  %v1275_v29 = vadd.f32 %v1211_v43, %v1015_v17  ;;  %v1277_v15 = vadd.f32 %v1213_v36, %v1017_v61 }
 0x4aa   :  { %v1407_v16 = vsel %vm1341_vm2, %v8683_v6, 0.0  ;;  %v2460_v57 = vadd.f32 %v2396_v10, %v2264_v51  ;;  %v1409_v9 = vsel %vm1343_vm3, %v8683_v6, 0.0  ;;  %vm1537_vm10 = vcmp.eq.s32.totalorder %v9918_v32, %v8607_v38  ;;  %v10311_v14 = vpop.f32.mrf.mxu3 }
 0x4ab   :  { %vm1539_vm14 = vcmp.eq.s32.totalorder %v12802_v19, %v8607_v38  ;;  %v2462_v49 = vadd.f32 %v2398_v60, %v2266_v23  ;;  %v1471_v20 = vadd.f32 %v1407_v16, %v1275_v29  ;;  %v1473_v1 = vadd.f32 %v1409_v9, %v1277_v15  ;;  %v12803_v15 = vld [vmem:[#allocation13_spill] sm:$0xff]  ;;  %v12804_v16 = vld [vmem:[#allocation14_spill] sm:$0xff]  ;;  %v12806_v9 = vld [vmem:[#allocation35_spill] sm:$0xff] }
 0x4ac   :  { %v1603_v39 = vsel %vm1537_vm10, %v8685_v59, 0.0  ;;  %v1605_v18 = vsel %vm1539_vm14, %v8685_v59, 0.0  ;;  %vm1733_vm8 = vcmp.eq.s32.totalorder %v9918_v32, %v8613_v52  ;;  %vm1735_vm6 = vcmp.eq.s32.totalorder %v12802_v19, %v8613_v52 }
 0x4ad   :  { %vm1929_vm7 = vcmp.eq.s32.totalorder %v9918_v32, %v8635_v11  ;;  %v2494_v0 = vpack.c.bf16 %v2462_v49, %v2460_v57  ;;  %v1667_v41 = vadd.f32 %v1603_v39, %v1471_v20  ;;  %v1669_v7 = vadd.f32 %v1605_v18, %v1473_v1  ;;  %v12807_v39 = vld [vmem:[#allocation30_spill] sm:$0xff] }
 0x4ae   :  { %v1799_v25 = vsel %vm1733_vm8, %v8687_v56, 0.0  ;;  %v1801_v28 = vsel %vm1735_vm6, %v8687_v56, 0.0  ;;  %vm1931_vm4 = vcmp.eq.s32.totalorder %v12802_v19, %v8635_v11  ;;  %v1995_v58 = vsel %vm1929_vm7, %v8689_v62, 0.0 }
 0x4af   :  { %vm2125_vm12 = vcmp.eq.s32.totalorder %v9918_v32, %v8637_v63  ;;  %2667 = vmatmul.bf16.gmra.mxu3 %v2494_v0  ;;  %v1863_v10 = vadd.f32 %v1799_v25, %v1667_v41  ;;  %v1865_v34 = vadd.f32 %v1801_v28, %v1669_v7  ;;  %v1997_v60 = vsel %vm1931_vm4, %v8689_v62, 0.0 }
 0x4b0   :  { %vm2127_vm15 = vcmp.eq.s32.totalorder %v12802_v19, %v8637_v63  ;;  %v2191_v17 = vsel %vm2125_vm12, %v8691_v35, 0.0  ;;  %vm2321_vm11 = vcmp.eq.s32.totalorder %v9918_v32, %v8639_v31  ;;  %vm2323_vm9 = vcmp.eq.s32.totalorder %v12802_v19, %v8639_v31  ;;  %v10315_v29 = vpop.f32.mrf.mxu2 }
 0x4b1   :  { %v2193_v61 = vsel %vm2127_vm15, %v8691_v35, 0.0  ;;  %v2059_v51 = vadd.f32 %v1995_v58, %v1863_v10  ;;  %v2061_v43 = vadd.f32 %v1997_v60, %v1865_v34  ;;  %v2387_v36 = vsel %vm2321_vm11, %v8693_v24, 0.0  ;;  %v12809_v34 = vld [vmem:[#allocation6_spill] sm:$0xff] }
 0x4b2   :  { %v2389_v23 = vsel %vm2323_vm9, %v8693_v24, 0.0  ;;  %vm2967_vm0 = vcmp.eq.s32.totalorder %v12803_v15, %v9788_v55  ;;  %vm2975_vm13 = vcmp.eq.s32.totalorder %v12804_v16, %v9788_v55  ;;  %v2619_v57 = vadd.f32 %v12805_v22, %v10186_v27 }
 0x4b3   :  { %v2621_v49 = vadd.f32 %v12806_v9, %v10238_v48  ;;  %v2255_v20 = vadd.f32 %v2191_v17, %v2059_v51  ;;  %v2257_v1 = vadd.f32 %v2193_v61, %v2061_v43  ;;  %vm6926_vm5 = vmpackc.low %vm2975_vm13, %vm2967_vm0  ;;  %v10326_v18 = vperm.slane %v12807_v39, 2  ;;  %v7328_v43 = vld [vmem:[%s12648_s4 + $0xe0] sm:$0xff] }
 0x4b4   :  { %vm953_vm1 = vcmp.eq.s32.totalorder %v10053_v44, %v8601_v45  ;;  %6927 = vmatmul.msk.bf16.gmra.mxu1 %vm6926_vm5, %v12786_v47  ;;  %vm955_vm2 = vcmp.eq.s32.totalorder %v10060_v42, %v8601_v45  ;;  %vm1149_vm3 = vcmp.eq.s32.totalorder %v10053_v44, %v8603_v4  ;;  %vm1151_vm14 = vcmp.eq.s32.totalorder %v10060_v42, %v8603_v4 }
 0x4b5   :  { %v2678_v0 = vpack.c.bf16 %v2621_v49, %v2619_v57  ;;  %v1019_v27 = vsel %vm953_vm1, %v8679_v5, 0.0  ;;  %v2451_v48 = vadd.f32 %v2387_v36, %v2255_v20  ;;  %v2453_v41 = vadd.f32 %v2389_v23, %v2257_v1  ;;  %v10366_v57 = vpop.f32.mrf.mxu3  ;;  %4581 = vmatpush.bf16.msra.mxu0 %v7328_v43 }
 0x4b6   :  { %vm2905_vm10 = vcmp.eq.s32.totalorder %v8267_v12, %v10326_v18  ;;  %v1021_v7 = vsel %vm955_vm2, %v8679_v5, 0.0  ;;  %v1215_v25 = vsel %vm1149_vm3, %v8681_v26, 0.0  ;;  %vm1345_vm8 = vcmp.eq.s32.totalorder %v10053_v44, %v8605_v33 }
 0x4b7   :  { %vm12808_vm6 = vcmask 261120   ;;  %v2489_v28 = vpack.c.bf16 %v2453_v41, %v2451_v48  ;;  %v1217_v58 = vsel %vm1151_vm14, %v8681_v26, 0.0  ;;  %v1279_v10 = vadd.f32 %v1215_v25, %v1019_v27 }
 0x4b8   :  { %6395 = vmatmul.msk.bf16.gmra.mxu0 %vm12808_vm6, %v2678_v0  ;;  %vm1347_vm7 = vcmp.eq.s32.totalorder %v10060_v42, %v8605_v33  ;;  %vm2913_vm4 = vcmp.eq.s32.totalorder %v12809_v34, %v10326_v18  ;;  %v1281_v60 = vadd.f32 %v1217_v58, %v1021_v7  ;;  %v1411_v17 = vsel %vm1345_vm8, %v8683_v6, 0.0  ;;  %v10361_v36 = vpop.f32.mrf.mxu2  ;;  %v12810_v58 = vld [vmem:[#allocation15_spill] sm:$0xff] }
 0x4b9   :  { %vm1541_vm12 = vcmp.eq.s32.totalorder %v10053_v44, %v8607_v38  ;;  %2568 = vmatmul.bf16.gmra.mxu2 %v2489_v28  ;;  %v1413_v61 = vsel %vm1347_vm7, %v8683_v6, 0.0  ;;  %v1475_v51 = vadd.f32 %v1411_v17, %v1279_v10  ;;  %vm1543_vm15 = vcmp.eq.s32.totalorder %v10060_v42, %v8607_v38  ;;  %vm6982_vm5 = vmpackc.low %vm2913_vm4, %vm2905_vm10  ;;  %v12811_v10 = vld [vmem:[#allocation16_spill] sm:$0xff] }
 0x4ba   :  { %vm1737_vm11 = vcmp.eq.s32.totalorder %v10053_v44, %v8613_v52  ;;  %v1477_v23 = vadd.f32 %v1413_v61, %v1281_v60  ;;  %v1607_v22 = vsel %vm1541_vm12, %v8685_v59, 0.0  ;;  %vm1739_vm9 = vcmp.eq.s32.totalorder %v10060_v42, %v8613_v52 }
 0x4bb   :  { %v1609_v9 = vsel %vm1543_vm15, %v8685_v59, 0.0  ;;  %v1671_v49 = vadd.f32 %v1607_v22, %v1475_v51  ;;  %vm1933_vm0 = vcmp.eq.s32.totalorder %v10053_v44, %v8635_v11  ;;  %vm1935_vm13 = vcmp.eq.s32.totalorder %v10060_v42, %v8635_v11 }
 0x4bc   :  { %v1673_v20 = vadd.f32 %v1609_v9, %v1477_v23  ;;  %v1803_v1 = vsel %vm1737_vm11, %v8687_v56, 0.0  ;;  %v1805_v39 = vsel %vm1739_vm9, %v8687_v56, 0.0  ;;  %vm2129_vm1 = vcmp.eq.s32.totalorder %v10053_v44, %v8637_v63 }
 0x4bd   :  { %v1867_v0 = vadd.f32 %v1803_v1, %v1671_v49  ;;  %v1999_v27 = vsel %vm1933_vm0, %v8689_v62, 0.0  ;;  %vm2131_vm2 = vcmp.eq.s32.totalorder %v10060_v42, %v8637_v63  ;;  %vm2325_vm3 = vcmp.eq.s32.totalorder %v10053_v44, %v8639_v31  ;;  %v12812_v1 = vld [vmem:[#allocation7_spill] sm:$0xff] }
 0x4be   :  { %v1869_v48 = vadd.f32 %v1805_v39, %v1673_v20  ;;  %v2001_v41 = vsel %vm1935_vm13, %v8689_v62, 0.0  ;;  %v2195_v7 = vsel %vm2129_vm1, %v8691_v35, 0.0  ;;  %vm2327_vm10 = vcmp.eq.s32.totalorder %v10060_v42, %v8639_v31 }
 0x4bf   :  { %6983 = vmatmul.msk.bf16.vlgmr.msra.gmra.mxu3 %vm6982_vm5, %v12786_v47  ;;  %v2063_v25 = vadd.f32 %v1999_v27, %v1867_v0  ;;  %v2197_v28 = vsel %vm2131_vm2, %v8691_v35, 0.0  ;;  %vm2983_vm14 = vcmp.eq.s32.totalorder %v12810_v58, %v9788_v55  ;;  %vm2991_vm8 = vcmp.eq.s32.totalorder %v12811_v10, %v9788_v55 }
 0x4c0   :  { %v2065_v60 = vadd.f32 %v2001_v41, %v1869_v48  ;;  %v2391_v17 = vsel %vm2325_vm3, %v8693_v24, 0.0  ;;  %v2624_v61 = vadd.f32 %v10042_v37, %v10280_v2  ;;  %v2626_v51 = vadd.f32 %v10101_v8, %v10315_v29  ;;  %vm6928_vm6 = vmpackc.low %vm2991_vm8, %vm2983_vm14  ;;  %v2541_v22 = vpop.f32.mrf.mxu2  ;;  %v12814_v41 = vld [vmem:[#allocation8_spill] sm:$0xff] }
 0x4c1   :  { %v2259_v43 = vadd.f32 %v2195_v7, %v2063_v25  ;;  %v2393_v23 = vsel %vm2327_vm10, %v8693_v24, 0.0  ;;  %vm957_vm7 = vcmp.eq.s32.totalorder %v10178_v46, %v8601_v45  ;;  %vm959_vm4 = vcmp.eq.s32.totalorder %v10193_v13, %v8601_v45 }
 0x4c2   :  { %v2261_v9 = vadd.f32 %v2197_v28, %v2065_v60  ;;  %v2679_v49 = vpack.c.bf16 %v2626_v51, %v2624_v61  ;;  %v1023_v20 = vsel %vm957_vm7, %v8679_v5, 0.0  ;;  %v1025_v37 = vsel %vm959_vm4, %v8679_v5, 0.0  ;;  %v10421_v5 = vpop.f32.mrf.mxu3  ;;  %v7347_v28 = vld [vmem:[%s12648_s4 + $0x178] sm:$0xff] }
 0x4c3   :  { %v2455_v2 = vadd.f32 %v2391_v17, %v2259_v43  ;;  %vm1153_vm12 = vcmp.eq.s32.totalorder %v10178_v46, %v8603_v4  ;;  %vm1155_vm15 = vcmp.eq.s32.totalorder %v10193_v13, %v8603_v4  ;;  %vm1349_vm11 = vcmp.eq.s32.totalorder %v10178_v46, %v8605_v33  ;;  %4756 = vmatpush.bf16.msrb.mxu2 %v7347_v28 }
 0x4c4   :  { %v2457_v8 = vadd.f32 %v2393_v23, %v2261_v9  ;;  %6929 = vmatmul.msk.bf16.gmra.mxu1 %vm6928_vm6, %v12786_v47  ;;  %v1219_v45 = vsel %vm1153_vm12, %v8681_v26, 0.0  ;;  %v1221_v29 = vsel %vm1155_vm15, %v8681_v26, 0.0  ;;  %vm1351_vm9 = vcmp.eq.s32.totalorder %v10193_v13, %v8605_v33 }
 0x4c5   :  { %vm2921_vm0 = vcmp.eq.s32.totalorder %v12812_v1, %v10326_v18  ;;  %v1283_v39 = vadd.f32 %v1219_v45, %v1023_v20  ;;  %v1285_v4 = vadd.f32 %v1221_v29, %v1025_v37  ;;  %v1415_v0 = vsel %vm1349_vm11, %v8683_v6, 0.0 }
 0x4c6   :  { %v1417_v27 = vsel %vm1351_vm9, %v8683_v6, 0.0  ;;  %vm1545_vm13 = vcmp.eq.s32.totalorder %v10178_v46, %v8607_v38  ;;  %vm1547_vm5 = vcmp.eq.s32.totalorder %v10193_v13, %v8607_v38  ;;  %vm12813_vm1 = vcmask 261120  }
 0x4c7   :  { %v2491_v33 = vpack.c.bf16 %v2457_v8, %v2455_v2  ;;  %v1479_v26 = vadd.f32 %v1415_v0, %v1283_v39  ;;  %v1481_v48 = vadd.f32 %v1417_v27, %v1285_v4  ;;  %vm1741_vm2 = vcmp.eq.s32.totalorder %v10178_v46, %v8613_v52  ;;  %v12819_v27 = vld [vmem:[#allocation9_spill] sm:$0xff] }
 0x4c8   :  { %6396 = vmatmul.msk.bf16.gmra.mxu0 %vm12813_vm1, %v2679_v49  ;;  %vm2929_vm3 = vcmp.eq.s32.totalorder %v12814_v41, %v10326_v18  ;;  %v1611_v7 = vsel %vm1545_vm13, %v8685_v59, 0.0  ;;  %v1613_v6 = vsel %vm1547_vm5, %v8685_v59, 0.0  ;;  %vm1743_vm10 = vcmp.eq.s32.totalorder %v10193_v13, %v8613_v52  ;;  %v2544_v60 = vpop.f32.mrf.mxu2  ;;  %v12816_v49 = vld [vmem:[#allocation18_spill] sm:$0xff]  ;;  %vm12818_vm13 = vmmov %vm12813_vm1 }
 0x4c9   :  { %2573 = vmatmul.bf16.gmra.mxu2 %v2491_v33  ;;  %v1675_v38 = vadd.f32 %v1611_v7, %v1479_v26  ;;  %v1677_v25 = vadd.f32 %v1613_v6, %v1481_v48  ;;  %vm1937_vm14 = vcmp.eq.s32.totalorder %v10178_v46, %v8635_v11  ;;  %vm1939_vm8 = vcmp.eq.s32.totalorder %v10193_v13, %v8635_v11  ;;  %vm6984_vm4 = vmpackc.low %vm2929_vm3, %vm2921_vm0  ;;  %v7339_v33 = vld [vmem:[%s12648_s4 + $0x138] sm:$0xff]  ;;  %v12822_v7 = vld [vmem:[#allocation19_spill] sm:$0xff] }
 0x4ca   :  { %v1807_v17 = vsel %vm1741_vm2, %v8687_v56, 0.0  ;;  %v1809_v59 = vsel %vm1743_vm10, %v8687_v56, 0.0  ;;  %vm2133_vm6 = vcmp.eq.s32.totalorder %v10178_v46, %v8637_v63  ;;  %vm2135_vm7 = vcmp.eq.s32.totalorder %v10193_v13, %v8637_v63  ;;  %v12815_v63 = vld [vmem:[#allocation17_spill] sm:$0xff]  ;;  %v10468_v37 = vpop.f32.mrf.mxu3  ;;  %4667 = vmatpush.bf16.msrb.mxu1 %v7339_v33  ;;  %v12823_v6 = vld [vmem:[#allocation20_spill] sm:$0xff] }
 0x4cb   :  { %v1871_v52 = vadd.f32 %v1807_v17, %v1675_v38  ;;  %v1873_v61 = vadd.f32 %v1809_v59, %v1677_v25  ;;  %v2003_v11 = vsel %vm1937_vm14, %v8689_v62, 0.0  ;;  %v2005_v56 = vsel %vm1939_vm8, %v8689_v62, 0.0  ;;  %v10509_v25 = vld [vmem:[%s12647_s3] sm:$0xff] }
 0x4cc   :  { %v2199_v23 = vsel %vm2133_vm6, %v8691_v35, 0.0  ;;  %v2201_v9 = vsel %vm2135_vm7, %v8691_v35, 0.0  ;;  %vm2999_vm12 = vcmp.eq.s32.totalorder %v12815_v63, %v9788_v55  ;;  %vm3007_vm15 = vcmp.eq.s32.totalorder %v12816_v49, %v9788_v55  ;;  %v10475_v35 = vpop.f32.mrf.mxu0  ;;  %v10515_v59 = vpop.f32.mrf.mxu1 }
 0x4cd   :  { %v2067_v51 = vadd.f32 %v2003_v11, %v1871_v52  ;;  %v2069_v43 = vadd.f32 %v2005_v56, %v1873_v61  ;;  %v2631_v20 = vadd.f32 %v10207_v30, %v2541_v22  ;;  %vm2329_vm11 = vcmp.eq.s32.totalorder %v10178_v46, %v8639_v31  ;;  %12817 = vst [vmem:[#allocation12_spill] sm:$0xff] %v10475_v35  ;;  %vm6930_vm0 = vmpackc.low %vm3007_vm15, %vm2999_vm12 }
 0x4ce   :  { %vm2331_vm9 = vcmp.eq.s32.totalorder %v10193_v13, %v8639_v31  ;;  %v2629_v8 = vadd.f32 %v10145_v53, %v10361_v36  ;;  %v2395_v30 = vsel %vm2329_vm11, %v8693_v24, 0.0  ;;  %vm2937_vm5 = vcmp.eq.s32.totalorder %v12819_v27, %v10326_v18  ;;  %v12820_v53 = vld [vmem:[#allocation10_spill] sm:$0xff]  ;;  %v7355_v36 = vld [vmem:[%s12648_s4 + $0x1b8] sm:$0xff] }
 0x4cf   :  { %6985 = vmatmul.msk.bf16.gmra.mxu3 %vm6984_vm4, %v12786_v47  ;;  %v2263_v2 = vadd.f32 %v2199_v23, %v2067_v51  ;;  %v2265_v62 = vadd.f32 %v2201_v9, %v2069_v43  ;;  %v2397_v22 = vsel %vm2331_vm9, %v8693_v24, 0.0  ;;  %vm2945_vm1 = vcmp.eq.s32.totalorder %v12820_v53, %v10326_v18  ;;  %v7327_v24 = vld [vmem:[%s12648_s4 + $0xd8] sm:$0xff]  ;;  %vm12825_vm4 = vmmov %vm12818_vm13  ;;  %v12827_v43 = vld [vmem:[#allocation21_spill] sm:$0xff] }
 0x4d0   :  { %v2680_v45 = vpack.c.bf16 %v2631_v20, %v2629_v8  ;;  %v2546_v4 = vpop.f32.mrf.mxu2  ;;  %4582 = vmatpush.bf16.msra.mxu0 %v7327_v24  ;;  %4845 = vmatpush.bf16.msrb.mxu3 %v7355_v36  ;;  %vm6986_vm2 = vmpackc.low %vm2945_vm1, %vm2937_vm5  ;;  %vm3015_vm3 = vcmp.eq.s32.totalorder %v12822_v7, %v9788_v55  ;;  %vm3023_vm10 = vcmp.eq.s32.totalorder %v12823_v6, %v9788_v55  ;;  %v10512_v28 = vperm.slane %v10509_v25, 1  ;;  %v12828_v23 = vld [vmem:[#allocation22_spill] sm:$0xff] }
 0x4d1   :  { %v2459_v29 = vadd.f32 %v2395_v30, %v2263_v2  ;;  %v2461_v39 = vadd.f32 %v2397_v22, %v2265_v62  ;;  %v2636_v38 = vadd.f32 %v10311_v14, %v2546_v4  ;;  %v2634_v17 = vadd.f32 %v10264_v3, %v2544_v60  ;;  %vm6932_vm14 = vmpackc.low %vm3023_vm10, %vm3015_vm3  ;;  %v7346_v60 = vld [vmem:[%s12648_s4 + $0x170] sm:$0xff]  ;;  %v12832_v4 = vld [vmem:[#allocation24_spill] sm:$0xff] }
 0x4d2   :  { %v10483_v31 = vpop.f32.mrf.mxu3  ;;  %vm2904_vm8 = vcmp.eq.s32.totalorder %v8267_v12, %v10512_v28  ;;  %vm2912_vm6 = vcmp.eq.s32.totalorder %v12809_v34, %v10512_v28  ;;  %vm2953_vm12 = vcmp.eq.s32.totalorder %v12798_v40, %v10326_v18  ;;  %vm2961_vm15 = vcmp.eq.s32.totalorder %v12799_v50, %v10326_v18  ;;  %4757 = vmatpush.bf16.msrb.mxu2 %v7346_v60  ;;  %vm12829_vm3 = vmmov %vm12825_vm4  ;;  %v7354_v22 = vld [vmem:[%s12648_s4 + $0x1b0] sm:$0xff]  ;;  %v12836_v60 = vld [vmem:[#allocation25_spill] sm:$0xff] }
 0x4d3   :  { %v2493_v0 = vpack.c.bf16 %v2461_v39, %v2459_v29  ;;  %v2681_v52 = vpack.c.bf16 %v2636_v38, %v2634_v17  ;;  %vm6950_vm7 = vmpackc.low %vm2912_vm6, %vm2904_vm8  ;;  %vm3031_vm9 = vcmp.eq.s32.totalorder %v12827_v43, %v9788_v55  ;;  %vm2920_vm5 = vcmp.eq.s32.totalorder %v12812_v1, %v10512_v28  ;;  %v12831_v39 = vld [vmem:[#allocation23_spill] sm:$0xff] }
 0x4d4   :  { %6931 = vmatmul.msk.bf16.gmra.mxu1 %vm6930_vm0, %v12786_v47  ;;  %v10498_v26 = vpop.f32.mrf.mxu0  ;;  %v10535_v11 = vpop.f32.mrf.mxu1  ;;  %vm6988_vm11 = vmpackc.low %vm2961_vm15, %vm2953_vm12  ;;  %vm3039_vm0 = vcmp.eq.s32.totalorder %v12828_v23, %v9788_v55  ;;  %vm2928_vm1 = vcmp.eq.s32.totalorder %v12814_v41, %v10512_v28  ;;  %vm2969_vm10 = vcmp.eq.s32.totalorder %v12803_v15, %v10326_v18  ;;  %4846 = vmatpush.bf16.msrb.mxu3 %v7354_v22 }
 0x4d5   :  { %12821 = vst [vmem:[#allocation13_spill] sm:$0xff] %v10498_v26  ;;  %vm3047_vm6 = vcmp.eq.s32.totalorder %v12831_v39, %v9788_v55  ;;  %vm2936_vm12 = vcmp.eq.s32.totalorder %v12819_v27, %v10512_v28  ;;  %vm2944_vm15 = vcmp.eq.s32.totalorder %v12820_v53, %v10512_v28  ;;  %v7333_v26 = vld [vmem:[%s12648_s4 + $0x108] sm:$0xff] }
 0x4d8   :  { %6397 = vmatmul.msk.bf16.gmra.mxu0 %vm12818_vm13, %v2680_v45  ;;  %v2549_v48 = vpop.f32.mrf.mxu2  ;;  %vm6934_vm13 = vmpackc.low %vm3039_vm0, %vm3031_vm9  ;;  %v7338_v45 = vld [vmem:[%s12648_s4 + $0x130] sm:$0xff]  ;;  %vm2985_vm0 = vcmp.eq.s32.totalorder %v12810_v58, %v10326_v18 }
 0x4d9   :  { %2578 = vmatmul.bf16.gmra.mxu2 %v2493_v0  ;;  %v2639_v20 = vadd.f32 %v10366_v57, %v2549_v48  ;;  %v7326_v57 = vld [vmem:[%s12648_s4 + $0xd0] sm:$0xff]  ;;  %4668 = vmatpush.bf16.msrb.mxu1 %v7338_v45  ;;  %vm12834_vm9 = vmmov %vm12829_vm3 }
 0x4da   :  { %v10517_v61 = vpop.f32.mrf.mxu3  ;;  %4583 = vmatpush.bf16.msra.mxu0 %v7326_v57 }
 0x4dc   :  { %v10523_v14 = vpop.f32.mrf.mxu0 }
 0x4dd   :  { %12824 = vst [vmem:[#allocation34_spill] sm:$0xff] %v10523_v14 }
 0x4df   :  { %6987 = vmatmul.msk.bf16.gmra.mxu3 %vm6986_vm2, %v12786_v47  ;;  %vm6952_vm2 = vmpackc.low %vm2928_vm1, %vm2920_vm5  ;;  %vm3063_vm1 = vcmp.eq.s32.totalorder %v12836_v60, %v9788_v55 }
 0x4e0   :  { %v2551_v3 = vpop.f32.mrf.mxu2 }
 0x4e1   :  { %v2641_v9 = vadd.f32 %v10421_v5, %v2551_v3 }
 0x4e2   :  { %v10537_v56 = vpop.f32.mrf.mxu3 }
 0x4e3   :  { %v2682_v62 = vpack.c.bf16 %v2641_v9, %v2639_v20  ;;  %v12837_v9 = vld [vmem:[#allocation26_spill] sm:$0xff] }
 0x4e4   :  { %6933 = vmatmul.msk.bf16.gmra.mxu1 %vm6932_vm14, %v12786_v47  ;;  %v10539_v51 = vpop.f32.mrf.mxu0  ;;  %vm2977_vm14 = vcmp.eq.s32.totalorder %v12804_v16, %v10326_v18 }
 0x4e5   :  { %12826 = vst [vmem:[#allocation35_spill] sm:$0xff] %v10539_v51  ;;  %v10553_v8 = vpop.f32.mrf.mxu1  ;;  %vm6990_vm8 = vmpackc.low %vm2977_vm14, %vm2969_vm10  ;;  %vm2952_vm10 = vcmp.eq.s32.totalorder %v12798_v40, %v10512_v28  ;;  %vm2960_vm14 = vcmp.eq.s32.totalorder %v12799_v50, %v10512_v28 }
 0x4e8   :  { %6398 = vmatmul.msk.bf16.gmra.mxu0 %vm12825_vm4, %v2681_v52 }
 0x4e9   :  { %6951 = vmatmul.msk.bf16.vlgmr.msra.gmra.mxu2 %vm6950_vm7, %v12786_v47  ;;  %vm3055_vm7 = vcmp.eq.s32.totalorder %v12832_v4, %v9788_v55 }
 0x4ea   :  { %v10555_v30 = vpop.f32.mrf.mxu3  ;;  %vm6936_vm4 = vmpackc.low %vm3055_vm7, %vm3047_vm6  ;;  %vm3001_vm7 = vcmp.eq.s32.totalorder %v12815_v63, %v10326_v18 }
 0x4eb   :  { %vm12839_vm6 = vmmov %vm12834_vm9 }
 0x4ec   :  { %v10558_v5 = vpop.f32.mrf.mxu0 }
 0x4ed   :  { %12830 = vst [vmem:[#allocation30_spill] sm:$0xff] %v10558_v5  ;;  %v10580_v24 = vpop.f32.mrf.mxu1 }
 0x4ef   :  { %6989 = vmatmul.msk.bf16.gmra.mxu3 %vm6988_vm11, %v12786_v47  ;;  %vm6954_vm11 = vmpackc.low %vm2944_vm15, %vm2936_vm12 }
 0x4f0   :  { %v2554_v2 = vpop.f32.mrf.mxu2 }
 0x4f1   :  { %v2644_v36 = vadd.f32 %v10468_v37, %v2554_v2 }
 0x4f2   :  { %v10583_v33 = vpop.f32.mrf.mxu3 }
 0x4f4   :  { %6935 = vmatmul.msk.bf16.gmra.mxu1 %vm6934_vm13, %v12786_v47  ;;  %v10585_v48 = vpop.f32.mrf.mxu0  ;;  %vm2993_vm13 = vcmp.eq.s32.totalorder %v12811_v10, %v10326_v18 }
 0x4f5   :  { %12833 = vst [vmem:[#allocation7_spill] sm:$0xff] %v10585_v48  ;;  %vm6992_vm5 = vmpackc.low %vm2993_vm13, %vm2985_vm0  ;;  %vm2968_vm0 = vcmp.eq.s32.totalorder %v12803_v15, %v10512_v28  ;;  %vm2976_vm13 = vcmp.eq.s32.totalorder %v12804_v16, %v10512_v28 }
 0x4f8   :  { %6399 = vmatmul.msk.bf16.gmra.mxu0 %vm12829_vm3, %v2682_v62  ;;  %v2556_v29 = vpop.f32.mrf.mxu2 }
 0x4f9   :  { %6953 = vmatmul.msk.bf16.gmra.mxu2 %vm6952_vm2, %v12786_v47  ;;  %v2646_v0 = vadd.f32 %v10483_v31, %v2556_v29  ;;  %v7345_v31 = vld [vmem:[%s12648_s4 + $0x168] sm:$0xff]  ;;  %vm3071_vm2 = vcmp.eq.s32.totalorder %v12837_v9, %v9788_v55 }
 0x4fa   :  { %4758 = vmatpush.bf16.msrb.mxu2 %v7345_v31  ;;  %vm6938_vm3 = vmpackc.low %vm3071_vm2, %vm3063_vm1  ;;  %v12841_v31 = vld [vmem:[#allocation27_spill] sm:$0xff]  ;;  %vm3017_vm1 = vcmp.eq.s32.totalorder %v12822_v7, %v10326_v18  ;;  %vm3025_vm2 = vcmp.eq.s32.totalorder %v12823_v6, %v10326_v18 }
 0x4fb   :  { %v2683_v38 = vpack.c.bf16 %v2646_v0, %v2644_v36  ;;  %v7337_v0 = vld [vmem:[%s12648_s4 + $0x128] sm:$0xff]  ;;  %vm3079_vm15 = vcmp.eq.s32.totalorder %v12841_v31, %v9788_v55 }
 0x4fc   :  { %4669 = vmatpush.bf16.msrb.mxu1 %v7337_v0 }
 0x4fe   :  { %v10598_v37 = vpop.f32.mrf.mxu1 }
 0x4ff   :  { %6991 = vmatmul.msk.bf16.gmra.mxu3 %vm6990_vm8, %v12786_v47  ;;  %v10603_v17 = vpop.f32.mrf.mxu3  ;;  %vm6956_vm8 = vmpackc.low %vm2960_vm14, %vm2952_vm10  ;;  %vm3095_vm10 = vcmp.eq.s32.totalorder %v9802_v54, %v9788_v55  ;;  %vm3103_vm14 = vcmp.eq.s32.totalorder %v9805_v21, %v9788_v55 }
 0x501   :  { %v10605_v3 = vpop.f32.mrf.mxu0 }
 0x502   :  { %12835 = vst [vmem:[#allocation8_spill] sm:$0xff] %v10605_v3 }
 0x504   :  { %6937 = vmatmul.msk.bf16.gmra.mxu1 %vm6936_vm4, %v12786_v47  ;;  %vm3009_vm4 = vcmp.eq.s32.totalorder %v12816_v49, %v10326_v18 }
 0x505   :  { %vm6994_vm12 = vmpackc.low %vm3009_vm4, %vm3001_vm7  ;;  %vm2984_vm7 = vcmp.eq.s32.totalorder %v12810_v58, %v10512_v28  ;;  %vm2992_vm4 = vcmp.eq.s32.totalorder %v12811_v10, %v10512_v28 }
 0x506   :  { %v10617_v62 = vpop.f32.mrf.mxu1 }
 0x507   :  { %v10621_v22 = vpop.f32.mrf.mxu3 }
 0x508   :  { %6400 = vmatmul.msk.bf16.gmra.mxu0 %vm12834_vm9, %v2683_v38 }
 0x509   :  { %6955 = vmatmul.msk.bf16.gmra.mxu2 %vm6954_vm11, %v12786_v47  ;;  %v10623_v29 = vpop.f32.mrf.mxu0 }
 0x50a   :  { %v2559_v52 = vpop.f32.mrf.mxu2  ;;  %12838 = vst [vmem:[#allocation9_spill] sm:$0xff] %v10623_v29 }
 0x50b   :  { %v2649_v2 = vadd.f32 %v10517_v61, %v2559_v52  ;;  %v7325_v61 = vld [vmem:[%s12648_s4 + $0xc8] sm:$0xff]  ;;  %v12842_v52 = vld [vmem:[#allocation28_spill] sm:$0xff] }
 0x50c   :  { %4584 = vmatpush.bf16.msra.mxu0 %v7325_v61  ;;  %vm3087_vm11 = vcmp.eq.s32.totalorder %v12842_v52, %v9788_v55 }
 0x50d   :  { %vm6940_vm9 = vmpackc.low %vm3087_vm11, %vm3079_vm15  ;;  %vm3033_vm15 = vcmp.eq.s32.totalorder %v12827_v43, %v10326_v18  ;;  %vm3041_vm11 = vcmp.eq.s32.totalorder %v12828_v23, %v10326_v18 }
 0x50f   :  { %6993 = vmatmul.msk.bf16.gmra.mxu3 %vm6992_vm5, %v12786_v47  ;;  %vm6958_vm5 = vmpackc.low %vm2976_vm13, %vm2968_vm0  ;;  %vm3111_vm0 = vcmp.eq.s32.totalorder %v9918_v32, %v9788_v55  ;;  %vm3119_vm13 = vcmp.eq.s32.totalorder %v12802_v19, %v9788_v55 }
 0x512   :  { %v2561_v20 = vpop.f32.mrf.mxu2 }
 0x513   :  { %v2651_v57 = vadd.f32 %v10537_v56, %v2561_v20  ;;  %v7353_v56 = vld [vmem:[%s12648_s4 + $0x1a8] sm:$0xff] }
 0x514   :  { %6939 = vmatmul.msk.bf16.gmra.mxu1 %vm6938_vm3, %v12786_v47  ;;  %4847 = vmatpush.bf16.msrb.mxu3 %v7353_v56  ;;  %v7344_v56 = vld [vmem:[%s12648_s4 + $0x160] sm:$0xff]  ;;  %vm6996_vm3 = vmpackc.low %vm3025_vm2, %vm3017_vm1  ;;  %vm3000_vm1 = vcmp.eq.s32.totalorder %v12815_v63, %v10512_v28  ;;  %vm3008_vm2 = vcmp.eq.s32.totalorder %v12816_v49, %v10512_v28 }
 0x515   :  { %v2684_v45 = vpack.c.bf16 %v2651_v57, %v2649_v2  ;;  %4759 = vmatpush.bf16.msrb.mxu2 %v7344_v56 }
 0x517   :  { %v10640_v36 = vpop.f32.mrf.mxu1 }
 0x518   :  { %6401 = vmatmul.msk.bf16.gmra.mxu0 %vm12839_vm6, %v2684_v45  ;;  %12840 = vst [vmem:[#allocation10_spill] sm:$0xff] %v10640_v36  ;;  %v10642_v38 = vpop.f32.mrf.mxu3 }
 0x519   :  { %6957 = vmatmul.msk.bf16.gmra.mxu2 %vm6956_vm8, %v12786_v47  ;;  %vm12846_vm8 = vmmov %vm12839_vm6 }
 0x51a   :  { %vm6942_vm6 = vmpackc.low %vm3103_vm14, %vm3095_vm10  ;;  %vm3049_vm14 = vcmp.eq.s32.totalorder %v12831_v39, %v10326_v18 }
 0x51b   :  { %vm12853_vm10 = vmmov %vm12846_vm8 }
 0x51c   :  { %v10649_v20 = vpop.f32.mrf.mxu0 }
 0x51d   :  { %12843 = vst [vmem:[#allocation23_spill] sm:$0xff] %v10649_v20 }
 0x51f   :  { %6995 = vmatmul.msk.bf16.gmra.mxu3 %vm6994_vm12, %v12786_v47  ;;  %v10656_v57 = vpop.f32.mrf.mxu1  ;;  %vm6960_vm12 = vmpackc.low %vm2992_vm4, %vm2984_vm7  ;;  %vm3127_vm7 = vcmp.eq.s32.totalorder %v10053_v44, %v9788_v55  ;;  %vm3135_vm4 = vcmp.eq.s32.totalorder %v10060_v42, %v9788_v55 }
 0x520   :  { %12844 = vst [vmem:[#allocation24_spill] sm:$0xff] %v10656_v57  ;;  %v10658_v45 = vpop.f32.mrf.mxu3 }
 0x523   :  { %v2564_v2 = vpop.f32.mrf.mxu2 }
 0x524   :  { %6941 = vmatmul.msk.bf16.gmra.mxu1 %vm6940_vm9, %v12786_v47  ;;  %v10665_v61 = vpop.f32.mrf.mxu0  ;;  %v2654_v20 = vadd.f32 %v10555_v30, %v2564_v2  ;;  %vm6998_vm9 = vmpackc.low %vm3041_vm11, %vm3033_vm15  ;;  %vm3016_vm15 = vcmp.eq.s32.totalorder %v12822_v7, %v10512_v28  ;;  %vm3024_vm11 = vcmp.eq.s32.totalorder %v12823_v6, %v10512_v28 }
 0x525   :  { %12845 = vst [vmem:[#allocation25_spill] sm:$0xff] %v10665_v61 }
 0x529   :  { %6959 = vmatmul.msk.bf16.gmra.mxu2 %vm6958_vm5, %v12786_v47  ;;  %vm6944_vm5 = vmpackc.low %vm3119_vm13, %vm3111_vm0  ;;  %vm3065_vm13 = vcmp.eq.s32.totalorder %v12836_v60, %v10326_v18 }
 0x52a   :  { %vm12858_vm0 = vmmov %vm12853_vm10 }
 0x52b   :  { %v2566_v0 = vpop.f32.mrf.mxu2 }
 0x52c   :  { %v2656_v3 = vadd.f32 %v10583_v33, %v2566_v0 }
 0x52e   :  { %v2685_v29 = vpack.c.bf16 %v2656_v3, %v2654_v20  ;;  %v7324_v3 = vld [vmem:[%s12648_s4 + $0xc0] sm:$0xff] }
 0x52f   :  { %6997 = vmatmul.msk.bf16.gmra.mxu3 %vm6996_vm3, %v12786_v47  ;;  %v7336_v20 = vld [vmem:[%s12648_s4 + $0x120] sm:$0xff]  ;;  %4585 = vmatpush.bf16.msra.mxu0 %v7324_v3  ;;  %vm6962_vm3 = vmpackc.low %vm3008_vm2, %vm3000_vm1  ;;  %vm3143_vm2 = vcmp.eq.s32.totalorder %v10178_v46, %v9788_v55 }
 0x530   :  { %6402 = vmatmul.msk.bf16.gmra.mxu0 %vm12846_vm8, %v2685_v29  ;;  %v7352_v29 = vld [vmem:[%s12648_s4 + $0x1a0] sm:$0xff]  ;;  %4670 = vmatpush.bf16.msrb.mxu1 %v7336_v20  ;;  %vm3057_vm8 = vcmp.eq.s32.totalorder %v12832_v4, %v10326_v18 }
 0x531   :  { %v10678_v61 = vpop.f32.mrf.mxu1  ;;  %4848 = vmatpush.bf16.msrb.mxu3 %v7352_v29 }
 0x532   :  { %12847 = vst [vmem:[#allocation26_spill] sm:$0xff] %v10678_v61  ;;  %v10680_v56 = vpop.f32.mrf.mxu3 }
 0x534   :  { %6943 = vmatmul.msk.bf16.gmra.mxu1 %vm6942_vm6, %v12786_v47  ;;  %vm7000_vm6 = vmpackc.low %vm3057_vm8, %vm3049_vm14  ;;  %vm3032_vm14 = vcmp.eq.s32.totalorder %v12827_v43, %v10512_v28  ;;  %vm3040_vm8 = vcmp.eq.s32.totalorder %v12828_v23, %v10512_v28 }
 0x535   :  { %v10686_v30 = vpop.f32.mrf.mxu0 }
 0x536   :  { %12848 = vst [vmem:[#allocation27_spill] sm:$0xff] %v10686_v30 }
 0x539   :  { %6961 = vmatmul.msk.bf16.gmra.mxu2 %vm6960_vm12, %v12786_v47  ;;  %v10690_v33 = vpop.f32.mrf.mxu1  ;;  %vm6946_vm12 = vmpackc.low %vm3135_vm4, %vm3127_vm7  ;;  %vm3081_vm4 = vcmp.eq.s32.totalorder %v12841_v31, %v10326_v18 }
 0x53a   :  { %12849 = vst [vmem:[#allocation28_spill] sm:$0xff] %v10690_v33  ;;  %v10705_v2 = vpop.f32.mrf.mxu3  ;;  %vm12863_vm7 = vmmov %vm12858_vm0 }
 0x53c   :  { %v2569_v30 = vpop.f32.mrf.mxu2 }
 0x53d   :  { %v10707_v0 = vpop.f32.mrf.mxu0  ;;  %v2659_v20 = vadd.f32 %v10603_v17, %v2569_v30  ;;  %v7343_v17 = vld [vmem:[%s12648_s4 + $0x158] sm:$0xff] }
 0x53e   :  { %12850 = vst [vmem:[#allocation37_spill] sm:$0xff] %v10707_v0  ;;  %4760 = vmatpush.bf16.msrb.mxu2 %v7343_v17 }
 0x53f   :  { %6999 = vmatmul.msk.bf16.gmra.mxu3 %vm6998_vm9, %v12786_v47  ;;  %vm6964_vm9 = vmpackc.low %vm3024_vm11, %vm3016_vm15 }
 0x541   :  { %v10714_v5 = vpop.f32.mrf.mxu1 }
 0x542   :  { %12851 = vst [vmem:[#allocation38_spill] sm:$0xff] %v10714_v5  ;;  %v10716_v48 = vpop.f32.mrf.mxu3 }
 0x544   :  { %v2571_v29 = vpop.f32.mrf.mxu2  ;;  %6945 = vmatmul.msk.bf16.gmra.mxu1 %vm6944_vm5, %v12786_v47  ;;  %vm3073_vm5 = vcmp.eq.s32.totalorder %v12837_v9, %v10326_v18 }
 0x545   :  { %v10722_v3 = vpop.f32.mrf.mxu0  ;;  %v2661_v0 = vadd.f32 %v10621_v22, %v2571_v29  ;;  %v7334_v29 = vld [vmem:[%s12648_s4 + $0x110] sm:$0xff]  ;;  %vm7002_vm1 = vmpackc.low %vm3073_vm5, %vm3065_vm13  ;;  %vm3048_vm13 = vcmp.eq.s32.totalorder %v12831_v39, %v10512_v28  ;;  %vm3056_vm5 = vcmp.eq.s32.totalorder %v12832_v4, %v10512_v28 }
 0x546   :  { %12852 = vst [vmem:[#allocation39_spill] sm:$0xff] %v10722_v3 }
 0x547   :  { %v2686_v14 = vpack.c.bf16 %v2661_v0, %v2659_v20  ;;  %v7335_v0 = vld [vmem:[%s12648_s4 + $0x118] sm:$0xff] }
 0x548   :  { %4671 = vmatpush.bf16.msrb.mxu1 %v7335_v0 }
 0x549   :  { %6403 = vmatmul.msk.bf16.gmra.mxu0 %vm12853_vm10, %v2686_v14  ;;  %6963 = vmatmul.msk.bf16.gmra.mxu2 %vm6962_vm3, %v12786_v47  ;;  %v10729_v51 = vpop.f32.mrf.mxu1  ;;  %vm3151_vm3 = vcmp.eq.s32.totalorder %v10193_v13, %v9788_v55 }
 0x54a   :  { %12854 = vst [vmem:[#allocation40_spill] sm:$0xff] %v10729_v51  ;;  %v10738_v30 = vpop.f32.mrf.mxu3  ;;  %v7332_v51 = vld [vmem:[%s12648_s4 + $0x100] sm:$0xff]  ;;  %vm6948_vm10 = vmpackc.low %vm3151_vm3, %vm3143_vm2 }
 0x54b   :  { %vm6968_vm3 = vmpackc.low %vm3056_vm5, %vm3048_vm13 }
 0x54c   :  { %v2574_v14 = vpop.f32.mrf.mxu2  ;;  %4672 = vmatpush.bf16.msrb.mxu1 %v7334_v29 }
 0x54d   :  { %v10740_v22 = vpop.f32.mrf.mxu0  ;;  %v2664_v0 = vadd.f32 %v10642_v38, %v2574_v14 }
 0x54e   :  { %12855 = vst [vmem:[#allocation41_spill] sm:$0xff] %v10740_v22 }
 0x54f   :  { %7001 = vmatmul.msk.bf16.gmra.mxu3 %vm7000_vm6, %v12786_v47  ;;  %vm6966_vm6 = vmpackc.low %vm3040_vm8, %vm3032_vm14  ;;  %vm3097_vm14 = vcmp.eq.s32.totalorder %v9802_v54, %v10326_v18  ;;  %vm3105_vm8 = vcmp.eq.s32.totalorder %v9805_v21, %v10326_v18 }
 0x550   :  { %4673 = vmatpush.bf16.msrb.mxu1 %v7333_v26  ;;  %v10786_v26 = vld [vmem:[%s12648_s4 + $0x1f8] sm:$0xff] }
 0x551   :  { %v10753_v20 = vpop.f32.mrf.mxu1  ;;  %4934 = vmatpush.bf16.msrb.mxu0 %v10786_v26 }
 0x552   :  { %12856 = vst [vmem:[#allocation42_spill] sm:$0xff] %v10753_v20  ;;  %v10755_v17 = vpop.f32.mrf.mxu3 }
 0x554   :  { %v2576_v22 = vpop.f32.mrf.mxu2  ;;  %6947 = vmatmul.msk.bf16.gmra.mxu1 %vm6946_vm12, %v12786_v47  ;;  %vm3089_vm12 = vcmp.eq.s32.totalorder %v12842_v52, %v10326_v18 }
 0x555   :  { %v10761_v3 = vpop.f32.mrf.mxu0  ;;  %v2666_v35 = vadd.f32 %v10658_v45, %v2576_v22  ;;  %4674 = vmatpush.bf16.msrb.mxu1 %v7332_v51  ;;  %vm7004_vm15 = vmpackc.low %vm3089_vm12, %vm3081_vm4 }
 0x556   :  { %12857 = vst [vmem:[#allocation43_spill] sm:$0xff] %v10761_v3 }
 0x557   :  { %v2687_v20 = vpack.c.bf16 %v2666_v35, %v2664_v0  ;;  %v7351_v35 = vld [vmem:[%s12648_s4 + $0x198] sm:$0xff] }
 0x558   :  { %4849 = vmatpush.bf16.msrb.mxu3 %v7351_v35 }
 0x559   :  { %6404 = vmatmul.msk.bf16.gmra.mxu0 %vm12858_vm0, %v2687_v20  ;;  %6965 = vmatmul.msk.bf16.gmra.mxu2 %vm6964_vm9, %v12786_v47  ;;  %v10774_v29 = vpop.f32.mrf.mxu1 }
 0x55a   :  { %12859 = vst [vmem:[#allocation44_spill] sm:$0xff] %v10774_v29  ;;  %v10788_v38 = vpop.f32.mrf.mxu3 }
 0x55c   :  { %v2579_v22 = vpop.f32.mrf.mxu2 }
 0x55d   :  { %v10790_v45 = vpop.f32.mrf.mxu0  ;;  %v2669_v55 = vadd.f32 %v10680_v56, %v2579_v22  ;;  %v7342_v56 = vld [vmem:[%s12648_s4 + $0x150] sm:$0xff] }
 0x55e   :  { %12860 = vst [vmem:[#allocation45_spill] sm:$0xff] %v10790_v45  ;;  %4761 = vmatpush.bf16.msrb.mxu2 %v7342_v56 }
 0x55f   :  { %7003 = vmatmul.msk.bf16.gmra.mxu3 %vm7002_vm1, %v12786_v47 }
 0x561   :  { %v10798_v14 = vpop.f32.mrf.mxu1 }
 0x562   :  { %12861 = vst [vmem:[#allocation46_spill] sm:$0xff] %v10798_v14  ;;  %v10800_v20 = vpop.f32.mrf.mxu3 }
 0x564   :  { %v2581_v0 = vpop.f32.mrf.mxu2  ;;  %6949 = vmatmul.msk.bf16.gmra.mxu1 %vm6948_vm10, %v12786_v47 }
 0x565   :  { %v10806_v51 = vpop.f32.mrf.mxu0  ;;  %v2671_v35 = vadd.f32 %v10705_v2, %v2581_v0  ;;  %v10825_v2 = vperm.slane %v10509_v25, 4 }
 0x566   :  { %12862 = vst [vmem:[#allocation47_spill] sm:$0xff] %v10806_v51 }
 0x567   :  { %v2688_v3 = vpack.c.bf16 %v2671_v35, %v2669_v55  ;;  %vm2907_vm11 = vcmp.eq.s32.totalorder %v8267_v12, %v10825_v2  ;;  %vm2915_vm9 = vcmp.eq.s32.totalorder %v12809_v34, %v10825_v2  ;;  %v10837_v55 = vperm.slane %v10509_v25, 3 }
 0x568   :  { %vm7046_vm0 = vmpackc.low %vm2915_vm9, %vm2907_vm11  ;;  %vm2931_vm4 = vcmp.eq.s32.totalorder %v12814_v41, %v10825_v2  ;;  %vm3072_vm11 = vcmp.eq.s32.totalorder %v12837_v9, %v10512_v28 }
 0x569   :  { %6405 = vmatmul.msk.bf16.gmra.mxu0 %vm12863_vm7, %v2688_v3  ;;  %6967 = vmatmul.msk.bf16.gmra.mxu2 %vm6966_vm6, %v12786_v47  ;;  %v10813_v45 = vpop.f32.mrf.mxu1  ;;  %vm2906_vm1 = vcmp.eq.s32.totalorder %v8267_v12, %v10837_v55  ;;  %vm2914_vm2 = vcmp.eq.s32.totalorder %v12809_v34, %v10837_v55  ;;  %vm7006_vm6 = vmpackc.low %vm3105_vm8, %vm3097_vm14  ;;  %vm2923_vm7 = vcmp.eq.s32.totalorder %v12812_v1, %v10825_v2 }
 0x56a   :  { %12864 = vst [vmem:[#allocation48_spill] sm:$0xff] %v10813_v45  ;;  %v10822_v22 = vpop.f32.mrf.mxu3  ;;  %vm7014_vm10 = vmpackc.low %vm2914_vm2, %vm2906_vm1  ;;  %v7350_v45 = vld [vmem:[%s12648_s4 + $0x190] sm:$0xff]  ;;  %vm2922_vm9 = vcmp.eq.s32.totalorder %v12812_v1, %v10837_v55  ;;  %vm3113_vm1 = vcmp.eq.s32.totalorder %v9918_v32, %v10326_v18  ;;  %vm3121_vm2 = vcmp.eq.s32.totalorder %v12802_v19, %v10326_v18  ;;  %vm2947_vm14 = vcmp.eq.s32.totalorder %v12820_v53, %v10825_v2 }
 0x56b   :  { %4850 = vmatpush.bf16.msrb.mxu3 %v7350_v45  ;;  %vm7048_vm12 = vmpackc.low %vm2931_vm4, %vm2923_vm7  ;;  %vm3088_vm7 = vcmp.eq.s32.totalorder %v12842_v52, %v10512_v28  ;;  %vm2938_vm4 = vcmp.eq.s32.totalorder %v12819_v27, %v10837_v55 }
 0x56c   :  { %v10827_v3 = vpop.f32.mrf.mxu2 }
 0x56d   :  { %v10829_v0 = vpop.f32.mrf.mxu0 }
 0x56e   :  { %12865 = vst [vmem:[#allocation49_spill] sm:$0xff] %v10829_v0 }
 0x56f   :  { %7005 = vmatmul.msk.bf16.gmra.mxu3 %vm7004_vm15, %v12786_v47  ;;  %vm3064_vm15 = vcmp.eq.s32.totalorder %v12836_v60, %v10512_v28 }
 0x570   :  { %vm6970_vm13 = vmpackc.low %vm3072_vm11, %vm3064_vm15 }
 0x571   :  { %v10839_v35 = vpop.f32.mrf.mxu1 }
 0x572   :  { %12866 = vst [vmem:[#allocation50_spill] sm:$0xff] %v10839_v35  ;;  %v10841_v56 = vpop.f32.mrf.mxu3 }
 0x573   :  { %12867 = vst [vmem:[#allocation51_spill] sm:$0xff] %v10841_v56 }
 0x574   :  { %v10851_v51 = vpop.f32.mrf.mxu2  ;;  %7047 = vmatmul.msk.bf16.vlgmr.msrb.gmra.mxu1 %vm7046_vm0, %v12786_v47  ;;  %vm2930_vm0 = vcmp.eq.s32.totalorder %v12814_v41, %v10837_v55 }
 0x575   :  { %v10854_v0 = vpop.f32.mrf.mxu0  ;;  %vm7016_vm5 = vmpackc.low %vm2930_vm0, %vm2922_vm9  ;;  %vm3129_vm9 = vcmp.eq.s32.totalorder %v10053_v44, %v10326_v18  ;;  %vm3137_vm0 = vcmp.eq.s32.totalorder %v10060_v42, %v10326_v18 }
 0x576   :  { %12868 = vst [vmem:[#allocation52_spill] sm:$0xff] %v10854_v0  ;;  %v10870_v0 = vld [vmem:[%s12648_s4 + $0x1f0] sm:$0xff] }
 0x577   :  { %4935 = vmatpush.bf16.msrb.mxu0 %v10870_v0 }
 0x579   :  { %6969 = vmatmul.msk.bf16.gmra.mxu2 %vm6968_vm3, %v12786_v47  ;;  %7015 = vmatmul.msk.bf16.vlgmr.msra.gmra.mxu0 %vm7014_vm10, %v12786_v47  ;;  %v10858_v35 = vpop.f32.mrf.mxu1  ;;  %vm7008_vm3 = vmpackc.low %vm3121_vm2, %vm3113_vm1  ;;  %vm2939_vm10 = vcmp.eq.s32.totalorder %v12819_v27, %v10825_v2  ;;  %vm2963_vm1 = vcmp.eq.s32.totalorder %v12799_v50, %v10825_v2 }
 0x57a   :  { %12869 = vst [vmem:[#allocation53_spill] sm:$0xff] %v10858_v35  ;;  %v10872_v14 = vpop.f32.mrf.mxu3  ;;  %vm7050_vm8 = vmpackc.low %vm2947_vm14, %vm2939_vm10  ;;  %vm3104_vm10 = vcmp.eq.s32.totalorder %v9805_v21, %v10512_v28  ;;  %vm2954_vm14 = vcmp.eq.s32.totalorder %v12798_v40, %v10837_v55 }
 0x57b   :  { %12870 = vst [vmem:[#allocation54_spill] sm:$0xff] %v10872_v14 }
 0x57c   :  { %v10875_v35 = vpop.f32.mrf.mxu2 }
 0x57d   :  { %v10882_v29 = vpop.f32.mrf.mxu0 }
 0x57e   :  { %12871 = vst [vmem:[#allocation55_spill] sm:$0xff] %v10882_v29 }
 0x57f   :  { %7007 = vmatmul.msk.bf16.gmra.mxu3 %vm7006_vm6, %v12786_v47  ;;  %vm3080_vm6 = vcmp.eq.s32.totalorder %v12841_v31, %v10512_v28 }
 0x580   :  { %vm6972_vm15 = vmpackc.low %vm3088_vm7, %vm3080_vm6 }
 0x581   :  { %v10884_v5 = vpop.f32.mrf.mxu1 }
 0x582   :  { %12872 = vst [vmem:[#allocation56_spill] sm:$0xff] %v10884_v5  ;;  %v10886_v33 = vpop.f32.mrf.mxu3  ;;  %v7341_v5 = vld [vmem:[%s12648_s4 + $0x148] sm:$0xff] }
 0x583   :  { %12873 = vst [vmem:[#allocation57_spill] sm:$0xff] %v10886_v33  ;;  %4762 = vmatpush.bf16.msrb.mxu2 %v7341_v5 }
 0x584   :  { %v10896_v45 = vpop.f32.mrf.mxu2  ;;  %7049 = vmatmul.msk.bf16.gmra.mxu1 %vm7048_vm12, %v12786_v47  ;;  %vm2946_vm12 = vcmp.eq.s32.totalorder %v12820_v53, %v10837_v55 }
 0x585   :  { %v10912_v61 = vpop.f32.mrf.mxu0  ;;  %vm7018_vm11 = vmpackc.low %vm2946_vm12, %vm2938_vm4  ;;  %vm3145_vm4 = vcmp.eq.s32.totalorder %v10178_v46, %v10326_v18  ;;  %vm3153_vm12 = vcmp.eq.s32.totalorder %v10193_v13, %v10326_v18 }
 0x586   :  { %12876 = vst [vmem:[#allocation60_spill] sm:$0xff] %v10912_v61 }
 0x589   :  { %6971 = vmatmul.msk.bf16.gmra.mxu2 %vm6970_vm13, %v12786_v47  ;;  %7017 = vmatmul.msk.bf16.gmra.mxu0 %vm7016_vm5, %v12786_v47  ;;  %v10901_v29 = vpop.f32.mrf.mxu1  ;;  %vm7010_vm13 = vmpackc.low %vm3137_vm0, %vm3129_vm9  ;;  %vm2955_vm5 = vcmp.eq.s32.totalorder %v12798_v40, %v10825_v2  ;;  %vm2979_vm9 = vcmp.eq.s32.totalorder %v12804_v16, %v10825_v2 }
 0x58a   :  { %12874 = vst [vmem:[#allocation58_spill] sm:$0xff] %v10901_v29  ;;  %v10910_v33 = vpop.f32.mrf.mxu3  ;;  %vm7052_vm2 = vmpackc.low %vm2963_vm1, %vm2955_vm5  ;;  %vm3120_vm5 = vcmp.eq.s32.totalorder %v12802_v19, %v10512_v28  ;;  %vm2970_vm1 = vcmp.eq.s32.totalorder %v12803_v15, %v10837_v55 }
 0x58b   :  { %12875 = vst [vmem:[#allocation59_spill] sm:$0xff] %v10910_v33 }
 0x58c   :  { %v10914_v14 = vpop.f32.mrf.mxu2 }
 0x58d   :  { %v10936_v61 = vpop.f32.mrf.mxu0 }
 0x58e   :  { %12879 = vst [vmem:[#allocation63_spill] sm:$0xff] %v10936_v61  ;;  %v7361_v61 = vld [vmem:[%s12648_s4 + $0x1e8] sm:$0xff] }
 0x58f   :  { %7009 = vmatmul.msk.bf16.gmra.mxu3 %vm7008_vm3, %v12786_v47  ;;  %4936 = vmatpush.bf16.msrb.mxu0 %v7361_v61  ;;  %vm3096_vm3 = vcmp.eq.s32.totalorder %v9802_v54, %v10512_v28 }
 0x590   :  { %vm6974_vm6 = vmpackc.low %vm3104_vm10, %vm3096_vm3 }
 0x591   :  { %v10921_v29 = vpop.f32.mrf.mxu1 }
 0x592   :  { %12877 = vst [vmem:[#allocation61_spill] sm:$0xff] %v10921_v29  ;;  %v10923_v57 = vpop.f32.mrf.mxu3 }
 0x593   :  { %12878 = vst [vmem:[#allocation62_spill] sm:$0xff] %v10923_v57  ;;  %v7349_v57 = vld [vmem:[%s12648_s4 + $0x188] sm:$0xff] }
 0x594   :  { %v10933_v5 = vpop.f32.mrf.mxu2  ;;  %7051 = vmatmul.msk.bf16.gmra.mxu1 %vm7050_vm8, %v12786_v47  ;;  %4851 = vmatpush.bf16.msrb.mxu3 %v7349_v57  ;;  %vm2962_vm8 = vcmp.eq.s32.totalorder %v12799_v50, %v10837_v55 }
 0x595   :  { %v10959_v36 = vpop.f32.mrf.mxu0  ;;  %vm7020_vm7 = vmpackc.low %vm2962_vm8, %vm2954_vm14 }
 0x596   :  { %12882 = vst [vmem:[#allocation66_spill] sm:$0xff] %v10959_v36 }
 0x599   :  { %6973 = vmatmul.msk.bf16.gmra.mxu2 %vm6972_vm15, %v12786_v47  ;;  %7019 = vmatmul.msk.bf16.gmra.mxu0 %vm7018_vm11, %v12786_v47  ;;  %v10940_v29 = vpop.f32.mrf.mxu1  ;;  %vm7012_vm15 = vmpackc.low %vm3153_vm12, %vm3145_vm4  ;;  %vm2971_vm11 = vcmp.eq.s32.totalorder %v12803_v15, %v10825_v2  ;;  %vm2995_vm4 = vcmp.eq.s32.totalorder %v12811_v10, %v10825_v2 }
 0x59a   :  { %12880 = vst [vmem:[#allocation64_spill] sm:$0xff] %v10940_v29  ;;  %v10952_v33 = vpop.f32.mrf.mxu3  ;;  %v7348_v29 = vld [vmem:[%s12648_s4 + $0x180] sm:$0xff]  ;;  %vm7054_vm0 = vmpackc.low %vm2979_vm9, %vm2971_vm11  ;;  %vm3136_vm11 = vcmp.eq.s32.totalorder %v10060_v42, %v10512_v28  ;;  %vm2986_vm9 = vcmp.eq.s32.totalorder %v12810_v58, %v10837_v55 }
 0x59b   :  { %12881 = vst [vmem:[#allocation65_spill] sm:$0xff] %v10952_v33  ;;  %4852 = vmatpush.bf16.msrb.mxu3 %v7348_v29 }
 0x59c   :  { %v10954_v56 = vpop.f32.mrf.mxu2 }
 0x59d   :  { %v10981_v29 = vpop.f32.mrf.mxu0 }
 0x59e   :  { %12885 = vst [vmem:[#allocation69_spill] sm:$0xff] %v10981_v29 }
 0x59f   :  { %7011 = vmatmul.msk.bf16.gmra.mxu3 %vm7010_vm13, %v12786_v47  ;;  %vm3112_vm13 = vcmp.eq.s32.totalorder %v9918_v32, %v10512_v28 }
 0x5a0   :  { %vm6976_vm3 = vmpackc.low %vm3120_vm5, %vm3112_vm13 }
 0x5a1   :  { %v10966_v57 = vpop.f32.mrf.mxu1 }
 0x5a2   :  { %12883 = vst [vmem:[#allocation67_spill] sm:$0xff] %v10966_v57  ;;  %v10968_v33 = vpop.f32.mrf.mxu3 }
 0x5a3   :  { %12884 = vst [vmem:[#allocation68_spill] sm:$0xff] %v10968_v33  ;;  %v7340_v33 = vld [vmem:[%s12648_s4 + $0x140] sm:$0xff] }
 0x5a4   :  { %v10978_v36 = vpop.f32.mrf.mxu2  ;;  %7053 = vmatmul.msk.bf16.gmra.mxu1 %vm7052_vm2, %v12786_v47  ;;  %4763 = vmatpush.bf16.msrb.mxu2 %v7340_v33  ;;  %vm2978_vm2 = vcmp.eq.s32.totalorder %v12804_v16, %v10837_v55 }
 0x5a5   :  { %vm7022_vm10 = vmpackc.low %vm2978_vm2, %vm2970_vm1 }
 0x5a8   :  { %7472 = vmatpush.bf16.msra.mxu2 %v10786_v26 }
 0x5a9   :  { %6975 = vmatmul.msk.bf16.gmra.mxu2 %vm6974_vm6, %v12786_v47  ;;  %7021 = vmatmul.msk.bf16.gmra.mxu0 %vm7020_vm7, %v12786_v47  ;;  %v10985_v57 = vpop.f32.mrf.mxu1  ;;  %vm2987_vm7 = vcmp.eq.s32.totalorder %v12810_v58, %v10825_v2 }
 0x5aa   :  { %12886 = vst [vmem:[#allocation70_spill] sm:$0xff] %v10985_v57  ;;  %v10994_v21 = vpop.f32.mrf.mxu3  ;;  %vm7056_vm12 = vmpackc.low %vm2995_vm4, %vm2987_vm7  ;;  %vm3152_vm7 = vcmp.eq.s32.totalorder %v10193_v13, %v10512_v28  ;;  %vm3002_vm4 = vcmp.eq.s32.totalorder %v12815_v63, %v10837_v55 }
 0x5ab   :  { %12887 = vst [vmem:[#allocation71_spill] sm:$0xff] %v10994_v21 }
 0x5ac   :  { %v10996_v29 = vpop.f32.mrf.mxu2  ;;  %7473 = vmatpush.bf16.msra.mxu2 %v10870_v0  ;;  %v11023_v0 = vperm.slane %v10509_v25, 6 }
 0x5ad   :  { %v11007_v57 = vpop.f32.mrf.mxu0 }
 0x5ae   :  { %12889 = vst [vmem:[#allocation73_spill] sm:$0xff] %v11007_v57  ;;  %vm2909_vm14 = vcmp.eq.s32.totalorder %v8267_v12, %v11023_v0  ;;  %vm2917_vm8 = vcmp.eq.s32.totalorder %v12809_v34, %v11023_v0  ;;  %vm2925_vm1 = vcmp.eq.s32.totalorder %v12812_v1, %v11023_v0  ;;  %vm2933_vm2 = vcmp.eq.s32.totalorder %v12814_v41, %v11023_v0 }
 0x5af   :  { %7013 = vmatmul.msk.bf16.gmra.mxu3 %vm7012_vm15, %v12786_v47  ;;  %vm7110_vm6 = vmpackc.low %vm2917_vm8, %vm2909_vm14  ;;  %vm3128_vm15 = vcmp.eq.s32.totalorder %v10053_v44, %v10512_v28  ;;  %vm3011_vm14 = vcmp.eq.s32.totalorder %v12816_v49, %v10825_v2 }
 0x5b0   :  { %7474 = vmatpush.bf16.msra.mxu2 %v7361_v61  ;;  %v7360_v61 = vld [vmem:[%s12648_s4 + $0x1e0] sm:$0xff]  ;;  %vm6978_vm13 = vmpackc.low %vm3136_vm11, %vm3128_vm15 }
 0x5b1   :  { %v11005_v18 = vpop.f32.mrf.mxu1  ;;  %4937 = vmatpush.bf16.msrb.mxu0 %v7360_v61 }
 0x5b2   :  { %12888 = vst [vmem:[#allocation72_spill] sm:$0xff] %v11005_v18  ;;  %v11009_v33 = vpop.f32.mrf.mxu3 }
 0x5b3   :  { %12890 = vst [vmem:[#allocation74_spill] sm:$0xff] %v11009_v33 }
 0x5b4   :  { %v11019_v26 = vpop.f32.mrf.mxu2  ;;  %7055 = vmatmul.msk.bf16.gmra.mxu1 %vm7054_vm0, %v12786_v47  ;;  %7475 = vmatpush.bf16.msra.mxu2 %v7360_v61  ;;  %vm2994_vm0 = vcmp.eq.s32.totalorder %v12811_v10, %v10837_v55 }
 0x5b5   :  { %v11040_v21 = vpop.f32.mrf.mxu0  ;;  %vm7024_vm5 = vmpackc.low %vm2994_vm0, %vm2986_vm9  ;;  %vm2941_vm9 = vcmp.eq.s32.totalorder %v12819_v27, %v11023_v0  ;;  %vm2949_vm0 = vcmp.eq.s32.totalorder %v12820_v53, %v11023_v0 }
 0x5b6   :  { %12894 = vst [vmem:[#allocation78_spill] sm:$0xff] %v11040_v21 }
 0x5b9   :  { %6977 = vmatmul.msk.bf16.gmra.mxu2 %vm6976_vm3, %v12786_v47  ;;  %7023 = vmatmul.msk.bf16.gmra.mxu0 %vm7022_vm10, %v12786_v47  ;;  %v11027_v57 = vpop.f32.mrf.mxu1  ;;  %vm7112_vm3 = vmpackc.low %vm2933_vm2, %vm2925_vm1  ;;  %vm3003_vm10 = vcmp.eq.s32.totalorder %v12815_v63, %v10825_v2  ;;  %vm3027_vm1 = vcmp.eq.s32.totalorder %v12823_v6, %v10825_v2 }
 0x5ba   :  { %12891 = vst [vmem:[#allocation75_spill] sm:$0xff] %v11027_v57  ;;  %v11036_v18 = vpop.f32.mrf.mxu3  ;;  %vm7058_vm8 = vmpackc.low %vm3011_vm14, %vm3003_vm10  ;;  %vm3026_vm10 = vcmp.eq.s32.totalorder %v12823_v6, %v10837_v55 }
 0x5bb   :  { %12892 = vst [vmem:[#allocation76_spill] sm:$0xff] %v11036_v18  ;;  %v11075_v18 = vld [vmem:[%s12650_s6 + $0x2] ss:$0 sm:$0xff] }
 0x5bc   :  { %v11038_v33 = vpop.f32.mrf.mxu2  ;;  %12900 = vst [vmem:[#allocation84_spill] sm:$0xff] %v11075_v18 }
 0x5bd   :  { %12893 = vst [vmem:[#allocation77_spill] sm:$0xff] %v11038_v33 }
 0x5bf   :  { %7111 = vmatmul.msk.bf16.vlgmr.msrb.gmra.mxu3 %vm7110_vm6, %v12786_v47  ;;  %vm3144_vm6 = vcmp.eq.s32.totalorder %v10178_v46, %v10512_v28 }
 0x5c0   :  { %vm6980_vm15 = vmpackc.low %vm3152_vm7, %vm3144_vm6 }
 0x5c1   :  { %v11047_v57 = vpop.f32.mrf.mxu1 }
 0x5c2   :  { %12895 = vst [vmem:[#allocation79_spill] sm:$0xff] %v11047_v57  ;;  %v11049_v19 = vpop.f32.mrf.mxu3 }
 0x5c3   :  { %12896 = vst [vmem:[#allocation80_spill] sm:$0xff] %v11049_v19 }
 0x5c4   :  { %v11059_v61 = vpop.f32.mrf.mxu2  ;;  %7057 = vmatmul.msk.bf16.gmra.mxu1 %vm7056_vm12, %v12786_v47  ;;  %vm3010_vm12 = vcmp.eq.s32.totalorder %v12816_v49, %v10837_v55 }
 0x5c5   :  { %12897 = vst [vmem:[#allocation81_spill] sm:$0xff] %v11059_v61  ;;  %vm7026_vm11 = vmpackc.low %vm3010_vm12, %vm3002_vm4  ;;  %vm2957_vm4 = vcmp.eq.s32.totalorder %v12798_v40, %v11023_v0  ;;  %vm2965_vm12 = vcmp.eq.s32.totalorder %v12799_v50, %v11023_v0 }
 0x5c6   :  { %v2831_v21 = vpop.f32.mrf.mxu0 }
 0x5c7   :  { %v2832_v44 = vadd.f32 %v11075_v18, %v2831_v21 }
 0x5c9   :  { %6979 = vmatmul.msk.bf16.gmra.mxu2 %vm6978_vm13, %v12786_v47  ;;  %7025 = vmatmul.msk.bf16.gmra.mxu0 %vm7024_vm5, %v12786_v47  ;;  %v11064_v57 = vpop.f32.mrf.mxu1  ;;  %vm7114_vm13 = vmpackc.low %vm2949_vm0, %vm2941_vm9  ;;  %vm3019_vm5 = vcmp.eq.s32.totalorder %v12822_v7, %v10825_v2  ;;  %vm3043_vm9 = vcmp.eq.s32.totalorder %v12828_v23, %v10825_v2 }
 0x5ca   :  { %12898 = vst [vmem:[#allocation82_spill] sm:$0xff] %v11064_v57  ;;  %v11070_v19 = vpop.f32.mrf.mxu3  ;;  %vm7060_vm2 = vmpackc.low %vm3027_vm1, %vm3019_vm5  ;;  %vm3042_vm5 = vcmp.eq.s32.totalorder %v12828_v23, %v10837_v55 }
 0x5cb   :  { %12899 = vst [vmem:[#allocation83_spill] sm:$0xff] %v11070_v19  ;;  %v2872_v19 = vmax.f32 %v2832_v44, 0.0 }
 0x5cc   :  { %v11077_v42 = vpop.f32.mrf.mxu2 }
 0x5cd   :  { %12901 = vst [vmem:[#allocation85_spill] sm:$0xff] %v11077_v42 }
 0x5ce   :  { %v2833_v61 = vpop.f32.mrf.mxu0 }
 0x5cf   :  { %v2834_v57 = vadd.f32 %v11075_v18, %v2833_v61  ;;  %7113 = vmatmul.msk.bf16.gmra.mxu3 %vm7112_vm3, %v12786_v47  ;;  %vm3018_vm3 = vcmp.eq.s32.totalorder %v12822_v7, %v10837_v55 }
 0x5d0   :  { %vm7028_vm6 = vmpackc.low %vm3026_vm10, %vm3018_vm3 }
 0x5d1   :  { %v2873_v33 = vmax.f32 %v2834_v57, 0.0  ;;  %v11086_v32 = vpop.f32.mrf.mxu1 }
 0x5d2   :  { %12902 = vst [vmem:[#allocation86_spill] sm:$0xff] %v11086_v32  ;;  %v11088_v42 = vpop.f32.mrf.mxu3 }
 0x5d3   :  { %12903 = vst [vmem:[#allocation87_spill] sm:$0xff] %v11088_v42  ;;  %v11094_v21 = vpack.c.bf16 %v2873_v33, %v2872_v19  ;;  %v7359_v19 = vld [vmem:[%s12648_s4 + $0x1d8] sm:$0xff] }
 0x5d4   :  { %v11100_v44 = vpop.f32.mrf.mxu2  ;;  %7059 = vmatmul.msk.bf16.gmra.mxu1 %vm7058_vm8, %v12786_v47  ;;  %4938 = vmatpush.bf16.msrb.mxu0 %v7359_v19 }
 0x5d5   :  { %12904 = vst [vmem:[#allocation88_spill] sm:$0xff] %v11094_v21  ;;  %7476 = vmatpush.bf16.msra.mxu2 %v7359_v19 }
 0x5d6   :  { %v2836_v57 = vpop.f32.mrf.mxu0 }
 0x5d7   :  { %v2837_v21 = vadd.f32 %v11075_v18, %v2836_v57 }
 0x5d9   :  { %6981 = vmatmul.msk.bf16.gmra.mxu2 %vm6980_vm15, %v12786_v47  ;;  %7027 = vmatmul.msk.bf16.gmra.mxu0 %vm7026_vm11, %v12786_v47  ;;  %v11105_v28 = vpop.f32.mrf.mxu1  ;;  %v2874_v19 = vmax.f32 %v2837_v21, 0.0  ;;  %vm7116_vm15 = vmpackc.low %vm2965_vm12, %vm2957_vm4  ;;  %vm3035_vm11 = vcmp.eq.s32.totalorder %v12827_v43, %v10825_v2  ;;  %vm3059_vm4 = vcmp.eq.s32.totalorder %v12832_v4, %v10825_v2 }
 0x5da   :  { %12905 = vst [vmem:[#allocation89_spill] sm:$0xff] %v11105_v28  ;;  %v11114_v33 = vpop.f32.mrf.mxu3  ;;  %vm7062_vm0 = vmpackc.low %vm3043_vm9, %vm3035_vm11  ;;  %vm3058_vm11 = vcmp.eq.s32.totalorder %v12832_v4, %v10837_v55 }
 0x5db   :  { %12906 = vst [vmem:[#allocation90_spill] sm:$0xff] %v11114_v33  ;;  %v11126_v33 = vperm.slane %v10509_v25, 5 }
 0x5dc   :  { %v11116_v61 = vpop.f32.mrf.mxu2 }
 0x5dd   :  { %12907 = vst [vmem:[#allocation91_spill] sm:$0xff] %v11116_v61  ;;  %vm2908_vm14 = vcmp.eq.s32.totalorder %v8267_v12, %v11126_v33  ;;  %vm2916_vm8 = vcmp.eq.s32.totalorder %v12809_v34, %v11126_v33  ;;  %vm2924_vm1 = vcmp.eq.s32.totalorder %v12812_v1, %v11126_v33  ;;  %vm2940_vm9 = vcmp.eq.s32.totalorder %v12819_v27, %v11126_v33 }
 0x5de   :  { %v2838_v28 = vpop.f32.mrf.mxu0  ;;  %vm7078_vm7 = vmpackc.low %vm2916_vm8, %vm2908_vm14  ;;  %vm2973_vm14 = vcmp.eq.s32.totalorder %v12803_v15, %v11023_v0  ;;  %vm2981_vm8 = vcmp.eq.s32.totalorder %v12804_v16, %v11023_v0 }
 0x5df   :  { %v2839_v32 = vadd.f32 %v11075_v18, %v2838_v28  ;;  %7115 = vmatmul.msk.bf16.gmra.mxu3 %vm7114_vm13, %v12786_v47  ;;  %vm3034_vm13 = vcmp.eq.s32.totalorder %v12827_v43, %v10837_v55 }
 0x5e0   :  { %vm7030_vm3 = vmpackc.low %vm3042_vm5, %vm3034_vm13 }
 0x5e1   :  { %v2875_v42 = vmax.f32 %v2839_v32, 0.0  ;;  %v11128_v61 = vpop.f32.mrf.mxu1 }
 0x5e2   :  { %12908 = vst [vmem:[#allocation92_spill] sm:$0xff] %v11128_v61  ;;  %v11130_v57 = vpop.f32.mrf.mxu3  ;;  %v4410_v61 = vadd.f32 %v10827_v3, %v10515_v59 }
 0x5e3   :  { %12909 = vst [vmem:[#allocation93_spill] sm:$0xff] %v11130_v57  ;;  %v11136_v13 = vpack.c.bf16 %v2875_v42, %v2874_v19 }
 0x5e4   :  { %v11142_v32 = vpop.f32.mrf.mxu2  ;;  %7061 = vmatmul.msk.bf16.gmra.mxu1 %vm7060_vm2, %v12786_v47  ;;  %vm2932_vm2 = vcmp.eq.s32.totalorder %v12814_v41, %v11126_v33  ;;  %v4499_v59 = vadd.f32 %v10716_v48, %v4410_v61  ;;  %v7358_v48 = vld [vmem:[%s12648_s4 + $0x1d0] sm:$0xff] }
 0x5e5   :  { %12910 = vst [vmem:[#allocation94_spill] sm:$0xff] %v11136_v13  ;;  %vm7080_vm10 = vmpackc.low %vm2932_vm2, %vm2924_vm1  ;;  %4939 = vmatpush.bf16.msrb.mxu0 %v7358_v48  ;;  %7477 = vmatpush.bf16.msra.mxu2 %v7358_v48  ;;  %vm2989_vm1 = vcmp.eq.s32.totalorder %v12810_v58, %v11023_v0  ;;  %vm2997_vm2 = vcmp.eq.s32.totalorder %v12811_v10, %v11023_v0 }
 0x5e6   :  { %v2841_v25 = vpop.f32.mrf.mxu0 }
 0x5e7   :  { %v2842_v19 = vadd.f32 %v11075_v18, %v2841_v25 }
 0x5e9   :  { %7029 = vmatmul.msk.bf16.gmra.mxu0 %vm7028_vm6, %v12786_v47  ;;  %7079 = vmatmul.msk.bf16.vlgmr.msrb.gmra.mxu2 %vm7078_vm7, %v12786_v47  ;;  %v11147_v21 = vpop.f32.mrf.mxu1  ;;  %vm7118_vm6 = vmpackc.low %vm2981_vm8, %vm2973_vm14  ;;  %vm3051_vm7 = vcmp.eq.s32.totalorder %v12831_v39, %v10825_v2  ;;  %vm3075_vm14 = vcmp.eq.s32.totalorder %v12837_v9, %v10825_v2 }
 0x5ea   :  { %12911 = vst [vmem:[#allocation95_spill] sm:$0xff] %v11147_v21  ;;  %v11153_v42 = vpop.f32.mrf.mxu3  ;;  %vm7064_vm12 = vmpackc.low %vm3059_vm4, %vm3051_vm7  ;;  %vm3074_vm7 = vcmp.eq.s32.totalorder %v12837_v9, %v10837_v55  ;;  %vm2956_vm4 = vcmp.eq.s32.totalorder %v12798_v40, %v11126_v33 }
 0x5eb   :  { %12912 = vst [vmem:[#allocation96_spill] sm:$0xff] %v11153_v42  ;;  %v2876_v42 = vmax.f32 %v2842_v19, 0.0 }
 0x5ec   :  { %v11155_v28 = vpop.f32.mrf.mxu2 }
 0x5ee   :  { %v2843_v13 = vpop.f32.mrf.mxu0 }
 0x5ef   :  { %v2844_v21 = vadd.f32 %v11075_v18, %v2843_v13  ;;  %7117 = vmatmul.msk.bf16.gmra.mxu3 %vm7116_vm15, %v12786_v47  ;;  %vm3050_vm15 = vcmp.eq.s32.totalorder %v12831_v39, %v10837_v55 }
 0x5f0   :  { %vm7032_vm13 = vmpackc.low %vm3058_vm11, %vm3050_vm15 }
 0x5f1   :  { %v2877_v57 = vmax.f32 %v2844_v21, 0.0  ;;  %v4676_v34 = vpop.f32.mrf.mxu1 }
 0x5f2   :  { %v11166_v12 = vpop.f32.mrf.mxu3 }
 0x5f3   :  { %v11172_v25 = vpack.c.bf16 %v2877_v57, %v2876_v42  ;;  %v4412_v57 = vadd.f32 %v10851_v51, %v10535_v11 }
 0x5f4   :  { %v11178_v13 = vpop.f32.mrf.mxu2  ;;  %7063 = vmatmul.msk.bf16.gmra.mxu1 %vm7062_vm0, %v12786_v47  ;;  %vm2948_vm0 = vcmp.eq.s32.totalorder %v12820_v53, %v11126_v33 }
 0x5f5   :  { %12913 = vst [vmem:[#allocation97_spill] sm:$0xff] %v11172_v25  ;;  %v4501_v11 = vadd.f32 %v10738_v30, %v4412_v57  ;;  %vm7082_vm5 = vmpackc.low %vm2948_vm0, %vm2940_vm9  ;;  %vm3005_vm9 = vcmp.eq.s32.totalorder %v12815_v63, %v11023_v0  ;;  %vm3013_vm0 = vcmp.eq.s32.totalorder %v12816_v49, %v11023_v0 }
 0x5f6   :  { %v4587_v3 = vpop.f32.mrf.mxu0 }
 0x5f7   :  { %v4588_v21 = vadd.f32 %v4587_v3, %v4499_v59  ;;  %v4415_v3 = vadd.f32 %v10875_v35, %v10553_v8 }
 0x5f9   :  { %v11184_v42 = vadd.f32 %v4676_v34, %v4588_v21  ;;  %7031 = vmatmul.msk.bf16.gmra.mxu0 %vm7030_vm3, %v12786_v47  ;;  %7081 = vmatmul.msk.bf16.gmra.mxu2 %vm7080_vm10, %v12786_v47  ;;  %v4678_v19 = vpop.f32.mrf.mxu1  ;;  %v4504_v8 = vadd.f32 %v10755_v17, %v4415_v3  ;;  %vm7120_vm3 = vmpackc.low %vm2997_vm2, %vm2989_vm1  ;;  %vm3067_vm10 = vcmp.eq.s32.totalorder %v12836_v60, %v10825_v2 }
 0x5fa   :  { %v11195_v61 = vpop.f32.mrf.mxu3  ;;  %vm7066_vm8 = vmpackc.low %vm3075_vm14, %vm3067_vm10  ;;  %vm3091_vm1 = vcmp.eq.s32.totalorder %v12842_v52, %v10825_v2  ;;  %vm3090_vm10 = vcmp.eq.s32.totalorder %v12842_v52, %v10837_v55  ;;  %vm2972_vm14 = vcmp.eq.s32.totalorder %v12803_v15, %v11126_v33 }
 0x5fc   :  { %v11197_v34 = vpop.f32.mrf.mxu2 }
 0x5fe   :  { %v4589_v51 = vpop.f32.mrf.mxu0 }
 0x5ff   :  { %v4590_v59 = vadd.f32 %v4589_v51, %v4501_v11  ;;  %7119 = vmatmul.msk.bf16.gmra.mxu3 %vm7118_vm6, %v12786_v47  ;;  %vm3066_vm6 = vcmp.eq.s32.totalorder %v12836_v60, %v10837_v55 }
 0x600   :  { %vm7034_vm15 = vmpackc.low %vm3074_vm7, %vm3066_vm6 }
 0x601   :  { %v11207_v21 = vadd.f32 %v4678_v19, %v4590_v59  ;;  %v4681_v48 = vpop.f32.mrf.mxu1  ;;  %v4417_v19 = vadd.f32 %v10896_v45, %v10580_v24 }
 0x602   :  { %v11209_v25 = vpop.f32.mrf.mxu3 }
 0x603   :  { %12914 = vst [vmem:[#allocation98_spill] sm:$0xff] %v11209_v25  ;;  %v4506_v24 = vadd.f32 %v10788_v38, %v4417_v19 }
 0x604   :  { %v11219_v30 = vpop.f32.mrf.mxu2  ;;  %7065 = vmatmul.msk.bf16.gmra.mxu1 %vm7064_vm12, %v12786_v47  ;;  %vm2964_vm12 = vcmp.eq.s32.totalorder %v12799_v50, %v11126_v33 }
 0x605   :  { %vm7084_vm11 = vmpackc.low %vm2964_vm12, %vm2956_vm4  ;;  %vm3021_vm4 = vcmp.eq.s32.totalorder %v12822_v7, %v11023_v0  ;;  %vm3029_vm12 = vcmp.eq.s32.totalorder %v12823_v6, %v11023_v0 }
 0x606   :  { %v4592_v35 = vpop.f32.mrf.mxu0 }
 0x607   :  { %v4593_v57 = vadd.f32 %v4592_v35, %v4504_v8 }
 0x609   :  { %v11225_v11 = vadd.f32 %v4681_v48, %v4593_v57  ;;  %7033 = vmatmul.msk.bf16.gmra.mxu0 %vm7032_vm13, %v12786_v47  ;;  %7083 = vmatmul.msk.bf16.gmra.mxu2 %vm7082_vm5, %v12786_v47  ;;  %v4683_v51 = vpop.f32.mrf.mxu1  ;;  %v4420_v48 = vadd.f32 %v10914_v14, %v10598_v37  ;;  %vm7122_vm13 = vmpackc.low %vm3013_vm0, %vm3005_vm9  ;;  %vm3083_vm5 = vcmp.eq.s32.totalorder %v12841_v31, %v10825_v2 }
 0x60a   :  { %v11233_v17 = vpop.f32.mrf.mxu3  ;;  %vm7068_vm2 = vmpackc.low %vm3091_vm1, %vm3083_vm5  ;;  %vm2988_vm1 = vcmp.eq.s32.totalorder %v12810_v58, %v11126_v33  ;;  %v12935_v58 = vld [vmem:[#allocation38_spill] sm:$0xff] }
 0x60b   :  { %12915 = vst [vmem:[#allocation99_spill] sm:$0xff] %v11233_v17  ;;  %v4509_v37 = vadd.f32 %v10800_v20, %v4420_v48  ;;  %v7357_v20 = vld [vmem:[%s12648_s4 + $0x1c8] sm:$0xff] }
 0x60c   :  { %v11235_v59 = vpop.f32.mrf.mxu2  ;;  %4940 = vmatpush.bf16.msrb.mxu0 %v7357_v20  ;;  %7478 = vmatpush.bf16.msra.mxu2 %v7357_v20 }
 0x60e   :  { %v4594_v45 = vpop.f32.mrf.mxu0 }
 0x60f   :  { %v4595_v3 = vadd.f32 %v4594_v45, %v4506_v24  ;;  %7121 = vmatmul.msk.bf16.gmra.mxu3 %vm7120_vm3, %v12786_v47  ;;  %vm3082_vm3 = vcmp.eq.s32.totalorder %v12841_v31, %v10837_v55 }
 0x610   :  { %vm7036_vm6 = vmpackc.low %vm3090_vm10, %vm3082_vm3 }
 0x611   :  { %v11245_v8 = vadd.f32 %v4683_v51, %v4595_v3  ;;  %v4686_v35 = vpop.f32.mrf.mxu1  ;;  %v4422_v51 = vadd.f32 %v10933_v5, %v10617_v62 }
 0x612   :  { %v11247_v57 = vpop.f32.mrf.mxu3 }
 0x613   :  { %12916 = vst [vmem:[#allocation100_spill] sm:$0xff] %v11247_v57  ;;  %v4511_v5 = vadd.f32 %v10822_v22, %v4422_v51 }
 0x614   :  { %v11257_v38 = vpop.f32.mrf.mxu2  ;;  %7067 = vmatmul.msk.bf16.gmra.mxu1 %vm7066_vm8, %v12786_v47  ;;  %vm2980_vm8 = vcmp.eq.s32.totalorder %v12804_v16, %v11126_v33 }
 0x615   :  { %vm7086_vm7 = vmpackc.low %vm2980_vm8, %vm2972_vm14  ;;  %vm3037_vm14 = vcmp.eq.s32.totalorder %v12827_v43, %v11023_v0  ;;  %vm3045_vm8 = vcmp.eq.s32.totalorder %v12828_v23, %v11023_v0 }
 0x616   :  { %v4597_v14 = vpop.f32.mrf.mxu0 }
 0x617   :  { %v4598_v19 = vadd.f32 %v4597_v14, %v4509_v37  ;;  %v12918_v37 = vld [vmem:[#allocation10_spill] sm:$0xff] }
 0x618   :  { %v4425_v14 = vadd.f32 %v10954_v56, %v12918_v37  ;;  %v12920_v56 = vld [vmem:[#allocation51_spill] sm:$0xff] }
 0x619   :  { %v11263_v24 = vadd.f32 %v4686_v35, %v4598_v19  ;;  %7035 = vmatmul.msk.bf16.gmra.mxu0 %vm7034_vm15, %v12786_v47  ;;  %7085 = vmatmul.msk.bf16.gmra.mxu2 %vm7084_vm11, %v12786_v47  ;;  %v4688_v45 = vpop.f32.mrf.mxu1  ;;  %vm7124_vm15 = vmpackc.low %vm3029_vm12, %vm3021_vm4  ;;  %vm3099_vm11 = vcmp.eq.s32.totalorder %v9802_v54, %v10825_v2 }
 0x61a   :  { %v11274_v3 = vpop.f32.mrf.mxu3  ;;  %v4514_v51 = vadd.f32 %v12920_v56, %v4425_v14 }
 0x61b   :  { %12917 = vst [vmem:[#allocation101_spill] sm:$0xff] %v11274_v3 }
 0x61c   :  { %v11276_v62 = vpop.f32.mrf.mxu2 }
 0x61e   :  { %v4599_v48 = vpop.f32.mrf.mxu0 }
 0x61f   :  { %v4600_v35 = vadd.f32 %v4599_v48, %v4511_v5  ;;  %7123 = vmatmul.msk.bf16.gmra.mxu3 %vm7122_vm13, %v12786_v47  ;;  %v12921_v48 = vld [vmem:[#allocation24_spill] sm:$0xff]  ;;  %vm3098_vm13 = vcmp.eq.s32.totalorder %v9802_v54, %v10837_v55 }
 0x621   :  { %v11286_v19 = vadd.f32 %v4688_v45, %v4600_v35  ;;  %v4691_v20 = vpop.f32.mrf.mxu1  ;;  %v4427_v35 = vadd.f32 %v10978_v36, %v12921_v48  ;;  %v12925_v48 = vld [vmem:[#allocation26_spill] sm:$0xff] }
 0x622   :  { %v11288_v3 = vpop.f32.mrf.mxu3  ;;  %v4430_v57 = vadd.f32 %v10996_v29, %v12925_v48  ;;  %v12928_v29 = vld [vmem:[#allocation57_spill] sm:$0xff] }
 0x623   :  { %12919 = vst [vmem:[#allocation10_spill] sm:$0xff] %v11288_v3 }
 0x624   :  { %v11298_v22 = vpop.f32.mrf.mxu2  ;;  %7069 = vmatmul.msk.bf16.gmra.mxu1 %vm7068_vm2, %v12786_v47  ;;  %vm2996_vm2 = vcmp.eq.s32.totalorder %v12811_v10, %v11126_v33 }
 0x625   :  { %vm7088_vm10 = vmpackc.low %vm2996_vm2, %vm2988_vm1  ;;  %vm3053_vm1 = vcmp.eq.s32.totalorder %v12831_v39, %v11023_v0  ;;  %vm3061_vm2 = vcmp.eq.s32.totalorder %v12832_v4, %v11023_v0 }
 0x626   :  { %v4602_v45 = vpop.f32.mrf.mxu0 }
 0x627   :  { %v4603_v5 = vadd.f32 %v4602_v45, %v4514_v51  ;;  %v12923_v51 = vld [vmem:[#allocation54_spill] sm:$0xff]  ;;  %v12924_v45 = vld [vmem:[#allocation31_spill] sm:$0xff] }
 0x628   :  { %v4516_v36 = vadd.f32 %v12923_v51, %v4427_v35  ;;  %vm3107_vm9 = vcmp.eq.s32.totalorder %v12924_v45, %v10825_v2  ;;  %vm3106_vm5 = vcmp.eq.s32.totalorder %v12924_v45, %v10837_v55 }
 0x629   :  { %v11304_v37 = vadd.f32 %v4691_v20, %v4603_v5  ;;  %7037 = vmatmul.msk.bf16.gmra.mxu0 %vm7036_vm6, %v12786_v47  ;;  %7087 = vmatmul.msk.bf16.gmra.mxu2 %vm7086_vm7, %v12786_v47  ;;  %v4693_v3 = vpop.f32.mrf.mxu1  ;;  %vm7070_vm0 = vmpackc.low %vm3107_vm9, %vm3099_vm11  ;;  %vm3004_vm9 = vcmp.eq.s32.totalorder %v12815_v63, %v11126_v33  ;;  %v12950_v63 = vld [vmem:[#allocation85_spill] sm:$0xff] }
 0x62a   :  { %v11312_v14 = vpop.f32.mrf.mxu3  ;;  %vm7038_vm3 = vmpackc.low %vm3106_vm5, %vm3098_vm13 }
 0x62b   :  { %12922 = vst [vmem:[#allocation51_spill] sm:$0xff] %v11312_v14  ;;  %vm7126_vm6 = vmpackc.low %vm3045_vm8, %vm3037_vm14 }
 0x62c   :  { %v11314_v56 = vpop.f32.mrf.mxu2 }
 0x62e   :  { %v4604_v20 = vpop.f32.mrf.mxu0 }
 0x62f   :  { %v4605_v5 = vadd.f32 %v4604_v20, %v4516_v36  ;;  %7125 = vmatmul.msk.bf16.gmra.mxu3 %vm7124_vm15, %v12786_v47  ;;  %v12929_v20 = vld [vmem:[#allocation28_spill] sm:$0xff] }
 0x631   :  { %v11324_v17 = vadd.f32 %v4693_v3, %v4605_v5  ;;  %v4696_v14 = vpop.f32.mrf.mxu1  ;;  %v4519_v3 = vadd.f32 %v12928_v29, %v4430_v57  ;;  %v4432_v5 = vadd.f32 %v11019_v26, %v12929_v20  ;;  %v7356_v57 = vld [vmem:[%s12648_s4 + $0x1c0] sm:$0xff] }
 0x632   :  { %v11326_v25 = vpop.f32.mrf.mxu3  ;;  %4941 = vmatpush.bf16.msrb.mxu0 %v7356_v57  ;;  %7479 = vmatpush.bf16.msra.mxu2 %v7356_v57  ;;  %v12934_v20 = vld [vmem:[#allocation33_spill] sm:$0xff] }
 0x633   :  { %12926 = vst [vmem:[#allocation24_spill] sm:$0xff] %v11326_v25  ;;  %vm3123_vm4 = vcmp.eq.s32.totalorder %v12934_v20, %v10825_v2  ;;  %vm3122_vm11 = vcmp.eq.s32.totalorder %v12934_v20, %v10837_v55 }
 0x634   :  { %v11336_v35 = vpop.f32.mrf.mxu2  ;;  %7071 = vmatmul.msk.bf16.gmra.mxu1 %vm7070_vm0, %v12786_v47  ;;  %vm3012_vm0 = vcmp.eq.s32.totalorder %v12816_v49, %v11126_v33 }
 0x635   :  { %12927 = vst [vmem:[#allocation54_spill] sm:$0xff] %v11336_v35  ;;  %vm7090_vm5 = vmpackc.low %vm3012_vm0, %vm3004_vm9  ;;  %vm3069_vm9 = vcmp.eq.s32.totalorder %v12836_v60, %v11023_v0  ;;  %vm3077_vm0 = vcmp.eq.s32.totalorder %v12837_v9, %v11023_v0 }
 0x636   :  { %v4607_v51 = vpop.f32.mrf.mxu0 }
 0x637   :  { %v4608_v36 = vadd.f32 %v4607_v51, %v4519_v3 }
 0x639   :  { %v11342_v48 = vadd.f32 %v4696_v14, %v4608_v36  ;;  %7039 = vmatmul.msk.bf16.gmra.mxu0 %vm7038_vm3, %v12786_v47  ;;  %7089 = vmatmul.msk.bf16.gmra.mxu2 %vm7088_vm10, %v12786_v47  ;;  %v11346_v25 = vpop.f32.mrf.mxu1  ;;  %v12932_v14 = vld [vmem:[#allocation59_spill] sm:$0xff]  ;;  %v12933_v36 = vld [vmem:[#allocation32_spill] sm:$0xff]  ;;  %vm7128_vm3 = vmpackc.low %vm3061_vm2, %vm3053_vm1 }
 0x63a   :  { %v11355_v29 = vpop.f32.mrf.mxu3  ;;  %v4521_v3 = vadd.f32 %v12932_v14, %v4432_v5  ;;  %vm3115_vm7 = vcmp.eq.s32.totalorder %v12933_v36, %v10825_v2  ;;  %vm3114_vm15 = vcmp.eq.s32.totalorder %v12933_v36, %v10837_v55 }
 0x63b   :  { %12930 = vst [vmem:[#allocation31_spill] sm:$0xff] %v11355_v29  ;;  %v12936_v29 = vld [vmem:[#allocation77_spill] sm:$0xff]  ;;  %vm7072_vm12 = vmpackc.low %vm3123_vm4, %vm3115_vm7  ;;  %vm3020_vm4 = vcmp.eq.s32.totalorder %v12822_v7, %v11126_v33 }
 0x63c   :  { %v11357_v26 = vpop.f32.mrf.mxu2  ;;  %v4435_v35 = vadd.f32 %v12936_v29, %v12935_v58  ;;  %v12939_v58 = vld [vmem:[#allocation62_spill] sm:$0xff]  ;;  %vm7040_vm13 = vmpackc.low %vm3122_vm11, %vm3114_vm15 }
 0x63d   :  { %12931 = vst [vmem:[#allocation26_spill] sm:$0xff] %v11357_v26 }
 0x63e   :  { %v4609_v51 = vpop.f32.mrf.mxu0  ;;  %v4524_v29 = vadd.f32 %v12939_v58, %v4435_v35 }
 0x63f   :  { %v11364_v10 = vadd.f32 %v4609_v51, %v4521_v3  ;;  %7127 = vmatmul.msk.bf16.gmra.mxu3 %vm7126_vm6, %v12786_v47  ;;  %v12940_v51 = vld [vmem:[#allocation40_spill] sm:$0xff] }
 0x641   :  { %v4701_v57 = vpop.f32.mrf.mxu1 }
 0x642   :  { %v11369_v26 = vpop.f32.mrf.mxu3 }
 0x643   :  { %12937 = vst [vmem:[#allocation57_spill] sm:$0xff] %v11369_v26  ;;  %v12941_v26 = vld [vmem:[#allocation81_spill] sm:$0xff] }
 0x644   :  { %v11379_v5 = vpop.f32.mrf.mxu2  ;;  %7073 = vmatmul.msk.bf16.gmra.mxu1 %vm7072_vm12, %v12786_v47  ;;  %v4437_v18 = vadd.f32 %v12941_v26, %v12940_v51  ;;  %v12945_v26 = vld [vmem:[#allocation65_spill] sm:$0xff]  ;;  %vm3028_vm12 = vcmp.eq.s32.totalorder %v12823_v6, %v11126_v33 }
 0x645   :  { %12938 = vst [vmem:[#allocation28_spill] sm:$0xff] %v11379_v5  ;;  %vm7092_vm11 = vmpackc.low %vm3028_vm12, %vm3020_vm4  ;;  %vm3085_vm12 = vcmp.eq.s32.totalorder %v12841_v31, %v11023_v0 }
 0x646   :  { %v4612_v14 = vpop.f32.mrf.mxu0 }
 0x647   :  { %v4613_v3 = vadd.f32 %v4612_v14, %v4524_v29  ;;  %v12946_v14 = vld [vmem:[#allocation29_spill] sm:$0xff] }
 0x648   :  { %vm3131_vm10 = vcmp.eq.s32.totalorder %v12946_v14, %v10825_v2  ;;  %vm3130_vm6 = vcmp.eq.s32.totalorder %v12946_v14, %v10837_v55 }
 0x649   :  { %v11385_v16 = vadd.f32 %v4701_v57, %v4613_v3  ;;  %7041 = vmatmul.msk.bf16.gmra.mxu0 %vm7040_vm13, %v12786_v47  ;;  %7091 = vmatmul.msk.bf16.gmra.mxu2 %vm7090_vm5, %v12786_v47  ;;  %v11389_v49 = vpop.f32.mrf.mxu1  ;;  %v4526_v57 = vadd.f32 %v12945_v26, %v4437_v18  ;;  %v12947_v3 = vld [vmem:[#allocation36_spill] sm:$0xff]  ;;  %vm7130_vm13 = vmpackc.low %vm3077_vm0, %vm3069_vm9  ;;  %vm3147_vm5 = vcmp.eq.s32.totalorder %v10178_v46, %v10825_v2 }
 0x64a   :  { %12942 = vst [vmem:[#allocation59_spill] sm:$0xff] %v11389_v49  ;;  %v11395_v35 = vpop.f32.mrf.mxu3  ;;  %vm3139_vm14 = vcmp.eq.s32.totalorder %v12947_v3, %v10825_v2  ;;  %v12949_v49 = vld [vmem:[#allocation42_spill] sm:$0xff]  ;;  %vm3138_vm7 = vcmp.eq.s32.totalorder %v12947_v3, %v10837_v55  ;;  %vm3052_vm9 = vcmp.eq.s32.totalorder %v12831_v39, %v11126_v33  ;;  %vm3060_vm0 = vcmp.eq.s32.totalorder %v12832_v4, %v11126_v33 }
 0x64b   :  { %12943 = vst [vmem:[#allocation32_spill] sm:$0xff] %v11395_v35  ;;  %v4440_v5 = vadd.f32 %v12950_v63, %v12949_v49  ;;  %vm7074_vm8 = vmpackc.low %vm3139_vm14, %vm3131_vm10  ;;  %v12952_v63 = vld [vmem:[#allocation68_spill] sm:$0xff]  ;;  %vm3146_vm10 = vcmp.eq.s32.totalorder %v10178_v46, %v10837_v55 }
 0x64c   :  { %v11397_v58 = vpop.f32.mrf.mxu2  ;;  %vm7042_vm15 = vmpackc.low %vm3138_vm7, %vm3130_vm6  ;;  %vm3044_vm6 = vcmp.eq.s32.totalorder %v12828_v23, %v11126_v33  ;;  %v12969_v23 = vld [vmem:[#allocation50_spill] sm:$0xff] }
 0x64d   :  { %12944 = vst [vmem:[#allocation33_spill] sm:$0xff] %v11397_v58  ;;  %v4529_v49 = vadd.f32 %v12952_v63, %v4440_v5 }
 0x64e   :  { %v4614_v29 = vpop.f32.mrf.mxu0 }
 0x64f   :  { %v11404_v51 = vadd.f32 %v4614_v29, %v4526_v57  ;;  %7129 = vmatmul.msk.bf16.gmra.mxu3 %vm7128_vm3, %v12786_v47  ;;  %v12953_v29 = vld [vmem:[#allocation44_spill] sm:$0xff]  ;;  %vm5349_vm3 = vcmask 1041408  }
 0x651   :  { %12948 = vst [vmem:[#allocation38_spill] sm:$0xff] %v11404_v51  ;;  %v4706_v35 = vpop.f32.mrf.mxu1  ;;  %v4442_v51 = vadd.f32 %v11100_v44, %v12953_v29  ;;  %v12956_v44 = vld [vmem:[#allocation71_spill] sm:$0xff]  ;;  %v12959_v29 = vld [vmem:[#allocation46_spill] sm:$0xff] }
 0x652   :  { %v11409_v58 = vpop.f32.mrf.mxu3 }
 0x653   :  { %12951 = vst [vmem:[#allocation77_spill] sm:$0xff] %v11409_v58 }
 0x654   :  { %v11419_v18 = vpop.f32.mrf.mxu2  ;;  %7075 = vmatmul.msk.bf16.gmra.mxu1 %vm7074_vm8, %v12786_v47  ;;  %vm3036_vm8 = vcmp.eq.s32.totalorder %v12827_v43, %v11126_v33 }
 0x655   :  { %vm7094_vm4 = vmpackc.low %vm3044_vm6, %vm3036_vm8  ;;  %vm3068_vm8 = vcmp.eq.s32.totalorder %v12836_v60, %v11126_v33  ;;  %vm3076_vm6 = vcmp.eq.s32.totalorder %v12837_v9, %v11126_v33 }
 0x656   :  { %v4617_v26 = vpop.f32.mrf.mxu0 }
 0x657   :  { %v4618_v57 = vadd.f32 %v4617_v26, %v4529_v49  ;;  %v12957_v26 = vld [vmem:[#allocation11_spill] sm:$0xff] }
 0x658   :  { %vm3155_vm1 = vcmp.eq.s32.totalorder %v12957_v26, %v10825_v2  ;;  %vm3154_vm14 = vcmp.eq.s32.totalorder %v12957_v26, %v10837_v55  ;;  %v12964_v55 = vld [vmem:[#allocation48_spill] sm:$0xff] }
 0x659   :  { %v11425_v58 = vadd.f32 %v4706_v35, %v4618_v57  ;;  %7043 = vmatmul.msk.bf16.gmra.mxu0 %vm7042_vm15, %v12786_v47  ;;  %7093 = vmatmul.msk.bf16.gmra.mxu2 %vm7092_vm11, %v12786_v47  ;;  %v11429_v6 = vpop.f32.mrf.mxu1  ;;  %v4531_v35 = vadd.f32 %v12956_v44, %v4442_v51  ;;  %vm7076_vm2 = vmpackc.low %vm3155_vm1, %vm3147_vm5  ;;  %v5295_v51 = vld [vmem:[%s12649_s5 + $0xc] sm:$0x3]  ;;  %vm3093_vm15 = vcmp.eq.s32.totalorder %v12842_v52, %v11023_v0 }
 0x65a   :  { %12954 = vst [vmem:[#allocation62_spill] sm:$0xff] %v11429_v6  ;;  %v11435_v5 = vpop.f32.mrf.mxu3  ;;  %v12960_v6 = vld [vmem:[#allocation91_spill] sm:$0xff]  ;;  %v5351_v2 = vsel %vm5349_vm3, %v5295_v51, 0  ;;  %vm7044_vm7 = vmpackc.low %vm3154_vm14, %vm3146_vm10  ;;  %v4447_v51 = vadd.f32 %v11142_v32, %v12964_v55  ;;  %v7686_v55 = vld [vmem:[%s12647_s3] sm:$0xff]  ;;  %vm3101_vm3 = vcmp.eq.s32.totalorder %v9802_v54, %v11023_v0  ;;  %vm3109_vm10 = vcmp.eq.s32.totalorder %v12924_v45, %v11023_v0 }
 0x65b   :  { %12955 = vst [vmem:[#allocation40_spill] sm:$0xff] %v11435_v5  ;;  %v4445_v7 = vadd.f32 %v12960_v6, %v12959_v29  ;;  %5360 = vmatpush.bf16.msra.mxu1 %v5351_v2  ;;  %7480 = vmatpush.bf16.msrb.mxu2 %v5351_v2  ;;  %vm7132_vm11 = vmpackc.low %vm3093_vm15, %vm3085_vm12 }
 0x65c   :  { %v11437_v63 = vpop.f32.mrf.mxu2  ;;  %vm7096_vm1 = vmpackc.low %vm3060_vm0, %vm3052_vm9  ;;  %vm3125_vm9 = vcmp.eq.s32.totalorder %v12934_v20, %v11023_v0 }
 0x65d   :  { %vm7134_vm14 = vmpackc.low %vm3109_vm10, %vm3101_vm3 }
 0x65e   :  { %v4619_v49 = vpop.f32.mrf.mxu0  ;;  %vm7098_vm12 = vmpackc.low %vm3076_vm6, %vm3068_vm8  ;;  %vm3141_vm8 = vcmp.eq.s32.totalorder %v12947_v3, %v11023_v0 }
 0x65f   :  { %v11444_v57 = vadd.f32 %v4619_v49, %v4531_v35  ;;  %7131 = vmatmul.msk.bf16.gmra.mxu3 %vm7130_vm13, %v12786_v47  ;;  %v12963_v35 = vld [vmem:[#allocation74_spill] sm:$0xff] }
 0x660   :  { %v4534_v49 = vadd.f32 %v12963_v35, %v4445_v7 }
 0x661   :  { %12958 = vst [vmem:[#allocation81_spill] sm:$0xff] %v11444_v57  ;;  %v4711_v5 = vpop.f32.mrf.mxu1 }
 0x662   :  { %v11452_v44 = vpop.f32.mrf.mxu3 }
 0x663   :  { %12961 = vst [vmem:[#allocation65_spill] sm:$0xff] %v11452_v44 }
 0x664   :  { %v11462_v6 = vpop.f32.mrf.mxu2  ;;  %7077 = vmatmul.msk.bf16.gmra.mxu1 %vm7076_vm2, %v12786_v47 }
 0x665   :  { %12962 = vst [vmem:[#allocation29_spill] sm:$0xff] %v11462_v6 }
 0x666   :  { %v4622_v29 = vpop.f32.mrf.mxu0 }
 0x667   :  { %v4623_v57 = vadd.f32 %v4622_v29, %v4534_v49 }
 0x669   :  { %v11468_v44 = vadd.f32 %v4711_v5, %v4623_v57  ;;  %7045 = vmatmul.msk.bf16.gmra.mxu0 %vm7044_vm7, %v12786_v47  ;;  %7095 = vmatmul.msk.bf16.gmra.mxu2 %vm7094_vm4, %v12786_v47  ;;  %v11472_v2 = vpop.f32.mrf.mxu1  ;;  %v12967_v5 = vld [vmem:[#allocation76_spill] sm:$0xff] }
 0x66a   :  { %12965 = vst [vmem:[#allocation36_spill] sm:$0xff] %v11472_v2  ;;  %v11478_v7 = vpop.f32.mrf.mxu3  ;;  %v4536_v57 = vadd.f32 %v12967_v5, %v4447_v51  ;;  %v11490_v2 = vperm.slane %v7686_v55, 7  ;;  %v12972_v51 = vld [vmem:[#allocation6_spill] sm:$0xff]  ;;  %v12974_v55 = vld [vmem:[#allocation53_spill] sm:$0xff] }
 0x66b   :  { %12966 = vst [vmem:[#allocation42_spill] sm:$0xff] %v11478_v7  ;;  %v4450_v7 = vadd.f32 %v11155_v28, %v12969_v23  ;;  %v12973_v23 = vld [vmem:[#allocation80_spill] sm:$0xff] }
 0x66c   :  { %v4765_v35 = vpop.f32.mrf.mxu2  ;;  %vm2918_vm5 = vcmp.eq.s32.totalorder %v12972_v51, %v11490_v2  ;;  %vm2926_vm7 = vcmp.eq.s32.totalorder %v12812_v1, %v11490_v2  ;;  %vm2934_vm4 = vcmp.eq.s32.totalorder %v12814_v41, %v11490_v2 }
 0x66d   :  { %v11481_v32 = vadd.f32 %v4765_v35, %v11184_v42  ;;  %v12971_v42 = vld [vmem:[#allocation5_spill] sm:$0xff]  ;;  %v4539_v28 = vadd.f32 %v12973_v23, %v4450_v7  ;;  %vm7144_vm15 = vmpackc.low %vm2934_vm4, %vm2926_vm7  ;;  %vm3100_vm7 = vcmp.eq.s32.totalorder %v9802_v54, %v11126_v33  ;;  %vm3108_vm4 = vcmp.eq.s32.totalorder %v12924_v45, %v11126_v33 }
 0x66e   :  { %v4624_v49 = vpop.f32.mrf.mxu0  ;;  %vm2910_vm13 = vcmp.eq.s32.totalorder %v12971_v42, %v11490_v2 }
 0x66f   :  { %v11484_v29 = vadd.f32 %v4624_v49, %v4536_v57  ;;  %7133 = vmatmul.msk.bf16.gmra.mxu3 %vm7132_vm11, %v12786_v47  ;;  %vm7142_vm2 = vmpackc.low %vm2918_vm5, %vm2910_vm13  ;;  %vm3117_vm11 = vcmp.eq.s32.totalorder %v12933_v36, %v11023_v0  ;;  %vm3084_vm13 = vcmp.eq.s32.totalorder %v12841_v31, %v11126_v33  ;;  %vm3092_vm5 = vcmp.eq.s32.totalorder %v12842_v52, %v11126_v33 }
 0x670   :  { %vm7136_vm0 = vmpackc.low %vm3125_vm9, %vm3117_vm11 }
 0x671   :  { %12968 = vst [vmem:[#allocation85_spill] sm:$0xff] %v11484_v29  ;;  %v4716_v43 = vpop.f32.mrf.mxu1  ;;  %v4452_v29 = vadd.f32 %v11178_v13, %v12974_v55  ;;  %vm7100_vm3 = vmpackc.low %vm3092_vm5, %vm3084_vm13  ;;  %vm3157_vm13 = vcmp.eq.s32.totalorder %v12957_v26, %v11023_v0 }
 0x672   :  { %v11494_v6 = vpop.f32.mrf.mxu3  ;;  %vm7102_vm11 = vmpackc.low %vm3108_vm4, %vm3100_vm7  ;;  %vm3132_vm7 = vcmp.eq.s32.totalorder %v12946_v14, %v11126_v33  ;;  %vm3140_vm4 = vcmp.eq.s32.totalorder %v12947_v3, %v11126_v33 }
 0x673   :  { %12970 = vst [vmem:[#allocation68_spill] sm:$0xff] %v11494_v6 }
 0x674   :  { %v4767_v35 = vpop.f32.mrf.mxu2 }
 0x675   :  { %v11505_v5 = vadd.f32 %v4767_v35, %v11207_v21 }
 0x676   :  { %v4627_v57 = vpop.f32.mrf.mxu0 }
 0x677   :  { %v4628_v49 = vadd.f32 %v4627_v57, %v4539_v28  ;;  %v12978_v28 = vld [vmem:[#allocation56_spill] sm:$0xff] }
 0x678   :  { %v4455_v57 = vadd.f32 %v11197_v34, %v12978_v28  ;;  %v12979_v34 = vld [vmem:[#allocation87_spill] sm:$0xff] }
 0x679   :  { %v11510_v6 = vadd.f32 %v4716_v43, %v4628_v49  ;;  %7097 = vmatmul.msk.bf16.gmra.mxu2 %vm7096_vm1, %v12786_v47  ;;  %7143 = vmatmul.msk.bf16.vlgmr.msrb.gmra.mxu0 %vm7142_vm2, %v12786_v47  ;;  %v11514_v42 = vpop.f32.mrf.mxu1  ;;  %v12976_v43 = vld [vmem:[#allocation83_spill] sm:$0xff]  ;;  %vm2942_vm1 = vcmp.eq.s32.totalorder %v12819_v27, %v11490_v2  ;;  %vm2950_vm2 = vcmp.eq.s32.totalorder %v12820_v53, %v11490_v2 }
 0x67a   :  { %12975 = vst [vmem:[#allocation44_spill] sm:$0xff] %v11514_v42  ;;  %v11520_v21 = vpop.f32.mrf.mxu3  ;;  %v4541_v51 = vadd.f32 %v12976_v43, %v4452_v29  ;;  %vm7146_vm10 = vmpackc.low %vm2950_vm2, %vm2942_vm1  ;;  %vm3116_vm1 = vcmp.eq.s32.totalorder %v12933_v36, %v11126_v33  ;;  %vm3124_vm2 = vcmp.eq.s32.totalorder %v12934_v20, %v11126_v33 }
 0x67c   :  { %v4770_v7 = vpop.f32.mrf.mxu2 }
 0x67d   :  { %v11523_v13 = vadd.f32 %v4770_v7, %v11225_v11  ;;  %v4544_v7 = vadd.f32 %v12979_v34, %v4455_v57  ;;  %v12982_v57 = vld [vmem:[#allocation90_spill] sm:$0xff] }
 0x67e   :  { %v4629_v35 = vpop.f32.mrf.mxu0 }
 0x67f   :  { %v11526_v23 = vadd.f32 %v4629_v35, %v4541_v51  ;;  %7135 = vmatmul.msk.bf16.gmra.mxu3 %vm7134_vm14, %v12786_v47  ;;  %v12980_v35 = vld [vmem:[#allocation58_spill] sm:$0xff]  ;;  %vm3133_vm14 = vcmp.eq.s32.totalorder %v12946_v14, %v11023_v0 }
 0x680   :  { %v4457_v28 = vadd.f32 %v11219_v30, %v12980_v35  ;;  %vm7138_vm6 = vmpackc.low %vm3141_vm8, %vm3133_vm14 }
 0x681   :  { %12977 = vst [vmem:[#allocation71_spill] sm:$0xff] %v11526_v23  ;;  %v4721_v49 = vpop.f32.mrf.mxu1  ;;  %vm7104_vm14 = vmpackc.low %vm3124_vm2, %vm3116_vm1 }
 0x682   :  { %v11531_v55 = vpop.f32.mrf.mxu3 }
 0x684   :  { %v4772_v11 = vpop.f32.mrf.mxu2 }
 0x685   :  { %v11542_v29 = vadd.f32 %v4772_v11, %v11245_v8 }
 0x686   :  { %v4632_v43 = vpop.f32.mrf.mxu0 }
 0x687   :  { %v4633_v51 = vadd.f32 %v4632_v43, %v4544_v7  ;;  %v12984_v7 = vld [vmem:[#allocation61_spill] sm:$0xff] }
 0x688   :  { %v4460_v43 = vadd.f32 %v11235_v59, %v12984_v7  ;;  %v12985_v59 = vld [vmem:[#allocation93_spill] sm:$0xff] }
 0x689   :  { %v11547_v42 = vadd.f32 %v4721_v49, %v4633_v51  ;;  %7099 = vmatmul.msk.bf16.gmra.mxu2 %vm7098_vm12, %v12786_v47  ;;  %7145 = vmatmul.msk.bf16.gmra.mxu0 %vm7144_vm15, %v12786_v47  ;;  %v11551_v1 = vpop.f32.mrf.mxu1  ;;  %v4546_v49 = vadd.f32 %v12982_v57, %v4457_v28  ;;  %vm2958_vm12 = vcmp.eq.s32.totalorder %v12798_v40, %v11490_v2 }
 0x68a   :  { %12981 = vst [vmem:[#allocation11_spill] sm:$0xff] %v11551_v1  ;;  %v11557_v41 = vpop.f32.mrf.mxu3  ;;  %vm2966_vm15 = vcmp.eq.s32.totalorder %v12799_v50, %v11490_v2 }
 0x68b   :  { %vm7148_vm9 = vmpackc.low %vm2966_vm15, %vm2958_vm12 }
 0x68c   :  { %v4775_v8 = vpop.f32.mrf.mxu2 }
 0x68d   :  { %v11560_v30 = vadd.f32 %v4775_v8, %v11263_v24  ;;  %v4549_v8 = vadd.f32 %v12985_v59, %v4460_v43  ;;  %v12988_v43 = vld [vmem:[#allocation96_spill] sm:$0xff] }
 0x68e   :  { %v4634_v11 = vpop.f32.mrf.mxu0 }
 0x68f   :  { %v11563_v34 = vadd.f32 %v4634_v11, %v4546_v49  ;;  %7137 = vmatmul.msk.bf16.gmra.mxu3 %vm7136_vm0, %v12786_v47  ;;  %v12986_v11 = vld [vmem:[#allocation64_spill] sm:$0xff]  ;;  %vm3149_vm0 = vcmp.eq.s32.totalorder %v10178_v46, %v11023_v0  ;;  %v4699_v0 = vadd.f32 %v11346_v25, %v11364_v10 }
 0x690   :  { %v4462_v7 = vadd.f32 %v11257_v38, %v12986_v11  ;;  %v12990_v11 = vld [vmem:[#allocation67_spill] sm:$0xff]  ;;  %vm7140_vm5 = vmpackc.low %vm3157_vm13, %vm3149_vm0  ;;  %v12999_v10 = vld [vmem:[#allocation12_spill] sm:$0xff]  ;;  %vm3148_vm13 = vcmp.eq.s32.totalorder %v10178_v46, %v11126_v33 }
 0x691   :  { %12983 = vst [vmem:[#allocation46_spill] sm:$0xff] %v11563_v34  ;;  %v4726_v51 = vpop.f32.mrf.mxu1 }
 0x692   :  { %v11568_v35 = vpop.f32.mrf.mxu3 }
 0x694   :  { %v4777_v24 = vpop.f32.mrf.mxu2 }
 0x695   :  { %v11579_v28 = vadd.f32 %v4777_v24, %v11286_v19 }
 0x696   :  { %v4637_v57 = vpop.f32.mrf.mxu0 }
 0x697   :  { %v4638_v49 = vadd.f32 %v4637_v57, %v4549_v8  ;;  %v7228_v8 = vld [vmem:[%s12649_s5 + $0x48] sm:$0xf]  ;;  %v7365_v57 = vld [vmem:[%s12649_s5 + $0x60] sm:$0xf0] }
 0x699   :  { %v11584_v1 = vadd.f32 %v4726_v51, %v4638_v49  ;;  %7101 = vmatmul.msk.bf16.gmra.mxu2 %vm7100_vm3, %v12786_v47  ;;  %7147 = vmatmul.msk.bf16.gmra.mxu0 %vm7146_vm10, %v12786_v47  ;;  %v11588_v27 = vpop.f32.mrf.mxu1  ;;  %v4551_v51 = vadd.f32 %v12988_v43, %v4462_v7  ;;  %v7229_v49 = vor.u32 %v7365_v57, %v7228_v8  ;;  %v7224_v7 = vld [vmem:[%s12649_s5 + $0x10] sm:$0xf]  ;;  %v7364_v43 = vld [vmem:[%s12649_s5 + $0x28] sm:$0xf0] }
 0x69a   :  { %12987 = vst [vmem:[#allocation91_spill] sm:$0xff] %v11588_v27  ;;  %v11594_v53 = vpop.f32.mrf.mxu3  ;;  %vm2974_vm3 = vcmp.eq.s32.totalorder %v12803_v15, %v11490_v2 }
 0x69b   :  { %5730 = vmatpush.bf16.msra.mxu3 %v7229_v49 }
 0x69c   :  { %v4780_v19 = vpop.f32.mrf.mxu2 }
 0x69d   :  { %v11597_v38 = vadd.f32 %v4780_v19, %v11304_v37  ;;  %v4465_v37 = vadd.f32 %v11276_v62, %v12990_v11 }
 0x69e   :  { %v4639_v24 = vpop.f32.mrf.mxu0 }
 0x69f   :  { %v11600_v59 = vadd.f32 %v4639_v24, %v4551_v51  ;;  %7139 = vmatmul.msk.bf16.gmra.mxu3 %vm7138_vm6, %v12786_v47  ;;  %v7225_v24 = vor.u32 %v7364_v43, %v7224_v7  ;;  %v4554_v57 = vadd.f32 %v11166_v12, %v4465_v37  ;;  %v12994_v37 = vld [vmem:[#allocation72_spill] sm:$0xff]  ;;  %vm13006_vm6 = vcmask 261120  }
 0x6a0   :  { %vm13020_vm0 = vmmov %vm13006_vm6 }
 0x6a1   :  { %12989 = vst [vmem:[#allocation74_spill] sm:$0xff] %v11600_v59  ;;  %v4731_v19 = vpop.f32.mrf.mxu1  ;;  %5731 = vmatpush.bf16.msra.mxu3 %v7225_v24  ;;  %v12991_v59 = vld [vmem:[#allocation70_spill] sm:$0xff]  ;;  %v12996_v24 = vld [vmem:[#allocation13_spill] sm:$0xff] }
 0x6a2   :  { %v11617_v51 = vpop.f32.mrf.mxu3  ;;  %v4467_v49 = vadd.f32 %v11298_v22, %v12991_v59 }
 0x6a4   :  { %v4782_v62 = vpop.f32.mrf.mxu2  ;;  %v4556_v22 = vadd.f32 %v11195_v61, %v4467_v49  ;;  %v12995_v61 = vld [vmem:[#allocation14_spill] sm:$0xff] }
 0x6a5   :  { %v11628_v8 = vadd.f32 %v4782_v62, %v11324_v17  ;;  %vm2982_vm10 = vcmp.eq.s32.totalorder %v12995_v61, %v11490_v2  ;;  %v12997_v62 = vld [vmem:[#allocation84_spill] sm:$0xff]  ;;  %v13001_v61 = vld [vmem:[#allocation54_spill] sm:$0xff] }
 0x6a6   :  { %v4642_v11 = vpop.f32.mrf.mxu0  ;;  %vm7150_vm8 = vmpackc.low %vm2982_vm10, %vm2974_vm3  ;;  %v2767_v25 = vadd.f32 %v12997_v62, %v12999_v10  ;;  %v13003_v10 = vld [vmem:[#allocation99_spill] sm:$0xff] }
 0x6a7   :  { %v4643_v27 = vadd.f32 %v4642_v11, %v4554_v57  ;;  %v12998_v11 = vld [vmem:[#allocation98_spill] sm:$0xff] }
 0x6a9   :  { %v11633_v7 = vadd.f32 %v4731_v19, %v4643_v27  ;;  %7103 = vmatmul.msk.bf16.gmra.mxu2 %vm7102_vm11, %v12786_v47  ;;  %7149 = vmatmul.msk.bf16.gmra.mxu0 %vm7148_vm9, %v12786_v47  ;;  %v11637_v40 = vpop.f32.mrf.mxu1  ;;  %v4470_v19 = vadd.f32 %v11314_v56, %v12994_v37  ;;  %v2769_v56 = vadd.f32 %v12997_v62, %v12996_v24  ;;  %v13000_v37 = vld [vmem:[#allocation75_spill] sm:$0xff]  ;;  %vm7106_vm11 = vmpackc.low %vm3140_vm4, %vm3132_vm7 }
 0x6aa   :  { %12992 = vst [vmem:[#allocation48_spill] sm:$0xff] %v11637_v40  ;;  %v11643_v12 = vpop.f32.mrf.mxu3  ;;  %v4472_v40 = vadd.f32 %v13001_v61, %v13000_v37  ;;  %vm3150_vm7 = vcmp.eq.s32.totalorder %v10178_v46, %v11490_v2  ;;  %vm3158_vm4 = vcmp.eq.s32.totalorder %v12957_v26, %v11490_v2 }
 0x6ab   :  { %v4559_v49 = vadd.f32 %v12998_v11, %v4470_v19 }
 0x6ac   :  { %v4785_v50 = vpop.f32.mrf.mxu2 }
 0x6ad   :  { %v11646_v17 = vadd.f32 %v4785_v50, %v11342_v48 }
 0x6ae   :  { %v4644_v27 = vpop.f32.mrf.mxu0 }
 0x6af   :  { %v11649_v59 = vadd.f32 %v4644_v27, %v4556_v22  ;;  %7141 = vmatmul.msk.bf16.gmra.mxu3 %vm7140_vm5, %v12786_v47  ;;  %v2847_v27 = vmax.f32 %v2769_v56, 0.0  ;;  %vm3156_vm5 = vcmp.eq.s32.totalorder %v12957_v26, %v11126_v33 }
 0x6b0   :  { %vm7108_vm3 = vmpackc.low %vm3156_vm5, %vm3148_vm13 }
 0x6b1   :  { %12993 = vst [vmem:[#allocation76_spill] sm:$0xff] %v11649_v59  ;;  %v4736_v43 = vpop.f32.mrf.mxu1 }
 0x6b2   :  { %v11669_v50 = vpop.f32.mrf.mxu3 }
 0x6b4   :  { %v4787_v48 = vpop.f32.mrf.mxu2 }
 0x6b5   :  { %v11666_v57 = vadd.f32 %v4787_v48, %v4699_v0  ;;  %v2846_v0 = vmax.f32 %v2767_v25, 0.0 }
 0x6b6   :  { %v4647_v22 = vpop.f32.mrf.mxu0 }
 0x6b7   :  { %v4648_v15 = vadd.f32 %v4647_v22, %v4559_v49  ;;  %v2878_v24 = vpack.c.bf16 %v2847_v27, %v2846_v0  ;;  %v4561_v49 = vadd.f32 %v13003_v10, %v4472_v40  ;;  %v13010_v40 = vld [vmem:[#allocation16_spill] sm:$0xff]  ;;  %v13011_v27 = vld [vmem:[#allocation35_spill] sm:$0xff] }
 0x6b8   :  { %vm2998_vm15 = vcmp.eq.s32.totalorder %v13010_v40, %v11490_v2  ;;  %v2774_v0 = vadd.f32 %v12997_v62, %v13011_v27 }
 0x6b9   :  { %v11675_v59 = vadd.f32 %v4736_v43, %v4648_v15  ;;  %7105 = vmatmul.msk.bf16.gmra.mxu2 %vm7104_vm14, %v12786_v47  ;;  %7151 = vmatmul.msk.bf16.gmra.mxu0 %vm7150_vm8, %v12786_v47  ;;  %v11679_v19 = vpop.f32.mrf.mxu1  ;;  %v13007_v43 = vld [vmem:[#allocation79_spill] sm:$0xff]  ;;  %v13008_v15 = vld [vmem:[#allocation26_spill] sm:$0xff]  ;;  %vm13032_vm14 = vmmov %vm13020_vm0 }
 0x6ba   :  { %13002 = vst [vmem:[#allocation50_spill] sm:$0xff] %v11679_v19  ;;  %v11687_v37 = vpop.f32.mrf.mxu3  ;;  %v4475_v61 = vadd.f32 %v13008_v15, %v13007_v43  ;;  %v2849_v15 = vmax.f32 %v2774_v0, 0.0  ;;  %v13014_v19 = vld [vmem:[#allocation82_spill] sm:$0xff]  ;;  %v13018_v0 = vld [vmem:[#allocation101_spill] sm:$0xff] }
 0x6bb   :  { %13005 = vst [vmem:[#allocation6_spill] sm:$0xff] %v11687_v37 }
 0x6bc   :  { %v4790_v48 = vpop.f32.mrf.mxu2 }
 0x6bd   :  { %v11682_v11 = vadd.f32 %v4790_v48, %v11385_v16  ;;  %v13009_v16 = vld [vmem:[#allocation15_spill] sm:$0xff]  ;;  %v13012_v48 = vld [vmem:[#allocation100_spill] sm:$0xff] }
 0x6be   :  { %v4649_v56 = vpop.f32.mrf.mxu0  ;;  %vm2990_vm12 = vcmp.eq.s32.totalorder %v13009_v16, %v11490_v2  ;;  %v13015_v16 = vld [vmem:[#allocation28_spill] sm:$0xff] }
 0x6bf   :  { %v11685_v22 = vadd.f32 %v4649_v56, %v4561_v49  ;;  %7230 = vmatmul.msk.bf16.vlgmr.msra.gmra.mxu3 %vm13006_vm6, %v2878_v24  ;;  %v4564_v24 = vadd.f32 %v13012_v48, %v4475_v61  ;;  %vm7152_vm9 = vmpackc.low %vm2998_vm15, %vm2990_vm12  ;;  %v13013_v49 = vld [vmem:[#allocation34_spill] sm:$0xff] }
 0x6c0   :  { %v2772_v56 = vadd.f32 %v12997_v62, %v13013_v49  ;;  %v13022_v49 = vld [vmem:[#allocation33_spill] sm:$0xff]  ;;  %vm7172_vm15 = vmpackc.low %vm3158_vm4, %vm3150_vm7  ;;  %vm3086_vm4 = vcmp.eq.s32.totalorder %v12841_v31, %v11490_v2 }
 0x6c1   :  { %13004 = vst [vmem:[#allocation5_spill] sm:$0xff] %v11685_v22  ;;  %v4741_v34 = vpop.f32.mrf.mxu1  ;;  %v4477_v22 = vadd.f32 %v13015_v16, %v13014_v19  ;;  %v13026_v16 = vld [vmem:[#allocation7_spill] sm:$0xff] }
 0x6c2   :  { %v11711_v40 = vpop.f32.mrf.mxu3  ;;  %v2848_v61 = vmax.f32 %v2772_v56, 0.0 }
 0x6c3   :  { %13016 = vst [vmem:[#allocation80_spill] sm:$0xff] %v11711_v40 }
 0x6c4   :  { %v11700_v25 = vpop.f32.mrf.mxu2  ;;  %v2879_v37 = vpack.c.bf16 %v2849_v15, %v2848_v61 }
 0x6c6   :  { %v4652_v10 = vpop.f32.mrf.mxu0 }
 0x6c7   :  { %v4653_v43 = vadd.f32 %v4652_v10, %v4564_v24  ;;  %v4566_v24 = vadd.f32 %v13018_v0, %v4477_v22  ;;  %v13025_v22 = vld [vmem:[#allocation18_spill] sm:$0xff] }
 0x6c8   :  { %vm3014_vm2 = vcmp.eq.s32.totalorder %v13025_v22, %v11490_v2  ;;  %v13029_v22 = vld [vmem:[#allocation89_spill] sm:$0xff] }
 0x6c9   :  { %v11709_v23 = vadd.f32 %v4741_v34, %v4653_v43  ;;  %7107 = vmatmul.msk.bf16.gmra.mxu2 %vm7106_vm11, %v12786_v47  ;;  %7153 = vmatmul.msk.bf16.gmra.mxu0 %vm7152_vm9, %v12786_v47  ;;  %v11715_v48 = vpop.f32.mrf.mxu1  ;;  %v13021_v34 = vld [vmem:[#allocation86_spill] sm:$0xff]  ;;  %vm13043_vm11 = vmmov %vm13020_vm0 }
 0x6ca   :  { %13017 = vst [vmem:[#allocation53_spill] sm:$0xff] %v11715_v48  ;;  %v4480_v43 = vadd.f32 %v13022_v49, %v13021_v34  ;;  %v11730_v56 = vpop.f32.mrf.mxu3  ;;  %v4482_v48 = vadd.f32 %v11419_v18, %v13029_v22  ;;  %v13033_v18 = vld [vmem:[#allocation92_spill] sm:$0xff]  ;;  %vm13051_vm5 = vmmov %vm13043_vm11 }
 0x6cb   :  { %13023 = vst [vmem:[#allocation56_spill] sm:$0xff] %v11730_v56  ;;  %v13037_v22 = vld [vmem:[#allocation24_spill] sm:$0xff]  ;;  %vm13063_vm7 = vmmov %vm13051_vm5 }
 0x6cc   :  { %v4795_v27 = vpop.f32.mrf.mxu2 }
 0x6cd   :  { %v11718_v62 = vadd.f32 %v4795_v27, %v11425_v58  ;;  %v13024_v58 = vld [vmem:[#allocation17_spill] sm:$0xff]  ;;  %v13027_v27 = vld [vmem:[#allocation10_spill] sm:$0xff] }
 0x6ce   :  { %v4654_v10 = vpop.f32.mrf.mxu0  ;;  %vm3006_vm1 = vcmp.eq.s32.totalorder %v13024_v58, %v11490_v2  ;;  %v4569_v33 = vadd.f32 %v13027_v27, %v4480_v43 }
 0x6cf   :  { %v11721_v19 = vadd.f32 %v4654_v10, %v4566_v24  ;;  %7231 = vmatmul.msk.bf16.gmra.mxu3 %vm13020_vm0, %v2879_v37  ;;  %v11741_v37 = vld [vmem:[%s12650_s6 + $0x2] ss:$0 sm:$0xff]  ;;  %vm7154_vm10 = vmpackc.low %vm3014_vm2, %vm3006_vm1  ;;  %v13028_v10 = vld [vmem:[#allocation30_spill] sm:$0xff]  ;;  %vm3054_vm1 = vcmp.eq.s32.totalorder %v12831_v39, %v11490_v2  ;;  %vm3062_vm2 = vcmp.eq.s32.totalorder %v12832_v4, %v11490_v2 }
 0x6d0   :  { %v2779_v61 = vadd.f32 %v11741_v37, %v13026_v16  ;;  %v2777_v34 = vadd.f32 %v11741_v37, %v13028_v10  ;;  %v13030_v10 = vld [vmem:[#allocation51_spill] sm:$0xff] }
 0x6d1   :  { %13019 = vst [vmem:[#allocation83_spill] sm:$0xff] %v11721_v19  ;;  %v4746_v24 = vpop.f32.mrf.mxu1 }
 0x6d2   :  { %v2851_v58 = vmax.f32 %v2779_v61, 0.0  ;;  %v2850_v16 = vmax.f32 %v2777_v34, 0.0  ;;  %v11754_v56 = vpop.f32.mrf.mxu3  ;;  %v13035_v34 = vld [vmem:[#allocation20_spill] sm:$0xff] }
 0x6d3   :  { %vm3030_vm6 = vcmp.eq.s32.totalorder %v13035_v34, %v11490_v2 }
 0x6d4   :  { %v11736_v15 = vpop.f32.mrf.mxu2  ;;  %v2880_v27 = vpack.c.bf16 %v2851_v58, %v2850_v16  ;;  %v13036_v58 = vld [vmem:[#allocation9_spill] sm:$0xff] }
 0x6d6   :  { %v4657_v0 = vpop.f32.mrf.mxu0 }
 0x6d7   :  { %v4658_v49 = vadd.f32 %v4657_v0, %v4569_v33  ;;  %v4571_v33 = vadd.f32 %v13030_v10, %v4482_v48  ;;  %v7704_v48 = vmov 4  }
 0x6d8   :  { %7484 = vset.pattern.permute.xlu0 %v7704_v48  ;;  %7485 = vset.pattern.permute.xlu2 %v7704_v48 }
 0x6d9   :  { %v11750_v19 = vadd.f32 %v4746_v24, %v4658_v49  ;;  %7109 = vmatmul.msk.bf16.gmra.mxu2 %vm7108_vm3, %v12786_v47  ;;  %7155 = vmatmul.msk.bf16.gmra.mxu0 %vm7154_vm10, %v12786_v47  ;;  %v4485_v24 = vadd.f32 %v11437_v63, %v13033_v18  ;;  %v13034_v49 = vld [vmem:[#allocation19_spill] sm:$0xff]  ;;  %v2784_v63 = vadd.f32 %v11741_v37, %v13036_v58  ;;  %v13041_v18 = vld [vmem:[#allocation29_spill] sm:$0xff]  ;;  %vm7160_vm3 = vmpackc.low %vm3062_vm2, %vm3054_vm1 }
 0x6da   :  { %vm3022_vm8 = vcmp.eq.s32.totalorder %v13034_v49, %v11490_v2  ;;  %7486 = vset.pattern.permute.xlu1 %v7704_v48  ;;  %v11780_v10 = vpop.f32.mrf.mxu3  ;;  %vm13057_vm10 = vmmov %vm13051_vm5  ;;  %vm3118_vm1 = vcmp.eq.s32.totalorder %v12933_v36, %v11490_v2  ;;  %vm3126_vm2 = vcmp.eq.s32.totalorder %v12934_v20, %v11490_v2 }
 0x6db   :  { %v4574_v16 = vadd.f32 %v13037_v22, %v4485_v24  ;;  %vm7156_vm12 = vmpackc.low %vm3030_vm6, %vm3022_vm8  ;;  %13039 = vst [vmem:[#allocation58_spill] sm:$0xff] %v11780_v10  ;;  %v13042_v22 = vld [vmem:[#allocation31_spill] sm:$0xff]  ;;  %vm3078_vm8 = vcmp.eq.s32.totalorder %v12837_v9, %v11490_v2 }
 0x6dc   :  { %v4800_v43 = vpop.f32.mrf.mxu2 }
 0x6dd   :  { %v11757_v40 = vadd.f32 %v4800_v43, %v11468_v44 }
 0x6de   :  { %v4659_v61 = vpop.f32.mrf.mxu0 }
 0x6df   :  { %v11760_v0 = vadd.f32 %v4659_v61, %v4571_v33  ;;  %7232 = vmatmul.msk.bf16.gmra.mxu3 %vm13032_vm14, %v2880_v27  ;;  %v13038_v27 = vld [vmem:[#allocation8_spill] sm:$0xff]  ;;  %v2853_v33 = vmax.f32 %v2784_v63, 0.0  ;;  %v13040_v61 = vld [vmem:[#allocation95_spill] sm:$0xff]  ;;  %vm3070_vm14 = vcmp.eq.s32.totalorder %v12836_v60, %v11490_v2 }
 0x6e0   :  { %v2782_v46 = vadd.f32 %v11741_v37, %v13038_v27  ;;  %v4487_v49 = vadd.f32 %v13041_v18, %v13040_v61  ;;  %v13048_v61 = vld [vmem:[#allocation57_spill] sm:$0xff]  ;;  %vm7162_vm6 = vmpackc.low %vm3078_vm8, %vm3070_vm14  ;;  %vm3134_vm14 = vcmp.eq.s32.totalorder %v12946_v14, %v11490_v2  ;;  %vm3142_vm8 = vcmp.eq.s32.totalorder %v12947_v3, %v11490_v2 }
 0x6e1   :  { %13031 = vst [vmem:[#allocation87_spill] sm:$0xff] %v11760_v0  ;;  %v4855_v18 = vadd.f32 %v13048_v61, %v11481_v32  ;;  %v13050_v61 = vld [vmem:[#allocation32_spill] sm:$0xff]  ;;  %v13077_v14 = vld [vmem:[#allocation81_spill] sm:$0xff] }
 0x6e2   :  { %v2852_v24 = vmax.f32 %v2782_v46, 0.0  ;;  %v4576_v27 = vadd.f32 %v13042_v22, %v4487_v49  ;;  %v11795_v63 = vpop.f32.mrf.mxu3  ;;  %v13049_v49 = vld [vmem:[#allocation23_spill] sm:$0xff] }
 0x6e3   :  { %13044 = vst [vmem:[#allocation90_spill] sm:$0xff] %v11795_v63  ;;  %v4857_v63 = vadd.f32 %v13050_v61, %v11505_v5 }
 0x6e4   :  { %v11773_v44 = vpop.f32.mrf.mxu2  ;;  %v2881_v48 = vpack.c.bf16 %v2853_v33, %v2852_v24  ;;  %v13047_v33 = vld [vmem:[#allocation25_spill] sm:$0xff]  ;;  %v2787_v24 = vadd.f32 %v11741_v37, %v13049_v49 }
 0x6e6   :  { %v4662_v43 = vpop.f32.mrf.mxu0 }
 0x6e7   :  { %v11782_v26 = vadd.f32 %v4662_v43, %v4574_v16  ;;  %v13045_v16 = vld [vmem:[#allocation21_spill] sm:$0xff]  ;;  %v13046_v43 = vld [vmem:[#allocation22_spill] sm:$0xff] }
 0x6e8   :  { %vm3038_vm9 = vcmp.eq.s32.totalorder %v13045_v16, %v11490_v2  ;;  %vm3046_vm0 = vcmp.eq.s32.totalorder %v13046_v43, %v11490_v2 }
 0x6e9   :  { %7157 = vmatmul.msk.bf16.gmra.mxu0 %vm7156_vm12, %v12786_v47  ;;  %7173 = vmatmul.msk.bf16.vlgmr.msra.gmra.mxu2 %vm7172_vm15, %v12786_v47  ;;  %vm7158_vm13 = vmpackc.low %vm3046_vm0, %vm3038_vm9  ;;  %vm3094_vm12 = vcmp.eq.s32.totalorder %v12842_v52, %v11490_v2  ;;  %vm3102_vm9 = vcmp.eq.s32.totalorder %v9802_v54, %v11490_v2  ;;  %vm3110_vm0 = vcmp.eq.s32.totalorder %v12924_v45, %v11490_v2 }
 0x6ea   :  { %v11813_v16 = vpop.f32.mrf.mxu3  ;;  %vm7164_vm15 = vmpackc.low %vm3094_vm12, %vm3086_vm4  ;;  %vm5300_vm12 = vcmask 31744  }
 0x6eb   :  { %vm13085_vm4 = vmmov %vm13051_vm5 }
 0x6ec   :  { %v4805_v34 = vpop.f32.mrf.mxu2 }
 0x6ed   :  { %v11789_v58 = vadd.f32 %v4805_v34, %v11510_v6  ;;  %v2789_v6 = vadd.f32 %v11741_v37, %v13047_v33 }
 0x6ee   :  { %v4664_v0 = vpop.f32.mrf.mxu0 }
 0x6ef   :  { %v11792_v10 = vadd.f32 %v4664_v0, %v4576_v27  ;;  %7233 = vmatmul.msk.bf16.gmra.mxu3 %vm13043_vm11, %v2881_v48  ;;  %v2855_v48 = vmax.f32 %v2789_v6, 0.0  ;;  %v2854_v27 = vmax.f32 %v2787_v24, 0.0  ;;  %v13052_v24 = vld [vmem:[#allocation37_spill] sm:$0xff]  ;;  %vm13067_vm11 = vmmov %vm13051_vm5 }
 0x6f0   :  { %v2794_v5 = vadd.f32 %v11741_v37, %v13052_v24 }
 0x6f1   :  { %v2882_v33 = vpack.c.bf16 %v2855_v48, %v2854_v27  ;;  %v13054_v48 = vld [vmem:[#allocation77_spill] sm:$0xff] }
 0x6f4   :  { %v11801_v46 = vpop.f32.mrf.mxu2 }
 0x6f6   :  { %v4943_v0 = vpop.f32.mrf.mxu0 }
 0x6f7   :  { %v11809_v34 = vadd.f32 %v4943_v0, %v4855_v18 }
 0x6f9   :  { %v5023_v22 = vmax.f32 %v11809_v34, 1.0  ;;  %7159 = vmatmul.msk.bf16.gmra.mxu0 %vm7158_vm13, %v12786_v47  ;;  %vm7166_vm13 = vmpackc.low %vm3110_vm0, %vm3102_vm9 }
 0x6fa   :  { %vm13102_vm9 = vmmov %vm13085_vm4 }
 0x6fb   :  { %7621 = vrcp.f32 %v5023_v22  ;;  %v4860_v22 = vadd.f32 %v13054_v48, %v11523_v13  ;;  %v13056_v48 = vld [vmem:[#allocation40_spill] sm:$0xff]  ;;  %vm13107_vm0 = vmmov %vm13085_vm4 }
 0x6fc   :  { %v4810_v43 = vpop.f32.mrf.mxu2 }
 0x6fd   :  { %v11816_v32 = vadd.f32 %v4810_v43, %v11547_v42  ;;  %v13055_v43 = vld [vmem:[#allocation27_spill] sm:$0xff] }
 0x6fe   :  { %v4945_v49 = vpop.f32.mrf.mxu0 }
 0x6ff   :  { %v11820_v18 = vadd.f32 %v4945_v49, %v4857_v63  ;;  %7234 = vmatmul.msk.bf16.gmra.mxu3 %vm13051_vm5, %v2882_v33  ;;  %v11832_v63 = vpop.f32.mrf.mxu3  ;;  %v2792_v33 = vadd.f32 %v11741_v37, %v13055_v43  ;;  %v2857_v49 = vmax.f32 %v2794_v5, 0.0 }
 0x700   :  { %13053 = vst [vmem:[#allocation61_spill] sm:$0xff] %v11832_v63  ;;  %v4862_v63 = vadd.f32 %v13056_v48, %v11542_v29  ;;  %v13058_v29 = vld [vmem:[#allocation41_spill] sm:$0xff] }
 0x701   :  { %v7622_v6 = vpop.eup %7621  ;;  %v5024_v0 = vmax.f32 %v11820_v18, 1.0 }
 0x702   :  { %5089 = vperm.xlu0 %7484, %v7622_v6   ;;  %v2856_v6 = vmax.f32 %v2792_v33, 0.0  ;;  %v2799_v33 = vadd.f32 %v11741_v37, %v13058_v29 }
 0x703   :  { %7623 = vrcp.f32 %v5024_v0 }
 0x704   :  { %v11828_v42 = vpop.f32.mrf.mxu2  ;;  %v2883_v24 = vpack.c.bf16 %v2857_v49, %v2856_v6  ;;  %v13060_v6 = vld [vmem:[#allocation39_spill] sm:$0xff]  ;;  %v2859_v60 = vmax.f32 %v2799_v33, 0.0 }
 0x706   :  { %v4948_v27 = vpop.f32.mrf.mxu0 }
 0x707   :  { %v11838_v61 = vadd.f32 %v4948_v27, %v4860_v22  ;;  %v11847_v22 = vpop.f32.mrf.mxu3 }
 0x709   :  { %v7624_v39 = vpop.eup %7623  ;;  %v5025_v4 = vmax.f32 %v11838_v61, 1.0  ;;  %7161 = vmatmul.msk.bf16.gmra.mxu0 %vm7160_vm3, %v12786_v47  ;;  %vm7168_vm3 = vmpackc.low %vm3126_vm2, %vm3118_vm1 }
 0x70a   :  { %5094 = vperm.xlu0 %7484, %v7624_v39  }
 0x70b   :  { %7625 = vrcp.f32 %v5025_v4 }
 0x70c   :  { %v4815_v0 = vpop.f32.mrf.mxu2 }
 0x70d   :  { %v11843_v13 = vadd.f32 %v4815_v0, %v11584_v1  ;;  %v2797_v0 = vadd.f32 %v11741_v37, %v13060_v6 }
 0x70e   :  { %v4950_v43 = vpop.f32.mrf.mxu0 }
 0x70f   :  { %v11849_v27 = vadd.f32 %v4950_v43, %v4862_v63  ;;  %7235 = vmatmul.msk.bf16.gmra.mxu3 %vm13057_vm10, %v2883_v24  ;;  %v13059_v63 = vld [vmem:[#allocation65_spill] sm:$0xff]  ;;  %v11867_v43 = vpop.f32.mrf.mxu3  ;;  %vm13074_vm10 = vmmov %vm13051_vm5 }
 0x710   :  { %v4865_v49 = vadd.f32 %v13059_v63, %v11560_v30  ;;  %13061 = vst [vmem:[#allocation93_spill] sm:$0xff] %v11867_v43  ;;  %v13062_v63 = vld [vmem:[#allocation42_spill] sm:$0xff] }
 0x711   :  { %v7626_v5 = vpop.eup %7625  ;;  %v5026_v39 = vmax.f32 %v11849_v27, 1.0 }
 0x712   :  { %5099 = vperm.xlu0 %7484, %v7626_v5   ;;  %v2858_v5 = vmax.f32 %v2797_v0, 0.0 }
 0x713   :  { %7627 = vrcp.f32 %v5026_v39 }
 0x714   :  { %v11857_v1 = vpop.f32.mrf.mxu2  ;;  %v2884_v30 = vpack.c.bf16 %v2859_v60, %v2858_v5  ;;  %v13065_v60 = vld [vmem:[#allocation68_spill] sm:$0xff] }
 0x716   :  { %v4953_v4 = vpop.f32.mrf.mxu0 }
 0x717   :  { %v11865_v24 = vadd.f32 %v4953_v4, %v4865_v49  ;;  %v4867_v49 = vadd.f32 %v13062_v63, %v11579_v28  ;;  %v13064_v28 = vld [vmem:[#allocation45_spill] sm:$0xff] }
 0x718   :  { %v2804_v0 = vadd.f32 %v11741_v37, %v13064_v28 }
 0x719   :  { %v7628_v48 = vpop.eup %7627  ;;  %v5027_v9 = vmax.f32 %v11865_v24, 1.0  ;;  %7163 = vmatmul.msk.bf16.gmra.mxu0 %vm7162_vm6, %v12786_v47  ;;  %vm7170_vm6 = vmpackc.low %vm3142_vm8, %vm3134_vm14 }
 0x71a   :  { %5104 = vperm.xlu0 %7484, %v7628_v48   ;;  %v11880_v48 = vpop.f32.mrf.mxu3  ;;  %v2861_v31 = vmax.f32 %v2804_v0, 0.0 }
 0x71b   :  { %7629 = vrcp.f32 %v5027_v9  ;;  %v4870_v9 = vadd.f32 %v13065_v60, %v11597_v38  ;;  %v4872_v60 = vadd.f32 %v11520_v21, %v11628_v8  ;;  %v4875_v8 = vadd.f32 %v11531_v55, %v11646_v17 }
 0x71c   :  { %v4820_v39 = vpop.f32.mrf.mxu2 }
 0x71d   :  { %v11872_v29 = vadd.f32 %v4820_v39, %v11633_v7  ;;  %v13066_v39 = vld [vmem:[#allocation43_spill] sm:$0xff] }
 0x71e   :  { %v4955_v4 = vpop.f32.mrf.mxu0 }
 0x71f   :  { %v11876_v6 = vadd.f32 %v4955_v4, %v4867_v49  ;;  %7236 = vmatmul.msk.bf16.gmra.mxu3 %vm13063_vm7, %v2884_v30  ;;  %v2802_v30 = vadd.f32 %v11741_v37, %v13066_v39  ;;  %vm13079_vm7 = vmmov %vm13051_vm5 }
 0x721   :  { %v7630_v33 = vpop.eup %7629  ;;  %v5028_v43 = vmax.f32 %v11876_v6, 1.0  ;;  %v2860_v52 = vmax.f32 %v2802_v30, 0.0  ;;  %v13068_v30 = vld [vmem:[#allocation49_spill] sm:$0xff] }
 0x722   :  { %5109 = vperm.xlu0 %7484, %v7630_v33   ;;  %v11898_v28 = vpop.f32.mrf.mxu3  ;;  %v2809_v21 = vadd.f32 %v11741_v37, %v13068_v30 }
 0x723   :  { %7631 = vrcp.f32 %v5028_v43  ;;  %v2885_v33 = vpack.c.bf16 %v2861_v31, %v2860_v52  ;;  %v13069_v31 = vld [vmem:[#allocation47_spill] sm:$0xff] }
 0x724   :  { %v11886_v7 = vpop.f32.mrf.mxu2 }
 0x726   :  { %v4958_v5 = vpop.f32.mrf.mxu0 }
 0x727   :  { %v11894_v43 = vadd.f32 %v4958_v5, %v4870_v9 }
 0x729   :  { %v7632_v63 = vpop.eup %7631  ;;  %v5029_v49 = vmax.f32 %v11894_v43, 1.0  ;;  %7165 = vmatmul.msk.bf16.gmra.mxu0 %vm7164_vm15, %v12786_v47  ;;  %vm13092_vm15 = vmmov %vm13085_vm4 }
 0x72a   :  { %5114 = vperm.xlu0 %7484, %v7632_v63   ;;  %v11921_v52 = vpop.f32.mrf.mxu3 }
 0x72b   :  { %7633 = vrcp.f32 %v5029_v49  ;;  %v2807_v49 = vadd.f32 %v11741_v37, %v13069_v31  ;;  %v4880_v31 = vadd.f32 %v11568_v35, %v11682_v11 }
 0x72c   :  { %v4825_v4 = vpop.f32.mrf.mxu2 }
 0x72d   :  { %v11901_v38 = vadd.f32 %v4825_v4, %v11675_v59 }
 0x72e   :  { %v4960_v9 = vpop.f32.mrf.mxu0 }
 0x72f   :  { %v11905_v5 = vadd.f32 %v4960_v9, %v4872_v60  ;;  %7237 = vmatmul.msk.bf16.gmra.mxu3 %vm13067_vm11, %v2885_v33  ;;  %v2863_v33 = vmax.f32 %v2809_v21, 0.0  ;;  %v2862_v60 = vmax.f32 %v2807_v49, 0.0  ;;  %vm13097_vm11 = vmmov %vm13085_vm4 }
 0x731   :  { %v7634_v0 = vpop.eup %7633  ;;  %v5030_v39 = vmax.f32 %v11905_v5, 1.0  ;;  %v2886_v55 = vpack.c.bf16 %v2863_v33, %v2862_v60  ;;  %v13073_v60 = vld [vmem:[#allocation59_spill] sm:$0xff] }
 0x732   :  { %5119 = vperm.xlu0 %7484, %v7634_v0   ;;  %v4877_v0 = vadd.f32 %v11557_v41, %v11666_v57  ;;  %v13070_v41 = vld [vmem:[#allocation55_spill] sm:$0xff] }
 0x733   :  { %7635 = vrcp.f32 %v5030_v39  ;;  %v2814_v57 = vadd.f32 %v11741_v37, %v13070_v41 }
 0x734   :  { %v11913_v59 = vpop.f32.mrf.mxu2 }
 0x735   :  { %v2865_v20 = vmax.f32 %v2814_v57, 0.0 }
 0x736   :  { %v4963_v63 = vpop.f32.mrf.mxu0 }
 0x737   :  { %v11923_v4 = vadd.f32 %v4963_v63, %v4875_v8  ;;  %v11935_v8 = vpop.f32.mrf.mxu3 }
 0x739   :  { %v7636_v54 = vpop.eup %7635  ;;  %v5031_v45 = vmax.f32 %v11923_v4, 1.0  ;;  %7167 = vmatmul.msk.bf16.gmra.mxu0 %vm7166_vm13, %v12786_v47  ;;  %vm5526_vm13 = vcmask 523264  }
 0x73a   :  { %5124 = vperm.xlu0 %7484, %v7636_v54   ;;  %v13071_v54 = vld [vmem:[#allocation52_spill] sm:$0xff] }
 0x73b   :  { %7637 = vrcp.f32 %v5031_v45  ;;  %v2812_v33 = vadd.f32 %v11741_v37, %v13071_v54  ;;  %v13072_v45 = vld [vmem:[#allocation38_spill] sm:$0xff] }
 0x73c   :  { %v4830_v9 = vpop.f32.mrf.mxu2 }
 0x73d   :  { %v11928_v17 = vadd.f32 %v4830_v9, %v11709_v23  ;;  %v4704_v9 = vadd.f32 %v13073_v60, %v13072_v45  ;;  %v2864_v35 = vmax.f32 %v2812_v33, 0.0  ;;  %v13075_v33 = vld [vmem:[#allocation63_spill] sm:$0xff]  ;;  %v4885_v60 = vadd.f32 %v11617_v51, %v11718_v62 }
 0x73e   :  { %v4965_v39 = vpop.f32.mrf.mxu0 }
 0x73f   :  { %v11932_v30 = vadd.f32 %v4965_v39, %v4877_v0  ;;  %7238 = vmatmul.msk.bf16.gmra.mxu3 %vm13051_vm5, %v2886_v55  ;;  %v4793_v0 = vadd.f32 %v11700_v25, %v4704_v9  ;;  %v11957_v11 = vpop.f32.mrf.mxu3  ;;  %v11977_v9 = vpop.f32.mrf.mxu1  ;;  %vm6070_vm5 = vcmask 162896  }
 0x741   :  { %v7638_v21 = vpop.eup %7637  ;;  %v5032_v63 = vmax.f32 %v11932_v30, 1.0 }
 0x742   :  { %5129 = vperm.xlu0 %7484, %v7638_v21  }
 0x743   :  { %7639 = vrcp.f32 %v5032_v63  ;;  %v2887_v63 = vpack.c.bf16 %v2865_v20, %v2864_v35  ;;  %v13076_v20 = vld [vmem:[#allocation60_spill] sm:$0xff] }
 0x744   :  { %v11942_v23 = vpop.f32.mrf.mxu2 }
 0x746   :  { %v4968_v49 = vpop.f32.mrf.mxu0 }
 0x747   :  { %v11952_v36 = vadd.f32 %v4968_v49, %v4880_v31  ;;  %v4882_v31 = vadd.f32 %v11594_v53, %v4793_v0  ;;  %v2819_v53 = vadd.f32 %v11741_v37, %v13075_v33  ;;  %v4929_v45 = vpop.f32.mrf.mxu3  ;;  %v2817_v0 = vadd.f32 %v11741_v37, %v13076_v20 }
 0x749   :  { %v7640_v55 = vpop.eup %7639  ;;  %v5033_v39 = vmax.f32 %v11952_v36, 1.0  ;;  %7169 = vmatmul.msk.bf16.gmra.mxu0 %vm7168_vm3, %v12786_v47  ;;  %v2866_v51 = vmax.f32 %v2817_v0, 0.0 }
 0x74a   :  { %5134 = vperm.xlu0 %7484, %v7640_v55  }
 0x74b   :  { %7641 = vrcp.f32 %v5033_v39  ;;  %v13078_v39 = vld [vmem:[#allocation62_spill] sm:$0xff] }
 0x74c   :  { %v4835_v21 = vpop.f32.mrf.mxu2  ;;  %v4709_v35 = vadd.f32 %v13078_v39, %v13077_v14 }
 0x74d   :  { %v11960_v41 = vadd.f32 %v4835_v21, %v11750_v19  ;;  %v2867_v21 = vmax.f32 %v2819_v53, 0.0  ;;  %v4751_v53 = vpop.f32.mrf.mxu1 }
 0x74e   :  { %v4970_v49 = vpop.f32.mrf.mxu0  ;;  %v4752_v14 = vadd.f32 %v4751_v53, %v11782_v26 }
 0x74f   :  { %v11963_v57 = vadd.f32 %v4970_v49, %v4882_v31  ;;  %7239 = vmatmul.msk.bf16.gmra.mxu3 %vm13074_vm10, %v2887_v63  ;;  %v4798_v63 = vadd.f32 %v11736_v15, %v4709_v35  ;;  %v2888_v49 = vpack.c.bf16 %v2867_v21, %v2866_v51  ;;  %v4931_v33 = vpop.f32.mrf.mxu3  ;;  %v13081_v35 = vld [vmem:[#allocation66_spill] sm:$0xff]  ;;  %v13082_v21 = vld [vmem:[#allocation85_spill] sm:$0xff] }
 0x751   :  { %v7642_v25 = vpop.eup %7641  ;;  %v5034_v54 = vmax.f32 %v11963_v57, 1.0 }
 0x752   :  { %5139 = vperm.xlu0 %7484, %v7642_v25   ;;  %v4887_v25 = vadd.f32 %v11643_v12, %v4798_v63  ;;  %v4890_v12 = vadd.f32 %v11669_v50, %v11757_v40  ;;  %v13083_v63 = vld [vmem:[#allocation36_spill] sm:$0xff] }
 0x753   :  { %7643 = vrcp.f32 %v5034_v54 }
 0x754   :  { %v11971_v19 = vpop.f32.mrf.mxu2 }
 0x755   :  { %v4753_v53 = vpop.f32.mrf.mxu1 }
 0x756   :  { %v4973_v55 = vpop.f32.mrf.mxu0 }
 0x757   :  { %v11983_v3 = vadd.f32 %v4973_v55, %v4885_v60  ;;  %v13080_v55 = vld [vmem:[#allocation69_spill] sm:$0xff] }
 0x758   :  { %v2824_v0 = vadd.f32 %v11741_v37, %v13080_v55 }
 0x759   :  { %v7644_v2 = vpop.eup %7643  ;;  %v5035_v31 = vmax.f32 %v11983_v3, 1.0  ;;  %7171 = vmatmul.msk.bf16.gmra.mxu0 %vm7170_vm6, %v12786_v47 }
 0x75a   :  { %5144 = vperm.xlu0 %7484, %v7644_v2   ;;  %v2822_v2 = vadd.f32 %v11741_v37, %v13081_v35 }
 0x75b   :  { %7645 = vrcp.f32 %v5035_v31  ;;  %v4714_v31 = vadd.f32 %v13083_v63, %v13082_v21  ;;  %v4754_v21 = vadd.f32 %v4753_v53, %v11792_v10 }
 0x75c   :  { %v4840_v62 = vpop.f32.mrf.mxu2  ;;  %v2868_v50 = vmax.f32 %v2822_v2, 0.0 }
 0x75d   :  { %v4841_v51 = vadd.f32 %v4840_v62, %v4752_v14  ;;  %v13084_v14 = vld [vmem:[#allocation6_spill] sm:$0xff] }
 0x75e   :  { %v4975_v54 = vpop.f32.mrf.mxu0 }
 0x75f   :  { %v11989_v20 = vadd.f32 %v4975_v54, %v4887_v25  ;;  %7240 = vmatmul.msk.bf16.gmra.mxu3 %vm13079_vm7, %v2888_v49  ;;  %v2869_v54 = vmax.f32 %v2824_v0, 0.0  ;;  %v4930_v40 = vadd.f32 %v4929_v45, %v4841_v51 }
 0x761   :  { %v7646_v60 = vpop.eup %7645  ;;  %v5036_v15 = vmax.f32 %v11989_v20, 1.0  ;;  %v2889_v35 = vpack.c.bf16 %v2869_v54, %v2868_v50  ;;  %v13086_v54 = vld [vmem:[#allocation78_spill] sm:$0xff]  ;;  %v13087_v50 = vld [vmem:[#allocation73_spill] sm:$0xff] }
 0x762   :  { %5149 = vperm.xlu0 %7484, %v7646_v60   ;;  %v4803_v60 = vadd.f32 %v11773_v44, %v4714_v31 }
 0x763   :  { %7647 = vrcp.f32 %v5036_v15  ;;  %v12005_v15 = vpop.f32.mrf.mxu3 }
 0x764   :  { %v4842_v47 = vpop.f32.mrf.mxu2 }
 0x766   :  { %v4978_v39 = vpop.f32.mrf.mxu0 }
 0x767   :  { %v12002_v49 = vadd.f32 %v4978_v39, %v4890_v12  ;;  %v4892_v12 = vadd.f32 %v13084_v14, %v4803_v60  ;;  %v4843_v39 = vadd.f32 %v4842_v47, %v4754_v21  ;;  %v2829_v47 = vadd.f32 %v11741_v37, %v13086_v54 }
 0x769   :  { %v7648_v25 = vpop.eup %7647  ;;  %v5037_v26 = vmax.f32 %v12002_v49, 1.0  ;;  %v4932_v10 = vadd.f32 %v4931_v33, %v4843_v39  ;;  %v2871_v39 = vmax.f32 %v2829_v47, 0.0 }
 0x76a   :  { %5154 = vperm.xlu0 %7484, %v7648_v25  }
 0x76b   :  { %7649 = vrcp.f32 %v5037_v26  ;;  %v12017_v2 = vpop.f32.mrf.mxu3 }
 0x76c   :  { %v5018_v55 = vpop.f32.mrf.mxu2 }
 0x76d   :  { %v12009_v62 = vadd.f32 %v5018_v55, %v4930_v40  ;;  %v2827_v40 = vadd.f32 %v11741_v37, %v13087_v50  ;;  %v13088_v55 = vld [vmem:[#allocation71_spill] sm:$0xff] }
 0x76e   :  { %v4980_v0 = vpop.f32.mrf.mxu0 }
 0x76f   :  { %v5053_v44 = vmax.f32 %v12009_v62, 1.0  ;;  %v12013_v63 = vadd.f32 %v4980_v0, %v4892_v12  ;;  %7241 = vmatmul.msk.bf16.gmra.mxu3 %vm13085_vm4, %v2889_v35  ;;  %v13089_v35 = vld [vmem:[#allocation44_spill] sm:$0xff] }
 0x770   :  { %v4719_v21 = vadd.f32 %v13089_v35, %v13088_v55  ;;  %v13090_v12 = vld [vmem:[#allocation80_spill] sm:$0xff] }
 0x771   :  { %v7650_v31 = vpop.eup %7649  ;;  %7651 = vrcp.f32 %v5053_v44  ;;  %v5038_v45 = vmax.f32 %v12013_v63, 1.0  ;;  %v4895_v33 = vadd.f32 %v13090_v12, %v11789_v58  ;;  %v13091_v55 = vld [vmem:[#allocation56_spill] sm:$0xff] }
 0x772   :  { %5159 = vperm.xlu0 %7484, %v7650_v31   ;;  %v4808_v44 = vadd.f32 %v11801_v46, %v4719_v21  ;;  %v13093_v21 = vld [vmem:[#allocation46_spill] sm:$0xff] }
 0x773   :  { %7653 = vrcp.f32 %v5038_v45  ;;  %v2870_v45 = vmax.f32 %v2827_v40, 0.0 }
 0x774   :  { %v5020_v51 = vpop.f32.mrf.mxu2  ;;  %v5090_v25 = vpop.permute.xlu0 %5089  ;;  %v4897_v58 = vadd.f32 %v13091_v55, %v4808_v44 }
 0x775   :  { %v12021_v60 = vadd.f32 %v5020_v51, %v4932_v10  ;;  %v2890_v37 = vpack.c.bf16 %v2871_v39, %v2870_v45  ;;  %v12033_v51 = vpop.f32.mrf.mxu3  ;;  %v5247_v54 = vmul.f32 %v5090_v25, %v11809_v34 }
 0x776   :  { %v4983_v26 = vpop.f32.mrf.mxu0 }
 0x777   :  { %v7652_v53 = vpop.eup %7651  ;;  %v5054_v14 = vmax.f32 %v12021_v60, 1.0  ;;  %v12031_v31 = vadd.f32 %v4983_v26, %v4895_v33 }
 0x778   :  { %5239 = vperm.xlu2 %7485, %v7652_v53  }
 0x779   :  { %v7654_v0 = vpop.eup %7653  ;;  %7655 = vrcp.f32 %v5054_v14  ;;  %v5039_v53 = vmax.f32 %v12031_v31, 1.0  ;;  %v13094_v14 = vld [vmem:[#allocation11_spill] sm:$0xff] }
 0x77a   :  { %5164 = vperm.xlu0 %7484, %v7654_v0   ;;  %v4724_v12 = vadd.f32 %v13094_v14, %v13093_v21  ;;  %v13099_v14 = vld [vmem:[#allocation74_spill] sm:$0xff] }
 0x77b   :  { %7657 = vrcp.f32 %v5039_v53 }
 0x77c   :  { %v5095_v10 = vpop.permute.xlu0 %5094  ;;  %v4813_v45 = vadd.f32 %v11828_v42, %v4724_v12  ;;  %v13100_v12 = vld [vmem:[#allocation91_spill] sm:$0xff] }
 0x77d   :  { %v5248_v50 = vmul.f32 %v5095_v10, %v11820_v18  ;;  %v4900_v18 = vadd.f32 %v11754_v56, %v11816_v32  ;;  %v12048_v33 = vpop.f32.mrf.mxu3 }
 0x77e   :  { %v4985_v47 = vpop.f32.mrf.mxu0 }
 0x77f   :  { %v5279_v46 = vpack.c.bf16 %v5248_v50, %v5247_v54  ;;  %v12039_v26 = vadd.f32 %v4985_v47, %v4897_v58  ;;  %7242 = vmatmul.msk.bf16.gmra.mxu3 %vm13092_vm15, %v2890_v37  ;;  %v7656_v40 = vpop.eup %7655  ;;  %v13095_v54 = vld [vmem:[#allocation58_spill] sm:$0xff]  ;;  %v13096_v47 = vld [vmem:[#allocation88_spill] sm:$0xff] }
 0x780   :  { %v4902_v50 = vadd.f32 %v13095_v54, %v4813_v45 }
 0x781   :  { %v5040_v35 = vmax.f32 %v12039_v26, 1.0  ;;  %7174 = vmatmul.msk.bf16.vlgmr.msra.gmra.mxu1 %vm5300_vm12, %v5279_v46  ;;  %v7658_v39 = vpop.eup %7657 }
 0x782   :  { %5244 = vperm.xlu0 %7484, %v7656_v40  }
 0x783   :  { %7659 = vrcp.f32 %v5040_v35 }
 0x784   :  { %v5100_v34 = vpop.permute.xlu0 %5099 }
 0x785   :  { %v5249_v56 = vmul.f32 %v5100_v34, %v11838_v61  ;;  %v12061_v46 = vpop.f32.mrf.mxu3  ;;  %v7260_v61 = vld [vmem:[%s12649_s5 + $0xc0] sm:$0xf] }
 0x786   :  { %v4988_v25 = vpop.f32.mrf.mxu0 }
 0x787   :  { %v12050_v0 = vadd.f32 %v4988_v25, %v4900_v18  ;;  %v13098_v18 = vld [vmem:[#allocation90_spill] sm:$0xff] }
 0x788   :  { %v4905_v25 = vadd.f32 %v13098_v18, %v11843_v13 }
 0x789   :  { %v7660_v44 = vpop.eup %7659  ;;  %v5041_v10 = vmax.f32 %v12050_v0, 1.0 }
 0x78a   :  { %5174 = vperm.xlu1 %7486, %v7660_v44   ;;  %5169 = vperm.xlu0 %7484, %v7658_v39   ;;  %v4729_v39 = vadd.f32 %v13100_v12, %v13099_v14 }
 0x78b   :  { %7661 = vrcp.f32 %v5041_v10 }
 0x78c   :  { %v5105_v37 = vpop.permute.xlu0 %5104  ;;  %v4818_v10 = vadd.f32 %v11857_v1, %v4729_v39 }
 0x78d   :  { %v5250_v32 = vmul.f32 %v5105_v37, %v11849_v27  ;;  %v7373_v27 = vld [vmem:[%s12649_s5 + $0xd8] sm:$0xf0] }
 0x78e   :  { %v4990_v55 = vpop.f32.mrf.mxu0  ;;  %v7261_v34 = vor.u32 %v7373_v27, %v7260_v61 }
 0x78f   :  { %v5280_v58 = vpack.c.bf16 %v5250_v32, %v5249_v56  ;;  %v12057_v53 = vadd.f32 %v4990_v55, %v4902_v50  ;;  %7243 = vmatmul.msk.bf16.gmra.mxu3 %vm13097_vm11, %v13096_v47  ;;  %v12079_v56 = vpop.f32.mrf.mxu3  ;;  %v4907_v50 = vadd.f32 %v11813_v16, %v4818_v10 }
 0x790   :  { %5985 = vmatpush.bf16.msra.mxu0 %v7261_v34  ;;  %v13105_v34 = vld [vmem:[#allocation48_spill] sm:$0xff] }
 0x791   :  { %v7662_v42 = vpop.eup %7661  ;;  %v5042_v40 = vmax.f32 %v12057_v53, 1.0  ;;  %7175 = vmatmul.msk.bf16.gmra.mxu1 %vm5300_vm12, %v5280_v58 }
 0x792   :  { %5179 = vperm.xlu0 %7484, %v7662_v42   ;;  %v13101_v42 = vld [vmem:[#allocation94_spill] sm:$0xff] }
 0x793   :  { %7663 = vrcp.f32 %v5042_v40 }
 0x794   :  { %v5110_v35 = vpop.permute.xlu0 %5109 }
 0x795   :  { %v5251_v54 = vmul.f32 %v5110_v35, %v11865_v24  ;;  %v13104_v35 = vld [vmem:[#allocation76_spill] sm:$0xff] }
 0x796   :  { %v4993_v21 = vpop.f32.mrf.mxu0  ;;  %v4734_v18 = vadd.f32 %v13105_v34, %v13104_v35 }
 0x797   :  { %v12075_v44 = vadd.f32 %v4993_v21, %v4905_v25  ;;  %v12090_v24 = vpop.f32.mrf.mxu3 }
 0x798   :  { %v4823_v14 = vadd.f32 %v11886_v7, %v4734_v18 }
 0x799   :  { %v7664_v45 = vpop.eup %7663  ;;  %v5043_v37 = vmax.f32 %v12075_v44, 1.0 }
 0x79a   :  { %5184 = vperm.xlu0 %7484, %v7664_v45  }
 0x79b   :  { %7665 = vrcp.f32 %v5043_v37 }
 0x79c   :  { %v5115_v32 = vpop.permute.xlu0 %5114 }
 0x79d   :  { %v5252_v13 = vmul.f32 %v5115_v32, %v11876_v6  ;;  %v13103_v6 = vld [vmem:[#allocation61_spill] sm:$0xff] }
 0x79e   :  { %v4995_v55 = vpop.f32.mrf.mxu0  ;;  %v4910_v16 = vadd.f32 %v13103_v6, %v11872_v29  ;;  %v4912_v29 = vadd.f32 %v11847_v22, %v4823_v14 }
 0x79f   :  { %v5281_v58 = vpack.c.bf16 %v5252_v13, %v5251_v54  ;;  %v12084_v47 = vadd.f32 %v4995_v55, %v4907_v50  ;;  %7244 = vmatmul.msk.bf16.gmra.mxu3 %vm13102_vm9, %v13101_v42  ;;  %v12103_v32 = vpop.f32.mrf.mxu3  ;;  %v13106_v50 = vld [vmem:[#allocation97_spill] sm:$0xff] }
 0x7a0   :  { %v13109_v42 = vld [vmem:[#allocation5_spill] sm:$0xff] }
 0x7a1   :  { %v7666_v1 = vpop.eup %7665  ;;  %v5044_v40 = vmax.f32 %v12084_v47, 1.0  ;;  %7176 = vmatmul.msk.bf16.gmra.mxu1 %vm5300_vm12, %v5281_v58 }
 0x7a2   :  { %5189 = vperm.xlu0 %7484, %v7666_v1   ;;  %v13110_v1 = vld [vmem:[#allocation50_spill] sm:$0xff] }
 0x7a3   :  { %7667 = vrcp.f32 %v5044_v40  ;;  %v4739_v40 = vadd.f32 %v13110_v1, %v13109_v42  ;;  %v7256_v42 = vld [vmem:[%s12649_s5 + $0x88] sm:$0xf] }
 0x7a4   :  { %v5120_v61 = vpop.permute.xlu0 %5119 }
 0x7a5   :  { %v5253_v45 = vmul.f32 %v5120_v61, %v11894_v43 }
 0x7a6   :  { %v4998_v27 = vpop.f32.mrf.mxu0 }
 0x7a7   :  { %v12096_v25 = vadd.f32 %v4998_v27, %v4910_v16  ;;  %v4828_v16 = vadd.f32 %v11913_v59, %v4739_v40 }
 0x7a9   :  { %v7668_v21 = vpop.eup %7667  ;;  %v5045_v12 = vmax.f32 %v12096_v25, 1.0 }
 0x7aa   :  { %5194 = vperm.xlu0 %7484, %v7668_v21  }
 0x7ab   :  { %7669 = vrcp.f32 %v5045_v12 }
 0x7ac   :  { %v5125_v39 = vpop.permute.xlu0 %5124 }
 0x7ad   :  { %v5254_v10 = vmul.f32 %v5125_v39, %v11905_v5  ;;  %v13108_v5 = vld [vmem:[#allocation93_spill] sm:$0xff] }
 0x7ae   :  { %v5000_v37 = vpop.f32.mrf.mxu0  ;;  %v4915_v22 = vadd.f32 %v13108_v5, %v11901_v38  ;;  %v4917_v38 = vadd.f32 %v11880_v48, %v4828_v16  ;;  %v13113_v16 = vld [vmem:[#allocation87_spill] sm:$0xff] }
 0x7af   :  { %v5282_v54 = vpack.c.bf16 %v5254_v10, %v5253_v45  ;;  %v12105_v13 = vadd.f32 %v5000_v37, %v4912_v29  ;;  %7245 = vmatmul.msk.bf16.gmra.mxu3 %vm13107_vm0, %v13106_v50  ;;  %v4920_v10 = vadd.f32 %v11898_v28, %v11928_v17  ;;  %v13111_v29 = vld [vmem:[#allocation83_spill] sm:$0xff] }
 0x7b1   :  { %v7670_v7 = vpop.eup %7669  ;;  %v5046_v55 = vmax.f32 %v12105_v13, 1.0  ;;  %7177 = vmatmul.msk.bf16.gmra.mxu1 %vm5300_vm12, %v5282_v54 }
 0x7b2   :  { %5199 = vperm.xlu0 %7484, %v7670_v7  }
 0x7b3   :  { %7671 = vrcp.f32 %v5046_v55 }
 0x7b4   :  { %v5130_v43 = vpop.permute.xlu0 %5129 }
 0x7b5   :  { %v5255_v34 = vmul.f32 %v5130_v43, %v11923_v4 }
 0x7b6   :  { %v5003_v58 = vpop.f32.mrf.mxu0 }
 0x7b7   :  { %v12115_v61 = vadd.f32 %v5003_v58, %v4915_v22 }
 0x7b9   :  { %v7672_v6 = vpop.eup %7671  ;;  %v5047_v27 = vmax.f32 %v12115_v61, 1.0 }
 0x7ba   :  { %5204 = vperm.xlu0 %7484, %v7672_v6  }
 0x7bb   :  { %7673 = vrcp.f32 %v5047_v27  ;;  %v4749_v27 = vadd.f32 %v11977_v9, %v13113_v16  ;;  %v7204_v9 = vld [vmem:[%s12649_s5 + $0xbc] sm:$0xf] }
 0x7bc   :  { %v5135_v35 = vpop.permute.xlu0 %5134 }
 0x7bd   :  { %v5256_v18 = vmul.f32 %v5135_v35, %v11932_v30  ;;  %v13112_v30 = vld [vmem:[#allocation53_spill] sm:$0xff] }
 0x7be   :  { %v5005_v21 = vpop.f32.mrf.mxu0  ;;  %v4744_v37 = vadd.f32 %v13112_v30, %v13111_v29 }
 0x7bf   :  { %v5283_v14 = vpack.c.bf16 %v5256_v18, %v5255_v34  ;;  %v12122_v12 = vadd.f32 %v5005_v21, %v4917_v38  ;;  %v4838_v18 = vadd.f32 %v11971_v19, %v4749_v27  ;;  %v7369_v19 = vld [vmem:[%s12649_s5 + $0xd4] sm:$0xf0] }
 0x7c0   :  { %v4833_v50 = vadd.f32 %v11942_v23, %v4744_v37  ;;  %v7372_v23 = vld [vmem:[%s12649_s5 + $0xa0] sm:$0xf0]  ;;  %v7196_v37 = vld [vmem:[%s12649_s5 + $0x4c] sm:$0xf] }
 0x7c1   :  { %v7674_v39 = vpop.eup %7673  ;;  %v5048_v45 = vmax.f32 %v12122_v12, 1.0  ;;  %7178 = vmatmul.msk.bf16.gmra.mxu1 %vm5300_vm12, %v5283_v14  ;;  %v7257_v1 = vor.u32 %v7372_v23, %v7256_v42 }
 0x7c2   :  { %5209 = vperm.xlu0 %7484, %v7674_v39   ;;  %v4922_v28 = vadd.f32 %v11921_v52, %v4833_v50 }
 0x7c3   :  { %7675 = vrcp.f32 %v5048_v45  ;;  %5986 = vmatpush.bf16.msra.mxu0 %v7257_v1 }
 0x7c4   :  { %v5140_v59 = vpop.permute.xlu0 %5139 }
 0x7c5   :  { %v5257_v43 = vmul.f32 %v5140_v59, %v11952_v36 }
 0x7c6   :  { %v5008_v4 = vpop.f32.mrf.mxu0 }
 0x7c7   :  { %v12130_v48 = vadd.f32 %v5008_v4, %v4920_v10  ;;  %v7205_v10 = vor.u32 %v7369_v19, %v7204_v9 }
 0x7c9   :  { %v7676_v54 = vpop.eup %7675  ;;  %v5049_v7 = vmax.f32 %v12130_v48, 1.0  ;;  %5579 = vmatpush.bf16.msra.mxu2 %v7205_v10 }
 0x7ca   :  { %5214 = vperm.xlu0 %7484, %v7676_v54   ;;  %v7367_v54 = vld [vmem:[%s12649_s5 + $0x64] sm:$0xf0] }
 0x7cb   :  { %7677 = vrcp.f32 %v5049_v7  ;;  %v7197_v50 = vor.u32 %v7367_v54, %v7196_v37 }
 0x7cc   :  { %v5145_v55 = vpop.permute.xlu0 %5144 }
 0x7cd   :  { %v5258_v5 = vmul.f32 %v5145_v55, %v11963_v57  ;;  %v4925_v57 = vadd.f32 %v11935_v8, %v11960_v41  ;;  %v4927_v8 = vadd.f32 %v11957_v11, %v4838_v18  ;;  %v7200_v11 = vld [vmem:[%s12649_s5 + $0x84] sm:$0xf]  ;;  %v7192_v55 = vld [vmem:[%s12649_s5 + $0x14] sm:$0xf] }
 0x7ce   :  { %v5010_v17 = vpop.f32.mrf.mxu0 }
 0x7cf   :  { %v5284_v22 = vpack.c.bf16 %v5258_v5, %v5257_v43  ;;  %v12137_v58 = vadd.f32 %v5010_v17, %v4922_v28  ;;  %v7366_v43 = vld [vmem:[%s12649_s5 + $0x2c] sm:$0xf0] }
 0x7d0   :  { %v7193_v28 = vor.u32 %v7366_v43, %v7192_v55 }
 0x7d1   :  { %v7678_v40 = vpop.eup %7677  ;;  %v5050_v36 = vmax.f32 %v12137_v58, 1.0  ;;  %7179 = vmatmul.msk.bf16.gmra.mxu1 %vm5300_vm12, %v5284_v22 }
 0x7d2   :  { %5219 = vperm.xlu0 %7484, %v7678_v40   ;;  %v5240_v23 = vpop.permute.xlu2 %5239 }
 0x7d3   :  { %7679 = vrcp.f32 %v5050_v36  ;;  %v5277_v40 = vmul.f32 %v5240_v23, %v12009_v62 }
 0x7d4   :  { %v5150_v52 = vpop.permute.xlu0 %5149 }
 0x7d5   :  { %v5259_v14 = vmul.f32 %v5150_v52, %v11983_v3 }
 0x7d6   :  { %v5013_v6 = vpop.f32.mrf.mxu0 }
 0x7d7   :  { %v12151_v35 = vadd.f32 %v5013_v6, %v4925_v57 }
 0x7d9   :  { %v7680_v34 = vpop.eup %7679  ;;  %v5051_v38 = vmax.f32 %v12151_v35, 1.0 }
 0x7da   :  { %5224 = vperm.xlu0 %7484, %v7680_v34   ;;  %v12197_v34 = vld [vmem:[%s12650_s6 + $0x3] ss:$0 sm:$0xff] }
 0x7db   :  { %7681 = vrcp.f32 %v5051_v38 }
 0x7dc   :  { %v5155_v21 = vpop.permute.xlu0 %5154 }
 0x7dd   :  { %v5260_v39 = vmul.f32 %v5155_v21, %v11989_v20  ;;  %v7368_v20 = vld [vmem:[%s12649_s5 + $0x9c] sm:$0xf0] }
 0x7de   :  { %v5015_v41 = vpop.f32.mrf.mxu0  ;;  %v7201_v29 = vor.u32 %v7368_v20, %v7200_v11 }
 0x7df   :  { %v5285_v45 = vpack.c.bf16 %v5260_v39, %v5259_v14  ;;  %v12158_v59 = vadd.f32 %v5015_v41, %v4927_v8  ;;  %v7371_v39 = vld [vmem:[%s12649_s5 + $0x68] sm:$0xf0] }
 0x7e0   :  { %5580 = vmatpush.bf16.msra.mxu2 %v7201_v29 }
 0x7e1   :  { %v7682_v4 = vpop.eup %7681  ;;  %v5052_v3 = vmax.f32 %v12158_v59, 1.0  ;;  %7180 = vmatmul.msk.bf16.gmra.mxu1 %vm5300_vm12, %v5285_v45 }
 0x7e2   :  { %5229 = vperm.xlu0 %7484, %v7682_v4  }
 0x7e3   :  { %7683 = vrcp.f32 %v5052_v3 }
 0x7e4   :  { %v5160_v30 = vpop.permute.xlu0 %5159  ;;  %5581 = vmatpush.bf16.msra.mxu2 %v7197_v50 }
 0x7e5   :  { %v5261_v17 = vmul.f32 %v5160_v30, %v12002_v49 }
 0x7e8   :  { %5582 = vmatpush.bf16.msra.mxu2 %v7193_v28 }
 0x7e9   :  { %v7684_v7 = vpop.eup %7683 }
 0x7ea   :  { %5234 = vperm.xlu2 %7485, %v7684_v7  }
 0x7ec   :  { %v5165_v5 = vpop.permute.xlu0 %5164 }
 0x7ed   :  { %v5262_v22 = vmul.f32 %v5165_v5, %v12013_v63 }
 0x7ef   :  { %v5286_v42 = vpack.c.bf16 %v5262_v22, %v5261_v17 }
 0x7f1   :  { %7181 = vmatmul.msk.bf16.gmra.mxu1 %vm5300_vm12, %v5286_v42 }
 0x7f4   :  { %v5245_v1 = vpop.permute.xlu0 %5244 }
 0x7f5   :  { %v5278_v36 = vmul.f32 %v5245_v1, %v12021_v60 }
 0x7f7   :  { %v5294_v52 = vpack.c.bf16 %v5278_v36, %v5277_v40 }
 0x7f9   :  { %7189 = vmatmul.msk.bf16.vlgmr.msrb.gmra.mxu2 %vm5300_vm12, %v5294_v52 }
 0x7fc   :  { %v5175_v57 = vpop.permute.xlu1 %5174  ;;  %v5170_v6 = vpop.permute.xlu0 %5169 }
 0x7fd   :  { %v5264_v16 = vmul.f32 %v5175_v57, %v12039_v26  ;;  %v5263_v49 = vmul.f32 %v5170_v6, %v12031_v31  ;;  %v7252_v31 = vld [vmem:[%s12649_s5 + $0x50] sm:$0xf] }
 0x7fe   :  { %v5362_v63 = vpop.f32.mrf.mxu1  ;;  %v7253_v41 = vor.u32 %v7371_v39, %v7252_v31 }
 0x7ff   :  { %v5287_v27 = vpack.c.bf16 %v5264_v16, %v5263_v49  ;;  %v5363_v60 = vadd.f32 %v12197_v34, %v5362_v63 }
 0x800   :  { %5987 = vmatpush.bf16.msra.mxu0 %v7253_v41 }
 0x801   :  { %7182 = vmatmul.msk.bf16.gmra.mxu1 %vm5300_vm12, %v5287_v27  ;;  %v5442_v21 = vmax.f32 %v5363_v60, 0.0 }
 0x804   :  { %v5180_v62 = vpop.permute.xlu0 %5179 }
 0x805   :  { %v5265_v45 = vmul.f32 %v5180_v62, %v12050_v0 }
 0x806   :  { %v5364_v18 = vpop.f32.mrf.mxu1 }
 0x807   :  { %v5365_v38 = vadd.f32 %v12197_v34, %v5364_v18  ;;  %v7248_v18 = vld [vmem:[%s12649_s5 + $0x18] sm:$0xf] }
 0x809   :  { %v5443_v14 = vmax.f32 %v5365_v38, 0.0  ;;  %v7370_v38 = vld [vmem:[%s12649_s5 + $0x30] sm:$0xf0] }
 0x80b   :  { %v5474_v26 = vpack.c.bf16 %v5443_v14, %v5442_v21  ;;  %v7249_v21 = vor.u32 %v7370_v38, %v7248_v18 }
 0x80c   :  { %v5185_v8 = vpop.permute.xlu0 %5184 }
 0x80d   :  { %v5266_v9 = vmul.f32 %v5185_v8, %v12057_v53  ;;  %7206 = vmatmul.msk.bf16.vlgmr.msra.gmra.mxu2 %vm5526_vm13, %v5474_v26  ;;  %5988 = vmatpush.bf16.msra.mxu0 %v7249_v21 }
 0x80e   :  { %v5367_v19 = vpop.f32.mrf.mxu1 }
 0x80f   :  { %v5288_v10 = vpack.c.bf16 %v5266_v9, %v5265_v45  ;;  %v5368_v3 = vadd.f32 %v12197_v34, %v5367_v19 }
 0x811   :  { %7183 = vmatmul.msk.bf16.gmra.mxu1 %vm5300_vm12, %v5288_v10  ;;  %v5444_v29 = vmax.f32 %v5368_v3, 0.0 }
 0x814   :  { %v5190_v4 = vpop.permute.xlu0 %5189 }
 0x815   :  { %v5267_v0 = vmul.f32 %v5190_v4, %v12075_v44 }
 0x816   :  { %v5369_v11 = vpop.f32.mrf.mxu1 }
 0x817   :  { %v5370_v20 = vadd.f32 %v12197_v34, %v5369_v11 }
 0x819   :  { %v5445_v30 = vmax.f32 %v5370_v20, 0.0 }
 0x81b   :  { %v5475_v37 = vpack.c.bf16 %v5445_v30, %v5444_v29 }
 0x81c   :  { %v5195_v54 = vpop.permute.xlu0 %5194 }
 0x81d   :  { %v5268_v53 = vmul.f32 %v5195_v54, %v12084_v47  ;;  %7207 = vmatmul.msk.bf16.gmra.mxu2 %vm5526_vm13, %v5475_v37 }
 0x81e   :  { %v5372_v50 = vpop.f32.mrf.mxu1 }
 0x81f   :  { %v5289_v7 = vpack.c.bf16 %v5268_v53, %v5267_v0  ;;  %v5373_v43 = vadd.f32 %v12197_v34, %v5372_v50 }
 0x821   :  { %7184 = vmatmul.msk.bf16.gmra.mxu1 %vm5300_vm12, %v5289_v7  ;;  %v5446_v17 = vmax.f32 %v5373_v43, 0.0 }
 0x824   :  { %v5200_v55 = vpop.permute.xlu0 %5199 }
 0x825   :  { %v5269_v44 = vmul.f32 %v5200_v55, %v12096_v25 }
 0x826   :  { %v5374_v5 = vpop.f32.mrf.mxu1 }
 0x827   :  { %v5375_v28 = vadd.f32 %v12197_v34, %v5374_v5 }
 0x829   :  { %v5447_v22 = vmax.f32 %v5375_v28, 0.0 }
 0x82b   :  { %v5476_v42 = vpack.c.bf16 %v5447_v22, %v5446_v17 }
 0x82c   :  { %v5205_v23 = vpop.permute.xlu0 %5204 }
 0x82d   :  { %v5270_v47 = vmul.f32 %v5205_v23, %v12105_v13  ;;  %7208 = vmatmul.msk.bf16.gmra.mxu2 %vm5526_vm13, %v5476_v42 }
 0x82e   :  { %v5377_v1 = vpop.f32.mrf.mxu1 }
 0x82f   :  { %v5290_v40 = vpack.c.bf16 %v5270_v47, %v5269_v44  ;;  %v5378_v52 = vadd.f32 %v12197_v34, %v5377_v1 }
 0x831   :  { %7185 = vmatmul.msk.bf16.gmra.mxu1 %vm5300_vm12, %v5290_v40  ;;  %v5448_v16 = vmax.f32 %v5378_v52, 0.0 }
 0x834   :  { %v5210_v36 = vpop.permute.xlu0 %5209 }
 0x835   :  { %v5271_v25 = vmul.f32 %v5210_v36, %v12115_v61 }
 0x836   :  { %v5379_v57 = vpop.f32.mrf.mxu1 }
 0x837   :  { %v5380_v6 = vadd.f32 %v12197_v34, %v5379_v57 }
 0x839   :  { %v5449_v49 = vmax.f32 %v5380_v6, 0.0 }
 0x83b   :  { %v5477_v63 = vpack.c.bf16 %v5449_v49, %v5448_v16 }
 0x83c   :  { %v5215_v27 = vpop.permute.xlu0 %5214 }
 0x83d   :  { %v5272_v13 = vmul.f32 %v5215_v27, %v12122_v12  ;;  %7209 = vmatmul.msk.bf16.gmra.mxu2 %vm5526_vm13, %v5477_v63 }
 0x83e   :  { %v5382_v62 = vpop.f32.mrf.mxu1 }
 0x83f   :  { %v5291_v60 = vpack.c.bf16 %v5272_v13, %v5271_v25  ;;  %v5383_v61 = vadd.f32 %v12197_v34, %v5382_v62 }
 0x841   :  { %7186 = vmatmul.msk.bf16.gmra.mxu1 %vm5300_vm12, %v5291_v60  ;;  %v5450_v31 = vmax.f32 %v5383_v61, 0.0 }
 0x844   :  { %v5220_v14 = vpop.permute.xlu0 %5219  ;;  %v5235_v37 = vpop.permute.xlu2 %5234 }
 0x845   :  { %v5273_v45 = vmul.f32 %v5220_v14, %v12130_v48  ;;  %v12266_v14 = vld [vmem:[%s12650_s6 + $0x4] ss:$0 sm:$0xff] }
 0x846   :  { %v5384_v12 = vpop.f32.mrf.mxu1 }
 0x847   :  { %v5385_v26 = vadd.f32 %v12197_v34, %v5384_v12 }
 0x849   :  { %v5451_v39 = vmax.f32 %v5385_v26, 0.0 }
 0x84b   :  { %v5478_v8 = vpack.c.bf16 %v5451_v39, %v5450_v31 }
 0x84c   :  { %v5225_v41 = vpop.permute.xlu0 %5224 }
 0x84d   :  { %v5274_v9 = vmul.f32 %v5225_v41, %v12137_v58  ;;  %7210 = vmatmul.msk.bf16.gmra.mxu2 %vm5526_vm13, %v5478_v8  ;;  %v5276_v58 = vmul.f32 %v5235_v37, %v12158_v59 }
 0x84e   :  { %v5387_v19 = vpop.f32.mrf.mxu1 }
 0x84f   :  { %v5292_v10 = vpack.c.bf16 %v5274_v9, %v5273_v45  ;;  %v5388_v4 = vadd.f32 %v12197_v34, %v5387_v19 }
 0x851   :  { %7187 = vmatmul.msk.bf16.gmra.mxu1 %vm5300_vm12, %v5292_v10  ;;  %v5452_v29 = vmax.f32 %v5388_v4, 0.0 }
 0x854   :  { %v5230_v20 = vpop.permute.xlu0 %5229 }
 0x855   :  { %v5275_v54 = vmul.f32 %v5230_v20, %v12151_v35 }
 0x856   :  { %v5389_v3 = vpop.f32.mrf.mxu1 }
 0x857   :  { %v5390_v11 = vadd.f32 %v12197_v34, %v5389_v3  ;;  %v5293_v53 = vpack.c.bf16 %v5276_v58, %v5275_v54 }
 0x859   :  { %v5453_v30 = vmax.f32 %v5390_v11, 0.0  ;;  %v5753_v11 = vpop.f32.mrf.mxu3 }
 0x85b   :  { %v5479_v48 = vpack.c.bf16 %v5453_v30, %v5452_v29 }
 0x85d   :  { %7211 = vmatmul.msk.bf16.gmra.mxu2 %vm5526_vm13, %v5479_v48 }
 0x85e   :  { %v5392_v0 = vpop.f32.mrf.mxu1 }
 0x85f   :  { %v5393_v50 = vadd.f32 %v12197_v34, %v5392_v0 }
 0x861   :  { %7188 = vmatmul.msk.bf16.gmra.mxu1 %vm5300_vm12, %v5293_v53  ;;  %v5454_v43 = vmax.f32 %v5393_v50, 0.0 }
 0x866   :  { %v5394_v7 = vpop.f32.mrf.mxu1 }
 0x867   :  { %v5395_v55 = vadd.f32 %v12197_v34, %v5394_v7  ;;  %v5755_v7 = vpop.f32.mrf.mxu3 }
 0x869   :  { %v5455_v5 = vmax.f32 %v5395_v55, 0.0 }
 0x86b   :  { %v5480_v28 = vpack.c.bf16 %v5455_v5, %v5454_v43 }
 0x86d   :  { %7212 = vmatmul.msk.bf16.gmra.mxu2 %vm5526_vm13, %v5480_v28 }
 0x86e   :  { %v5397_v35 = vpop.f32.mrf.mxu1 }
 0x86f   :  { %v5398_v17 = vadd.f32 %v12197_v34, %v5397_v35 }
 0x871   :  { %v5456_v42 = vmax.f32 %v5398_v17, 0.0 }
 0x876   :  { %v5399_v59 = vpop.f32.mrf.mxu1 }
 0x877   :  { %v5400_v22 = vadd.f32 %v12197_v34, %v5399_v59  ;;  %v5758_v59 = vpop.f32.mrf.mxu3 }
 0x879   :  { %v5457_v23 = vmax.f32 %v5400_v22, 0.0 }
 0x87b   :  { %v5481_v44 = vpack.c.bf16 %v5457_v23, %v5456_v42 }
 0x87c   :  { %v5437_v47 = vpop.f32.mrf.mxu2 }
 0x87d   :  { %7213 = vmatmul.msk.bf16.gmra.mxu2 %vm5526_vm13, %v5481_v44  ;;  %v5438_v40 = vadd.f32 %v12197_v34, %v5437_v47 }
 0x87e   :  { %v5402_v1 = vpop.f32.mrf.mxu1 }
 0x87f   :  { %v5403_v52 = vadd.f32 %v12197_v34, %v5402_v1  ;;  %v5472_v16 = vmax.f32 %v5438_v40, 0.0 }
 0x881   :  { %v5458_v27 = vmax.f32 %v5403_v52, 0.0 }
 0x884   :  { %v5439_v36 = vpop.f32.mrf.mxu2 }
 0x885   :  { %v5440_v57 = vadd.f32 %v12197_v34, %v5439_v36 }
 0x886   :  { %v5404_v6 = vpop.f32.mrf.mxu1 }
 0x887   :  { %v5473_v49 = vmax.f32 %v5440_v57, 0.0  ;;  %v5405_v63 = vadd.f32 %v12197_v34, %v5404_v6 }
 0x889   :  { %v12258_v25 = vpack.c.bf16 %v5473_v49, %v5472_v16  ;;  %v5459_v13 = vmax.f32 %v5405_v63, 0.0  ;;  %v5760_v16 = vpop.f32.mrf.mxu3 }
 0x88b   :  { %v5482_v62 = vpack.c.bf16 %v5459_v13, %v5458_v27 }
 0x88d   :  { %7214 = vmatmul.msk.bf16.gmra.mxu2 %vm5526_vm13, %v5482_v62 }
 0x88e   :  { %v5407_v60 = vpop.f32.mrf.mxu1 }
 0x88f   :  { %v5408_v38 = vadd.f32 %v12197_v34, %v5407_v60 }
 0x890   :  { %v5584_v18 = vpop.f32.mrf.mxu2 }
 0x891   :  { %v5734_v21 = vadd.f32 %v12005_v15, %v5584_v18  ;;  %v5460_v31 = vmax.f32 %v5408_v38, 0.0 }
 0x893   :  { %v5817_v39 = vadd.f32 %v12266_v14, %v5734_v21 }
 0x895   :  { %v5849_v19 = vmax.f32 %v5817_v39, 0.0 }
 0x896   :  { %v5409_v61 = vpop.f32.mrf.mxu1 }
 0x897   :  { %v5410_v12 = vadd.f32 %v12197_v34, %v5409_v61  ;;  %v5763_v61 = vpop.f32.mrf.mxu3 }
 0x898   :  { %v5586_v26 = vpop.f32.mrf.mxu2 }
 0x899   :  { %v5461_v8 = vmax.f32 %v5410_v12, 0.0  ;;  %v5736_v41 = vadd.f32 %v12017_v2, %v5586_v26 }
 0x89b   :  { %v5483_v45 = vpack.c.bf16 %v5461_v8, %v5460_v31  ;;  %v5818_v9 = vadd.f32 %v12266_v14, %v5736_v41 }
 0x89d   :  { %v5850_v15 = vmax.f32 %v5818_v9, 0.0  ;;  %7215 = vmatmul.msk.bf16.gmra.mxu2 %vm5526_vm13, %v5483_v45 }
 0x89e   :  { %v5412_v10 = vpop.f32.mrf.mxu1 }
 0x89f   :  { %v5881_v4 = vpack.c.bf16 %v5850_v15, %v5849_v19  ;;  %v5413_v20 = vadd.f32 %v12197_v34, %v5412_v10  ;;  %v5765_v45 = vpop.f32.mrf.mxu3 }
 0x8a0   :  { %v5589_v3 = vpop.f32.mrf.mxu2 }
 0x8a1   :  { %7262 = vmatmul.msk.bf16.vlgmr.msra.gmra.mxu0 %vm5526_vm13, %v5881_v4  ;;  %v5739_v29 = vadd.f32 %v12033_v51, %v5589_v3  ;;  %v5462_v54 = vmax.f32 %v5413_v20, 0.0 }
 0x8a3   :  { %v5819_v48 = vadd.f32 %v12266_v14, %v5739_v29 }
 0x8a5   :  { %v5851_v55 = vmax.f32 %v5819_v48, 0.0 }
 0x8a6   :  { %v5414_v30 = vpop.f32.mrf.mxu1 }
 0x8a7   :  { %v5415_v2 = vadd.f32 %v12197_v34, %v5414_v30  ;;  %v5768_v48 = vpop.f32.mrf.mxu3 }
 0x8a8   :  { %v5591_v37 = vpop.f32.mrf.mxu2 }
 0x8a9   :  { %v5463_v58 = vmax.f32 %v5415_v2, 0.0  ;;  %v5741_v0 = vadd.f32 %v12048_v33, %v5591_v37 }
 0x8ab   :  { %v5484_v53 = vpack.c.bf16 %v5463_v58, %v5462_v54  ;;  %v5820_v50 = vadd.f32 %v12266_v14, %v5741_v0 }
 0x8ad   :  { %v5852_v43 = vmax.f32 %v5820_v50, 0.0  ;;  %7216 = vmatmul.msk.bf16.gmra.mxu2 %vm5526_vm13, %v5484_v53 }
 0x8ae   :  { %v5417_v5 = vpop.f32.mrf.mxu1 }
 0x8af   :  { %v5882_v51 = vpack.c.bf16 %v5852_v43, %v5851_v55  ;;  %v5418_v35 = vadd.f32 %v12197_v34, %v5417_v5 }
 0x8b0   :  { %v5594_v28 = vpop.f32.mrf.mxu2 }
 0x8b1   :  { %7263 = vmatmul.msk.bf16.gmra.mxu0 %vm5526_vm13, %v5882_v51  ;;  %v5744_v17 = vadd.f32 %v12061_v46, %v5594_v28  ;;  %v5464_v23 = vmax.f32 %v5418_v35, 0.0 }
 0x8b3   :  { %v5821_v44 = vadd.f32 %v12266_v14, %v5744_v17 }
 0x8b5   :  { %v5853_v52 = vmax.f32 %v5821_v44, 0.0 }
 0x8b6   :  { %v5419_v22 = vpop.f32.mrf.mxu1 }
 0x8b7   :  { %v5420_v33 = vadd.f32 %v12197_v34, %v5419_v22 }
 0x8b8   :  { %v5596_v42 = vpop.f32.mrf.mxu2 }
 0x8b9   :  { %v5465_v47 = vmax.f32 %v5420_v33, 0.0  ;;  %v5746_v1 = vadd.f32 %v12079_v56, %v5596_v42 }
 0x8bb   :  { %v5485_v40 = vpack.c.bf16 %v5465_v47, %v5464_v23  ;;  %v5822_v36 = vadd.f32 %v12266_v14, %v5746_v1 }
 0x8bd   :  { %v5854_v57 = vmax.f32 %v5822_v36, 0.0  ;;  %7217 = vmatmul.msk.bf16.gmra.mxu2 %vm5526_vm13, %v5485_v40 }
 0x8be   :  { %v5422_v6 = vpop.f32.mrf.mxu1 }
 0x8bf   :  { %v5883_v46 = vpack.c.bf16 %v5854_v57, %v5853_v52  ;;  %v5423_v63 = vadd.f32 %v12197_v34, %v5422_v6 }
 0x8c0   :  { %v5599_v49 = vpop.f32.mrf.mxu2 }
 0x8c1   :  { %7264 = vmatmul.msk.bf16.gmra.mxu0 %vm5526_vm13, %v5883_v46  ;;  %v5749_v27 = vadd.f32 %v12090_v24, %v5599_v49  ;;  %v5466_v60 = vmax.f32 %v5423_v63, 0.0 }
 0x8c3   :  { %v5823_v18 = vadd.f32 %v12266_v14, %v5749_v27 }
 0x8c5   :  { %v5855_v31 = vmax.f32 %v5823_v18, 0.0 }
 0x8c6   :  { %v5424_v13 = vpop.f32.mrf.mxu1 }
 0x8c7   :  { %v5425_v56 = vadd.f32 %v12197_v34, %v5424_v13 }
 0x8c8   :  { %v5601_v62 = vpop.f32.mrf.mxu2 }
 0x8c9   :  { %v5467_v38 = vmax.f32 %v5425_v56, 0.0  ;;  %v5751_v21 = vadd.f32 %v12103_v32, %v5601_v62 }
 0x8cb   :  { %v5486_v12 = vpack.c.bf16 %v5467_v38, %v5466_v60  ;;  %v5824_v26 = vadd.f32 %v12266_v14, %v5751_v21 }
 0x8cd   :  { %v5856_v39 = vmax.f32 %v5824_v26, 0.0  ;;  %7218 = vmatmul.msk.bf16.gmra.mxu2 %vm5526_vm13, %v5486_v12 }
 0x8ce   :  { %v5427_v8 = vpop.f32.mrf.mxu1 }
 0x8cf   :  { %v5884_v24 = vpack.c.bf16 %v5856_v39, %v5855_v31  ;;  %v5428_v9 = vadd.f32 %v12197_v34, %v5427_v8 }
 0x8d0   :  { %v5604_v41 = vpop.f32.mrf.mxu2 }
 0x8d1   :  { %7265 = vmatmul.msk.bf16.gmra.mxu0 %vm5526_vm13, %v5884_v24  ;;  %v5754_v19 = vadd.f32 %v5753_v11, %v5604_v41  ;;  %v5468_v4 = vmax.f32 %v5428_v9, 0.0  ;;  %v12323_v41 = vld [vmem:[%s12650_s6 + $0x5] ss:$0 sm:$0xff]  ;;  %s7278_s6 = sld [smem:[#allocation2 + $0x1]] }
 0x8d3   :  { %v5825_v3 = vadd.f32 %v12266_v14, %v5754_v19 }
 0x8d5   :  { %v5857_v37 = vmax.f32 %v5825_v3, 0.0 }
 0x8d6   :  { %v5429_v15 = vpop.f32.mrf.mxu1 }
 0x8d7   :  { %v5430_v32 = vadd.f32 %v12197_v34, %v5429_v15  ;;  %s6168_s13 = sadd.s32 10, %s7278_s6 }
 0x8d8   :  { %v5606_v10 = vpop.f32.mrf.mxu2 }
 0x8d9   :  { %v5469_v20 = vmax.f32 %v5430_v32, 0.0  ;;  %v5756_v29 = vadd.f32 %v5755_v7, %v5606_v10  ;;  %v5770_v7 = vpop.f32.mrf.mxu3 }
 0x8db   :  { %v5487_v30 = vpack.c.bf16 %v5469_v20, %v5468_v4  ;;  %v5826_v2 = vadd.f32 %v12266_v14, %v5756_v29 }
 0x8dd   :  { %v5858_v54 = vmax.f32 %v5826_v2, 0.0  ;;  %7219 = vmatmul.msk.bf16.gmra.mxu2 %vm5526_vm13, %v5487_v30 }
 0x8de   :  { %v5432_v58 = vpop.f32.mrf.mxu1 }
 0x8df   :  { %v5885_v0 = vpack.c.bf16 %v5858_v54, %v5857_v37  ;;  %v5433_v53 = vadd.f32 %v12197_v34, %v5432_v58 }
 0x8e0   :  { %v5609_v11 = vpop.f32.mrf.mxu2 }
 0x8e1   :  { %7266 = vmatmul.msk.bf16.gmra.mxu0 %vm5526_vm13, %v5885_v0  ;;  %v5759_v50 = vadd.f32 %v5758_v59, %v5609_v11  ;;  %v5470_v51 = vmax.f32 %v5433_v53, 0.0  ;;  %v5773_v59 = vpop.f32.mrf.mxu3 }
 0x8e3   :  { %v5827_v28 = vadd.f32 %v12266_v14, %v5759_v50 }
 0x8e5   :  { %v5859_v42 = vmax.f32 %v5827_v28, 0.0 }
 0x8e6   :  { %v5434_v55 = vpop.f32.mrf.mxu1 }
 0x8e7   :  { %v5435_v43 = vadd.f32 %v12197_v34, %v5434_v55 }
 0x8e8   :  { %v5611_v5 = vpop.f32.mrf.mxu2 }
 0x8e9   :  { %v5471_v35 = vmax.f32 %v5435_v43, 0.0  ;;  %v5761_v17 = vadd.f32 %v5760_v16, %v5611_v5  ;;  %v5775_v57 = vpop.f32.mrf.mxu3 }
 0x8eb   :  { %v5488_v22 = vpack.c.bf16 %v5471_v35, %v5470_v51  ;;  %v5828_v33 = vadd.f32 %v12266_v14, %v5761_v17 }
 0x8ed   :  { %v5860_v23 = vmax.f32 %v5828_v33, 0.0  ;;  %7220 = vmatmul.msk.bf16.gmra.mxu2 %vm5526_vm13, %v5488_v22 }
 0x8ef   :  { %v5886_v44 = vpack.c.bf16 %v5860_v23, %v5859_v42 }
 0x8f0   :  { %v5614_v47 = vpop.f32.mrf.mxu2 }
 0x8f1   :  { %7267 = vmatmul.msk.bf16.gmra.mxu0 %vm5526_vm13, %v5886_v44  ;;  %v5764_v34 = vadd.f32 %v5763_v61, %v5614_v47  ;;  %v5778_v27 = vpop.f32.mrf.mxu3 }
 0x8f3   :  { %v5829_v40 = vadd.f32 %v12266_v14, %v5764_v34 }
 0x8f5   :  { %v5861_v6 = vmax.f32 %v5829_v40, 0.0 }
 0x8f8   :  { %v5616_v1 = vpop.f32.mrf.mxu2 }
 0x8f9   :  { %v5766_v36 = vadd.f32 %v5765_v45, %v5616_v1  ;;  %v5780_v61 = vpop.f32.mrf.mxu3 }
 0x8fb   :  { %v5830_v52 = vadd.f32 %v12266_v14, %v5766_v36 }
 0x8fd   :  { %v5862_v46 = vmax.f32 %v5830_v52, 0.0  ;;  %7221 = vmatmul.msk.bf16.gmra.mxu2 %vm5526_vm13, %v12258_v25 }
 0x8ff   :  { %v5887_v16 = vpack.c.bf16 %v5862_v46, %v5861_v6 }
 0x900   :  { %v5619_v49 = vpop.f32.mrf.mxu2 }
 0x901   :  { %7268 = vmatmul.msk.bf16.gmra.mxu0 %vm5526_vm13, %v5887_v16  ;;  %v5769_v63 = vadd.f32 %v5768_v48, %v5619_v49  ;;  %v5783_v8 = vpop.f32.mrf.mxu3 }
 0x903   :  { %v5831_v56 = vadd.f32 %v12266_v14, %v5769_v63 }
 0x905   :  { %v5863_v18 = vmax.f32 %v5831_v56, 0.0 }
 0x908   :  { %v5621_v13 = vpop.f32.mrf.mxu2 }
 0x909   :  { %v5771_v62 = vadd.f32 %v5770_v7, %v5621_v13  ;;  %v5785_v3 = vpop.f32.mrf.mxu3 }
 0x90b   :  { %v5832_v60 = vadd.f32 %v12266_v14, %v5771_v62 }
 0x90d   :  { %v5864_v38 = vmax.f32 %v5832_v60, 0.0 }
 0x90f   :  { %v5888_v21 = vpack.c.bf16 %v5864_v38, %v5863_v18 }
 0x910   :  { %v5624_v12 = vpop.f32.mrf.mxu2 }
 0x911   :  { %7269 = vmatmul.msk.bf16.gmra.mxu0 %vm5526_vm13, %v5888_v21  ;;  %v5774_v25 = vadd.f32 %v5773_v59, %v5624_v12  ;;  %v5788_v53 = vpop.f32.mrf.mxu3 }
 0x913   :  { %v5833_v31 = vadd.f32 %v12266_v14, %v5774_v25 }
 0x915   :  { %v5865_v45 = vmax.f32 %v5833_v31, 0.0 }
 0x918   :  { %v5626_v26 = vpop.f32.mrf.mxu2 }
 0x919   :  { %v5776_v39 = vadd.f32 %v5775_v57, %v5626_v26  ;;  %v5790_v17 = vpop.f32.mrf.mxu3 }
 0x91b   :  { %v5834_v24 = vadd.f32 %v12266_v14, %v5776_v39 }
 0x91d   :  { %v5866_v9 = vmax.f32 %v5834_v24, 0.0 }
 0x91e   :  { %v5990_v19 = vpop.f32.mrf.mxu0 }
 0x91f   :  { %v5889_v15 = vpack.c.bf16 %v5866_v9, %v5865_v45  ;;  %v12326_v32 = vadd.f32 %v12323_v41, %v5990_v19 }
 0x920   :  { %v5629_v10 = vpop.f32.mrf.mxu2 }
 0x921   :  { %7270 = vmatmul.msk.bf16.gmra.mxu0 %vm5526_vm13, %v5889_v15  ;;  %v6071_v4 = vsel %vm6070_vm5, %v12326_v32, -inf  ;;  %v5779_v20 = vadd.f32 %v5778_v27, %v5629_v10  ;;  %v5793_v57 = vpop.f32.mrf.mxu3 }
 0x922   :  { %6072 = vmax.xlane.f32.xlu1 %v6071_v4 }
 0x923   :  { %v5835_v37 = vadd.f32 %v12266_v14, %v5779_v20 }
 0x925   :  { %v5867_v0 = vmax.f32 %v5835_v37, 0.0 }
 0x926   :  { %v5992_v29 = vpop.f32.mrf.mxu0 }
 0x927   :  { %v12332_v30 = vadd.f32 %v12323_v41, %v5992_v29 }
 0x928   :  { %v5631_v2 = vpop.f32.mrf.mxu2 }
 0x929   :  { %v5781_v54 = vadd.f32 %v5780_v61, %v5631_v2  ;;  %v6074_v48 = vsel %vm6070_vm5, %v12332_v30, -inf  ;;  %v5795_v62 = vpop.f32.mrf.mxu3 }
 0x92a   :  { %6075 = vmax.xlane.f32.xlu0 %v6074_v48 }
 0x92b   :  { %v5836_v58 = vadd.f32 %v12266_v14, %v5781_v54 }
 0x92d   :  { %v5868_v11 = vmax.f32 %v5836_v58, 0.0 }
 0x92e   :  { %v5995_v50 = vpop.f32.mrf.mxu0 }
 0x92f   :  { %v5890_v55 = vpack.c.bf16 %v5868_v11, %v5867_v0  ;;  %v12339_v43 = vadd.f32 %v12323_v41, %v5995_v50 }
 0x930   :  { %v5634_v7 = vpop.f32.mrf.mxu2 }
 0x931   :  { %7271 = vmatmul.msk.bf16.gmra.mxu0 %vm5526_vm13, %v5890_v55  ;;  %v6077_v5 = vsel %vm6070_vm5, %v12339_v43, -inf  ;;  %v5784_v51 = vadd.f32 %v5783_v8, %v5634_v7  ;;  %v5798_v31 = vpop.f32.mrf.mxu3 }
 0x932   :  { %6078 = vmax.xlane.f32.xlu2 %v6077_v5 }
 0x933   :  { %v5837_v33 = vadd.f32 %v12266_v14, %v5784_v51 }
 0x935   :  { %v5869_v47 = vmax.f32 %v5837_v33, 0.0 }
 0x936   :  { %v5997_v28 = vpop.f32.mrf.mxu0 }
 0x937   :  { %v12345_v35 = vadd.f32 %v12323_v41, %v5997_v28 }
 0x938   :  { %v5636_v22 = vpop.f32.mrf.mxu2 }
 0x939   :  { %v5786_v42 = vadd.f32 %v5785_v3, %v5636_v22  ;;  %v6080_v23 = vsel %vm6070_vm5, %v12345_v35, -inf  ;;  %v5800_v2 = vpop.f32.mrf.mxu3 }
 0x93a   :  { %6081 = vmax.xlane.f32.xlu1 %v6080_v23 }
 0x93b   :  { %v5838_v44 = vadd.f32 %v12266_v14, %v5786_v42 }
 0x93d   :  { %v5870_v59 = vmax.f32 %v5838_v44, 0.0 }
 0x93e   :  { %v6000_v34 = vpop.f32.mrf.mxu0 }
 0x93f   :  { %v5891_v1 = vpack.c.bf16 %v5870_v59, %v5869_v47  ;;  %v12352_v40 = vadd.f32 %v12323_v41, %v6000_v34 }
 0x940   :  { %v5639_v36 = vpop.f32.mrf.mxu2 }
 0x941   :  { %7272 = vmatmul.msk.bf16.gmra.mxu0 %vm5526_vm13, %v5891_v1  ;;  %v6083_v52 = vsel %vm6070_vm5, %v12352_v40, -inf  ;;  %v5789_v6 = vadd.f32 %v5788_v53, %v5639_v36  ;;  %v5803_v7 = vpop.f32.mrf.mxu3 }
 0x942   :  { %6084 = vmax.xlane.f32.xlu0 %v6083_v52 }
 0x943   :  { %v5839_v63 = vadd.f32 %v12266_v14, %v5789_v6 }
 0x945   :  { %v5871_v60 = vmax.f32 %v5839_v63, 0.0 }
 0x946   :  { %v6002_v46 = vpop.f32.mrf.mxu0 }
 0x947   :  { %v12358_v16 = vadd.f32 %v12323_v41, %v6002_v46 }
 0x948   :  { %v5641_v49 = vpop.f32.mrf.mxu2 }
 0x949   :  { %v5791_v27 = vadd.f32 %v5790_v17, %v5641_v49  ;;  %v6086_v13 = vsel %vm6070_vm5, %v12358_v16, -inf  ;;  %v5805_v44 = vpop.f32.mrf.mxu3 }
 0x94a   :  { %6087 = vmax.xlane.f32.xlu2 %v6086_v13 }
 0x94b   :  { %v5840_v56 = vadd.f32 %v12266_v14, %v5791_v27 }
 0x94d   :  { %v5872_v18 = vmax.f32 %v5840_v56, 0.0 }
 0x94e   :  { %v6005_v38 = vpop.f32.mrf.mxu0 }
 0x94f   :  { %v5892_v21 = vpack.c.bf16 %v5872_v18, %v5871_v60  ;;  %v12365_v61 = vadd.f32 %v12323_v41, %v6005_v38 }
 0x950   :  { %v5644_v12 = vpop.f32.mrf.mxu2 }
 0x951   :  { %7273 = vmatmul.msk.bf16.gmra.mxu0 %vm5526_vm13, %v5892_v21  ;;  %v6089_v25 = vsel %vm6070_vm5, %v12365_v61, -inf  ;;  %v5794_v26 = vadd.f32 %v5793_v57, %v5644_v12  ;;  %v5808_v63 = vpop.f32.mrf.mxu3 }
 0x952   :  { %6090 = vmax.xlane.f32.xlu1 %v6089_v25 }
 0x953   :  { %v5841_v45 = vadd.f32 %v12266_v14, %v5794_v26 }
 0x955   :  { %v5873_v10 = vmax.f32 %v5841_v45, 0.0 }
 0x956   :  { %v6007_v39 = vpop.f32.mrf.mxu0 }
 0x957   :  { %v12371_v8 = vadd.f32 %v12323_v41, %v6007_v39 }
 0x958   :  { %v5646_v24 = vpop.f32.mrf.mxu2 }
 0x959   :  { %v5796_v9 = vadd.f32 %v5795_v62, %v5646_v24  ;;  %v6092_v19 = vsel %vm6070_vm5, %v12371_v8, -inf  ;;  %v5810_v12 = vpop.f32.mrf.mxu3 }
 0x95a   :  { %6093 = vmax.xlane.f32.xlu0 %v6092_v19 }
 0x95b   :  { %v5842_v15 = vadd.f32 %v12266_v14, %v5796_v9 }
 0x95d   :  { %v5874_v4 = vmax.f32 %v5842_v15, 0.0 }
 0x95e   :  { %v6010_v3 = vpop.f32.mrf.mxu0 }
 0x95f   :  { %v5893_v20 = vpack.c.bf16 %v5874_v4, %v5873_v10  ;;  %v12378_v29 = vadd.f32 %v12323_v41, %v6010_v3 }
 0x960   :  { %v5649_v37 = vpop.f32.mrf.mxu2 }
 0x961   :  { %7274 = vmatmul.msk.bf16.gmra.mxu0 %vm5526_vm13, %v5893_v20  ;;  %v6095_v54 = vsel %vm6070_vm5, %v12378_v29, -inf  ;;  %v5799_v48 = vadd.f32 %v5798_v31, %v5649_v37  ;;  %v13114_v20 = vlaneseq  ;;  %v6171_v37 = vstv %s6168_s13 }
 0x962   :  { %6096 = vmax.xlane.f32.xlu2 %v6095_v54 }
 0x963   :  { %v5843_v53 = vadd.f32 %v12266_v14, %v5799_v48 }
 0x965   :  { %v5875_v51 = vmax.f32 %v5843_v53, 0.0 }
 0x966   :  { %v6012_v58 = vpop.f32.mrf.mxu0 }
 0x967   :  { %v12384_v0 = vadd.f32 %v12323_v41, %v6012_v58 }
 0x968   :  { %v5651_v11 = vpop.f32.mrf.mxu2 }
 0x969   :  { %v5801_v50 = vadd.f32 %v5800_v2, %v5651_v11  ;;  %v6098_v55 = vsel %vm6070_vm5, %v12384_v0, -inf  ;;  %v6170_v2 = vand.u32 127, %v13114_v20 }
 0x96a   :  { %6099 = vmax.xlane.f32.xlu1 %v6098_v55 }
 0x96b   :  { %v5844_v5 = vadd.f32 %v12266_v14, %v5801_v50  ;;  %vm12428_vm1 = vcmp.eq.s32.totalorder %v6170_v2, %v6171_v37 }
 0x96d   :  { %v5876_v28 = vmax.f32 %v5844_v5, 0.0 }
 0x96e   :  { %v6015_v17 = vpop.f32.mrf.mxu0 }
 0x96f   :  { %v5894_v22 = vpack.c.bf16 %v5876_v28, %v5875_v51  ;;  %v12391_v33 = vadd.f32 %v12323_v41, %v6015_v17 }
 0x970   :  { %v5654_v42 = vpop.f32.mrf.mxu2 }
 0x971   :  { %7275 = vmatmul.msk.bf16.gmra.mxu0 %vm5526_vm13, %v5894_v22  ;;  %v6101_v23 = vsel %vm6070_vm5, %v12391_v33, -inf  ;;  %v5804_v47 = vadd.f32 %v5803_v7, %v5654_v42 }
 0x972   :  { %6102 = vmax.xlane.f32.xlu0 %v6101_v23 }
 0x973   :  { %v5845_v36 = vadd.f32 %v12266_v14, %v5804_v47 }
 0x975   :  { %v5877_v46 = vmax.f32 %v5845_v36, 0.0 }
 0x976   :  { %v6017_v59 = vpop.f32.mrf.mxu0 }
 0x977   :  { %v12397_v34 = vadd.f32 %v12323_v41, %v6017_v59 }
 0x978   :  { %v5656_v1 = vpop.f32.mrf.mxu2 }
 0x979   :  { %v5806_v52 = vadd.f32 %v5805_v44, %v5656_v1  ;;  %v6104_v57 = vsel %vm6070_vm5, %v12397_v34, -inf }
 0x97a   :  { %6105 = vmax.xlane.f32.xlu2 %v6104_v57 }
 0x97b   :  { %v5846_v6 = vadd.f32 %v12266_v14, %v5806_v52 }
 0x97d   :  { %v5878_v49 = vmax.f32 %v5846_v6, 0.0 }
 0x97e   :  { %v6020_v27 = vpop.f32.mrf.mxu0 }
 0x97f   :  { %v5895_v13 = vpack.c.bf16 %v5878_v49, %v5877_v46  ;;  %v12404_v56 = vadd.f32 %v12323_v41, %v6020_v27 }
 0x980   :  { %v5659_v62 = vpop.f32.mrf.mxu2 }
 0x981   :  { %7276 = vmatmul.msk.bf16.gmra.mxu0 %vm5526_vm13, %v5895_v13  ;;  %v6107_v60 = vsel %vm6070_vm5, %v12404_v56, -inf  ;;  %v5809_v18 = vadd.f32 %v5808_v63, %v5659_v62 }
 0x982   :  { %6108 = vmax.xlane.f32.xlu1 %v6107_v60 }
 0x983   :  { %v5847_v26 = vadd.f32 %v12266_v14, %v5809_v18 }
 0x985   :  { %v5879_v45 = vmax.f32 %v5847_v26, 0.0 }
 0x986   :  { %v6022_v38 = vpop.f32.mrf.mxu0 }
 0x987   :  { %v12410_v21 = vadd.f32 %v12323_v41, %v6022_v38 }
 0x988   :  { %v5661_v25 = vpop.f32.mrf.mxu2 }
 0x989   :  { %v5811_v31 = vadd.f32 %v5810_v12, %v5661_v25  ;;  %v6110_v39 = vsel %vm6070_vm5, %v12410_v21, -inf }
 0x98a   :  { %6111 = vmax.xlane.f32.xlu0 %v6110_v39 }
 0x98b   :  { %v5848_v24 = vadd.f32 %v12266_v14, %v5811_v31 }
 0x98d   :  { %v5880_v9 = vmax.f32 %v5848_v24, 0.0 }
 0x98e   :  { %v6025_v19 = vpop.f32.mrf.mxu0 }
 0x98f   :  { %v5896_v15 = vpack.c.bf16 %v5880_v9, %v5879_v45  ;;  %v12417_v10 = vadd.f32 %v12323_v41, %v6025_v19 }
 0x991   :  { %7277 = vmatmul.msk.bf16.gmra.mxu0 %vm5526_vm13, %v5896_v15  ;;  %v6113_v4 = vsel %vm6070_vm5, %v12417_v10, -inf }
 0x992   :  { %6114 = vmax.xlane.f32.xlu2 %v6113_v4 }
 0x995   :  { %v6073_v58 = vpop.xlane.xlu1 %6072 }
 0x996   :  { %v6027_v3 = vpop.f32.mrf.mxu0  ;;  %v6173_v53 = vsel %vm12428_vm1, %v6073_v58, %v12326_v32 }
 0x997   :  { %v12424_v14 = vadd.f32 %v12323_v41, %v6027_v3 }
 0x999   :  { %v6116_v54 = vsel %vm6070_vm5, %v12424_v14, -inf }
 0x99a   :  { %6117 = vmax.xlane.f32.xlu1 %v6116_v54 }
 0x99d   :  { %v6076_v11 = vpop.xlane.xlu0 %6075 }
 0x99e   :  { %v6174_v50 = vsel %vm12428_vm1, %v6076_v11, %v12332_v30  ;;  %v6030_v55 = vpop.f32.mrf.mxu0 }
 0x99f   :  { %v7377_v7 = vpack.c.bf16 %v6174_v50, %v6173_v53  ;;  %v12439_v5 = vadd.f32 %v12323_v41, %v6030_v55 }
 0x9a1   :  { %7378 = vst [vmem:[%s12651_s7] sm:$0xff] %v7377_v7   ;;  %v6119_v51 = vsel %vm6070_vm5, %v12439_v5, -inf }
 0x9a2   :  { %6120 = vmax.xlane.f32.xlu0 %v6119_v51 }
 0x9a5   :  { %v6079_v17 = vpop.xlane.xlu2 %6078 }
 0x9a6   :  { %v6032_v28 = vpop.f32.mrf.mxu0  ;;  %v6175_v42 = vsel %vm12428_vm1, %v6079_v17, %v12339_v43 }
 0x9a7   :  { %v12447_v32 = vadd.f32 %v12323_v41, %v6032_v28 }
 0x9a9   :  { %v6122_v30 = vsel %vm6070_vm5, %v12447_v32, -inf }
 0x9aa   :  { %6123 = vmax.xlane.f32.xlu2 %v6122_v30 }
 0x9ad   :  { %v6082_v22 = vpop.xlane.xlu1 %6081 }
 0x9ae   :  { %v6176_v23 = vsel %vm12428_vm1, %v6082_v22, %v12345_v35  ;;  %v6035_v44 = vpop.f32.mrf.mxu0 }
 0x9af   :  { %v7382_v47 = vpack.c.bf16 %v6176_v23, %v6175_v42  ;;  %v12458_v59 = vadd.f32 %v12323_v41, %v6035_v44 }
 0x9b1   :  { %7454 = vst [vmem:[%s12651_s7 + $0x8] sm:$0xff] %v7382_v47   ;;  %v6125_v1 = vsel %vm6070_vm5, %v12458_v59, -inf }
 0x9b2   :  { %6126 = vmax.xlane.f32.xlu1 %v6125_v1 }
 0x9b5   :  { %v6085_v52 = vpop.xlane.xlu0 %6084 }
 0x9b6   :  { %v6037_v36 = vpop.f32.mrf.mxu0  ;;  %v6177_v6 = vsel %vm12428_vm1, %v6085_v52, %v12352_v40 }
 0x9b7   :  { %v12466_v43 = vadd.f32 %v12323_v41, %v6037_v36 }
 0x9b9   :  { %v6128_v35 = vsel %vm6070_vm5, %v12466_v43, -inf }
 0x9ba   :  { %6129 = vmax.xlane.f32.xlu0 %v6128_v35 }
 0x9bd   :  { %v6088_v57 = vpop.xlane.xlu2 %6087 }
 0x9be   :  { %v6178_v46 = vsel %vm12428_vm1, %v6088_v57, %v12358_v16  ;;  %v6040_v49 = vpop.f32.mrf.mxu0 }
 0x9bf   :  { %v7387_v63 = vpack.c.bf16 %v6178_v46, %v6177_v6  ;;  %v12477_v27 = vadd.f32 %v12323_v41, %v6040_v49 }
 0x9c1   :  { %7455 = vst [vmem:[%s12651_s7 + $0x10] sm:$0xff] %v7387_v63   ;;  %v6131_v13 = vsel %vm6070_vm5, %v12477_v27, -inf }
 0x9c2   :  { %6132 = vmax.xlane.f32.xlu2 %v6131_v13 }
 0x9c5   :  { %v6091_v60 = vpop.xlane.xlu1 %6090 }
 0x9c6   :  { %v6042_v62 = vpop.f32.mrf.mxu0  ;;  %v6179_v38 = vsel %vm12428_vm1, %v6091_v60, %v12365_v61 }
 0x9c7   :  { %v12485_v40 = vadd.f32 %v12323_v41, %v6042_v62 }
 0x9c9   :  { %v6134_v16 = vsel %vm6070_vm5, %v12485_v40, -inf }
 0x9ca   :  { %6135 = vmax.xlane.f32.xlu1 %v6134_v16 }
 0x9cd   :  { %v6094_v18 = vpop.xlane.xlu0 %6093 }
 0x9ce   :  { %v6180_v12 = vsel %vm12428_vm1, %v6094_v18, %v12371_v8  ;;  %v6045_v25 = vpop.f32.mrf.mxu0 }
 0x9cf   :  { %v7392_v26 = vpack.c.bf16 %v6180_v12, %v6179_v38  ;;  %v12496_v31 = vadd.f32 %v12323_v41, %v6045_v25 }
 0x9d1   :  { %7456 = vst [vmem:[%s12651_s7 + $0x18] sm:$0xff] %v7392_v26   ;;  %v6137_v39 = vsel %vm6070_vm5, %v12496_v31, -inf }
 0x9d2   :  { %6138 = vmax.xlane.f32.xlu0 %v6137_v39 }
 0x9d5   :  { %v6097_v45 = vpop.xlane.xlu2 %6096 }
 0x9d6   :  { %v6047_v24 = vpop.f32.mrf.mxu0  ;;  %v6181_v19 = vsel %vm12428_vm1, %v6097_v45, %v12378_v29 }
 0x9d7   :  { %v12504_v61 = vadd.f32 %v12323_v41, %v6047_v24 }
 0x9d9   :  { %v6140_v8 = vsel %vm6070_vm5, %v12504_v61, -inf }
 0x9da   :  { %6141 = vmax.xlane.f32.xlu2 %v6140_v8 }
 0x9dd   :  { %v6100_v9 = vpop.xlane.xlu1 %6099 }
 0x9de   :  { %v6182_v15 = vsel %vm12428_vm1, %v6100_v9, %v12384_v0  ;;  %v6050_v4 = vpop.f32.mrf.mxu0 }
 0x9df   :  { %v7397_v3 = vpack.c.bf16 %v6182_v15, %v6181_v19  ;;  %v12515_v20 = vadd.f32 %v12323_v41, %v6050_v4 }
 0x9e1   :  { %7457 = vst [vmem:[%s12651_s7 + $0x20] sm:$0xff] %v7397_v3   ;;  %v6143_v2 = vsel %vm6070_vm5, %v12515_v20, -inf }
 0x9e2   :  { %6144 = vmax.xlane.f32.xlu1 %v6143_v2 }
 0x9e5   :  { %v6103_v54 = vpop.xlane.xlu0 %6102 }
 0x9e6   :  { %v6052_v37 = vpop.f32.mrf.mxu0  ;;  %v6183_v11 = vsel %vm12428_vm1, %v6103_v54, %v12391_v33 }
 0x9e7   :  { %v12523_v29 = vadd.f32 %v12323_v41, %v6052_v37 }
 0x9e9   :  { %v6146_v0 = vsel %vm6070_vm5, %v12523_v29, -inf }
 0x9ea   :  { %6147 = vmax.xlane.f32.xlu0 %v6146_v0 }
 0x9ed   :  { %v6106_v58 = vpop.xlane.xlu2 %6105 }
 0x9ee   :  { %v6184_v53 = vsel %vm12428_vm1, %v6106_v58, %v12397_v34  ;;  %v6055_v50 = vpop.f32.mrf.mxu0 }
 0x9ef   :  { %v7402_v55 = vpack.c.bf16 %v6184_v53, %v6183_v11  ;;  %v12534_v7 = vadd.f32 %v12323_v41, %v6055_v50 }
 0x9f1   :  { %7458 = vst [vmem:[%s12651_s7 + $0x28] sm:$0xff] %v7402_v55   ;;  %v6149_v51 = vsel %vm6070_vm5, %v12534_v7, -inf }
 0x9f2   :  { %6150 = vmax.xlane.f32.xlu2 %v6149_v51 }
 0x9f5   :  { %v6109_v30 = vpop.xlane.xlu1 %6108 }
 0x9f6   :  { %v6057_v28 = vpop.f32.mrf.mxu0  ;;  %v6185_v22 = vsel %vm12428_vm1, %v6109_v30, %v12404_v56 }
 0x9f7   :  { %v12542_v33 = vadd.f32 %v12323_v41, %v6057_v28 }
 0x9f9   :  { %v6152_v34 = vsel %vm6070_vm5, %v12542_v33, -inf }
 0x9fa   :  { %6153 = vmax.xlane.f32.xlu1 %v6152_v34 }
 0x9fd   :  { %v6112_v17 = vpop.xlane.xlu0 %6111 }
 0x9fe   :  { %v6186_v42 = vsel %vm12428_vm1, %v6112_v17, %v12410_v21  ;;  %v6060_v23 = vpop.f32.mrf.mxu0 }
 0x9ff   :  { %v7407_v44 = vpack.c.bf16 %v6186_v42, %v6185_v22  ;;  %v12553_v47 = vadd.f32 %v12323_v41, %v6060_v23 }
 0xa01   :  { %7459 = vst [vmem:[%s12651_s7 + $0x30] sm:$0xff] %v7407_v44   ;;  %v6155_v1 = vsel %vm6070_vm5, %v12553_v47, -inf }
 0xa02   :  { %6156 = vmax.xlane.f32.xlu0 %v6155_v1 }
 0xa05   :  { %v6115_v21 = vpop.xlane.xlu2 %6114 }
 0xa06   :  { %v6062_v36 = vpop.f32.mrf.mxu0  ;;  %v6187_v57 = vsel %vm12428_vm1, %v6115_v21, %v12417_v10 }
 0xa07   :  { %v6063_v56 = vadd.f32 %v12323_v41, %v6062_v36 }
 0xa09   :  { %v6158_v35 = vsel %vm6070_vm5, %v6063_v56, -inf }
 0xa0a   :  { %6159 = vmax.xlane.f32.xlu2 %v6158_v35 }
 0xa0d   :  { %v6118_v52 = vpop.xlane.xlu1 %6117 }
 0xa0e   :  { %v6188_v6 = vsel %vm12428_vm1, %v6118_v52, %v12424_v14  ;;  %v6065_v46 = vpop.f32.mrf.mxu0 }
 0xa0f   :  { %v7412_v49 = vpack.c.bf16 %v6188_v6, %v6187_v57  ;;  %v6066_v63 = vadd.f32 %v12323_v41, %v6065_v46 }
 0xa11   :  { %7460 = vst [vmem:[%s12651_s7 + $0x38] sm:$0xff] %v7412_v49   ;;  %v6161_v13 = vsel %vm6070_vm5, %v6066_v63, -inf }
 0xa12   :  { %6162 = vmax.xlane.f32.xlu1 %v6161_v13 }
 0xa15   :  { %v6121_v60 = vpop.xlane.xlu0 %6120 }
 0xa16   :  { %v6067_v62 = vpop.f32.mrf.mxu0  ;;  %v6189_v14 = vsel %vm12428_vm1, %v6121_v60, %v12439_v5 }
 0xa17   :  { %v6068_v16 = vadd.f32 %v12323_v41, %v6067_v62 }
 0xa19   :  { %v6164_v10 = vsel %vm6070_vm5, %v6068_v16, -inf }
 0xa1a   :  { %6165 = vmax.xlane.f32.xlu0 %v6164_v10 }
 0xa1d   :  { %v6124_v18 = vpop.xlane.xlu2 %6123 }
 0xa1e   :  { %v6190_v38 = vsel %vm12428_vm1, %v6124_v18, %v12447_v32 }
 0xa1f   :  { %v7417_v12 = vpack.c.bf16 %v6190_v38, %v6189_v14 }
 0xa21   :  { %7461 = vst [vmem:[%s12651_s7 + $0x40] sm:$0xff] %v7417_v12  }
 0xa25   :  { %v6127_v25 = vpop.xlane.xlu1 %6126 }
 0xa26   :  { %v6191_v26 = vsel %vm12428_vm1, %v6127_v25, %v12458_v59 }
 0xa2d   :  { %v6130_v41 = vpop.xlane.xlu0 %6129 }
 0xa2e   :  { %v6192_v39 = vsel %vm12428_vm1, %v6130_v41, %v12466_v43 }
 0xa2f   :  { %v7422_v5 = vpack.c.bf16 %v6192_v39, %v6191_v26 }
 0xa31   :  { %7462 = vst [vmem:[%s12651_s7 + $0x48] sm:$0xff] %v7422_v5  }
 0xa35   :  { %v6133_v32 = vpop.xlane.xlu2 %6132 }
 0xa36   :  { %v6193_v8 = vsel %vm12428_vm1, %v6133_v32, %v12477_v27 }
 0xa3d   :  { %v6136_v24 = vpop.xlane.xlu1 %6135 }
 0xa3e   :  { %v6194_v45 = vsel %vm12428_vm1, %v6136_v24, %v12485_v40 }
 0xa3f   :  { %v7427_v59 = vpack.c.bf16 %v6194_v45, %v6193_v8 }
 0xa41   :  { %7463 = vst [vmem:[%s12651_s7 + $0x50] sm:$0xff] %v7427_v59  }
 0xa45   :  { %v6139_v43 = vpop.xlane.xlu0 %6138 }
 0xa46   :  { %v6195_v19 = vsel %vm12428_vm1, %v6139_v43, %v12496_v31 }
 0xa4d   :  { %v6142_v9 = vpop.xlane.xlu2 %6141 }
 0xa4e   :  { %v6196_v15 = vsel %vm12428_vm1, %v6142_v9, %v12504_v61 }
 0xa4f   :  { %v7432_v27 = vpack.c.bf16 %v6196_v15, %v6195_v19 }
 0xa51   :  { %7464 = vst [vmem:[%s12651_s7 + $0x58] sm:$0xff] %v7432_v27  }
 0xa55   :  { %v6145_v40 = vpop.xlane.xlu1 %6144 }
 0xa56   :  { %v6197_v3 = vsel %vm12428_vm1, %v6145_v40, %v12515_v20 }
 0xa5d   :  { %v6148_v4 = vpop.xlane.xlu0 %6147 }
 0xa5e   :  { %v6198_v2 = vsel %vm12428_vm1, %v6148_v4, %v12523_v29 }
 0xa5f   :  { %v7437_v31 = vpack.c.bf16 %v6198_v2, %v6197_v3 }
 0xa61   :  { %7465 = vst [vmem:[%s12651_s7 + $0x60] sm:$0xff] %v7437_v31  }
 0xa65   :  { %v6151_v61 = vpop.xlane.xlu2 %6150 }
 0xa66   :  { %v6199_v0 = vsel %vm12428_vm1, %v6151_v61, %v12534_v7 }
 0xa6d   :  { %v6154_v37 = vpop.xlane.xlu1 %6153 }
 0xa6e   :  { %v6200_v54 = vsel %vm12428_vm1, %v6154_v37, %v12542_v33 }
 0xa6f   :  { %v7442_v20 = vpack.c.bf16 %v6200_v54, %v6199_v0 }
 0xa71   :  { %7466 = vst [vmem:[%s12651_s7 + $0x68] sm:$0xff] %v7442_v20  }
 0xa75   :  { %v6157_v29 = vpop.xlane.xlu0 %6156 }
 0xa76   :  { %v6201_v11 = vsel %vm12428_vm1, %v6157_v29, %v12553_v47 }
 0xa7d   :  { %v6160_v58 = vpop.xlane.xlu2 %6159 }
 0xa7e   :  { %v6202_v53 = vsel %vm12428_vm1, %v6160_v58, %v6063_v56 }
 0xa7f   :  { %v7447_v50 = vpack.c.bf16 %v6202_v53, %v6201_v11 }
 0xa81   :  { %7467 = vst [vmem:[%s12651_s7 + $0x70] sm:$0xff] %v7447_v50  }
 0xa85   :  { %v6163_v55 = vpop.xlane.xlu1 %6162 }
 0xa86   :  { %v6203_v51 = vsel %vm12428_vm1, %v6163_v55, %v6066_v63 }
 0xa8d   :  { %v6166_v7 = vpop.xlane.xlu0 %6165 }
 0xa8e   :  { %v6204_v28 = vsel %vm12428_vm1, %v6166_v7, %v6068_v16 }
 0xa8f   :  { %v7452_v33 = vpack.c.bf16 %v6204_v28, %v6203_v51 }
 0xa91   :  { %7468 = vst [vmem:[%s12651_s7 + $0x78] sm:$0xff] %v7452_v33  }
 0xa92   :  { %6273 = vsyncpa [#allocation3], 1 }

</bundles_post_ra>
